<compile_context>
chip_gen: v7x
topology: tpu7x:2x2x1
jax: 0.10.0
libtpu: 0.0.40
codegen_flags: <defaults>
</compile_context>

<pallas_src>
import functools

import jax
import jax.numpy as jnp
from jax import lax
from jax.experimental import pallas as pl
from jax.experimental.pallas import tpu as pltpu

LRELU_SLOPE = 0.2
BN_EPS = 1e-5
LANE = 128                              # pad Cout to a multiple of this
ACC_BYTES_BUDGET = 512 * 1024           # ~f32 accumulator bytes per grid step
VMEM_LIMIT_BYTES = 48 * 1024 * 1024     # inside v7x's 64 MiB physical VMEM


def _round_up(x, m):
    return (x + m - 1) // m * m


def _pick_tho(ho, wo, coutp):
    """Output-row tile: divides ho, keeps the f32 accumulator small."""
    max_rows = max(1, ACC_BYTES_BUDGET // (wo * coutp * 4))
    tho = min(ho, max_rows)
    while ho % tho:
        tho -= 1
    return tho


# ---------------------------------------------------------------------------
# Fused conv (+bias) (+LeakyReLU) (+BN partial stats) kernel.
# Grid = (batch, output-row tiles).  x block = whole padded image (resident
# across row tiles); w block = all taps (resident across the whole grid).
# ---------------------------------------------------------------------------
def _conv_kernel(x_ref, w_ref, b_ref, y_ref, *rest, kh, kw, tho, wo,
                 apply_act, compute_stats):
    t = pl.program_id(1)                 # top-level only (never inside pl.when)
    h0 = t * tho
    coutp = y_ref.shape[-1]

    acc = jnp.zeros((1, tho, wo, coutp), jnp.float32)
    for ky in range(kh):
        # Offset-0 (aligned) load of tho input rows; only the H start is dynamic.
        xrow = x_ref[:, pl.ds(h0 + ky, tho), :, :]          # (1, tho, Wp, Cin)
        for kx in range(kw):
            xs = xrow[:, :, kx:kx + wo, :]                    # shifted window (value slice)
            acc = acc + lax.dot_general(
                xs, w_ref[ky * kw + kx], (((3,), (0,)), ((), ())),
                preferred_element_type=jnp.float32)

    y = acc + b_ref[...]                 # (1, Coutp) broadcasts over the tile

    if compute_stats:
        # Pre-activation per-channel partial sums for BatchNorm, packed into
        # rows 0 (sum) / 1 (sum of squares) of a tiny (2, Coutp) block.
        s = jnp.sum(y, axis=(1, 2))                           # (1, Coutp)
        sq = jnp.sum(y * y, axis=(1, 2))                      # (1, Coutp)
        row = lax.broadcasted_iota(jnp.int32, (2, coutp), 0)
        rest[0][...] = jnp.where(row == 0, s, sq)[None, None]

    if apply_act:
        y = jnp.where(y >= 0, y, LRELU_SLOPE * y)
    y_ref[...] = y.astype(y_ref.dtype)


def conv_pallas(xp, w_taps, bias, *, kh, kw, ho, wo, apply_act, compute_stats):
    n, hp, wp, cin = xp.shape
    ntaps, _, coutp = w_taps.shape
    assert ntaps == kh * kw
    tho = _pick_tho(ho, wo, coutp)
    nt = ho // tho
    b2d = bias.reshape(1, coutp).astype(jnp.float32)

    kern = functools.partial(_conv_kernel, kh=kh, kw=kw, tho=tho, wo=wo,
                             apply_act=apply_act, compute_stats=compute_stats)
    in_specs = [
        pl.BlockSpec((1, hp, wp, cin), lambda i, t: (i, 0, 0, 0)),   # resident per image
        pl.BlockSpec((ntaps, cin, coutp), lambda i, t: (0, 0, 0)),   # resident weights
        pl.BlockSpec((1, coutp), lambda i, t: (0, 0)),
    ]
    y_shape = jax.ShapeDtypeStruct((n, ho, wo, coutp), jnp.bfloat16)
    y_spec = pl.BlockSpec((1, tho, wo, coutp), lambda i, t: (i, t, 0, 0))
    cparams = pltpu.CompilerParams(
        dimension_semantics=("parallel", "parallel"),
        vmem_limit_bytes=VMEM_LIMIT_BYTES)

    if compute_stats:
        s_shape = jax.ShapeDtypeStruct((n, nt, 2, coutp), jnp.float32)
        s_spec = pl.BlockSpec((1, 1, 2, coutp), lambda i, t: (i, t, 0, 0))
        y, stats = pl.pallas_call(
            kern, out_shape=(y_shape, s_shape), grid=(n, nt),
            in_specs=in_specs, out_specs=(y_spec, s_spec),
            compiler_params=cparams)(xp, w_taps, b2d)
        return y, stats

    y = pl.pallas_call(
        kern, out_shape=y_shape, grid=(n, nt),
        in_specs=in_specs, out_specs=y_spec,
        compiler_params=cparams)(xp, w_taps, b2d)
    return y, None


# ---------------------------------------------------------------------------
# Glue: fused (BN affine + LeakyReLU) + pad + space-to-depth; weight prep.
# ---------------------------------------------------------------------------
def _prep_input(x, affine, stride):
    if affine is not None:
        scale, shift = affine
        xf = x.astype(jnp.float32) * scale + shift
        xf = jnp.where(xf >= 0, xf, LRELU_SLOPE * xf)
        xb = xf.astype(jnp.bfloat16)
    else:
        xb = x.astype(jnp.bfloat16)
    xp = jnp.pad(xb, ((0, 0), (1, 1), (1, 1), (0, 0)))
    if stride == 2:
        n, hp, wp, c = xp.shape
        xp = jnp.pad(xp, ((0, 0), (0, hp % 2), (0, wp % 2), (0, 0)))
        n, hp, wp, c = xp.shape
        xp = xp.reshape(n, hp // 2, 2, wp // 2, 2, c)
        xp = jnp.transpose(xp, (0, 1, 3, 2, 4, 5)).reshape(n, hp // 2, wp // 2, 4 * c)
        return xp, 2, 2       # stride-2 4x4 conv == stride-1 2x2 conv on s2d image
    return xp, 4, 4


def _prep_weight(w, cin_carried, coutp, stride):
    """PyTorch OIHW [Cout,Cin,4,4] -> [taps, Cin', Coutp] bf16, zero-padded on
    carried input channels and padded output channels, matching s2d layout."""
    cout, cin = w.shape[0], w.shape[1]
    wt = jnp.transpose(w, (2, 3, 1, 0))                              # [4,4,cin,cout]
    wt = jnp.pad(wt, ((0, 0), (0, 0), (0, cin_carried - cin), (0, coutp - cout)))
    if stride == 2:
        wt = wt.reshape(2, 2, 2, 2, cin_carried, coutp)              # [a,p,b,q,ci,co]
        wt = jnp.transpose(wt, (0, 2, 1, 3, 4, 5))                   # [a,b,p,q,ci,co]
        wt = wt.reshape(4, 4 * cin_carried, coutp)
    else:
        wt = wt.reshape(16, cin_carried, coutp)
    return wt.astype(jnp.bfloat16)


def _conv_out_hw(h, w, stride):
    return (h + 2 - 4) // stride + 1, (w + 2 - 4) // stride + 1


def discriminator_forward(x_nchw, layers):
    x = jnp.transpose(x_nchw, (0, 2, 3, 1)).astype(jnp.bfloat16)     # NCHW -> NHWC
    pending = None                  # (scale, shift) of previous BN layer (+LReLU)
    for layer in layers:
        n, h, w_sp, c_carried = x.shape
        stride = layer["stride"]
        cout = layer["w"].shape[0]
        coutp = _round_up(cout, LANE)
        ho, wo = _conv_out_hw(h, w_sp, stride)

        xp, kh, kw = _prep_input(x, pending, stride)
        w_taps = _prep_weight(layer["w"], c_carried, coutp, stride)
        bias = jnp.pad(layer["b"], (0, coutp - cout))

        y, stats = conv_pallas(xp, w_taps, bias, kh=kh, kw=kw, ho=ho, wo=wo,
                               apply_act=layer["act"] and not layer["bn"],
                               compute_stats=layer["bn"])
        if layer["bn"]:
            # Tiny finalize of the fused per-block stats (training-mode BN,
            # biased variance, clamped >= 0); folded into the next layer's glue.
            m = n * ho * wo
            tot = jnp.sum(stats[:, :, 0, :], axis=(0, 1))
            tsq = jnp.sum(stats[:, :, 1, :], axis=(0, 1))
            mean = tot / m
            var = jnp.maximum(tsq / m - mean * mean, 0.0)
            gamma = jnp.pad(layer["gamma"], (0, coutp - cout))
            beta = jnp.pad(layer["beta"], (0, coutp - cout))
            inv = gamma / jnp.sqrt(var + BN_EPS)      # 0 on padded channels
            pending = (inv, beta - mean * inv)
        else:
            pending = None
        x = y
    x = x[..., :layers[-1]["w"].shape[0]]             # drop padded output channels
    return jnp.transpose(x, (0, 3, 1, 2)).astype(jnp.float32)        # NHWC -> NCHW


# ---------------------------------------------------------------------------
# Deterministic parameter construction (same topology as the nn.Module).
# norm_layer = BatchNorm2d  =>  use_bias = False for the inner convs.
# ---------------------------------------------------------------------------
def build_discriminator_params(key, input_nc, ndf=64, n_layers=3):
    layers = []

    def kgen():
        nonlocal key
        key, sub = jax.random.split(key)
        return sub

    def add_conv(cin, cout, stride, bias, bn, act):
        w = 0.02 * jax.random.normal(kgen(), (cout, cin, 4, 4), jnp.float32)
        b = (0.02 * jax.random.normal(kgen(), (cout,), jnp.float32)
             if bias else jnp.zeros((cout,), jnp.float32))
        gamma = (1.0 + 0.1 * jax.random.normal(kgen(), (cout,), jnp.float32)
                 if bn else None)
        beta = (0.1 * jax.random.normal(kgen(), (cout,), jnp.float32)
                if bn else None)
        layers.append(dict(w=w, b=b, stride=stride, bn=bn,
                           gamma=gamma, beta=beta, act=act))

    add_conv(input_nc, ndf, 2, True, False, True)
    nf_mult = 1
    for n in range(1, n_layers):
        nf_mult_prev = nf_mult
        nf_mult = min(2 ** n, 8)
        add_conv(ndf * nf_mult_prev, ndf * nf_mult, 2, False, True, True)
    nf_mult_prev = nf_mult
    nf_mult = min(2 ** n_layers, 8)
    add_conv(ndf * nf_mult_prev, ndf * nf_mult, 1, False, True, True)
    add_conv(ndf * nf_mult, 1, 1, True, False, False)
    return layers


# ---------------------------------------------------------------------------
# Pure-JAX f32 reference (lax.conv) used only to validate the Pallas kernels.
# ---------------------------------------------------------------------------
def _reference_forward(x_nchw, layers):
    x = x_nchw
    for layer in layers:
        y = jax.lax.conv_general_dilated(
            x, layer["w"], window_strides=(layer["stride"],) * 2,
            padding=[(1, 1), (1, 1)],
            dimension_numbers=("NCHW", "OIHW", "NCHW"))
        y = y + layer["b"][None, :, None, None]
        if layer["bn"]:
            mean = jnp.mean(y, axis=(0, 2, 3))
            var = jnp.mean(y * y, axis=(0, 2, 3)) - mean * mean
            inv = layer["gamma"] / jnp.sqrt(var + BN_EPS)
            y = y * inv[None, :, None, None] + \
                (layer["beta"] - mean * inv)[None, :, None, None]
        if layer["act"]:
            y = jnp.where(y >= 0, y, LRELU_SLOPE * y)
        x = y
    return x


if __name__ == "__main__":
    key = jax.random.PRNGKey(0)
    key, pkey, xkey = jax.random.split(key, 3)

    input_nc, ndf, n_layers = 3, 16, 3
    layers = build_discriminator_params(pkey, input_nc, ndf, n_layers)

    x = jax.random.normal(xkey, (2, input_nc, 32, 32), jnp.float32)   # NCHW

    fwd = jax.jit(lambda xx: discriminator_forward(xx, layers))
    out = jax.block_until_ready(fwd(x))

    ref = jax.block_until_ready(_reference_forward(x, layers))
    assert out.shape == ref.shape == (2, 1, 2, 2), out.shape
    max_err = float(jnp.max(jnp.abs(out - ref)))
    # bf16 operands / bf16 intermediates vs f32 reference -> loose tolerance.
    assert jnp.allclose(out, ref, atol=1e-1, rtol=1e-1), max_err

    print("KERNEL_OK")
</pallas_src>

<mosaic_0001>
module attributes {stable_mosaic.version = 11 : i64} {
  func.func @_conv_kernel(%arg0: i32, %arg1: i32, %arg2: memref<1x17x17x12xbf16, #tpu.memory_space<vmem>>, %arg3: memref<4x12x128xbf16, #tpu.memory_space<vmem>>, %arg4: memref<1x128xf32, #tpu.memory_space<vmem>>, %arg5: memref<1x16x16x128xbf16, #tpu.memory_space<vmem>>) attributes {dimension_semantics = [#tpu.dimension_semantics<parallel>, #tpu.dimension_semantics<parallel>], iteration_bounds = array<i64: 2, 1>, scalar_prefetch = 0 : i64, scratch_operands = 0 : i64, tpu.core_type = #tpu.core_type<tc>, window_params = [{transform_indices = @transform_0, window_bounds = array<i64: 1, 17, 17, 12>}, {pipeline_mode = #tpu.pipeline_mode<synchronous>, transform_indices = @transform_1, window_bounds = array<i64: 4, 12, 128>}, {pipeline_mode = #tpu.pipeline_mode<synchronous>, transform_indices = @transform_2, window_bounds = array<i64: 1, 128>}, {transform_indices = @transform_3, window_bounds = array<i64: 1, 16, 16, 128>}]} {
    %c16_i32 = arith.constant 16 : i32
    %0 = arith.muli %arg1, %c16_i32 : i32
    %cst = arith.constant 0.000000e+00 : f32
    %1 = vector.broadcast %cst : f32 to vector<1x16x16x128xf32>
    %c0_i32 = arith.constant 0 : i32
    %2 = arith.addi %0, %c0_i32 : i32
    %c0 = arith.constant 0 : index
    %3 = arith.index_cast %2 : i32 to index
    %c0_0 = arith.constant 0 : index
    %c0_1 = arith.constant 0 : index
    %4 = vector.load %arg2[%c0, %3, %c0_0, %c0_1] : memref<1x17x17x12xbf16, #tpu.memory_space<vmem>>, vector<1x16x17x12xbf16>
    %5 = vector.extract_strided_slice %4 {offsets = [0, 0, 0, 0], sizes = [1, 16, 16, 12], strides = [1, 1, 1, 1]} : vector<1x16x17x12xbf16> to vector<1x16x16x12xbf16>
    %c0_2 = arith.constant 0 : index
    %c0_3 = arith.constant 0 : index
    %c0_4 = arith.constant 0 : index
    %6 = vector.load %arg3[%c0_2, %c0_3, %c0_4] : memref<4x12x128xbf16, #tpu.memory_space<vmem>>, vector<1x12x128xbf16>
    %7 = vector.shape_cast %6 : vector<1x12x128xbf16> to vector<12x128xbf16>
    %cst_5 = arith.constant dense<0.000000e+00> : vector<1x16x16x128xf32>
    %8 = tpu.matmul %5, %7, %cst_5 {dimension_numbers = #tpu.dot_dimension_numbers<[3], [0], [0, 1, 2], [1], [0, 0, 0, 1, 0, 2, 1, 1], [], []>} : vector<1x16x16x12xbf16>, vector<12x128xbf16>, vector<1x16x16x128xf32> -> vector<1x16x16x128xf32>
    %9 = arith.addf %1, %8 : vector<1x16x16x128xf32>
    %10 = vector.extract_strided_slice %4 {offsets = [0, 0, 1, 0], sizes = [1, 16, 16, 12], strides = [1, 1, 1, 1]} : vector<1x16x17x12xbf16> to vector<1x16x16x12xbf16>
    %c1 = arith.constant 1 : index
    %c0_6 = arith.constant 0 : index
    %c0_7 = arith.constant 0 : index
    %11 = vector.load %arg3[%c1, %c0_6, %c0_7] : memref<4x12x128xbf16, #tpu.memory_space<vmem>>, vector<1x12x128xbf16>
    %12 = vector.shape_cast %11 : vector<1x12x128xbf16> to vector<12x128xbf16>
    %cst_8 = arith.constant dense<0.000000e+00> : vector<1x16x16x128xf32>
    %13 = tpu.matmul %10, %12, %cst_8 {dimension_numbers = #tpu.dot_dimension_numbers<[3], [0], [0, 1, 2], [1], [0, 0, 0, 1, 0, 2, 1, 1], [], []>} : vector<1x16x16x12xbf16>, vector<12x128xbf16>, vector<1x16x16x128xf32> -> vector<1x16x16x128xf32>
    %14 = arith.addf %9, %13 : vector<1x16x16x128xf32>
    %c1_i32 = arith.constant 1 : i32
    %15 = arith.addi %0, %c1_i32 : i32
    %c0_9 = arith.constant 0 : index
    %16 = arith.index_cast %15 : i32 to index
    %c0_10 = arith.constant 0 : index
    %c0_11 = arith.constant 0 : index
    %17 = vector.load %arg2[%c0_9, %16, %c0_10, %c0_11] : memref<1x17x17x12xbf16, #tpu.memory_space<vmem>>, vector<1x16x17x12xbf16>
    %18 = vector.extract_strided_slice %17 {offsets = [0, 0, 0, 0], sizes = [1, 16, 16, 12], strides = [1, 1, 1, 1]} : vector<1x16x17x12xbf16> to vector<1x16x16x12xbf16>
    %c2 = arith.constant 2 : index
    %c0_12 = arith.constant 0 : index
    %c0_13 = arith.constant 0 : index
    %19 = vector.load %arg3[%c2, %c0_12, %c0_13] : memref<4x12x128xbf16, #tpu.memory_space<vmem>>, vector<1x12x128xbf16>
    %20 = vector.shape_cast %19 : vector<1x12x128xbf16> to vector<12x128xbf16>
    %cst_14 = arith.constant dense<0.000000e+00> : vector<1x16x16x128xf32>
    %21 = tpu.matmul %18, %20, %cst_14 {dimension_numbers = #tpu.dot_dimension_numbers<[3], [0], [0, 1, 2], [1], [0, 0, 0, 1, 0, 2, 1, 1], [], []>} : vector<1x16x16x12xbf16>, vector<12x128xbf16>, vector<1x16x16x128xf32> -> vector<1x16x16x128xf32>
    %22 = arith.addf %14, %21 : vector<1x16x16x128xf32>
    %23 = vector.extract_strided_slice %17 {offsets = [0, 0, 1, 0], sizes = [1, 16, 16, 12], strides = [1, 1, 1, 1]} : vector<1x16x17x12xbf16> to vector<1x16x16x12xbf16>
    %c3 = arith.constant 3 : index
    %c0_15 = arith.constant 0 : index
    %c0_16 = arith.constant 0 : index
    %24 = vector.load %arg3[%c3, %c0_15, %c0_16] : memref<4x12x128xbf16, #tpu.memory_space<vmem>>, vector<1x12x128xbf16>
    %25 = vector.shape_cast %24 : vector<1x12x128xbf16> to vector<12x128xbf16>
    %cst_17 = arith.constant dense<0.000000e+00> : vector<1x16x16x128xf32>
    %26 = tpu.matmul %23, %25, %cst_17 {dimension_numbers = #tpu.dot_dimension_numbers<[3], [0], [0, 1, 2], [1], [0, 0, 0, 1, 0, 2, 1, 1], [], []>} : vector<1x16x16x12xbf16>, vector<12x128xbf16>, vector<1x16x16x128xf32> -> vector<1x16x16x128xf32>
    %27 = arith.addf %22, %26 : vector<1x16x16x128xf32>
    %c0_18 = arith.constant 0 : index
    %c0_19 = arith.constant 0 : index
    %28 = vector.load %arg4[%c0_18, %c0_19] : memref<1x128xf32, #tpu.memory_space<vmem>>, vector<1x128xf32>
    %29 = vector.shape_cast %28 : vector<1x128xf32> to vector<1x1x1x128xf32>
    %30 = vector.broadcast %29 : vector<1x1x1x128xf32> to vector<1x16x16x128xf32>
    %31 = arith.addf %27, %30 : vector<1x16x16x128xf32>
    %cst_20 = arith.constant 0.000000e+00 : f32
    %32 = vector.broadcast %cst_20 : f32 to vector<1x16x16x128xf32>
    %33 = arith.cmpf oge, %31, %32 : vector<1x16x16x128xf32>
    %cst_21 = arith.constant 2.000000e-01 : f32
    %34 = vector.broadcast %cst_21 : f32 to vector<1x16x16x128xf32>
    %35 = arith.mulf %34, %31 : vector<1x16x16x128xf32>
    %36 = arith.select %33, %31, %35 : vector<1x16x16x128xi1>, vector<1x16x16x128xf32>
    %37 = arith.truncf %36 : vector<1x16x16x128xf32> to vector<1x16x16x128xbf16>
    %c0_22 = arith.constant 0 : index
    %c0_23 = arith.constant 0 : index
    %c0_24 = arith.constant 0 : index
    %c0_25 = arith.constant 0 : index
    %38 = vector.load %arg5[%c0_22, %c0_23, %c0_24, %c0_25] : memref<1x16x16x128xbf16, #tpu.memory_space<vmem>>, vector<1x16x16x128xbf16>
    tpu.vector_store %arg5[%c0_22, %c0_23, %c0_24, %c0_25], %37 {strides = array<i32>} : memref<1x16x16x128xbf16, #tpu.memory_space<vmem>>, vector<1x16x16x128xbf16>,
    return
  }
  func.func @transform_0(%arg0: i32, %arg1: i32) -> (i32, i32, i32, i32) {
    %c0_i32 = arith.constant 0 : i32
    %c0_i32_0 = arith.constant 0 : i32
    %c0_i32_1 = arith.constant 0 : i32
    %c0_i32_2 = arith.constant 0 : i32
    return %arg0, %c0_i32, %c0_i32_0, %c0_i32_1 : i32, i32, i32, i32
  }
  func.func @transform_1(%arg0: i32, %arg1: i32) -> (i32, i32, i32) {
    %c0_i32 = arith.constant 0 : i32
    %c0_i32_0 = arith.constant 0 : i32
    %c0_i32_1 = arith.constant 0 : i32
    %c0_i32_2 = arith.constant 0 : i32
    return %c0_i32, %c0_i32_0, %c0_i32_1 : i32, i32, i32
  }
  func.func @transform_2(%arg0: i32, %arg1: i32) -> (i32, i32) {
    %c0_i32 = arith.constant 0 : i32
    %c0_i32_0 = arith.constant 0 : i32
    %c0_i32_1 = arith.constant 0 : i32
    return %c0_i32, %c0_i32_0 : i32, i32
  }
  func.func @transform_3(%arg0: i32, %arg1: i32) -> (i32, i32, i32, i32) {
    %c0_i32 = arith.constant 0 : i32
    %c0_i32_0 = arith.constant 0 : i32
    %c0_i32_1 = arith.constant 0 : i32
    return %arg0, %arg1, %c0_i32, %c0_i32_0 : i32, i32, i32, i32
  }
}

module attributes {stable_mosaic.version = 11 : i64} {
  func.func @_conv_kernel(%arg0: i32, %arg1: i32, %arg2: memref<1x9x9x512xbf16, #tpu.memory_space<vmem>>, %arg3: memref<4x512x128xbf16, #tpu.memory_space<vmem>>, %arg4: memref<1x128xf32, #tpu.memory_space<vmem>>, %arg5: memref<1x8x8x128xbf16, #tpu.memory_space<vmem>>, %arg6: memref<1x1x2x128xf32, #tpu.memory_space<vmem>>) attributes {dimension_semantics = [#tpu.dimension_semantics<parallel>, #tpu.dimension_semantics<parallel>], iteration_bounds = array<i64: 2, 1>, scalar_prefetch = 0 : i64, scratch_operands = 0 : i64, tpu.core_type = #tpu.core_type<tc>, window_params = [{transform_indices = @transform_0, window_bounds = array<i64: 1, 9, 9, 512>}, {pipeline_mode = #tpu.pipeline_mode<synchronous>, transform_indices = @transform_1, window_bounds = array<i64: 4, 512, 128>}, {pipeline_mode = #tpu.pipeline_mode<synchronous>, transform_indices = @transform_2, window_bounds = array<i64: 1, 128>}, {transform_indices = @transform_3, window_bounds = array<i64: 1, 8, 8, 128>}, {transform_indices = @transform_4, window_bounds = array<i64: 1, 1, 2, 128>}]} {
    %c8_i32 = arith.constant 8 : i32
    %0 = arith.muli %arg1, %c8_i32 : i32
    %cst = arith.constant 0.000000e+00 : f32
    %1 = vector.broadcast %cst : f32 to vector<1x8x8x128xf32>
    %c0_i32 = arith.constant 0 : i32
    %2 = arith.addi %0, %c0_i32 : i32
    %c0 = arith.constant 0 : index
    %3 = arith.index_cast %2 : i32 to index
    %c0_0 = arith.constant 0 : index
    %c0_1 = arith.constant 0 : index
    %4 = vector.load %arg2[%c0, %3, %c0_0, %c0_1] : memref<1x9x9x512xbf16, #tpu.memory_space<vmem>>, vector<1x8x9x512xbf16>
    %5 = vector.extract_strided_slice %4 {offsets = [0, 0, 0, 0], sizes = [1, 8, 8, 512], strides = [1, 1, 1, 1]} : vector<1x8x9x512xbf16> to vector<1x8x8x512xbf16>
    %c0_2 = arith.constant 0 : index
    %c0_3 = arith.constant 0 : index
    %c0_4 = arith.constant 0 : index
    %6 = vector.load %arg3[%c0_2, %c0_3, %c0_4] : memref<4x512x128xbf16, #tpu.memory_space<vmem>>, vector<1x512x128xbf16>
    %7 = vector.shape_cast %6 : vector<1x512x128xbf16> to vector<512x128xbf16>
    %cst_5 = arith.constant dense<0.000000e+00> : vector<1x8x8x128xf32>
    %8 = tpu.matmul %5, %7, %cst_5 {dimension_numbers = #tpu.dot_dimension_numbers<[3], [0], [0, 1, 2], [1], [0, 0, 0, 1, 0, 2, 1, 1], [], []>} : vector<1x8x8x512xbf16>, vector<512x128xbf16>, vector<1x8x8x128xf32> -> vector<1x8x8x128xf32>
    %9 = arith.addf %1, %8 : vector<1x8x8x128xf32>
    %10 = vector.extract_strided_slice %4 {offsets = [0, 0, 1, 0], sizes = [1, 8, 8, 512], strides = [1, 1, 1, 1]} : vector<1x8x9x512xbf16> to vector<1x8x8x512xbf16>
    %c1 = arith.constant 1 : index
    %c0_6 = arith.constant 0 : index
    %c0_7 = arith.constant 0 : index
    %11 = vector.load %arg3[%c1, %c0_6, %c0_7] : memref<4x512x128xbf16, #tpu.memory_space<vmem>>, vector<1x512x128xbf16>
    %12 = vector.shape_cast %11 : vector<1x512x128xbf16> to vector<512x128xbf16>
    %cst_8 = arith.constant dense<0.000000e+00> : vector<1x8x8x128xf32>
    %13 = tpu.matmul %10, %12, %cst_8 {dimension_numbers = #tpu.dot_dimension_numbers<[3], [0], [0, 1, 2], [1], [0, 0, 0, 1, 0, 2, 1, 1], [], []>} : vector<1x8x8x512xbf16>, vector<512x128xbf16>, vector<1x8x8x128xf32> -> vector<1x8x8x128xf32>
    %14 = arith.addf %9, %13 : vector<1x8x8x128xf32>
    %c1_i32 = arith.constant 1 : i32
    %15 = arith.addi %0, %c1_i32 : i32
    %c0_9 = arith.constant 0 : index
    %16 = arith.index_cast %15 : i32 to index
    %c0_10 = arith.constant 0 : index
    %c0_11 = arith.constant 0 : index
    %17 = vector.load %arg2[%c0_9, %16, %c0_10, %c0_11] : memref<1x9x9x512xbf16, #tpu.memory_space<vmem>>, vector<1x8x9x512xbf16>
    %18 = vector.extract_strided_slice %17 {offsets = [0, 0, 0, 0], sizes = [1, 8, 8, 512], strides = [1, 1, 1, 1]} : vector<1x8x9x512xbf16> to vector<1x8x8x512xbf16>
    %c2 = arith.constant 2 : index
    %c0_12 = arith.constant 0 : index
    %c0_13 = arith.constant 0 : index
    %19 = vector.load %arg3[%c2, %c0_12, %c0_13] : memref<4x512x128xbf16, #tpu.memory_space<vmem>>, vector<1x512x128xbf16>
    %20 = vector.shape_cast %19 : vector<1x512x128xbf16> to vector<512x128xbf16>
    %cst_14 = arith.constant dense<0.000000e+00> : vector<1x8x8x128xf32>
    %21 = tpu.matmul %18, %20, %cst_14 {dimension_numbers = #tpu.dot_dimension_numbers<[3], [0], [0, 1, 2], [1], [0, 0, 0, 1, 0, 2, 1, 1], [], []>} : vector<1x8x8x512xbf16>, vector<512x128xbf16>, vector<1x8x8x128xf32> -> vector<1x8x8x128xf32>
    %22 = arith.addf %14, %21 : vector<1x8x8x128xf32>
    %23 = vector.extract_strided_slice %17 {offsets = [0, 0, 1, 0], sizes = [1, 8, 8, 512], strides = [1, 1, 1, 1]} : vector<1x8x9x512xbf16> to vector<1x8x8x512xbf16>
    %c3 = arith.constant 3 : index
    %c0_15 = arith.constant 0 : index
    %c0_16 = arith.constant 0 : index
    %24 = vector.load %arg3[%c3, %c0_15, %c0_16] : memref<4x512x128xbf16, #tpu.memory_space<vmem>>, vector<1x512x128xbf16>
    %25 = vector.shape_cast %24 : vector<1x512x128xbf16> to vector<512x128xbf16>
    %cst_17 = arith.constant dense<0.000000e+00> : vector<1x8x8x128xf32>
    %26 = tpu.matmul %23, %25, %cst_17 {dimension_numbers = #tpu.dot_dimension_numbers<[3], [0], [0, 1, 2], [1], [0, 0, 0, 1, 0, 2, 1, 1], [], []>} : vector<1x8x8x512xbf16>, vector<512x128xbf16>, vector<1x8x8x128xf32> -> vector<1x8x8x128xf32>
    %27 = arith.addf %22, %26 : vector<1x8x8x128xf32>
    %c0_18 = arith.constant 0 : index
    %c0_19 = arith.constant 0 : index
    %28 = vector.load %arg4[%c0_18, %c0_19] : memref<1x128xf32, #tpu.memory_space<vmem>>, vector<1x128xf32>
    %29 = vector.shape_cast %28 : vector<1x128xf32> to vector<1x1x1x128xf32>
    %30 = vector.broadcast %29 : vector<1x1x1x128xf32> to vector<1x8x8x128xf32>
    %31 = arith.addf %27, %30 : vector<1x8x8x128xf32>
    %cst_20 = arith.constant dense<0.000000e+00> : vector<1x128xf32>
    %32 = vector.multi_reduction <add>, %31, %cst_20 [1, 2] : vector<1x8x8x128xf32> to vector<1x128xf32>
    %33 = arith.mulf %31, %31 : vector<1x8x8x128xf32>
    %cst_21 = arith.constant dense<0.000000e+00> : vector<1x128xf32>
    %34 = vector.multi_reduction <add>, %33, %cst_21 [1, 2] : vector<1x8x8x128xf32> to vector<1x128xf32>
    %35 = tpu.iota {dimensions = array<i32: 0>} : vector<2x128xi32>
    %c0_i32_22 = arith.constant 0 : i32
    %36 = vector.broadcast %c0_i32_22 : i32 to vector<2x128xi32>
    %37 = arith.cmpi eq, %35, %36 : vector<2x128xi32>
    %38 = vector.shape_cast %32 : vector<1x128xf32> to vector<1x128xf32>
    %39 = vector.broadcast %38 : vector<1x128xf32> to vector<2x128xf32>
    %40 = vector.shape_cast %34 : vector<1x128xf32> to vector<1x128xf32>
    %41 = vector.broadcast %40 : vector<1x128xf32> to vector<2x128xf32>
    %42 = arith.select %37, %39, %41 : vector<2x128xi1>, vector<2x128xf32>
    %43 = vector.shape_cast %42 : vector<2x128xf32> to vector<1x1x2x128xf32>
    %c0_23 = arith.constant 0 : index
    %c0_24 = arith.constant 0 : index
    %c0_25 = arith.constant 0 : index
    %c0_26 = arith.constant 0 : index
    %44 = vector.load %arg6[%c0_23, %c0_24, %c0_25, %c0_26] : memref<1x1x2x128xf32, #tpu.memory_space<vmem>>, vector<1x1x2x128xf32>
    tpu.vector_store %arg6[%c0_23, %c0_24, %c0_25, %c0_26], %43 {strides = array<i32>} : memref<1x1x2x128xf32, #tpu.memory_space<vmem>>, vector<1x1x2x128xf32>,
    %45 = arith.truncf %31 : vector<1x8x8x128xf32> to vector<1x8x8x128xbf16>
    %c0_27 = arith.constant 0 : index
    %c0_28 = arith.constant 0 : index
    %c0_29 = arith.constant 0 : index
    %c0_30 = arith.constant 0 : index
    %46 = vector.load %arg5[%c0_27, %c0_28, %c0_29, %c0_30] : memref<1x8x8x128xbf16, #tpu.memory_space<vmem>>, vector<1x8x8x128xbf16>
    tpu.vector_store %arg5[%c0_27, %c0_28, %c0_29, %c0_30], %45 {strides = array<i32>} : memref<1x8x8x128xbf16, #tpu.memory_space<vmem>>, vector<1x8x8x128xbf16>,
    return
  }
  func.func @transform_0(%arg0: i32, %arg1: i32) -> (i32, i32, i32, i32) {
    %c0_i32 = arith.constant 0 : i32
    %c0_i32_0 = arith.constant 0 : i32
    %c0_i32_1 = arith.constant 0 : i32
    %c0_i32_2 = arith.constant 0 : i32
    return %arg0, %c0_i32, %c0_i32_0, %c0_i32_1 : i32, i32, i32, i32
  }
  func.func @transform_1(%arg0: i32, %arg1: i32) -> (i32, i32, i32) {
    %c0_i32 = arith.constant 0 : i32
    %c0_i32_0 = arith.constant 0 : i32
    %c0_i32_1 = arith.constant 0 : i32
    %c0_i32_2 = arith.constant 0 : i32
    return %c0_i32, %c0_i32_0, %c0_i32_1 : i32, i32, i32
  }
  func.func @transform_2(%arg0: i32, %arg1: i32) -> (i32, i32) {
    %c0_i32 = arith.constant 0 : i32
    %c0_i32_0 = arith.constant 0 : i32
    %c0_i32_1 = arith.constant 0 : i32
    return %c0_i32, %c0_i32_0 : i32, i32
  }
  func.func @transform_3(%arg0: i32, %arg1: i32) -> (i32, i32, i32, i32) {
    %c0_i32 = arith.constant 0 : i32
    %c0_i32_0 = arith.constant 0 : i32
    %c0_i32_1 = arith.constant 0 : i32
    return %arg0, %arg1, %c0_i32, %c0_i32_0 : i32, i32, i32, i32
  }
  func.func @transform_4(%arg0: i32, %arg1: i32) -> (i32, i32, i32, i32) {
    %c0_i32 = arith.constant 0 : i32
    %c0_i32_0 = arith.constant 0 : i32
    %c0_i32_1 = arith.constant 0 : i32
    return %arg0, %arg1, %c0_i32, %c0_i32_0 : i32, i32, i32, i32
  }
}

module attributes {stable_mosaic.version = 11 : i64} {
  func.func @_conv_kernel(%arg0: i32, %arg1: i32, %arg2: memref<1x5x5x512xbf16, #tpu.memory_space<vmem>>, %arg3: memref<4x512x128xbf16, #tpu.memory_space<vmem>>, %arg4: memref<1x128xf32, #tpu.memory_space<vmem>>, %arg5: memref<1x4x4x128xbf16, #tpu.memory_space<vmem>>, %arg6: memref<1x1x2x128xf32, #tpu.memory_space<vmem>>) attributes {dimension_semantics = [#tpu.dimension_semantics<parallel>, #tpu.dimension_semantics<parallel>], iteration_bounds = array<i64: 2, 1>, scalar_prefetch = 0 : i64, scratch_operands = 0 : i64, tpu.core_type = #tpu.core_type<tc>, window_params = [{transform_indices = @transform_0, window_bounds = array<i64: 1, 5, 5, 512>}, {pipeline_mode = #tpu.pipeline_mode<synchronous>, transform_indices = @transform_1, window_bounds = array<i64: 4, 512, 128>}, {pipeline_mode = #tpu.pipeline_mode<synchronous>, transform_indices = @transform_2, window_bounds = array<i64: 1, 128>}, {transform_indices = @transform_3, window_bounds = array<i64: 1, 4, 4, 128>}, {transform_indices = @transform_4, window_bounds = array<i64: 1, 1, 2, 128>}]} {
    %c4_i32 = arith.constant 4 : i32
    %0 = arith.muli %arg1, %c4_i32 : i32
    %cst = arith.constant 0.000000e+00 : f32
    %1 = vector.broadcast %cst : f32 to vector<1x4x4x128xf32>
    %c0_i32 = arith.constant 0 : i32
    %2 = arith.addi %0, %c0_i32 : i32
    %c0 = arith.constant 0 : index
    %3 = arith.index_cast %2 : i32 to index
    %c0_0 = arith.constant 0 : index
    %c0_1 = arith.constant 0 : index
    %4 = vector.load %arg2[%c0, %3, %c0_0, %c0_1] : memref<1x5x5x512xbf16, #tpu.memory_space<vmem>>, vector<1x4x5x512xbf16>
    %5 = vector.extract_strided_slice %4 {offsets = [0, 0, 0, 0], sizes = [1, 4, 4, 512], strides = [1, 1, 1, 1]} : vector<1x4x5x512xbf16> to vector<1x4x4x512xbf16>
    %c0_2 = arith.constant 0 : index
    %c0_3 = arith.constant 0 : index
    %c0_4 = arith.constant 0 : index
    %6 = vector.load %arg3[%c0_2, %c0_3, %c0_4] : memref<4x512x128xbf16, #tpu.memory_space<vmem>>, vector<1x512x128xbf16>
    %7 = vector.shape_cast %6 : vector<1x512x128xbf16> to vector<512x128xbf16>
    %cst_5 = arith.constant dense<0.000000e+00> : vector<1x4x4x128xf32>
    %8 = tpu.matmul %5, %7, %cst_5 {dimension_numbers = #tpu.dot_dimension_numbers<[3], [0], [0, 1, 2], [1], [0, 0, 0, 1, 0, 2, 1, 1], [], []>} : vector<1x4x4x512xbf16>, vector<512x128xbf16>, vector<1x4x4x128xf32> -> vector<1x4x4x128xf32>
    %9 = arith.addf %1, %8 : vector<1x4x4x128xf32>
    %10 = vector.extract_strided_slice %4 {offsets = [0, 0, 1, 0], sizes = [1, 4, 4, 512], strides = [1, 1, 1, 1]} : vector<1x4x5x512xbf16> to vector<1x4x4x512xbf16>
    %c1 = arith.constant 1 : index
    %c0_6 = arith.constant 0 : index
    %c0_7 = arith.constant 0 : index
    %11 = vector.load %arg3[%c1, %c0_6, %c0_7] : memref<4x512x128xbf16, #tpu.memory_space<vmem>>, vector<1x512x128xbf16>
    %12 = vector.shape_cast %11 : vector<1x512x128xbf16> to vector<512x128xbf16>
    %cst_8 = arith.constant dense<0.000000e+00> : vector<1x4x4x128xf32>
    %13 = tpu.matmul %10, %12, %cst_8 {dimension_numbers = #tpu.dot_dimension_numbers<[3], [0], [0, 1, 2], [1], [0, 0, 0, 1, 0, 2, 1, 1], [], []>} : vector<1x4x4x512xbf16>, vector<512x128xbf16>, vector<1x4x4x128xf32> -> vector<1x4x4x128xf32>
    %14 = arith.addf %9, %13 : vector<1x4x4x128xf32>
    %c1_i32 = arith.constant 1 : i32
    %15 = arith.addi %0, %c1_i32 : i32
    %c0_9 = arith.constant 0 : index
    %16 = arith.index_cast %15 : i32 to index
    %c0_10 = arith.constant 0 : index
    %c0_11 = arith.constant 0 : index
    %17 = vector.load %arg2[%c0_9, %16, %c0_10, %c0_11] : memref<1x5x5x512xbf16, #tpu.memory_space<vmem>>, vector<1x4x5x512xbf16>
    %18 = vector.extract_strided_slice %17 {offsets = [0, 0, 0, 0], sizes = [1, 4, 4, 512], strides = [1, 1, 1, 1]} : vector<1x4x5x512xbf16> to vector<1x4x4x512xbf16>
    %c2 = arith.constant 2 : index
    %c0_12 = arith.constant 0 : index
    %c0_13 = arith.constant 0 : index
    %19 = vector.load %arg3[%c2, %c0_12, %c0_13] : memref<4x512x128xbf16, #tpu.memory_space<vmem>>, vector<1x512x128xbf16>
    %20 = vector.shape_cast %19 : vector<1x512x128xbf16> to vector<512x128xbf16>
    %cst_14 = arith.constant dense<0.000000e+00> : vector<1x4x4x128xf32>
    %21 = tpu.matmul %18, %20, %cst_14 {dimension_numbers = #tpu.dot_dimension_numbers<[3], [0], [0, 1, 2], [1], [0, 0, 0, 1, 0, 2, 1, 1], [], []>} : vector<1x4x4x512xbf16>, vector<512x128xbf16>, vector<1x4x4x128xf32> -> vector<1x4x4x128xf32>
    %22 = arith.addf %14, %21 : vector<1x4x4x128xf32>
    %23 = vector.extract_strided_slice %17 {offsets = [0, 0, 1, 0], sizes = [1, 4, 4, 512], strides = [1, 1, 1, 1]} : vector<1x4x5x512xbf16> to vector<1x4x4x512xbf16>
    %c3 = arith.constant 3 : index
    %c0_15 = arith.constant 0 : index
    %c0_16 = arith.constant 0 : index
    %24 = vector.load %arg3[%c3, %c0_15, %c0_16] : memref<4x512x128xbf16, #tpu.memory_space<vmem>>, vector<1x512x128xbf16>
    %25 = vector.shape_cast %24 : vector<1x512x128xbf16> to vector<512x128xbf16>
    %cst_17 = arith.constant dense<0.000000e+00> : vector<1x4x4x128xf32>
    %26 = tpu.matmul %23, %25, %cst_17 {dimension_numbers = #tpu.dot_dimension_numbers<[3], [0], [0, 1, 2], [1], [0, 0, 0, 1, 0, 2, 1, 1], [], []>} : vector<1x4x4x512xbf16>, vector<512x128xbf16>, vector<1x4x4x128xf32> -> vector<1x4x4x128xf32>
    %27 = arith.addf %22, %26 : vector<1x4x4x128xf32>
    %c0_18 = arith.constant 0 : index
    %c0_19 = arith.constant 0 : index
    %28 = vector.load %arg4[%c0_18, %c0_19] : memref<1x128xf32, #tpu.memory_space<vmem>>, vector<1x128xf32>
    %29 = vector.shape_cast %28 : vector<1x128xf32> to vector<1x1x1x128xf32>
    %30 = vector.broadcast %29 : vector<1x1x1x128xf32> to vector<1x4x4x128xf32>
    %31 = arith.addf %27, %30 : vector<1x4x4x128xf32>
    %cst_20 = arith.constant dense<0.000000e+00> : vector<1x128xf32>
    %32 = vector.multi_reduction <add>, %31, %cst_20 [1, 2] : vector<1x4x4x128xf32> to vector<1x128xf32>
    %33 = arith.mulf %31, %31 : vector<1x4x4x128xf32>
    %cst_21 = arith.constant dense<0.000000e+00> : vector<1x128xf32>
    %34 = vector.multi_reduction <add>, %33, %cst_21 [1, 2] : vector<1x4x4x128xf32> to vector<1x128xf32>
    %35 = tpu.iota {dimensions = array<i32: 0>} : vector<2x128xi32>
    %c0_i32_22 = arith.constant 0 : i32
    %36 = vector.broadcast %c0_i32_22 : i32 to vector<2x128xi32>
    %37 = arith.cmpi eq, %35, %36 : vector<2x128xi32>
    %38 = vector.shape_cast %32 : vector<1x128xf32> to vector<1x128xf32>
    %39 = vector.broadcast %38 : vector<1x128xf32> to vector<2x128xf32>
    %40 = vector.shape_cast %34 : vector<1x128xf32> to vector<1x128xf32>
    %41 = vector.broadcast %40 : vector<1x128xf32> to vector<2x128xf32>
    %42 = arith.select %37, %39, %41 : vector<2x128xi1>, vector<2x128xf32>
    %43 = vector.shape_cast %42 : vector<2x128xf32> to vector<1x1x2x128xf32>
    %c0_23 = arith.constant 0 : index
    %c0_24 = arith.constant 0 : index
    %c0_25 = arith.constant 0 : index
    %c0_26 = arith.constant 0 : index
    %44 = vector.load %arg6[%c0_23, %c0_24, %c0_25, %c0_26] : memref<1x1x2x128xf32, #tpu.memory_space<vmem>>, vector<1x1x2x128xf32>
    tpu.vector_store %arg6[%c0_23, %c0_24, %c0_25, %c0_26], %43 {strides = array<i32>} : memref<1x1x2x128xf32, #tpu.memory_space<vmem>>, vector<1x1x2x128xf32>,
    %45 = arith.truncf %31 : vector<1x4x4x128xf32> to vector<1x4x4x128xbf16>
    %c0_27 = arith.constant 0 : index
    %c0_28 = arith.constant 0 : index
    %c0_29 = arith.constant 0 : index
    %c0_30 = arith.constant 0 : index
    %46 = vector.load %arg5[%c0_27, %c0_28, %c0_29, %c0_30] : memref<1x4x4x128xbf16, #tpu.memory_space<vmem>>, vector<1x4x4x128xbf16>
    tpu.vector_store %arg5[%c0_27, %c0_28, %c0_29, %c0_30], %45 {strides = array<i32>} : memref<1x4x4x128xbf16, #tpu.memory_space<vmem>>, vector<1x4x4x128xbf16>,
    return
  }
  func.func @transform_0(%arg0: i32, %arg1: i32) -> (i32, i32, i32, i32) {
    %c0_i32 = arith.constant 0 : i32
    %c0_i32_0 = arith.constant 0 : i32
    %c0_i32_1 = arith.constant 0 : i32
    %c0_i32_2 = arith.constant 0 : i32
    return %arg0, %c0_i32, %c0_i32_0, %c0_i32_1 : i32, i32, i32, i32
  }
  func.func @transform_1(%arg0: i32, %arg1: i32) -> (i32, i32, i32) {
    %c0_i32 = arith.constant 0 : i32
    %c0_i32_0 = arith.constant 0 : i32
    %c0_i32_1 = arith.constant 0 : i32
    %c0_i32_2 = arith.constant 0 : i32
    return %c0_i32, %c0_i32_0, %c0_i32_1 : i32, i32, i32
  }
  func.func @transform_2(%arg0: i32, %arg1: i32) -> (i32, i32) {
    %c0_i32 = arith.constant 0 : i32
    %c0_i32_0 = arith.constant 0 : i32
    %c0_i32_1 = arith.constant 0 : i32
    return %c0_i32, %c0_i32_0 : i32, i32
  }
  func.func @transform_3(%arg0: i32, %arg1: i32) -> (i32, i32, i32, i32) {
    %c0_i32 = arith.constant 0 : i32
    %c0_i32_0 = arith.constant 0 : i32
    %c0_i32_1 = arith.constant 0 : i32
    return %arg0, %arg1, %c0_i32, %c0_i32_0 : i32, i32, i32, i32
  }
  func.func @transform_4(%arg0: i32, %arg1: i32) -> (i32, i32, i32, i32) {
    %c0_i32 = arith.constant 0 : i32
    %c0_i32_0 = arith.constant 0 : i32
    %c0_i32_1 = arith.constant 0 : i32
    return %arg0, %arg1, %c0_i32, %c0_i32_0 : i32, i32, i32, i32
  }
}

module attributes {stable_mosaic.version = 11 : i64} {
  func.func @_conv_kernel(%arg0: i32, %arg1: i32, %arg2: memref<1x5x5x128xbf16, #tpu.memory_space<vmem>>, %arg3: memref<16x128x128xbf16, #tpu.memory_space<vmem>>, %arg4: memref<1x128xf32, #tpu.memory_space<vmem>>, %arg5: memref<1x2x2x128xbf16, #tpu.memory_space<vmem>>) attributes {dimension_semantics = [#tpu.dimension_semantics<parallel>, #tpu.dimension_semantics<parallel>], iteration_bounds = array<i64: 2, 1>, scalar_prefetch = 0 : i64, scratch_operands = 0 : i64, tpu.core_type = #tpu.core_type<tc>, window_params = [{transform_indices = @transform_0, window_bounds = array<i64: 1, 5, 5, 128>}, {pipeline_mode = #tpu.pipeline_mode<synchronous>, transform_indices = @transform_1, window_bounds = array<i64: 16, 128, 128>}, {pipeline_mode = #tpu.pipeline_mode<synchronous>, transform_indices = @transform_2, window_bounds = array<i64: 1, 128>}, {transform_indices = @transform_3, window_bounds = array<i64: 1, 2, 2, 128>}]} {
    %c2_i32 = arith.constant 2 : i32
    %0 = arith.muli %arg1, %c2_i32 : i32
    %cst = arith.constant 0.000000e+00 : f32
    %1 = vector.broadcast %cst : f32 to vector<1x2x2x128xf32>
    %c0_i32 = arith.constant 0 : i32
    %2 = arith.addi %0, %c0_i32 : i32
    %c0 = arith.constant 0 : index
    %3 = arith.index_cast %2 : i32 to index
    %c0_0 = arith.constant 0 : index
    %c0_1 = arith.constant 0 : index
    %4 = vector.load %arg2[%c0, %3, %c0_0, %c0_1] : memref<1x5x5x128xbf16, #tpu.memory_space<vmem>>, vector<1x2x5x128xbf16>
    %5 = vector.extract_strided_slice %4 {offsets = [0, 0, 0, 0], sizes = [1, 2, 2, 128], strides = [1, 1, 1, 1]} : vector<1x2x5x128xbf16> to vector<1x2x2x128xbf16>
    %c0_2 = arith.constant 0 : index
    %c0_3 = arith.constant 0 : index
    %c0_4 = arith.constant 0 : index
    %6 = vector.load %arg3[%c0_2, %c0_3, %c0_4] : memref<16x128x128xbf16, #tpu.memory_space<vmem>>, vector<1x128x128xbf16>
    %7 = vector.shape_cast %6 : vector<1x128x128xbf16> to vector<128x128xbf16>
    %cst_5 = arith.constant dense<0.000000e+00> : vector<1x2x2x128xf32>
    %8 = tpu.matmul %5, %7, %cst_5 {dimension_numbers = #tpu.dot_dimension_numbers<[3], [0], [0, 1, 2], [1], [0, 0, 0, 1, 0, 2, 1, 1], [], []>} : vector<1x2x2x128xbf16>, vector<128x128xbf16>, vector<1x2x2x128xf32> -> vector<1x2x2x128xf32>
    %9 = arith.addf %1, %8 : vector<1x2x2x128xf32>
    %10 = vector.extract_strided_slice %4 {offsets = [0, 0, 1, 0], sizes = [1, 2, 2, 128], strides = [1, 1, 1, 1]} : vector<1x2x5x128xbf16> to vector<1x2x2x128xbf16>
    %c1 = arith.constant 1 : index
    %c0_6 = arith.constant 0 : index
    %c0_7 = arith.constant 0 : index
    %11 = vector.load %arg3[%c1, %c0_6, %c0_7] : memref<16x128x128xbf16, #tpu.memory_space<vmem>>, vector<1x128x128xbf16>
    %12 = vector.shape_cast %11 : vector<1x128x128xbf16> to vector<128x128xbf16>
    %cst_8 = arith.constant dense<0.000000e+00> : vector<1x2x2x128xf32>
    %13 = tpu.matmul %10, %12, %cst_8 {dimension_numbers = #tpu.dot_dimension_numbers<[3], [0], [0, 1, 2], [1], [0, 0, 0, 1, 0, 2, 1, 1], [], []>} : vector<1x2x2x128xbf16>, vector<128x128xbf16>, vector<1x2x2x128xf32> -> vector<1x2x2x128xf32>
    %14 = arith.addf %9, %13 : vector<1x2x2x128xf32>
    %15 = vector.extract_strided_slice %4 {offsets = [0, 0, 2, 0], sizes = [1, 2, 2, 128], strides = [1, 1, 1, 1]} : vector<1x2x5x128xbf16> to vector<1x2x2x128xbf16>
    %c2 = arith.constant 2 : index
    %c0_9 = arith.constant 0 : index
    %c0_10 = arith.constant 0 : index
    %16 = vector.load %arg3[%c2, %c0_9, %c0_10] : memref<16x128x128xbf16, #tpu.memory_space<vmem>>, vector<1x128x128xbf16>
    %17 = vector.shape_cast %16 : vector<1x128x128xbf16> to vector<128x128xbf16>
    %cst_11 = arith.constant dense<0.000000e+00> : vector<1x2x2x128xf32>
    %18 = tpu.matmul %15, %17, %cst_11 {dimension_numbers = #tpu.dot_dimension_numbers<[3], [0], [0, 1, 2], [1], [0, 0, 0, 1, 0, 2, 1, 1], [], []>} : vector<1x2x2x128xbf16>, vector<128x128xbf16>, vector<1x2x2x128xf32> -> vector<1x2x2x128xf32>
    %19 = arith.addf %14, %18 : vector<1x2x2x128xf32>
    %20 = vector.extract_strided_slice %4 {offsets = [0, 0, 3, 0], sizes = [1, 2, 2, 128], strides = [1, 1, 1, 1]} : vector<1x2x5x128xbf16> to vector<1x2x2x128xbf16>
    %c3 = arith.constant 3 : index
    %c0_12 = arith.constant 0 : index
    %c0_13 = arith.constant 0 : index
    %21 = vector.load %arg3[%c3, %c0_12, %c0_13] : memref<16x128x128xbf16, #tpu.memory_space<vmem>>, vector<1x128x128xbf16>
    %22 = vector.shape_cast %21 : vector<1x128x128xbf16> to vector<128x128xbf16>
    %cst_14 = arith.constant dense<0.000000e+00> : vector<1x2x2x128xf32>
    %23 = tpu.matmul %20, %22, %cst_14 {dimension_numbers = #tpu.dot_dimension_numbers<[3], [0], [0, 1, 2], [1], [0, 0, 0, 1, 0, 2, 1, 1], [], []>} : vector<1x2x2x128xbf16>, vector<128x128xbf16>, vector<1x2x2x128xf32> -> vector<1x2x2x128xf32>
    %24 = arith.addf %19, %23 : vector<1x2x2x128xf32>
    %c1_i32 = arith.constant 1 : i32
    %25 = arith.addi %0, %c1_i32 : i32
    %c0_15 = arith.constant 0 : index
    %26 = arith.index_cast %25 : i32 to index
    %c0_16 = arith.constant 0 : index
    %c0_17 = arith.constant 0 : index
    %27 = vector.load %arg2[%c0_15, %26, %c0_16, %c0_17] : memref<1x5x5x128xbf16, #tpu.memory_space<vmem>>, vector<1x2x5x128xbf16>
    %28 = vector.extract_strided_slice %27 {offsets = [0, 0, 0, 0], sizes = [1, 2, 2, 128], strides = [1, 1, 1, 1]} : vector<1x2x5x128xbf16> to vector<1x2x2x128xbf16>
    %c4 = arith.constant 4 : index
    %c0_18 = arith.constant 0 : index
    %c0_19 = arith.constant 0 : index
    %29 = vector.load %arg3[%c4, %c0_18, %c0_19] : memref<16x128x128xbf16, #tpu.memory_space<vmem>>, vector<1x128x128xbf16>
    %30 = vector.shape_cast %29 : vector<1x128x128xbf16> to vector<128x128xbf16>
    %cst_20 = arith.constant dense<0.000000e+00> : vector<1x2x2x128xf32>
    %31 = tpu.matmul %28, %30, %cst_20 {dimension_numbers = #tpu.dot_dimension_numbers<[3], [0], [0, 1, 2], [1], [0, 0, 0, 1, 0, 2, 1, 1], [], []>} : vector<1x2x2x128xbf16>, vector<128x128xbf16>, vector<1x2x2x128xf32> -> vector<1x2x2x128xf32>
    %32 = arith.addf %24, %31 : vector<1x2x2x128xf32>
    %33 = vector.extract_strided_slice %27 {offsets = [0, 0, 1, 0], sizes = [1, 2, 2, 128], strides = [1, 1, 1, 1]} : vector<1x2x5x128xbf16> to vector<1x2x2x128xbf16>
    %c5 = arith.constant 5 : index
    %c0_21 = arith.constant 0 : index
    %c0_22 = arith.constant 0 : index
    %34 = vector.load %arg3[%c5, %c0_21, %c0_22] : memref<16x128x128xbf16, #tpu.memory_space<vmem>>, vector<1x128x128xbf16>
    %35 = vector.shape_cast %34 : vector<1x128x128xbf16> to vector<128x128xbf16>
    %cst_23 = arith.constant dense<0.000000e+00> : vector<1x2x2x128xf32>
    %36 = tpu.matmul %33, %35, %cst_23 {dimension_numbers = #tpu.dot_dimension_numbers<[3], [0], [0, 1, 2], [1], [0, 0, 0, 1, 0, 2, 1, 1], [], []>} : vector<1x2x2x128xbf16>, vector<128x128xbf16>, vector<1x2x2x128xf32> -> vector<1x2x2x128xf32>
    %37 = arith.addf %32, %36 : vector<1x2x2x128xf32>
    %38 = vector.extract_strided_slice %27 {offsets = [0, 0, 2, 0], sizes = [1, 2, 2, 128], strides = [1, 1, 1, 1]} : vector<1x2x5x128xbf16> to vector<1x2x2x128xbf16>
    %c6 = arith.constant 6 : index
    %c0_24 = arith.constant 0 : index
    %c0_25 = arith.constant 0 : index
    %39 = vector.load %arg3[%c6, %c0_24, %c0_25] : memref<16x128x128xbf16, #tpu.memory_space<vmem>>, vector<1x128x128xbf16>
    %40 = vector.shape_cast %39 : vector<1x128x128xbf16> to vector<128x128xbf16>
    %cst_26 = arith.constant dense<0.000000e+00> : vector<1x2x2x128xf32>
    %41 = tpu.matmul %38, %40, %cst_26 {dimension_numbers = #tpu.dot_dimension_numbers<[3], [0], [0, 1, 2], [1], [0, 0, 0, 1, 0, 2, 1, 1], [], []>} : vector<1x2x2x128xbf16>, vector<128x128xbf16>, vector<1x2x2x128xf32> -> vector<1x2x2x128xf32>
    %42 = arith.addf %37, %41 : vector<1x2x2x128xf32>
    %43 = vector.extract_strided_slice %27 {offsets = [0, 0, 3, 0], sizes = [1, 2, 2, 128], strides = [1, 1, 1, 1]} : vector<1x2x5x128xbf16> to vector<1x2x2x128xbf16>
    %c7 = arith.constant 7 : index
    %c0_27 = arith.constant 0 : index
    %c0_28 = arith.constant 0 : index
    %44 = vector.load %arg3[%c7, %c0_27, %c0_28] : memref<16x128x128xbf16, #tpu.memory_space<vmem>>, vector<1x128x128xbf16>
    %45 = vector.shape_cast %44 : vector<1x128x128xbf16> to vector<128x128xbf16>
    %cst_29 = arith.constant dense<0.000000e+00> : vector<1x2x2x128xf32>
    %46 = tpu.matmul %43, %45, %cst_29 {dimension_numbers = #tpu.dot_dimension_numbers<[3], [0], [0, 1, 2], [1], [0, 0, 0, 1, 0, 2, 1, 1], [], []>} : vector<1x2x2x128xbf16>, vector<128x128xbf16>, vector<1x2x2x128xf32> -> vector<1x2x2x128xf32>
    %47 = arith.addf %42, %46 : vector<1x2x2x128xf32>
    %c2_i32_30 = arith.constant 2 : i32
    %48 = arith.addi %0, %c2_i32_30 : i32
    %c0_31 = arith.constant 0 : index
    %49 = arith.index_cast %48 : i32 to index
    %c0_32 = arith.constant 0 : index
    %c0_33 = arith.constant 0 : index
    %50 = vector.load %arg2[%c0_31, %49, %c0_32, %c0_33] : memref<1x5x5x128xbf16, #tpu.memory_space<vmem>>, vector<1x2x5x128xbf16>
    %51 = vector.extract_strided_slice %50 {offsets = [0, 0, 0, 0], sizes = [1, 2, 2, 128], strides = [1, 1, 1, 1]} : vector<1x2x5x128xbf16> to vector<1x2x2x128xbf16>
    %c8 = arith.constant 8 : index
    %c0_34 = arith.constant 0 : index
    %c0_35 = arith.constant 0 : index
    %52 = vector.load %arg3[%c8, %c0_34, %c0_35] : memref<16x128x128xbf16, #tpu.memory_space<vmem>>, vector<1x128x128xbf16>
    %53 = vector.shape_cast %52 : vector<1x128x128xbf16> to vector<128x128xbf16>
    %cst_36 = arith.constant dense<0.000000e+00> : vector<1x2x2x128xf32>
    %54 = tpu.matmul %51, %53, %cst_36 {dimension_numbers = #tpu.dot_dimension_numbers<[3], [0], [0, 1, 2], [1], [0, 0, 0, 1, 0, 2, 1, 1], [], []>} : vector<1x2x2x128xbf16>, vector<128x128xbf16>, vector<1x2x2x128xf32> -> vector<1x2x2x128xf32>
    %55 = arith.addf %47, %54 : vector<1x2x2x128xf32>
    %56 = vector.extract_strided_slice %50 {offsets = [0, 0, 1, 0], sizes = [1, 2, 2, 128], strides = [1, 1, 1, 1]} : vector<1x2x5x128xbf16> to vector<1x2x2x128xbf16>
    %c9 = arith.constant 9 : index
    %c0_37 = arith.constant 0 : index
    %c0_38 = arith.constant 0 : index
    %57 = vector.load %arg3[%c9, %c0_37, %c0_38] : memref<16x128x128xbf16, #tpu.memory_space<vmem>>, vector<1x128x128xbf16>
    %58 = vector.shape_cast %57 : vector<1x128x128xbf16> to vector<128x128xbf16>
    %cst_39 = arith.constant dense<0.000000e+00> : vector<1x2x2x128xf32>
    %59 = tpu.matmul %56, %58, %cst_39 {dimension_numbers = #tpu.dot_dimension_numbers<[3], [0], [0, 1, 2], [1], [0, 0, 0, 1, 0, 2, 1, 1], [], []>} : vector<1x2x2x128xbf16>, vector<128x128xbf16>, vector<1x2x2x128xf32> -> vector<1x2x2x128xf32>
    %60 = arith.addf %55, %59 : vector<1x2x2x128xf32>
    %61 = vector.extract_strided_slice %50 {offsets = [0, 0, 2, 0], sizes = [1, 2, 2, 128], strides = [1, 1, 1, 1]} : vector<1x2x5x128xbf16> to vector<1x2x2x128xbf16>
    %c10 = arith.constant 10 : index
    %c0_40 = arith.constant 0 : index
    %c0_41 = arith.constant 0 : index
    %62 = vector.load %arg3[%c10, %c0_40, %c0_41] : memref<16x128x128xbf16, #tpu.memory_space<vmem>>, vector<1x128x128xbf16>
    %63 = vector.shape_cast %62 : vector<1x128x128xbf16> to vector<128x128xbf16>
    %cst_42 = arith.constant dense<0.000000e+00> : vector<1x2x2x128xf32>
    %64 = tpu.matmul %61, %63, %cst_42 {dimension_numbers = #tpu.dot_dimension_numbers<[3], [0], [0, 1, 2], [1], [0, 0, 0, 1, 0, 2, 1, 1], [], []>} : vector<1x2x2x128xbf16>, vector<128x128xbf16>, vector<1x2x2x128xf32> -> vector<1x2x2x128xf32>
    %65 = arith.addf %60, %64 : vector<1x2x2x128xf32>
    %66 = vector.extract_strided_slice %50 {offsets = [0, 0, 3, 0], sizes = [1, 2, 2, 128], strides = [1, 1, 1, 1]} : vector<1x2x5x128xbf16> to vector<1x2x2x128xbf16>
    %c11 = arith.constant 11 : index
    %c0_43 = arith.constant 0 : index
    %c0_44 = arith.constant 0 : index
    %67 = vector.load %arg3[%c11, %c0_43, %c0_44] : memref<16x128x128xbf16, #tpu.memory_space<vmem>>, vector<1x128x128xbf16>
    %68 = vector.shape_cast %67 : vector<1x128x128xbf16> to vector<128x128xbf16>
    %cst_45 = arith.constant dense<0.000000e+00> : vector<1x2x2x128xf32>
    %69 = tpu.matmul %66, %68, %cst_45 {dimension_numbers = #tpu.dot_dimension_numbers<[3], [0], [0, 1, 2], [1], [0, 0, 0, 1, 0, 2, 1, 1], [], []>} : vector<1x2x2x128xbf16>, vector<128x128xbf16>, vector<1x2x2x128xf32> -> vector<1x2x2x128xf32>
    %70 = arith.addf %65, %69 : vector<1x2x2x128xf32>
    %c3_i32 = arith.constant 3 : i32
    %71 = arith.addi %0, %c3_i32 : i32
    %c0_46 = arith.constant 0 : index
    %72 = arith.index_cast %71 : i32 to index
    %c0_47 = arith.constant 0 : index
    %c0_48 = arith.constant 0 : index
    %73 = vector.load %arg2[%c0_46, %72, %c0_47, %c0_48] : memref<1x5x5x128xbf16, #tpu.memory_space<vmem>>, vector<1x2x5x128xbf16>
    %74 = vector.extract_strided_slice %73 {offsets = [0, 0, 0, 0], sizes = [1, 2, 2, 128], strides = [1, 1, 1, 1]} : vector<1x2x5x128xbf16> to vector<1x2x2x128xbf16>
    %c12 = arith.constant 12 : index
    %c0_49 = arith.constant 0 : index
    %c0_50 = arith.constant 0 : index
    %75 = vector.load %arg3[%c12, %c0_49, %c0_50] : memref<16x128x128xbf16, #tpu.memory_space<vmem>>, vector<1x128x128xbf16>
    %76 = vector.shape_cast %75 : vector<1x128x128xbf16> to vector<128x128xbf16>
    %cst_51 = arith.constant dense<0.000000e+00> : vector<1x2x2x128xf32>
    %77 = tpu.matmul %74, %76, %cst_51 {dimension_numbers = #tpu.dot_dimension_numbers<[3], [0], [0, 1, 2], [1], [0, 0, 0, 1, 0, 2, 1, 1], [], []>} : vector<1x2x2x128xbf16>, vector<128x128xbf16>, vector<1x2x2x128xf32> -> vector<1x2x2x128xf32>
    %78 = arith.addf %70, %77 : vector<1x2x2x128xf32>
    %79 = vector.extract_strided_slice %73 {offsets = [0, 0, 1, 0], sizes = [1, 2, 2, 128], strides = [1, 1, 1, 1]} : vector<1x2x5x128xbf16> to vector<1x2x2x128xbf16>
    %c13 = arith.constant 13 : index
    %c0_52 = arith.constant 0 : index
    %c0_53 = arith.constant 0 : index
    %80 = vector.load %arg3[%c13, %c0_52, %c0_53] : memref<16x128x128xbf16, #tpu.memory_space<vmem>>, vector<1x128x128xbf16>
    %81 = vector.shape_cast %80 : vector<1x128x128xbf16> to vector<128x128xbf16>
    %cst_54 = arith.constant dense<0.000000e+00> : vector<1x2x2x128xf32>
    %82 = tpu.matmul %79, %81, %cst_54 {dimension_numbers = #tpu.dot_dimension_numbers<[3], [0], [0, 1, 2], [1], [0, 0, 0, 1, 0, 2, 1, 1], [], []>} : vector<1x2x2x128xbf16>, vector<128x128xbf16>, vector<1x2x2x128xf32> -> vector<1x2x2x128xf32>
    %83 = arith.addf %78, %82 : vector<1x2x2x128xf32>
    %84 = vector.extract_strided_slice %73 {offsets = [0, 0, 2, 0], sizes = [1, 2, 2, 128], strides = [1, 1, 1, 1]} : vector<1x2x5x128xbf16> to vector<1x2x2x128xbf16>
    %c14 = arith.constant 14 : index
    %c0_55 = arith.constant 0 : index
    %c0_56 = arith.constant 0 : index
    %85 = vector.load %arg3[%c14, %c0_55, %c0_56] : memref<16x128x128xbf16, #tpu.memory_space<vmem>>, vector<1x128x128xbf16>
    %86 = vector.shape_cast %85 : vector<1x128x128xbf16> to vector<128x128xbf16>
    %cst_57 = arith.constant dense<0.000000e+00> : vector<1x2x2x128xf32>
    %87 = tpu.matmul %84, %86, %cst_57 {dimension_numbers = #tpu.dot_dimension_numbers<[3], [0], [0, 1, 2], [1], [0, 0, 0, 1, 0, 2, 1, 1], [], []>} : vector<1x2x2x128xbf16>, vector<128x128xbf16>, vector<1x2x2x128xf32> -> vector<1x2x2x128xf32>
    %88 = arith.addf %83, %87 : vector<1x2x2x128xf32>
    %89 = vector.extract_strided_slice %73 {offsets = [0, 0, 3, 0], sizes = [1, 2, 2, 128], strides = [1, 1, 1, 1]} : vector<1x2x5x128xbf16> to vector<1x2x2x128xbf16>
    %c15 = arith.constant 15 : index
    %c0_58 = arith.constant 0 : index
    %c0_59 = arith.constant 0 : index
    %90 = vector.load %arg3[%c15, %c0_58, %c0_59] : memref<16x128x128xbf16, #tpu.memory_space<vmem>>, vector<1x128x128xbf16>
    %91 = vector.shape_cast %90 : vector<1x128x128xbf16> to vector<128x128xbf16>
    %cst_60 = arith.constant dense<0.000000e+00> : vector<1x2x2x128xf32>
    %92 = tpu.matmul %89, %91, %cst_60 {dimension_numbers = #tpu.dot_dimension_numbers<[3], [0], [0, 1, 2], [1], [0, 0, 0, 1, 0, 2, 1, 1], [], []>} : vector<1x2x2x128xbf16>, vector<128x128xbf16>, vector<1x2x2x128xf32> -> vector<1x2x2x128xf32>
    %93 = arith.addf %88, %92 : vector<1x2x2x128xf32>
    %c0_61 = arith.constant 0 : index
    %c0_62 = arith.constant 0 : index
    %94 = vector.load %arg4[%c0_61, %c0_62] : memref<1x128xf32, #tpu.memory_space<vmem>>, vector<1x128xf32>
    %95 = vector.shape_cast %94 : vector<1x128xf32> to vector<1x1x1x128xf32>
    %96 = vector.broadcast %95 : vector<1x1x1x128xf32> to vector<1x2x2x128xf32>
    %97 = arith.addf %93, %96 : vector<1x2x2x128xf32>
    %98 = arith.truncf %97 : vector<1x2x2x128xf32> to vector<1x2x2x128xbf16>
    %c0_63 = arith.constant 0 : index
    %c0_64 = arith.constant 0 : index
    %c0_65 = arith.constant 0 : index
    %c0_66 = arith.constant 0 : index
    %99 = vector.load %arg5[%c0_63, %c0_64, %c0_65, %c0_66] : memref<1x2x2x128xbf16, #tpu.memory_space<vmem>>, vector<1x2x2x128xbf16>
    tpu.vector_store %arg5[%c0_63, %c0_64, %c0_65, %c0_66], %98 {strides = array<i32>} : memref<1x2x2x128xbf16, #tpu.memory_space<vmem>>, vector<1x2x2x128xbf16>,
    return
  }
  func.func @transform_0(%arg0: i32, %arg1: i32) -> (i32, i32, i32, i32) {
    %c0_i32 = arith.constant 0 : i32
    %c0_i32_0 = arith.constant 0 : i32
    %c0_i32_1 = arith.constant 0 : i32
    %c0_i32_2 = arith.constant 0 : i32
    return %arg0, %c0_i32, %c0_i32_0, %c0_i32_1 : i32, i32, i32, i32
  }
  func.func @transform_1(%arg0: i32, %arg1: i32) -> (i32, i32, i32) {
    %c0_i32 = arith.constant 0 : i32
    %c0_i32_0 = arith.constant 0 : i32
    %c0_i32_1 = arith.constant 0 : i32
    %c0_i32_2 = arith.constant 0 : i32
    return %c0_i32, %c0_i32_0, %c0_i32_1 : i32, i32, i32
  }
  func.func @transform_2(%arg0: i32, %arg1: i32) -> (i32, i32) {
    %c0_i32 = arith.constant 0 : i32
    %c0_i32_0 = arith.constant 0 : i32
    %c0_i32_1 = arith.constant 0 : i32
    return %c0_i32, %c0_i32_0 : i32, i32
  }
  func.func @transform_3(%arg0: i32, %arg1: i32) -> (i32, i32, i32, i32) {
    %c0_i32 = arith.constant 0 : i32
    %c0_i32_0 = arith.constant 0 : i32
    %c0_i32_1 = arith.constant 0 : i32
    return %arg0, %arg1, %c0_i32, %c0_i32_0 : i32, i32, i32, i32
  }
}

module attributes {stable_mosaic.version = 11 : i64} {
  func.func @_conv_kernel(%arg0: i32, %arg1: i32, %arg2: memref<1x6x6x128xbf16, #tpu.memory_space<vmem>>, %arg3: memref<16x128x128xbf16, #tpu.memory_space<vmem>>, %arg4: memref<1x128xf32, #tpu.memory_space<vmem>>, %arg5: memref<1x3x3x128xbf16, #tpu.memory_space<vmem>>, %arg6: memref<1x1x2x128xf32, #tpu.memory_space<vmem>>) attributes {dimension_semantics = [#tpu.dimension_semantics<parallel>, #tpu.dimension_semantics<parallel>], iteration_bounds = array<i64: 2, 1>, scalar_prefetch = 0 : i64, scratch_operands = 0 : i64, tpu.core_type = #tpu.core_type<tc>, window_params = [{transform_indices = @transform_0, window_bounds = array<i64: 1, 6, 6, 128>}, {pipeline_mode = #tpu.pipeline_mode<synchronous>, transform_indices = @transform_1, window_bounds = array<i64: 16, 128, 128>}, {pipeline_mode = #tpu.pipeline_mode<synchronous>, transform_indices = @transform_2, window_bounds = array<i64: 1, 128>}, {transform_indices = @transform_3, window_bounds = array<i64: 1, 3, 3, 128>}, {transform_indices = @transform_4, window_bounds = array<i64: 1, 1, 2, 128>}]} {
    %c3_i32 = arith.constant 3 : i32
    %0 = arith.muli %arg1, %c3_i32 : i32
    %cst = arith.constant 0.000000e+00 : f32
    %1 = vector.broadcast %cst : f32 to vector<1x3x3x128xf32>
    %c0_i32 = arith.constant 0 : i32
    %2 = arith.addi %0, %c0_i32 : i32
    %c0 = arith.constant 0 : index
    %3 = arith.index_cast %2 : i32 to index
    %c0_0 = arith.constant 0 : index
    %c0_1 = arith.constant 0 : index
    %4 = vector.load %arg2[%c0, %3, %c0_0, %c0_1] : memref<1x6x6x128xbf16, #tpu.memory_space<vmem>>, vector<1x3x6x128xbf16>
    %5 = vector.extract_strided_slice %4 {offsets = [0, 0, 0, 0], sizes = [1, 3, 3, 128], strides = [1, 1, 1, 1]} : vector<1x3x6x128xbf16> to vector<1x3x3x128xbf16>
    %c0_2 = arith.constant 0 : index
    %c0_3 = arith.constant 0 : index
    %c0_4 = arith.constant 0 : index
    %6 = vector.load %arg3[%c0_2, %c0_3, %c0_4] : memref<16x128x128xbf16, #tpu.memory_space<vmem>>, vector<1x128x128xbf16>
    %7 = vector.shape_cast %6 : vector<1x128x128xbf16> to vector<128x128xbf16>
    %cst_5 = arith.constant dense<0.000000e+00> : vector<1x3x3x128xf32>
    %8 = tpu.matmul %5, %7, %cst_5 {dimension_numbers = #tpu.dot_dimension_numbers<[3], [0], [0, 1, 2], [1], [0, 0, 0, 1, 0, 2, 1, 1], [], []>} : vector<1x3x3x128xbf16>, vector<128x128xbf16>, vector<1x3x3x128xf32> -> vector<1x3x3x128xf32>
    %9 = arith.addf %1, %8 : vector<1x3x3x128xf32>
    %10 = vector.extract_strided_slice %4 {offsets = [0, 0, 1, 0], sizes = [1, 3, 3, 128], strides = [1, 1, 1, 1]} : vector<1x3x6x128xbf16> to vector<1x3x3x128xbf16>
    %c1 = arith.constant 1 : index
    %c0_6 = arith.constant 0 : index
    %c0_7 = arith.constant 0 : index
    %11 = vector.load %arg3[%c1, %c0_6, %c0_7] : memref<16x128x128xbf16, #tpu.memory_space<vmem>>, vector<1x128x128xbf16>
    %12 = vector.shape_cast %11 : vector<1x128x128xbf16> to vector<128x128xbf16>
    %cst_8 = arith.constant dense<0.000000e+00> : vector<1x3x3x128xf32>
    %13 = tpu.matmul %10, %12, %cst_8 {dimension_numbers = #tpu.dot_dimension_numbers<[3], [0], [0, 1, 2], [1], [0, 0, 0, 1, 0, 2, 1, 1], [], []>} : vector<1x3x3x128xbf16>, vector<128x128xbf16>, vector<1x3x3x128xf32> -> vector<1x3x3x128xf32>
    %14 = arith.addf %9, %13 : vector<1x3x3x128xf32>
    %15 = vector.extract_strided_slice %4 {offsets = [0, 0, 2, 0], sizes = [1, 3, 3, 128], strides = [1, 1, 1, 1]} : vector<1x3x6x128xbf16> to vector<1x3x3x128xbf16>
    %c2 = arith.constant 2 : index
    %c0_9 = arith.constant 0 : index
    %c0_10 = arith.constant 0 : index
    %16 = vector.load %arg3[%c2, %c0_9, %c0_10] : memref<16x128x128xbf16, #tpu.memory_space<vmem>>, vector<1x128x128xbf16>
    %17 = vector.shape_cast %16 : vector<1x128x128xbf16> to vector<128x128xbf16>
    %cst_11 = arith.constant dense<0.000000e+00> : vector<1x3x3x128xf32>
    %18 = tpu.matmul %15, %17, %cst_11 {dimension_numbers = #tpu.dot_dimension_numbers<[3], [0], [0, 1, 2], [1], [0, 0, 0, 1, 0, 2, 1, 1], [], []>} : vector<1x3x3x128xbf16>, vector<128x128xbf16>, vector<1x3x3x128xf32> -> vector<1x3x3x128xf32>
    %19 = arith.addf %14, %18 : vector<1x3x3x128xf32>
    %20 = vector.extract_strided_slice %4 {offsets = [0, 0, 3, 0], sizes = [1, 3, 3, 128], strides = [1, 1, 1, 1]} : vector<1x3x6x128xbf16> to vector<1x3x3x128xbf16>
    %c3 = arith.constant 3 : index
    %c0_12 = arith.constant 0 : index
    %c0_13 = arith.constant 0 : index
    %21 = vector.load %arg3[%c3, %c0_12, %c0_13] : memref<16x128x128xbf16, #tpu.memory_space<vmem>>, vector<1x128x128xbf16>
    %22 = vector.shape_cast %21 : vector<1x128x128xbf16> to vector<128x128xbf16>
    %cst_14 = arith.constant dense<0.000000e+00> : vector<1x3x3x128xf32>
    %23 = tpu.matmul %20, %22, %cst_14 {dimension_numbers = #tpu.dot_dimension_numbers<[3], [0], [0, 1, 2], [1], [0, 0, 0, 1, 0, 2, 1, 1], [], []>} : vector<1x3x3x128xbf16>, vector<128x128xbf16>, vector<1x3x3x128xf32> -> vector<1x3x3x128xf32>
    %24 = arith.addf %19, %23 : vector<1x3x3x128xf32>
    %c1_i32 = arith.constant 1 : i32
    %25 = arith.addi %0, %c1_i32 : i32
    %c0_15 = arith.constant 0 : index
    %26 = arith.index_cast %25 : i32 to index
    %c0_16 = arith.constant 0 : index
    %c0_17 = arith.constant 0 : index
    %27 = vector.load %arg2[%c0_15, %26, %c0_16, %c0_17] : memref<1x6x6x128xbf16, #tpu.memory_space<vmem>>, vector<1x3x6x128xbf16>
    %28 = vector.extract_strided_slice %27 {offsets = [0, 0, 0, 0], sizes = [1, 3, 3, 128], strides = [1, 1, 1, 1]} : vector<1x3x6x128xbf16> to vector<1x3x3x128xbf16>
    %c4 = arith.constant 4 : index
    %c0_18 = arith.constant 0 : index
    %c0_19 = arith.constant 0 : index
    %29 = vector.load %arg3[%c4, %c0_18, %c0_19] : memref<16x128x128xbf16, #tpu.memory_space<vmem>>, vector<1x128x128xbf16>
    %30 = vector.shape_cast %29 : vector<1x128x128xbf16> to vector<128x128xbf16>
    %cst_20 = arith.constant dense<0.000000e+00> : vector<1x3x3x128xf32>
    %31 = tpu.matmul %28, %30, %cst_20 {dimension_numbers = #tpu.dot_dimension_numbers<[3], [0], [0, 1, 2], [1], [0, 0, 0, 1, 0, 2, 1, 1], [], []>} : vector<1x3x3x128xbf16>, vector<128x128xbf16>, vector<1x3x3x128xf32> -> vector<1x3x3x128xf32>
    %32 = arith.addf %24, %31 : vector<1x3x3x128xf32>
    %33 = vector.extract_strided_slice %27 {offsets = [0, 0, 1, 0], sizes = [1, 3, 3, 128], strides = [1, 1, 1, 1]} : vector<1x3x6x128xbf16> to vector<1x3x3x128xbf16>
    %c5 = arith.constant 5 : index
    %c0_21 = arith.constant 0 : index
    %c0_22 = arith.constant 0 : index
    %34 = vector.load %arg3[%c5, %c0_21, %c0_22] : memref<16x128x128xbf16, #tpu.memory_space<vmem>>, vector<1x128x128xbf16>
    %35 = vector.shape_cast %34 : vector<1x128x128xbf16> to vector<128x128xbf16>
    %cst_23 = arith.constant dense<0.000000e+00> : vector<1x3x3x128xf32>
    %36 = tpu.matmul %33, %35, %cst_23 {dimension_numbers = #tpu.dot_dimension_numbers<[3], [0], [0, 1, 2], [1], [0, 0, 0, 1, 0, 2, 1, 1], [], []>} : vector<1x3x3x128xbf16>, vector<128x128xbf16>, vector<1x3x3x128xf32> -> vector<1x3x3x128xf32>
    %37 = arith.addf %32, %36 : vector<1x3x3x128xf32>
    %38 = vector.extract_strided_slice %27 {offsets = [0, 0, 2, 0], sizes = [1, 3, 3, 128], strides = [1, 1, 1, 1]} : vector<1x3x6x128xbf16> to vector<1x3x3x128xbf16>
    %c6 = arith.constant 6 : index
    %c0_24 = arith.constant 0 : index
    %c0_25 = arith.constant 0 : index
    %39 = vector.load %arg3[%c6, %c0_24, %c0_25] : memref<16x128x128xbf16, #tpu.memory_space<vmem>>, vector<1x128x128xbf16>
    %40 = vector.shape_cast %39 : vector<1x128x128xbf16> to vector<128x128xbf16>
    %cst_26 = arith.constant dense<0.000000e+00> : vector<1x3x3x128xf32>
    %41 = tpu.matmul %38, %40, %cst_26 {dimension_numbers = #tpu.dot_dimension_numbers<[3], [0], [0, 1, 2], [1], [0, 0, 0, 1, 0, 2, 1, 1], [], []>} : vector<1x3x3x128xbf16>, vector<128x128xbf16>, vector<1x3x3x128xf32> -> vector<1x3x3x128xf32>
    %42 = arith.addf %37, %41 : vector<1x3x3x128xf32>
    %43 = vector.extract_strided_slice %27 {offsets = [0, 0, 3, 0], sizes = [1, 3, 3, 128], strides = [1, 1, 1, 1]} : vector<1x3x6x128xbf16> to vector<1x3x3x128xbf16>
    %c7 = arith.constant 7 : index
    %c0_27 = arith.constant 0 : index
    %c0_28 = arith.constant 0 : index
    %44 = vector.load %arg3[%c7, %c0_27, %c0_28] : memref<16x128x128xbf16, #tpu.memory_space<vmem>>, vector<1x128x128xbf16>
    %45 = vector.shape_cast %44 : vector<1x128x128xbf16> to vector<128x128xbf16>
    %cst_29 = arith.constant dense<0.000000e+00> : vector<1x3x3x128xf32>
    %46 = tpu.matmul %43, %45, %cst_29 {dimension_numbers = #tpu.dot_dimension_numbers<[3], [0], [0, 1, 2], [1], [0, 0, 0, 1, 0, 2, 1, 1], [], []>} : vector<1x3x3x128xbf16>, vector<128x128xbf16>, vector<1x3x3x128xf32> -> vector<1x3x3x128xf32>
    %47 = arith.addf %42, %46 : vector<1x3x3x128xf32>
    %c2_i32 = arith.constant 2 : i32
    %48 = arith.addi %0, %c2_i32 : i32
    %c0_30 = arith.constant 0 : index
    %49 = arith.index_cast %48 : i32 to index
    %c0_31 = arith.constant 0 : index
    %c0_32 = arith.constant 0 : index
    %50 = vector.load %arg2[%c0_30, %49, %c0_31, %c0_32] : memref<1x6x6x128xbf16, #tpu.memory_space<vmem>>, vector<1x3x6x128xbf16>
    %51 = vector.extract_strided_slice %50 {offsets = [0, 0, 0, 0], sizes = [1, 3, 3, 128], strides = [1, 1, 1, 1]} : vector<1x3x6x128xbf16> to vector<1x3x3x128xbf16>
    %c8 = arith.constant 8 : index
    %c0_33 = arith.constant 0 : index
    %c0_34 = arith.constant 0 : index
    %52 = vector.load %arg3[%c8, %c0_33, %c0_34] : memref<16x128x128xbf16, #tpu.memory_space<vmem>>, vector<1x128x128xbf16>
    %53 = vector.shape_cast %52 : vector<1x128x128xbf16> to vector<128x128xbf16>
    %cst_35 = arith.constant dense<0.000000e+00> : vector<1x3x3x128xf32>
    %54 = tpu.matmul %51, %53, %cst_35 {dimension_numbers = #tpu.dot_dimension_numbers<[3], [0], [0, 1, 2], [1], [0, 0, 0, 1, 0, 2, 1, 1], [], []>} : vector<1x3x3x128xbf16>, vector<128x128xbf16>, vector<1x3x3x128xf32> -> vector<1x3x3x128xf32>
    %55 = arith.addf %47, %54 : vector<1x3x3x128xf32>
    %56 = vector.extract_strided_slice %50 {offsets = [0, 0, 1, 0], sizes = [1, 3, 3, 128], strides = [1, 1, 1, 1]} : vector<1x3x6x128xbf16> to vector<1x3x3x128xbf16>
    %c9 = arith.constant 9 : index
    %c0_36 = arith.constant 0 : index
    %c0_37 = arith.constant 0 : index
    %57 = vector.load %arg3[%c9, %c0_36, %c0_37] : memref<16x128x128xbf16, #tpu.memory_space<vmem>>, vector<1x128x128xbf16>
    %58 = vector.shape_cast %57 : vector<1x128x128xbf16> to vector<128x128xbf16>
    %cst_38 = arith.constant dense<0.000000e+00> : vector<1x3x3x128xf32>
    %59 = tpu.matmul %56, %58, %cst_38 {dimension_numbers = #tpu.dot_dimension_numbers<[3], [0], [0, 1, 2], [1], [0, 0, 0, 1, 0, 2, 1, 1], [], []>} : vector<1x3x3x128xbf16>, vector<128x128xbf16>, vector<1x3x3x128xf32> -> vector<1x3x3x128xf32>
    %60 = arith.addf %55, %59 : vector<1x3x3x128xf32>
    %61 = vector.extract_strided_slice %50 {offsets = [0, 0, 2, 0], sizes = [1, 3, 3, 128], strides = [1, 1, 1, 1]} : vector<1x3x6x128xbf16> to vector<1x3x3x128xbf16>
    %c10 = arith.constant 10 : index
    %c0_39 = arith.constant 0 : index
    %c0_40 = arith.constant 0 : index
    %62 = vector.load %arg3[%c10, %c0_39, %c0_40] : memref<16x128x128xbf16, #tpu.memory_space<vmem>>, vector<1x128x128xbf16>
    %63 = vector.shape_cast %62 : vector<1x128x128xbf16> to vector<128x128xbf16>
    %cst_41 = arith.constant dense<0.000000e+00> : vector<1x3x3x128xf32>
    %64 = tpu.matmul %61, %63, %cst_41 {dimension_numbers = #tpu.dot_dimension_numbers<[3], [0], [0, 1, 2], [1], [0, 0, 0, 1, 0, 2, 1, 1], [], []>} : vector<1x3x3x128xbf16>, vector<128x128xbf16>, vector<1x3x3x128xf32> -> vector<1x3x3x128xf32>
    %65 = arith.addf %60, %64 : vector<1x3x3x128xf32>
    %66 = vector.extract_strided_slice %50 {offsets = [0, 0, 3, 0], sizes = [1, 3, 3, 128], strides = [1, 1, 1, 1]} : vector<1x3x6x128xbf16> to vector<1x3x3x128xbf16>
    %c11 = arith.constant 11 : index
    %c0_42 = arith.constant 0 : index
    %c0_43 = arith.constant 0 : index
    %67 = vector.load %arg3[%c11, %c0_42, %c0_43] : memref<16x128x128xbf16, #tpu.memory_space<vmem>>, vector<1x128x128xbf16>
    %68 = vector.shape_cast %67 : vector<1x128x128xbf16> to vector<128x128xbf16>
    %cst_44 = arith.constant dense<0.000000e+00> : vector<1x3x3x128xf32>
    %69 = tpu.matmul %66, %68, %cst_44 {dimension_numbers = #tpu.dot_dimension_numbers<[3], [0], [0, 1, 2], [1], [0, 0, 0, 1, 0, 2, 1, 1], [], []>} : vector<1x3x3x128xbf16>, vector<128x128xbf16>, vector<1x3x3x128xf32> -> vector<1x3x3x128xf32>
    %70 = arith.addf %65, %69 : vector<1x3x3x128xf32>
    %c3_i32_45 = arith.constant 3 : i32
    %71 = arith.addi %0, %c3_i32_45 : i32
    %c0_46 = arith.constant 0 : index
    %72 = arith.index_cast %71 : i32 to index
    %c0_47 = arith.constant 0 : index
    %c0_48 = arith.constant 0 : index
    %73 = vector.load %arg2[%c0_46, %72, %c0_47, %c0_48] : memref<1x6x6x128xbf16, #tpu.memory_space<vmem>>, vector<1x3x6x128xbf16>
    %74 = vector.extract_strided_slice %73 {offsets = [0, 0, 0, 0], sizes = [1, 3, 3, 128], strides = [1, 1, 1, 1]} : vector<1x3x6x128xbf16> to vector<1x3x3x128xbf16>
    %c12 = arith.constant 12 : index
    %c0_49 = arith.constant 0 : index
    %c0_50 = arith.constant 0 : index
    %75 = vector.load %arg3[%c12, %c0_49, %c0_50] : memref<16x128x128xbf16, #tpu.memory_space<vmem>>, vector<1x128x128xbf16>
    %76 = vector.shape_cast %75 : vector<1x128x128xbf16> to vector<128x128xbf16>
    %cst_51 = arith.constant dense<0.000000e+00> : vector<1x3x3x128xf32>
    %77 = tpu.matmul %74, %76, %cst_51 {dimension_numbers = #tpu.dot_dimension_numbers<[3], [0], [0, 1, 2], [1], [0, 0, 0, 1, 0, 2, 1, 1], [], []>} : vector<1x3x3x128xbf16>, vector<128x128xbf16>, vector<1x3x3x128xf32> -> vector<1x3x3x128xf32>
    %78 = arith.addf %70, %77 : vector<1x3x3x128xf32>
    %79 = vector.extract_strided_slice %73 {offsets = [0, 0, 1, 0], sizes = [1, 3, 3, 128], strides = [1, 1, 1, 1]} : vector<1x3x6x128xbf16> to vector<1x3x3x128xbf16>
    %c13 = arith.constant 13 : index
    %c0_52 = arith.constant 0 : index
    %c0_53 = arith.constant 0 : index
    %80 = vector.load %arg3[%c13, %c0_52, %c0_53] : memref<16x128x128xbf16, #tpu.memory_space<vmem>>, vector<1x128x128xbf16>
    %81 = vector.shape_cast %80 : vector<1x128x128xbf16> to vector<128x128xbf16>
    %cst_54 = arith.constant dense<0.000000e+00> : vector<1x3x3x128xf32>
    %82 = tpu.matmul %79, %81, %cst_54 {dimension_numbers = #tpu.dot_dimension_numbers<[3], [0], [0, 1, 2], [1], [0, 0, 0, 1, 0, 2, 1, 1], [], []>} : vector<1x3x3x128xbf16>, vector<128x128xbf16>, vector<1x3x3x128xf32> -> vector<1x3x3x128xf32>
    %83 = arith.addf %78, %82 : vector<1x3x3x128xf32>
    %84 = vector.extract_strided_slice %73 {offsets = [0, 0, 2, 0], sizes = [1, 3, 3, 128], strides = [1, 1, 1, 1]} : vector<1x3x6x128xbf16> to vector<1x3x3x128xbf16>
    %c14 = arith.constant 14 : index
    %c0_55 = arith.constant 0 : index
    %c0_56 = arith.constant 0 : index
    %85 = vector.load %arg3[%c14, %c0_55, %c0_56] : memref<16x128x128xbf16, #tpu.memory_space<vmem>>, vector<1x128x128xbf16>
    %86 = vector.shape_cast %85 : vector<1x128x128xbf16> to vector<128x128xbf16>
    %cst_57 = arith.constant dense<0.000000e+00> : vector<1x3x3x128xf32>
    %87 = tpu.matmul %84, %86, %cst_57 {dimension_numbers = #tpu.dot_dimension_numbers<[3], [0], [0, 1, 2], [1], [0, 0, 0, 1, 0, 2, 1, 1], [], []>} : vector<1x3x3x128xbf16>, vector<128x128xbf16>, vector<1x3x3x128xf32> -> vector<1x3x3x128xf32>
    %88 = arith.addf %83, %87 : vector<1x3x3x128xf32>
    %89 = vector.extract_strided_slice %73 {offsets = [0, 0, 3, 0], sizes = [1, 3, 3, 128], strides = [1, 1, 1, 1]} : vector<1x3x6x128xbf16> to vector<1x3x3x128xbf16>
    %c15 = arith.constant 15 : index
    %c0_58 = arith.constant 0 : index
    %c0_59 = arith.constant 0 : index
    %90 = vector.load %arg3[%c15, %c0_58, %c0_59] : memref<16x128x128xbf16, #tpu.memory_space<vmem>>, vector<1x128x128xbf16>
    %91 = vector.shape_cast %90 : vector<1x128x128xbf16> to vector<128x128xbf16>
    %cst_60 = arith.constant dense<0.000000e+00> : vector<1x3x3x128xf32>
    %92 = tpu.matmul %89, %91, %cst_60 {dimension_numbers = #tpu.dot_dimension_numbers<[3], [0], [0, 1, 2], [1], [0, 0, 0, 1, 0, 2, 1, 1], [], []>} : vector<1x3x3x128xbf16>, vector<128x128xbf16>, vector<1x3x3x128xf32> -> vector<1x3x3x128xf32>
    %93 = arith.addf %88, %92 : vector<1x3x3x128xf32>
    %c0_61 = arith.constant 0 : index
    %c0_62 = arith.constant 0 : index
    %94 = vector.load %arg4[%c0_61, %c0_62] : memref<1x128xf32, #tpu.memory_space<vmem>>, vector<1x128xf32>
    %95 = vector.shape_cast %94 : vector<1x128xf32> to vector<1x1x1x128xf32>
    %96 = vector.broadcast %95 : vector<1x1x1x128xf32> to vector<1x3x3x128xf32>
    %97 = arith.addf %93, %96 : vector<1x3x3x128xf32>
    %cst_63 = arith.constant dense<0.000000e+00> : vector<1x128xf32>
    %98 = vector.multi_reduction <add>, %97, %cst_63 [1, 2] : vector<1x3x3x128xf32> to vector<1x128xf32>
    %99 = arith.mulf %97, %97 : vector<1x3x3x128xf32>
    %cst_64 = arith.constant dense<0.000000e+00> : vector<1x128xf32>
    %100 = vector.multi_reduction <add>, %99, %cst_64 [1, 2] : vector<1x3x3x128xf32> to vector<1x128xf32>
    %101 = tpu.iota {dimensions = array<i32: 0>} : vector<2x128xi32>
    %c0_i32_65 = arith.constant 0 : i32
    %102 = vector.broadcast %c0_i32_65 : i32 to vector<2x128xi32>
    %103 = arith.cmpi eq, %101, %102 : vector<2x128xi32>
    %104 = vector.shape_cast %98 : vector<1x128xf32> to vector<1x128xf32>
    %105 = vector.broadcast %104 : vector<1x128xf32> to vector<2x128xf32>
    %106 = vector.shape_cast %100 : vector<1x128xf32> to vector<1x128xf32>
    %107 = vector.broadcast %106 : vector<1x128xf32> to vector<2x128xf32>
    %108 = arith.select %103, %105, %107 : vector<2x128xi1>, vector<2x128xf32>
    %109 = vector.shape_cast %108 : vector<2x128xf32> to vector<1x1x2x128xf32>
    %c0_66 = arith.constant 0 : index
    %c0_67 = arith.constant 0 : index
    %c0_68 = arith.constant 0 : index
    %c0_69 = arith.constant 0 : index
    %110 = vector.load %arg6[%c0_66, %c0_67, %c0_68, %c0_69] : memref<1x1x2x128xf32, #tpu.memory_space<vmem>>, vector<1x1x2x128xf32>
    tpu.vector_store %arg6[%c0_66, %c0_67, %c0_68, %c0_69], %109 {strides = array<i32>} : memref<1x1x2x128xf32, #tpu.memory_space<vmem>>, vector<1x1x2x128xf32>,
    %111 = arith.truncf %97 : vector<1x3x3x128xf32> to vector<1x3x3x128xbf16>
    %c0_70 = arith.constant 0 : index
    %c0_71 = arith.constant 0 : index
    %c0_72 = arith.constant 0 : index
    %c0_73 = arith.constant 0 : index
    %112 = vector.load %arg5[%c0_70, %c0_71, %c0_72, %c0_73] : memref<1x3x3x128xbf16, #tpu.memory_space<vmem>>, vector<1x3x3x128xbf16>
    tpu.vector_store %arg5[%c0_70, %c0_71, %c0_72, %c0_73], %111 {strides = array<i32>} : memref<1x3x3x128xbf16, #tpu.memory_space<vmem>>, vector<1x3x3x128xbf16>,
    return
  }
  func.func @transform_0(%arg0: i32, %arg1: i32) -> (i32, i32, i32, i32) {
    %c0_i32 = arith.constant 0 : i32
    %c0_i32_0 = arith.constant 0 : i32
    %c0_i32_1 = arith.constant 0 : i32
    %c0_i32_2 = arith.constant 0 : i32
    return %arg0, %c0_i32, %c0_i32_0, %c0_i32_1 : i32, i32, i32, i32
  }
  func.func @transform_1(%arg0: i32, %arg1: i32) -> (i32, i32, i32) {
    %c0_i32 = arith.constant 0 : i32
    %c0_i32_0 = arith.constant 0 : i32
    %c0_i32_1 = arith.constant 0 : i32
    %c0_i32_2 = arith.constant 0 : i32
    return %c0_i32, %c0_i32_0, %c0_i32_1 : i32, i32, i32
  }
  func.func @transform_2(%arg0: i32, %arg1: i32) -> (i32, i32) {
    %c0_i32 = arith.constant 0 : i32
    %c0_i32_0 = arith.constant 0 : i32
    %c0_i32_1 = arith.constant 0 : i32
    return %c0_i32, %c0_i32_0 : i32, i32
  }
  func.func @transform_3(%arg0: i32, %arg1: i32) -> (i32, i32, i32, i32) {
    %c0_i32 = arith.constant 0 : i32
    %c0_i32_0 = arith.constant 0 : i32
    %c0_i32_1 = arith.constant 0 : i32
    return %arg0, %arg1, %c0_i32, %c0_i32_0 : i32, i32, i32, i32
  }
  func.func @transform_4(%arg0: i32, %arg1: i32) -> (i32, i32, i32, i32) {
    %c0_i32 = arith.constant 0 : i32
    %c0_i32_0 = arith.constant 0 : i32
    %c0_i32_1 = arith.constant 0 : i32
    return %arg0, %arg1, %c0_i32, %c0_i32_0 : i32, i32, i32, i32
  }
}

</mosaic_0001>

<bundles_post_ra>
// kernel: _lambda_.5
= control target key start
LH: loop header
LB: loop body
LE: loop exit
PB: predicated region body
PF: predicated region fallthrough
CT: control target
= control target key end

     0   :  { %s3432_s12 = smov 0   ;;  %s3434_s13 = smov 0   ;;  %s4211_s0 = inlined_call_operand.vmem [shape: bf16[2,17,17,12], index: 0, kind: input, shape index: {}]   ;;  %s4212_s1 = inlined_call_operand.vmem [shape: bf16[4,12,128], index: 1, kind: input, shape index: {}]   ;;  %s4213_s2 = inlined_call_operand.vmem [shape: f32[1,128], index: 2, kind: input, shape index: {}]   ;;  %s4214_s3 = inlined_call_operand.vmem [shape: bf16[2,16,16,128], index: 3, kind: output, shape index: {}]  }
   0x1   :  { %s3436_s14 = smov 0  }
   0x2 LB: > { %s25_s15 = sadd.s32 1, %s3406_s13  ;;  %p2665_p0 = scmp.ge.s32.totalorder %s3410_s14, 1  ;;  %s3410_s14 = sphi %s3436_s14, %s13_s14   ;;  %s3406_s13 = sphi %s3434_s13, %s4347_s13   ;;  %s3402_s12 = sphi %s3432_s12, %s4346_s12  }
   0x3   : > { %p27_p1 = scmp.ge.s32.totalorder %s25_s15, 2  ;;  %p151_p2 = scmp.lt.s32.totalorder %s3410_s14, 3 }
   0x5   : > { %s4349_s15 = smov (%p27_p1, %s25_s15), 0  ;;  %p152_p3 = pnand %p2665_p0, %p151_p2 }
   0x7   : > { %155 = sbr.rel (%p152_p3) target bundleno = 424 (0x1a8), region = 32 }
   0xe   : > { %vm743_vm0 = vcmask 1045504   ;;  %p180_p4 = scmp.lt.s32.totalorder %s3402_s12, 1  ;;  %v3347_v0 = vld [vmem:[%s4212_s1 + $0x10] sm:$0x3f]   ;;  %v3350_v2 = vld [vmem:[%s4212_s1 + $0x8] sm:$0x3f]  }
   0xf   : > { %3320 = vmatprep.subr.msk.bf16.mxu0 %vm743_vm0, %v3347_v0  ;;  %v1394_v1 = vsel %vm743_vm0, %v3347_v0, 0  ;;  %vm694_vm1 = vcmask 97280   ;;  %vm254_vm2 = vsmask.f32 3328  ;;  %3318 = vmatprep.subr.msk.bf16.mxu1 %vm743_vm0, %v3350_v2  ;;  %v745_v3 = vsel %vm743_vm0, %v3350_v2, 0 }
  0x10   : > { %s4351_s12 = smov (!%p180_p4, %s3402_s12), 1  ;;  %3155 = vmatpush3.bf16.msra.mxu0 %v1394_v1  ;;  %v3466_v4 = vld [vmem:[%s4212_s1] sm:$0x3f]   ;;  %vm255_vm3 = vsmask.f32 7440  ;;  %3087 = vmatpush3.bf16.msra.mxu1 %v745_v3 }
  0x11   : > { %s3322_s20 = smul.u32 204, %s4351_s12  ;;  %v3476_v5 = vld [vmem:[%s4212_s1 + $0x18] sm:$0x3f]   ;;  %3319 = vmatprep.subr.msk.bf16.mxu1 %vm743_vm0, %v3466_v4  ;;  %vm3511_vm4 = vmor %vm254_vm2, %vm255_vm3  ;;  %s2890_s30 = sshll.u32 %s4351_s12, 7 }
  0x12   : > { %3321 = vmatprep.subr.msk.bf16.mxu0 %vm743_vm0, %v3476_v5  ;;  %s4156_s6 = scalar_lea.vmem %s4214_s3, %s2890_s30 }
  0x13   : > { %s3471_s25 = scalar_lea.vmem %s4211_s0, %s3322_s20 }
  0x14   : > { %v2737_v6 = vld [vmem:[%s3471_s25 + $0xc] sm:$0xf]  ;;  %v2738_v7 = vld [vmem:[%s3471_s25 + $0x10] sm:$0xf]  ;;  %v2740_v8 = vld [vmem:[%s3471_s25 + $0x18] sm:$0xf] }
  0x15   : > { %v2787_v9 = vcombine.low %v2737_v6, %v2738_v7  ;;  %v1593_v10 = vshrl.u32 %v2737_v6, 16  ;;  %v1596_v11 = vshll.u32 %v2737_v6, 16  ;;  %v1602_v12 = vshll.u32 %v2738_v7, 16  ;;  %v2741_v13 = vld [vmem:[%s3471_s25 + $0x1c] sm:$0xf] }
  0x16   : > { %v1606_v14 = vshrl.u32 %v2738_v7, 16  ;;  %v2788_v15 = vcombine.low %v2740_v8, %v2741_v13  ;;  %v1617_v16 = vshrl.u32 %v2740_v8, 16  ;;  %v1620_v17 = vshll.u32 %v2740_v8, 16  ;;  %v2743_v18 = vld [vmem:[%s3471_s25 + $0x24] sm:$0xf] }
  0x17   : > { %3156 = vmatprep.mubr.msk.bf16.mxu0 %vm694_vm1, %v2787_v9  ;;  %v1595_v19 = vrot.slane %v1593_v10, 4  ;;  %v1598_v20 = vrot.slane %v1596_v11, 5  ;;  %v3488_v21 = vrot.slane %v1602_v12, 5  ;;  %v1626_v22 = vshll.u32 %v2741_v13, 16  ;;  %v2744_v23 = vld [vmem:[%s3471_s25 + $0x28] sm:$0xf] }
  0x18   : > { %v1608_v24 = vrot.slane %v1606_v14, 4  ;;  %3157 = vmatmul.mubr.msk.bf16.vlgmr.msra.gmra.mrb[0].mxu0 %vm694_vm1, %v2788_v15  ;;  %v1619_v25 = vrot.slane %v1617_v16, 4  ;;  %v1622_v26 = vrot.slane %v1620_v17, 5  ;;  %v1630_v27 = vshrl.u32 %v2741_v13, 16  ;;  %v201_v36 = vld [vmem:[%s3471_s25] sm:$0xf] }
  0x19   : > { %v1599_v28 = vor.u32 %v1598_v20, %v1595_v19  ;;  %v3492_v29 = vrot.slane %v1626_v22, 5  ;;  %v2789_v30 = vcombine.low %v2743_v18, %v2744_v23  ;;  %v1641_v31 = vshrl.u32 %v2743_v18, 16  ;;  %v202_v37 = vld [vmem:[%s3471_s25 + $0x4] sm:$0xf]  ;;  %v203_v39 = vld [vmem:[%s3471_s25 + $0x8] sm:$0x1] }
  0x1a   : > { %v1609_v32 = vor.u32 %v1608_v24, %v3488_v21  ;;  %v1623_v33 = vor.u32 %v1622_v26, %v1619_v25  ;;  %v1632_v34 = vrot.slane %v1630_v27, 4  ;;  %v1644_v35 = vshll.u32 %v2743_v18, 16  ;;  %v2746_v40 = vld [vmem:[%s3471_s25 + $0x30] sm:$0xf]  ;;  %v2747_v45 = vld [vmem:[%s3471_s25 + $0x34] sm:$0xf] }
  0x1b   : > { %v3497_v38 = vrot.slane %v1599_v28, 4  ;;  %3160 = vmatprep.mubr.msk.bf16.mxu0 %vm694_vm1, %v2789_v30  ;;  %v3504_v42 = vrot.slane %v1641_v31, 4  ;;  %v1650_v43 = vshll.u32 %v2744_v23, 16  ;;  %v1654_v44 = vshrl.u32 %v2744_v23, 16  ;;  %v204_v59 = vld [vmem:[%s3471_s25 + $0xc] sm:$0xf] }
  0x1c   : > { %v3502_v41 = vrot.slane %v1623_v33, 4  ;;  %v3507_v46 = vrot.slane %v1609_v32, 4  ;;  %v1633_v48 = vor.u32 %v1632_v34, %v3492_v29  ;;  %v258_v49 = vshrl.u32 %v201_v36, 16  ;;  %v205_v6 = vld [vmem:[%s3471_s25 + $0x10] sm:$0xf] }
  0x1d   : > { %v261_v50 = vshll.u32 %v201_v36, 16  ;;  %v3520_v52 = vrot.slane %v1644_v35, 5  ;;  %v267_v53 = vshll.u32 %v202_v37, 16  ;;  %v271_v54 = vshrl.u32 %v202_v37, 16  ;;  %v206_v10 = vld [vmem:[%s3471_s25 + $0x14] sm:$0x1] }
  0x1e   : > { %v260_v55 = vrot.slane %v258_v49, 4  ;;  %v277_v57 = vshll.u32 %v203_v39, 16  ;;  %v2790_v58 = vcombine.low %v2746_v40, %v2747_v45  ;;  %v3523_v60 = vrot.slane %v1650_v43, 5  ;;  %v2749_v16 = vld [vmem:[%s3471_s25 + $0x3c] sm:$0xf] }
  0x1f   : > { %v263_v56 = vrot.slane %v261_v50, 5  ;;  %v269_v61 = vrot.slane %v267_v53, 5  ;;  %v273_v62 = vrot.slane %v271_v54, 4  ;;  %v1665_v63 = vshrl.u32 %v2746_v40, 16  ;;  %v2750_v22 = vld [vmem:[%s3471_s25 + $0x40] sm:$0xf] }
  0x20   : > { %v3525_v0 = vrot.slane %v1633_v48, 4  ;;  %v3527_v1 = vrot.slane %v1654_v44, 4  ;;  %3161 = vmatmul.mubr.msk.bf16.gmra.mrb[4].mxu0 %vm694_vm1, %v2790_v58  ;;  %v1668_v3 = vshll.u32 %v2746_v40, 16  ;;  %v279_v8 = vrot.slane %v277_v57, 5  ;;  %v207_v32 = vld [vmem:[%s3471_s25 + $0x18] sm:$0xf] }
  0x21   : > { %v264_v2 = vor.u32 %v263_v56, %v260_v55  ;;  %v274_v7 = vor.u32 %v273_v62, %v269_v61  ;;  %v1674_v9 = vshll.u32 %v2747_v45, 16  ;;  %v282_v11 = vshrl.u32 %v204_v59, 16  ;;  %v3548_v37 = vld [vmem:[%s3471_s25 + $0x1c] sm:$0xf]  ;;  %v2752_v53 = vld [vmem:[%s3471_s25 + $0x48] sm:$0xf] }
  0x22   : > { %v3532_v13 = vrot.slane %v1665_v63, 4  ;;  %v1678_v14 = vshrl.u32 %v2747_v45, 16  ;;  %v285_v15 = vshll.u32 %v204_v59, 16  ;;  %v291_v19 = vshll.u32 %v205_v6, 16  ;;  %v209_v45 = vld [vmem:[%s3471_s25 + $0x20] sm:$0x1] }
  0x23   : > { %v265_v12 = vrot.slane %v264_v2, 4  ;;  %v275_v17 = vrot.slane %v274_v7, 4  ;;  %v284_v18 = vrot.slane %v282_v11, 4  ;;  %v295_v20 = vshrl.u32 %v205_v6, 16  ;;  %v2753_v58 = vld [vmem:[%s3471_s25 + $0x4c] sm:$0xf] }
  0x24   : > { %v3538_v24 = vrot.slane %v1668_v3, 5  ;;  %v287_v25 = vrot.slane %v285_v15, 5  ;;  %v301_v26 = vshll.u32 %v206_v10, 16  ;;  %v293_v28 = vrot.slane %v291_v19, 5  ;;  %v3568_v11 = vld [vmem:[%s3471_s25 + $0x24] sm:$0xf] }
  0x25   : > { %v270_v23 = vsel %vm3511_vm4, %v265_v12, %v269_v61  ;;  %v280_v27 = vsel %vm3511_vm4, %v275_v17, %v279_v8  ;;  %v297_v30 = vrot.slane %v295_v20, 4  ;;  %v2078_v31 = vsel %vm743_vm0, %v3476_v5, 0  ;;  %4246 = vst [vmem:[#allocation2_spill] sm:$0xff] %v3568_v11  ;;  %v3571_v12 = vld [vmem:[%s3471_s25 + $0x28] sm:$0xf] }
  0x26   : > { %v2671_v33 = vcombine.low %v270_v23, %v280_v27  ;;  %v3545_v34 = vrot.slane %v1674_v9, 5  ;;  %v288_v35 = vor.u32 %v287_v25, %v284_v18  ;;  %3189 = vmatpush3.bf16.msra.mxu0 %v2078_v31  ;;  %v2791_v36 = vcombine.low %v2749_v16, %v2750_v22  ;;  %v212_v18 = vld [vmem:[%s3471_s25 + $0x2c] sm:$0x1]  ;;  %v2755_v25 = vld [vmem:[%s3471_s25 + $0x54] sm:$0xf] }
  0x27   : > { %v3550_v39 = vrot.slane %v1678_v14, 4  ;;  %v298_v40 = vor.u32 %v297_v30, %v293_v28  ;;  %v303_v43 = vrot.slane %v301_v26, 5  ;;  %v1689_v44 = vshrl.u32 %v2749_v16, 16  ;;  %v2756_v31 = vld [vmem:[%s3471_s25 + $0x58] sm:$0xf] }
  0x28   : > { %3088 = vmatprep.mubr.msk.bf16.mxu1 %vm694_vm1, %v2671_v33  ;;  %v289_v5 = vrot.slane %v288_v35, 4  ;;  %v1042_v48 = vsel %vm743_vm0, %v3466_v4, 0  ;;  %3164 = vmatprep.mubr.msk.bf16.mxu0 %vm694_vm1, %v2791_v36  ;;  %v306_v49 = vshrl.u32 %v207_v32, 16  ;;  %v309_v50 = vshll.u32 %v207_v32, 16 }
  0x29   : > { %v299_v54 = vrot.slane %v298_v40, 4  ;;  %v1692_v55 = vshll.u32 %v2749_v16, 16  ;;  %v1698_v56 = vshll.u32 %v2750_v22, 16  ;;  %v1702_v57 = vshrl.u32 %v2750_v22, 16 }
  0x2a   : > { %v294_v59 = vsel %vm3511_vm4, %v289_v5, %v293_v28  ;;  %v3561_v61 = vrot.slane %v1689_v44, 4  ;;  %v308_v62 = vrot.slane %v306_v49, 4  ;;  %v311_v4 = vrot.slane %v309_v50, 5 }
  0x2b   : > { %v304_v63 = vsel %vm3511_vm4, %v299_v54, %v303_v43  ;;  %v315_v2 = vshll.u32 %v3548_v37, 16  ;;  %v319_v3 = vshrl.u32 %v3548_v37, 16  ;;  %v325_v6 = vshll.u32 %v209_v45, 16 }
  0x2c   : > { %v2672_v7 = vcombine.low %v294_v59, %v304_v63  ;;  %v312_v8 = vor.u32 %v311_v4, %v308_v62  ;;  %v2792_v9 = vcombine.low %v2752_v53, %v2753_v58  ;;  %v1713_v10 = vshrl.u32 %v2752_v53, 16 }
  0x2d   : > { %v3573_v14 = vrot.slane %v1692_v55, 5  ;;  %v3575_v15 = vrot.slane %v1698_v56, 5  ;;  %v317_v16 = vrot.slane %v315_v2, 5  ;;  %v321_v17 = vrot.slane %v319_v3, 4  ;;  %v215_v2 = vld [vmem:[%s3471_s25 + $0x38] sm:$0x1] }
  0x2e   : > { %3089 = vmatmul.mubr.msk.bf16.vlgmr.msra.gmra.mrb[0].mxu1 %vm694_vm1, %v2672_v7  ;;  %v3579_v19 = vrot.slane %v1702_v57, 4  ;;  %v313_v20 = vrot.slane %v312_v8, 4  ;;  %v327_v22 = vrot.slane %v325_v6, 5  ;;  %3165 = vmatmul.mubr.msk.bf16.gmra.mrb[8].mxu0 %vm694_vm1, %v2792_v9  ;;  %v1716_v23 = vshll.u32 %v2752_v53, 16  ;;  %v3597_v57 = vld [vmem:[%s3471_s25 + $0x30] sm:$0xf] }
  0x2f   : > { %3121 = vmatpush3.bf16.msra.mxu1 %v1042_v48  ;;  %v322_v26 = vor.u32 %v321_v17, %v317_v16  ;;  %v3583_v27 = vrot.slane %v1713_v10, 4  ;;  %v330_v28 = vshrl.u32 %v3568_v11, 16  ;;  %v333_v30 = vshll.u32 %v3568_v11, 16  ;;  %4247 = vst [vmem:[#allocation3_spill] sm:$0xff] %v3597_v57  ;;  %v2758_v9 = vld [vmem:[%s3471_s25 + $0x60] sm:$0xf] }
  0x30   : > { %v318_v32 = vsel %vm3511_vm4, %v313_v20, %v317_v16  ;;  %v1722_v33 = vshll.u32 %v2753_v58, 16  ;;  %v1726_v35 = vshrl.u32 %v2753_v58, 16  ;;  %v339_v36 = vshll.u32 %v3571_v12, 16  ;;  %v3600_v58 = vld [vmem:[%s3471_s25 + $0x34] sm:$0xf] }
  0x31   : > { %v323_v40 = vrot.slane %v322_v26, 4  ;;  %v332_v43 = vrot.slane %v330_v28, 4  ;;  %v335_v44 = vrot.slane %v333_v30, 5  ;;  %v343_v45 = vshrl.u32 %v3571_v12, 16  ;;  %4248 = vst [vmem:[#allocation4_spill] sm:$0xff] %v3600_v58 }
  0x32   : > { %v341_v5 = vrot.slane %v339_v36, 5  ;;  %v349_v48 = vshll.u32 %v212_v18, 16  ;;  %v2793_v49 = vcombine.low %v2755_v25, %v2756_v31  ;;  %v1737_v50 = vshrl.u32 %v2755_v25, 16  ;;  %v2759_v20 = vld [vmem:[%s3471_s25 + $0x64] sm:$0xf] }
  0x33   : > { %v328_v53 = vsel %vm3511_vm4, %v323_v40, %v327_v22  ;;  %v3594_v54 = vrot.slane %v1716_v23, 5  ;;  %v336_v55 = vor.u32 %v335_v44, %v332_v43  ;;  %v345_v56 = vrot.slane %v343_v45, 4  ;;  %v3622_v44 = vld [vmem:[%s3471_s25 + $0x3c] sm:$0xf]  ;;  %v3705_v11 = vld [vmem:[%s3471_s25 + $0x60] sm:$0xf] }
  0x34   : > { %v2673_v59 = vcombine.low %v318_v32, %v328_v53  ;;  %v3602_v62 = vrot.slane %v1722_v33, 5  ;;  %v3604_v4 = vrot.slane %v1726_v35, 4  ;;  %3168 = vmatprep.mubr.msk.bf16.mxu0 %vm694_vm1, %v2793_v49  ;;  %v1740_v63 = vshll.u32 %v2755_v25, 16  ;;  %4249 = vst [vmem:[#allocation5_spill] sm:$0xff] %v3622_v44  ;;  %v3629_v49 = vld [vmem:[%s3471_s25 + $0x40] sm:$0xf] }
  0x35   : > { %v337_v3 = vrot.slane %v336_v55, 4  ;;  %v346_v6 = vor.u32 %v345_v56, %v341_v5  ;;  %v351_v7 = vrot.slane %v349_v48, 5  ;;  %v3608_v8 = vrot.slane %v1737_v50, 4  ;;  %4250 = vst [vmem:[#allocation6_spill] sm:$0xff] %v3629_v49  ;;  %v218_v50 = vld [vmem:[%s3471_s25 + $0x44] sm:$0x1] }
  0x36   : > { %3092 = vmatprep.mubr.msk.bf16.mxu1 %vm694_vm1, %v2673_v59  ;;  %v1746_v10 = vshll.u32 %v2756_v31, 16  ;;  %v354_v16 = vshrl.u32 %v3597_v57, 16  ;;  %v357_v17 = vshll.u32 %v3597_v57, 16  ;;  %v363_v18 = vshll.u32 %v3600_v58, 16  ;;  %4257 = vst [vmem:[#allocation13_spill] sm:$0xff] %v3705_v11 }
  0x37   : > { %v342_v22 = vsel %vm3511_vm4, %v337_v3, %v341_v5  ;;  %v347_v23 = vrot.slane %v346_v6, 4  ;;  %v1750_v25 = vshrl.u32 %v2756_v31, 16  ;;  %v367_v26 = vshrl.u32 %v3600_v58, 16 }
  0x38   : > { %v356_v28 = vrot.slane %v354_v16, 4  ;;  %v359_v30 = vrot.slane %v357_v17, 5  ;;  %v365_v32 = vrot.slane %v363_v18, 5  ;;  %v373_v33 = vshll.u32 %v215_v2, 16  ;;  %v2761_v2 = vld [vmem:[%s3471_s25 + $0x6c] sm:$0xf] }
  0x39   : > { %v352_v35 = vsel %vm3511_vm4, %v347_v23, %v351_v7  ;;  %v369_v36 = vrot.slane %v367_v26, 4  ;;  %v2794_v40 = vcombine.low %v2758_v9, %v2759_v20  ;;  %v1761_v43 = vshrl.u32 %v2758_v9, 16 }
  0x3a   : > { %v2674_v45 = vcombine.low %v342_v22, %v352_v35  ;;  %v3624_v5 = vrot.slane %v1740_v63, 5  ;;  %v3626_v31 = vrot.slane %v1746_v10, 5  ;;  %v360_v48 = vor.u32 %v359_v30, %v356_v28  ;;  %v2762_v10 = vld [vmem:[%s3471_s25 + $0x70] sm:$0xf] }
  0x3b   : > { %v3632_v53 = vrot.slane %v1750_v25, 4  ;;  %v370_v55 = vor.u32 %v369_v36, %v365_v32  ;;  %v375_v56 = vrot.slane %v373_v33, 5  ;;  %3169 = vmatmul.mubr.msk.bf16.gmra.mrb[12].mxu0 %vm694_vm1, %v2794_v40  ;;  %v1764_v59 = vshll.u32 %v2758_v9, 16  ;;  %v3649_v36 = vld [vmem:[%s3471_s25 + $0x48] sm:$0xf] }
  0x3c   : > { %3093 = vmatmul.mubr.msk.bf16.gmra.mrb[4].mxu1 %vm694_vm1, %v2674_v45  ;;  %v361_v3 = vrot.slane %v360_v48, 4  ;;  %v3637_v63 = vrot.slane %v1761_v43, 4  ;;  %v378_v6 = vshrl.u32 %v3622_v44, 16  ;;  %v381_v7 = vshll.u32 %v3622_v44, 16  ;;  %4251 = vst [vmem:[#allocation7_spill] sm:$0xff] %v3649_v36 }
  0x3d   : > { %v371_v16 = vrot.slane %v370_v55, 4  ;;  %v1770_v17 = vshll.u32 %v2759_v20, 16  ;;  %v1774_v18 = vshrl.u32 %v2759_v20, 16  ;;  %v387_v22 = vshll.u32 %v3629_v49, 16  ;;  %v3652_v48 = vld [vmem:[%s3471_s25 + $0x4c] sm:$0xf] }
  0x3e   : > { %v366_v9 = vsel %vm3511_vm4, %v361_v3, %v365_v32  ;;  %v380_v23 = vrot.slane %v378_v6, 4  ;;  %v383_v25 = vrot.slane %v381_v7, 5  ;;  %v391_v26 = vshrl.u32 %v3629_v49, 16  ;;  %4252 = vst [vmem:[#allocation8_spill] sm:$0xff] %v3652_v48  ;;  %v221_v32 = vld [vmem:[%s3471_s25 + $0x50] sm:$0x1] }
  0x3f   : > { %v376_v28 = vsel %vm3511_vm4, %v371_v16, %v375_v56  ;;  %v389_v30 = vrot.slane %v387_v22, 5  ;;  %v397_v33 = vshll.u32 %v218_v50, 16  ;;  %v2795_v35 = vcombine.low %v2761_v2, %v2762_v10  ;;  %v2764_v50 = vld [vmem:[%s3471_s25 + $0x78] sm:$0xf] }
  0x40   : > { %v2675_v20 = vcombine.low %v366_v9, %v376_v28  ;;  %v384_v40 = vor.u32 %v383_v25, %v380_v23  ;;  %v393_v43 = vrot.slane %v391_v26, 4  ;;  %v1785_v45 = vshrl.u32 %v2761_v2, 16  ;;  %v2765_v23 = vld [vmem:[%s3471_s25 + $0x7c] sm:$0xf] }
  0x41   : > { %v3655_v55 = vrot.slane %v1764_v59, 5  ;;  %v3657_v3 = vrot.slane %v1770_v17, 5  ;;  %v3659_v6 = vrot.slane %v1774_v18, 4  ;;  %v399_v56 = vrot.slane %v397_v33, 5  ;;  %3172 = vmatprep.mubr.msk.bf16.mxu0 %vm694_vm1, %v2795_v35 }
  0x42   : > { %3096 = vmatprep.mubr.msk.bf16.mxu1 %vm694_vm1, %v2675_v20  ;;  %v385_v7 = vrot.slane %v384_v40, 4  ;;  %v394_v16 = vor.u32 %v393_v43, %v389_v30  ;;  %v1788_v22 = vshll.u32 %v2761_v2, 16  ;;  %v402_v9 = vshrl.u32 %v3649_v36, 16 }
  0x43   : > { %v3666_v25 = vrot.slane %v1785_v45, 4  ;;  %v1794_v59 = vshll.u32 %v2762_v10, 16  ;;  %v1798_v17 = vshrl.u32 %v2762_v10, 16  ;;  %v405_v18 = vshll.u32 %v3649_v36, 16 }
  0x44   : > { %v390_v26 = vsel %vm3511_vm4, %v385_v7, %v389_v30  ;;  %v395_v28 = vrot.slane %v394_v16, 4  ;;  %v404_v33 = vrot.slane %v402_v9, 4  ;;  %v411_v35 = vshll.u32 %v3652_v48, 16  ;;  %v3678_v30 = vld [vmem:[%s3471_s25 + $0x54] sm:$0xf] }
  0x45   : > { %v407_v2 = vrot.slane %v405_v18, 5  ;;  %v415_v20 = vshrl.u32 %v3652_v48, 16  ;;  %v421_v40 = vshll.u32 %v221_v32, 16  ;;  %v2796_v43 = vcombine.low %v2764_v50, %v2765_v23  ;;  %4253 = vst [vmem:[#allocation9_spill] sm:$0xff] %v3678_v30  ;;  %v3684_v32 = vld [vmem:[%s3471_s25 + $0x58] sm:$0xf] }
  0x46   : > { %v400_v45 = vsel %vm3511_vm4, %v395_v28, %v399_v56  ;;  %v3675_v10 = vrot.slane %v1788_v22, 5  ;;  %v413_v51 = vrot.slane %v411_v35, 5  ;;  %v1809_v36 = vshrl.u32 %v2764_v50, 16  ;;  %4254 = vst [vmem:[#allocation10_spill] sm:$0xff] %v3684_v32  ;;  %v224_v48 = vld [vmem:[%s3471_s25 + $0x5c] sm:$0x1] }
  0x47   : > { %v2676_v7 = vcombine.low %v390_v26, %v400_v45  ;;  %v3680_v16 = vrot.slane %v1794_v59, 5  ;;  %v408_v9 = vor.u32 %v407_v2, %v404_v33  ;;  %v417_v18 = vrot.slane %v415_v20, 4  ;;  %3173 = vmatmul.mubr.msk.bf16.gmra.mrb[16].mxu0 %vm694_vm1, %v2796_v43  ;;  %v2767_v35 = vld [vmem:[%s3471_s25 + $0x84] sm:$0xf]  ;;  %v2768_v2 = vld [vmem:[%s3471_s25 + $0x88] sm:$0xf] }
  0x48   : > { %v3687_v44 = vrot.slane %v1798_v17, 4  ;;  %v423_v56 = vrot.slane %v421_v40, 5  ;;  %v3689_v22 = vrot.slane %v1809_v36, 4  ;;  %v1812_v28 = vshll.u32 %v2764_v50, 16 }
  0x49   : > { %3097 = vmatmul.mubr.msk.bf16.gmra.mrb[8].mxu1 %vm694_vm1, %v2676_v7  ;;  %v409_v26 = vrot.slane %v408_v9, 4  ;;  %v418_v59 = vor.u32 %v417_v18, %v413_v51  ;;  %v426_v45 = vshrl.u32 %v3678_v30, 16  ;;  %v429_v33 = vshll.u32 %v3678_v30, 16 }
  0x4a   : > { %4255 = vst [vmem:[#allocation11_spill] sm:$0xff] %v3689_v22  ;;  %v1818_v20 = vshll.u32 %v2765_v23, 16  ;;  %v1822_v43 = vshrl.u32 %v2765_v23, 16  ;;  %v435_v17 = vshll.u32 %v3684_v32, 16  ;;  %v439_v40 = vshrl.u32 %v3684_v32, 16 }
  0x4b   : > { %v414_v36 = vsel %vm3511_vm4, %v409_v26, %v413_v51  ;;  %v419_v50 = vrot.slane %v418_v59, 4  ;;  %v428_v49 = vrot.slane %v426_v45, 4  ;;  %v431_v7 = vrot.slane %v429_v33, 5  ;;  %v227_v33 = vld [vmem:[%s3471_s25 + $0x68] sm:$0x1] }
  0x4c   : > { %v437_v9 = vrot.slane %v435_v17, 5  ;;  %v441_v18 = vrot.slane %v439_v40, 4  ;;  %v445_v57 = vshll.u32 %v224_v48, 16  ;;  %v2797_v30 = vcombine.low %v2767_v35, %v2768_v2  ;;  %v3711_v48 = vld [vmem:[%s3471_s25 + $0x64] sm:$0xf] }
  0x4d   : > { %v424_v58 = vsel %vm3511_vm4, %v419_v50, %v423_v56  ;;  %v3702_v23 = vrot.slane %v1812_v28, 5  ;;  %v432_v22 = vor.u32 %v431_v7, %v428_v49  ;;  %v1833_v32 = vshrl.u32 %v2767_v35, 16  ;;  %4259 = vst [vmem:[#allocation15_spill] sm:$0xff] %v3711_v48  ;;  %v2770_v49 = vld [vmem:[%s3471_s25 + $0x90] sm:$0xf] }
  0x4e   : > { %v2677_v51 = vcombine.low %v414_v36, %v424_v58  ;;  %v3707_v26 = vrot.slane %v1818_v20, 5  ;;  %v442_v59 = vor.u32 %v441_v18, %v437_v9  ;;  %v447_v45 = vrot.slane %v445_v57, 5  ;;  %3176 = vmatprep.mubr.msk.bf16.mxu0 %vm694_vm1, %v2797_v30  ;;  %v2771_v30 = vld [vmem:[%s3471_s25 + $0x94] sm:$0xf] }
  0x4f   : > { %4256 = vst [vmem:[#allocation12_spill] sm:$0xff] %v3702_v23  ;;  %v3714_v17 = vrot.slane %v1822_v43, 4  ;;  %v433_v56 = vrot.slane %v432_v22, 4  ;;  %v1836_v28 = vshll.u32 %v2767_v35, 16  ;;  %v1842_v40 = vshll.u32 %v2768_v2, 16 }
  0x50   : > { %4258 = vst [vmem:[#allocation14_spill] sm:$0xff] %v3707_v26  ;;  %3100 = vmatprep.mubr.msk.bf16.mxu1 %vm694_vm1, %v2677_v51  ;;  %v443_v58 = vrot.slane %v442_v59, 4  ;;  %v3718_v20 = vrot.slane %v1833_v32, 4  ;;  %v450_v36 = vshrl.u32 %v3705_v11, 16  ;;  %v453_v57 = vshll.u32 %v3705_v11, 16 }
  0x51   : > { %4260 = vst [vmem:[#allocation16_spill] sm:$0xff] %v3714_v17  ;;  %v438_v43 = vsel %vm3511_vm4, %v433_v56, %v437_v9  ;;  %v1846_v50 = vshrl.u32 %v2768_v2, 16  ;;  %v459_v22 = vshll.u32 %v3711_v48, 16  ;;  %v463_v35 = vshrl.u32 %v3711_v48, 16  ;;  %v3730_v59 = vld [vmem:[%s3471_s25 + $0x6c] sm:$0xf] }
  0x52   : > { %4261 = vst [vmem:[#allocation17_spill] sm:$0xff] %v3718_v20  ;;  %v448_v7 = vsel %vm3511_vm4, %v443_v58, %v447_v45  ;;  %v452_v32 = vrot.slane %v450_v36, 4  ;;  %v455_v18 = vrot.slane %v453_v57, 5  ;;  %v469_v51 = vshll.u32 %v227_v33, 16  ;;  %4262 = vst [vmem:[#allocation18_spill] sm:$0xff] %v3730_v59 }
  0x53   : > { %v2678_v20 = vcombine.low %v438_v43, %v448_v7  ;;  %v461_v11 = vrot.slane %v459_v22, 5  ;;  %v465_v17 = vrot.slane %v463_v35, 4  ;;  %v2798_v26 = vcombine.low %v2770_v49, %v2771_v30  ;;  %v3733_v9 = vld [vmem:[%s3471_s25 + $0x70] sm:$0xf]  ;;  %v230_v45 = vld [vmem:[%s3471_s25 + $0x74] sm:$0x1] }
  0x54   : > { %4263 = vst [vmem:[#allocation19_spill] sm:$0xff] %v3733_v9  ;;  %v3735_v2 = vrot.slane %v1836_v28, 5  ;;  %v3737_v56 = vrot.slane %v1842_v40, 5  ;;  %v456_v48 = vor.u32 %v455_v18, %v452_v32  ;;  %v1857_v23 = vshrl.u32 %v2770_v49, 16  ;;  %v2773_v43 = vld [vmem:[%s3471_s25 + $0x9c] sm:$0xf] }
  0x55   : > { %3101 = vmatmul.mubr.msk.bf16.gmra.mrb[12].mxu1 %vm694_vm1, %v2678_v20  ;;  %v3741_v33 = vrot.slane %v1846_v50, 4  ;;  %v466_v58 = vor.u32 %v465_v17, %v461_v11  ;;  %v471_v36 = vrot.slane %v469_v51, 5  ;;  %3177 = vmatmul.mubr.msk.bf16.gmra.mrb[20].mxu0 %vm694_vm1, %v2798_v26  ;;  %v474_v57 = vshrl.u32 %v3730_v59, 16  ;;  %v2774_v7 = vld [vmem:[%s3471_s25 + $0xa0] sm:$0xf] }
  0x56   : > { %4264 = vst [vmem:[#allocation20_spill] sm:$0xff] %v3735_v2  ;;  %4265 = vst [vmem:[#allocation21_spill] sm:$0xff] %v3737_v56  ;;  %v457_v22 = vrot.slane %v456_v48, 4  ;;  %v1860_v28 = vshll.u32 %v2770_v49, 16  ;;  %v1866_v35 = vshll.u32 %v2771_v30, 16  ;;  %v477_v40 = vshll.u32 %v3730_v59, 16 }
  0x57   : > { %4266 = vst [vmem:[#allocation22_spill] sm:$0xff] %v3741_v33  ;;  %v467_v32 = vrot.slane %v466_v58, 4  ;;  %v3748_v18 = vrot.slane %v1857_v23, 4  ;;  %v1870_v20 = vshrl.u32 %v2771_v30, 16  ;;  %v476_v50 = vrot.slane %v474_v57, 4 }
  0x58   : > { %v462_v17 = vsel %vm3511_vm4, %v457_v22, %v461_v11  ;;  %v479_v26 = vrot.slane %v477_v40, 5  ;;  %v483_v51 = vshll.u32 %v3733_v9, 16  ;;  %v487_v48 = vshrl.u32 %v3733_v9, 16  ;;  %v3757_v23 = vld [vmem:[%s3471_s25 + $0x78] sm:$0xf] }
  0x59   : > { %4267 = vst [vmem:[#allocation23_spill] sm:$0xff] %v3748_v18  ;;  %v472_v49 = vsel %vm3511_vm4, %v467_v32, %v471_v36  ;;  %v493_v59 = vshll.u32 %v230_v45, 16  ;;  %v2799_v33 = vcombine.low %v2773_v43, %v2774_v7  ;;  %v1881_v58 = vshrl.u32 %v2773_v43, 16  ;;  %4268 = vst [vmem:[#allocation24_spill] sm:$0xff] %v3757_v23  ;;  %v3760_v11 = vld [vmem:[%s3471_s25 + $0x7c] sm:$0xf] }
  0x5a   : > { %v2679_v18 = vcombine.low %v462_v17, %v472_v49  ;;  %v480_v30 = vor.u32 %v479_v26, %v476_v50  ;;  %v485_v57 = vrot.slane %v483_v51, 5  ;;  %v489_v56 = vrot.slane %v487_v48, 4  ;;  %4269 = vst [vmem:[#allocation25_spill] sm:$0xff] %v3760_v11  ;;  %v233_v45 = vld [vmem:[%s3471_s25 + $0x80] sm:$0x1] }
  0x5b   : > { %v3762_v22 = vrot.slane %v1860_v28, 5  ;;  %v3764_v40 = vrot.slane %v1866_v35, 5  ;;  %v3766_v9 = vrot.slane %v1870_v20, 4  ;;  %v495_v36 = vrot.slane %v493_v59, 5  ;;  %3180 = vmatprep.mubr.msk.bf16.mxu0 %vm694_vm1, %v2799_v33  ;;  %v2776_v51 = vld [vmem:[%s3471_s25 + $0xa8] sm:$0xf] }
  0x5c   : > { %3104 = vmatprep.mubr.msk.bf16.mxu1 %vm694_vm1, %v2679_v18  ;;  %v481_v32 = vrot.slane %v480_v30, 4  ;;  %v490_v17 = vor.u32 %v489_v56, %v485_v57  ;;  %v1884_v50 = vshll.u32 %v2773_v43, 16  ;;  %v498_v26 = vshrl.u32 %v3757_v23, 16  ;;  %v2777_v59 = vld [vmem:[%s3471_s25 + $0xac] sm:$0xf] }
  0x5d   : > { %4270 = vst [vmem:[#allocation26_spill] sm:$0xff] %v3762_v22  ;;  %4271 = vst [vmem:[#allocation27_spill] sm:$0xff] %v3764_v40  ;;  %v3773_v48 = vrot.slane %v1881_v58, 4  ;;  %v1890_v28 = vshll.u32 %v2774_v7, 16  ;;  %v501_v35 = vshll.u32 %v3757_v23, 16  ;;  %v507_v20 = vshll.u32 %v3760_v11, 16 }
  0x5e   : > { %4272 = vst [vmem:[#allocation28_spill] sm:$0xff] %v3766_v9  ;;  %v486_v33 = vsel %vm3511_vm4, %v481_v32, %v485_v57  ;;  %v491_v49 = vrot.slane %v490_v17, 4  ;;  %v1894_v18 = vshrl.u32 %v2774_v7, 16  ;;  %v500_v56 = vrot.slane %v498_v26, 4  ;;  %v3786_v2 = vld [vmem:[%s3471_s25 + $0x84] sm:$0xf] }
  0x5f   : > { %4273 = vst [vmem:[#allocation29_spill] sm:$0xff] %v3773_v48  ;;  %v503_v43 = vrot.slane %v501_v35, 5  ;;  %v509_v30 = vrot.slane %v507_v20, 5  ;;  %v511_v58 = vshrl.u32 %v3760_v11, 16  ;;  %v517_v48 = vshll.u32 %v233_v45, 16  ;;  %4275 = vst [vmem:[#allocation31_spill] sm:$0xff] %v3786_v2 }
  0x60   : > { %v496_v9 = vsel %vm3511_vm4, %v491_v49, %v495_v36  ;;  %v3783_v23 = vrot.slane %v1884_v50, 5  ;;  %v2800_v40 = vcombine.low %v2776_v51, %v2777_v59  ;;  %v1905_v22 = vshrl.u32 %v2776_v51, 16  ;;  %v3791_v26 = vld [vmem:[%s3471_s25 + $0x88] sm:$0xf]  ;;  %v236_v35 = vld [vmem:[%s3471_s25 + $0x8c] sm:$0x1] }
  0x61   : > { %v2680_v57 = vcombine.low %v486_v33, %v496_v9  ;;  %v3788_v32 = vrot.slane %v1890_v28, 5  ;;  %v504_v7 = vor.u32 %v503_v43, %v500_v56  ;;  %v513_v17 = vrot.slane %v511_v58, 4  ;;  %4277 = vst [vmem:[#allocation33_spill] sm:$0xff] %v3791_v26  ;;  %v2779_v49 = vld [vmem:[%s3471_s25 + $0xb4] sm:$0xf] }
  0x62   : > { %4274 = vst [vmem:[#allocation30_spill] sm:$0xff] %v3783_v23  ;;  %v3794_v45 = vrot.slane %v1894_v18, 4  ;;  %v519_v20 = vrot.slane %v517_v48, 5  ;;  %3181 = vmatmul.mubr.msk.bf16.gmra.mrb[24].mxu0 %vm694_vm1, %v2800_v40  ;;  %v3797_v36 = vrot.slane %v1905_v22, 4  ;;  %v1908_v50 = vshll.u32 %v2776_v51, 16 }
  0x63   : > { %4276 = vst [vmem:[#allocation32_spill] sm:$0xff] %v3788_v32  ;;  %3105 = vmatmul.mubr.msk.bf16.gmra.mrb[16].mxu1 %vm694_vm1, %v2680_v57  ;;  %v505_v9 = vrot.slane %v504_v7, 4  ;;  %v514_v28 = vor.u32 %v513_v17, %v509_v30  ;;  %v522_v33 = vshrl.u32 %v3786_v2, 16  ;;  %v525_v56 = vshll.u32 %v3786_v2, 16  ;;  %v2780_v43 = vld [vmem:[%s3471_s25 + $0xb8] sm:$0xf] }
  0x64   : > { %4278 = vst [vmem:[#allocation34_spill] sm:$0xff] %v3794_v45  ;;  %4279 = vst [vmem:[#allocation35_spill] sm:$0xff] %v3797_v36  ;;  %v1914_v58 = vshll.u32 %v2777_v59, 16  ;;  %v1918_v18 = vshrl.u32 %v2777_v59, 16  ;;  %v531_v48 = vshll.u32 %v3791_v26, 16  ;;  %v535_v40 = vshrl.u32 %v3791_v26, 16 }
  0x65   : > { %v510_v22 = vsel %vm3511_vm4, %v505_v9, %v509_v30  ;;  %v515_v51 = vrot.slane %v514_v28, 4  ;;  %v524_v36 = vrot.slane %v522_v33, 4  ;;  %v527_v57 = vrot.slane %v525_v56, 5  ;;  %v3813_v23 = vld [vmem:[%s3471_s25 + $0x90] sm:$0xf] }
  0x66   : > { %v533_v7 = vrot.slane %v531_v48, 5  ;;  %v537_v17 = vrot.slane %v535_v40, 4  ;;  %v541_v11 = vshll.u32 %v236_v35, 16  ;;  %v2801_v2 = vcombine.low %v2779_v49, %v2780_v43  ;;  %4281 = vst [vmem:[#allocation37_spill] sm:$0xff] %v3813_v23  ;;  %v3819_v35 = vld [vmem:[%s3471_s25 + $0x94] sm:$0xf] }
  0x67   : > { %v520_v45 = vsel %vm3511_vm4, %v515_v51, %v519_v20  ;;  %v3810_v59 = vrot.slane %v1908_v50, 5  ;;  %v528_v32 = vor.u32 %v527_v57, %v524_v36  ;;  %v1929_v26 = vshrl.u32 %v2779_v49, 16  ;;  %4283 = vst [vmem:[#allocation39_spill] sm:$0xff] %v3819_v35  ;;  %v239_v56 = vld [vmem:[%s3471_s25 + $0x98] sm:$0x1] }
  0x68   : > { %v2681_v30 = vcombine.low %v510_v22, %v520_v45  ;;  %v3815_v9 = vrot.slane %v1914_v58, 5  ;;  %v538_v28 = vor.u32 %v537_v17, %v533_v7  ;;  %v543_v33 = vrot.slane %v541_v11, 5  ;;  %3184 = vmatprep.mubr.msk.bf16.mxu0 %vm694_vm1, %v2801_v2  ;;  %v3825_v36 = vld [vmem:[%s3471_s25 + $0xc0] sm:$0xf]  ;;  %v3833_v22 = vld [vmem:[%s3471_s25 + $0xc4] sm:$0xf] }
  0x69   : > { %4280 = vst [vmem:[#allocation36_spill] sm:$0xff] %v3810_v59  ;;  %v3822_v48 = vrot.slane %v1918_v18, 4  ;;  %v529_v20 = vrot.slane %v528_v32, 4  ;;  %v1932_v50 = vshll.u32 %v2779_v49, 16  ;;  %v1938_v40 = vshll.u32 %v2780_v43, 16 }
  0x6a   : > { %4282 = vst [vmem:[#allocation38_spill] sm:$0xff] %v3815_v9  ;;  %3108 = vmatprep.mubr.msk.bf16.mxu1 %vm694_vm1, %v2681_v30  ;;  %v539_v45 = vrot.slane %v538_v28, 4  ;;  %v3828_v58 = vrot.slane %v1929_v26, 4  ;;  %v546_v11 = vshrl.u32 %v3813_v23, 16  ;;  %v549_v2 = vshll.u32 %v3813_v23, 16 }
  0x6b   : > { %4284 = vst [vmem:[#allocation40_spill] sm:$0xff] %v3822_v48  ;;  %v534_v18 = vsel %vm3511_vm4, %v529_v20, %v533_v7  ;;  %v1942_v32 = vshrl.u32 %v2780_v43, 16  ;;  %v555_v49 = vshll.u32 %v3819_v35, 16  ;;  %v559_v51 = vshrl.u32 %v3819_v35, 16  ;;  %v3842_v28 = vld [vmem:[%s3471_s25 + $0x9c] sm:$0xf] }
  0x6c   : > { %4285 = vst [vmem:[#allocation41_spill] sm:$0xff] %v3828_v58  ;;  %v544_v57 = vsel %vm3511_vm4, %v539_v45, %v543_v33  ;;  %v548_v26 = vrot.slane %v546_v11, 4  ;;  %v551_v17 = vrot.slane %v549_v2, 5  ;;  %v565_v30 = vshll.u32 %v239_v56, 16  ;;  %4286 = vst [vmem:[#allocation42_spill] sm:$0xff] %v3842_v28 }
  0x6d   : > { %v2682_v23 = vcombine.low %v534_v18, %v544_v57  ;;  %v557_v58 = vrot.slane %v555_v49, 5  ;;  %v561_v48 = vrot.slane %v559_v51, 4  ;;  %v2802_v43 = vcombine.low %v3825_v36, %v3833_v22  ;;  %v3852_v45 = vld [vmem:[%s3471_s25 + $0xa0] sm:$0xf]  ;;  %v242_v18 = vld [vmem:[%s3471_s25 + $0xa4] sm:$0x1] }
  0x6e   : > { %v3846_v7 = vrot.slane %v1932_v50, 5  ;;  %v3848_v20 = vrot.slane %v1938_v40, 5  ;;  %v552_v35 = vor.u32 %v551_v17, %v548_v26  ;;  %v1953_v33 = vshrl.u32 %v3825_v36, 16  ;;  %4289 = vst [vmem:[#allocation45_spill] sm:$0xff] %v3852_v45  ;;  %v2739_v26 = vld [vmem:[%s3471_s25 + $0x14] sm:$0x1] }
  0x6f   : > { %3109 = vmatmul.mubr.msk.bf16.gmra.mrb[20].mxu1 %vm694_vm1, %v2682_v23  ;;  %v3855_v56 = vrot.slane %v1942_v32, 4  ;;  %v562_v11 = vor.u32 %v561_v48, %v557_v58  ;;  %v567_v2 = vrot.slane %v565_v30, 5  ;;  %3185 = vmatmul.mubr.msk.bf16.gmra.mrb[28].mxu0 %vm694_vm1, %v2802_v43  ;;  %v570_v50 = vshrl.u32 %v3842_v28, 16  ;;  %v3872_v51 = vld [vmem:[%s3471_s25 + $0xa8] sm:$0xf] }
  0x70   : > { %4287 = vst [vmem:[#allocation43_spill] sm:$0xff] %v3846_v7  ;;  %4288 = vst [vmem:[#allocation44_spill] sm:$0xff] %v3848_v20  ;;  %v553_v49 = vrot.slane %v552_v35, 4  ;;  %v573_v57 = vshll.u32 %v3842_v28, 16  ;;  %v3864_v32 = vrot.slane %v1953_v33, 4  ;;  %v579_v35 = vshll.u32 %v3852_v45, 16 }
  0x71   : > { %4290 = vst [vmem:[#allocation46_spill] sm:$0xff] %v3855_v56  ;;  %v563_v23 = vrot.slane %v562_v11, 4  ;;  %v572_v17 = vrot.slane %v570_v50, 4  ;;  %v583_v40 = vshrl.u32 %v3852_v45, 16  ;;  %4292 = vst [vmem:[#allocation48_spill] sm:$0xff] %v3872_v51  ;;  %v589_v33 = vshll.u32 %v242_v18, 16 }
  0x72   : > { %4291 = vst [vmem:[#allocation47_spill] sm:$0xff] %v3864_v32  ;;  %v558_v30 = vsel %vm3511_vm4, %v553_v49, %v557_v58  ;;  %v575_v43 = vrot.slane %v573_v57, 5  ;;  %v1605_v50 = vsel %vm3511_vm4, %v3497_v38, %v3488_v21  ;;  %v1612_v48 = vshll.u32 %v2739_v26, 16  ;;  %v3881_v28 = vld [vmem:[%s3471_s25 + $0xac] sm:$0xf] }
  0x73   : > { %v568_v11 = vsel %vm3511_vm4, %v563_v23, %v567_v2  ;;  %4293 = vst [vmem:[#allocation49_spill] sm:$0xff] %v3881_v28  ;;  %v581_v57 = vrot.slane %v579_v35, 5  ;;  %v585_v45 = vrot.slane %v583_v40, 4  ;;  %v245_v32 = vld [vmem:[%s3471_s25 + $0xb0] sm:$0x1]  ;;  %v591_v56 = vrot.slane %v589_v33, 5 }
  0x74   : > { %v2683_v58 = vcombine.low %v558_v30, %v568_v11  ;;  %v576_v49 = vor.u32 %v575_v43, %v572_v17  ;;  %v1614_v20 = vrot.slane %v1612_v48, 5  ;;  %v594_v2 = vshrl.u32 %v3872_v51, 16  ;;  %v2742_v23 = vld [vmem:[%s3471_s25 + $0x20] sm:$0x1]  ;;  %v3891_v17 = vld [vmem:[%s3471_s25 + $0xb4] sm:$0xf] }
  0x75   : > { %v597_v18 = vshll.u32 %v3872_v51, 16  ;;  %v586_v38 = vor.u32 %v585_v45, %v581_v57  ;;  %v603_v26 = vshll.u32 %v3881_v28, 16  ;;  %v607_v30 = vshrl.u32 %v3881_v28, 16  ;;  %v3897_v11 = vld [vmem:[%s3471_s25 + $0xb8] sm:$0xf] }
  0x76   : > { %3112 = vmatprep.mubr.msk.bf16.mxu1 %vm694_vm1, %v2683_v58  ;;  %v577_v21 = vrot.slane %v576_v49, 4  ;;  %v1615_v40 = vsel %vm3511_vm4, %v3507_v46, %v1614_v20  ;;  %v596_v48 = vrot.slane %v594_v2, 4  ;;  %v613_v35 = vshll.u32 %v245_v32, 16  ;;  %v248_v46 = vld [vmem:[%s3471_s25 + $0xbc] sm:$0x1] }
  0x77   : > { %v599_v43 = vrot.slane %v597_v18, 5  ;;  %v587_v45 = vrot.slane %v586_v38, 4  ;;  %v2822_v58 = vcombine.low %v1605_v50, %v1615_v40  ;;  %v605_v49 = vrot.slane %v603_v26, 5  ;;  %v2745_v40 = vld [vmem:[%s3471_s25 + $0x2c] sm:$0x1] }
  0x78   : > { %v582_v33 = vsel %vm3511_vm4, %v577_v21, %v581_v57  ;;  %v609_v28 = vrot.slane %v607_v30, 4  ;;  %v615_v7 = vrot.slane %v613_v35, 5  ;;  %v1636_v9 = vshll.u32 %v2742_v23, 16 }
  0x79   : > { %v600_v51 = vor.u32 %v599_v43, %v596_v48  ;;  %v592_v59 = vsel %vm3511_vm4, %v587_v45, %v591_v56  ;;  %3190 = vmatprep.mubr.msk.bf16.mxu0 %vm694_vm1, %v2822_v58  ;;  %v618_v20 = vshrl.u32 %v3891_v17, 16  ;;  %v621_v32 = vshll.u32 %v3891_v17, 16 }
  0x7a   : > { %v627_v57 = vshll.u32 %v3897_v11, 16  ;;  %v2684_v2 = vcombine.low %v582_v33, %v592_v59  ;;  %v610_v18 = vor.u32 %v609_v28, %v605_v49  ;;  %v1638_v21 = vrot.slane %v1636_v9, 5 }
  0x7b   : > { %v601_v50 = vrot.slane %v600_v51, 4  ;;  %v620_v38 = vrot.slane %v618_v20, 4  ;;  %v623_v26 = vrot.slane %v621_v32, 5  ;;  %v631_v23 = vshrl.u32 %v3897_v11, 16  ;;  %v2748_v32 = vld [vmem:[%s3471_s25 + $0x38] sm:$0x1] }
  0x7c   : > { %v629_v30 = vrot.slane %v627_v57, 5  ;;  %3113 = vmatmul.mubr.msk.bf16.gmra.mrb[24].mxu1 %vm694_vm1, %v2684_v2  ;;  %v611_v48 = vrot.slane %v610_v18, 4  ;;  %v1639_v59 = vsel %vm3511_vm4, %v3525_v0, %v1638_v21  ;;  %v637_v51 = vshll.u32 %v248_v46, 16 }
  0x7d   : > { %v606_v56 = vsel %vm3511_vm4, %v601_v50, %v605_v49  ;;  %v4294_v9 = vsel %vm3511_vm4, %v3502_v41, %v3492_v29  ;;  %v624_v43 = vor.u32 %v623_v26, %v620_v38  ;;  %v633_v35 = vrot.slane %v631_v23, 4  ;;  %v3383_v38 = vld [vmem:[%s3471_s25] sm:$0xf]  ;;  %v3384_v26 = vld [vmem:[%s3471_s25 + $0x4] sm:$0xf] }
  0x7e   : > { %v2823_v28 = vcombine.low %v4294_v9, %v1639_v59  ;;  %v1647_v33 = vor.u32 %v3520_v52, %v3504_v42  ;;  %v616_v45 = vsel %vm3511_vm4, %v611_v48, %v615_v7  ;;  %v639_v58 = vrot.slane %v637_v51, 5  ;;  %v2754_v59 = vld [vmem:[%s3471_s25 + $0x50] sm:$0x1] }
  0x7f   : > { %v1657_v49 = vor.u32 %v3527_v1, %v3523_v60  ;;  %v1660_v0 = vshll.u32 %v2745_v40, 16  ;;  %v2685_v46 = vcombine.low %v606_v56, %v616_v45  ;;  %v625_v29 = vrot.slane %v624_v43, 4  ;;  %v2751_v40 = vld [vmem:[%s3471_s25 + $0x44] sm:$0x1] }
  0x80   : > { %3191 = vmatmul.mubr.msk.bf16.vlgmr.msra.gmra.mrb[0].mxu0 %vm694_vm1, %v2823_v28  ;;  %v634_v41 = vor.u32 %v633_v35, %v629_v30  ;;  %v1648_v20 = vrot.slane %v1647_v33, 4  ;;  %v4295_v57 = vshll.u32 %v3825_v36, 16  ;;  %v1671_v1 = vor.u32 %v3538_v24, %v3532_v13 }
  0x81   : > { %v1658_v52 = vrot.slane %v1657_v49, 4  ;;  %v1662_v7 = vrot.slane %v1660_v0, 5  ;;  %3116 = vmatprep.mubr.msk.bf16.mxu1 %vm694_vm1, %v2685_v46  ;;  %v630_v2 = vsel %vm3511_vm4, %v625_v29, %v629_v30  ;;  %v1681_v36 = vor.u32 %v3550_v39, %v3545_v34  ;;  %v2757_v49 = vld [vmem:[%s3471_s25 + $0x5c] sm:$0x1]  ;;  %v3385_v29 = vld [vmem:[%s3471_s25 + $0xc] sm:$0xf] }
  0x82   : > { %v3931_v42 = vrot.slane %v4295_v57, 5  ;;  %v635_v50 = vrot.slane %v634_v41, 4  ;;  %v1653_v18 = vsel %vm3511_vm4, %v1648_v20, %v3523_v60  ;;  %v2704_v13 = vcombine.low %v3383_v38, %v3384_v26  ;;  %v3386_v41 = vld [vmem:[%s3471_s25 + $0x10] sm:$0xf] }
  0x83   : > { %v1663_v21 = vsel %vm3511_vm4, %v1658_v52, %v1662_v7  ;;  %v1672_v24 = vrot.slane %v1671_v1, 4  ;;  %v1684_v23 = vshll.u32 %v2748_v32, 16  ;;  %v1682_v48 = vrot.slane %v1681_v36, 4 }
  0x84   : > { %v640_v30 = vsel %vm3511_vm4, %v635_v50, %v639_v58  ;;  %v2824_v56 = vcombine.low %v1653_v18, %v1663_v21  ;;  %v1695_v60 = vor.u32 %v3573_v14, %v3561_v61  ;;  %v1705_v28 = vor.u32 %v3579_v19, %v3575_v15  ;;  %v3387_v18 = vld [vmem:[%s3471_s25 + $0x18] sm:$0xf] }
  0x85   : > { %v2686_v39 = vcombine.low %v630_v2, %v640_v30  ;;  %v1677_v51 = vsel %vm3511_vm4, %v1672_v24, %v3545_v34  ;;  %v1686_v9 = vrot.slane %v1684_v23, 5  ;;  %v4296_v43 = vshll.u32 %v3833_v22, 16  ;;  %v2760_v2 = vld [vmem:[%s3471_s25 + $0x68] sm:$0x1] }
  0x86   : > { %3194 = vmatprep.mubr.msk.bf16.mxu0 %vm694_vm1, %v2824_v56  ;;  %v1696_v61 = vrot.slane %v1695_v60, 4  ;;  %v1708_v14 = vshll.u32 %v2751_v40, 16  ;;  %v1719_v33 = vor.u32 %v3594_v54, %v3583_v27  ;;  %v1706_v45 = vrot.slane %v1705_v28, 4  ;;  %v4299_v28 = vld [vmem:[#allocation11_spill] sm:$0xff] }
  0x87   : > { %v3960_v35 = vrot.slane %v4296_v43, 5  ;;  %3117 = vmatmul.mubr.msk.bf16.gmra.mrb[28].mxu1 %vm694_vm1, %v2686_v39  ;;  %v1687_v34 = vsel %vm3511_vm4, %v1682_v48, %v1686_v9  ;;  %v1729_v19 = vor.u32 %v3604_v4, %v3602_v62  ;;  %v1732_v58 = vshll.u32 %v2754_v59, 16  ;;  %v2766_v59 = vld [vmem:[%s3471_s25 + $0x80] sm:$0x1]  ;;  %v4300_v43 = vld [vmem:[#allocation12_spill] sm:$0xff] }
  0x88   : > { %3122 = vmatprep.mubr.msk.bf16.mxu1 %vm694_vm1, %v2704_v13  ;;  %v2825_v0 = vcombine.low %v1677_v51, %v1687_v34  ;;  %v1701_v46 = vsel %vm3511_vm4, %v1696_v61, %v3575_v15  ;;  %v1710_v27 = vrot.slane %v1708_v14, 5  ;;  %v1720_v54 = vrot.slane %v1719_v33, 4  ;;  %v4301_v14 = vld [vmem:[#allocation14_spill] sm:$0xff]  ;;  %v4302_v33 = vld [vmem:[#allocation16_spill] sm:$0xff] }
  0x89   : > { %v2705_v20 = vcombine.low %v3385_v29, %v3386_v41  ;;  %v1730_v32 = vrot.slane %v1729_v19, 4  ;;  %v1734_v57 = vrot.slane %v1732_v58, 5  ;;  %v1743_v4 = vor.u32 %v3624_v5, %v3608_v8  ;;  %v4304_v19 = vld [vmem:[#allocation3_spill] sm:$0xff]  ;;  %v4305_v29 = vld [vmem:[#allocation17_spill] sm:$0xff]  ;;  %v4306_v41 = vld [vmem:[#allocation20_spill] sm:$0xff] }
  0x8a   : > { %3195 = vmatmul.mubr.msk.bf16.gmra.mrb[4].mxu0 %vm694_vm1, %v2825_v0  ;;  %v1711_v52 = vsel %vm3511_vm4, %v1706_v45, %v1710_v27  ;;  %v1725_v15 = vsel %vm3511_vm4, %v1720_v54, %v3602_v62  ;;  %v1753_v7 = vor.u32 %v3632_v53, %v3626_v31  ;;  %v1756_v1 = vshll.u32 %v2757_v49, 16  ;;  %v2763_v62 = vld [vmem:[%s3471_s25 + $0x74] sm:$0x1]  ;;  %v2769_v45 = vld [vmem:[%s3471_s25 + $0x8c] sm:$0x1] }
  0x8b   : > { %v2826_v50 = vcombine.low %v1701_v46, %v1711_v52  ;;  %v2706_v36 = vcombine.low %v3387_v18, %v3548_v37  ;;  %v1735_v8 = vsel %vm3511_vm4, %v1730_v32, %v1734_v57  ;;  %v1744_v5 = vrot.slane %v1743_v4, 4  ;;  %v4307_v4 = vld [vmem:[#allocation21_spill] sm:$0xff]  ;;  %v4308_v52 = vld [vmem:[#allocation22_spill] sm:$0xff] }
  0x8c   : > { %v2827_v21 = vcombine.low %v1725_v15, %v1735_v8  ;;  %v1754_v38 = vrot.slane %v1753_v7, 4  ;;  %v1758_v26 = vrot.slane %v1756_v1, 5  ;;  %v1767_v13 = vor.u32 %v3655_v55, %v3637_v63  ;;  %v2772_v1 = vld [vmem:[%s3471_s25 + $0x98] sm:$0x1]  ;;  %v4311_v8 = vld [vmem:[#allocation23_spill] sm:$0xff] }
  0x8d   : > { %v4297_v53 = vshrl.u32 %v3833_v22, 16  ;;  %3198 = vmatprep.mubr.msk.bf16.mxu0 %vm694_vm1, %v2826_v50  ;;  %v1749_v37 = vsel %vm3511_vm4, %v1744_v5, %v3626_v31  ;;  %v1777_v23 = vor.u32 %v3659_v6, %v3657_v3  ;;  %v1780_v40 = vshll.u32 %v2760_v2, 16  ;;  %v4298_v6 = vld [vmem:[#allocation2_spill] sm:$0xff]  ;;  %v4310_v2 = vld [vmem:[#allocation5_spill] sm:$0xff] }
  0x8e   : > { %v1759_v30 = vsel %vm3511_vm4, %v1754_v38, %v1758_v26  ;;  %v1768_v63 = vrot.slane %v1767_v13, 4  ;;  %v1791_v55 = vor.u32 %v3675_v10, %v3666_v25  ;;  %v1801_v22 = vor.u32 %v3687_v44, %v3680_v16  ;;  %v4312_v5 = vld [vmem:[#allocation26_spill] sm:$0xff] }
  0x8f   : > { %v3997_v24 = vrot.slane %v4297_v53, 4  ;;  %3123 = vmatmul.mubr.msk.bf16.vlgmr.msra.gmra.mrb[0].mxu1 %vm694_vm1, %v2705_v20  ;;  %v2828_v56 = vcombine.low %v1749_v37, %v1759_v30  ;;  %v1778_v48 = vrot.slane %v1777_v23, 4  ;;  %v1782_v31 = vrot.slane %v1780_v40, 5  ;;  %v4314_v53 = vld [vmem:[#allocation28_spill] sm:$0xff] }
  0x90   : > { %v1804_v60 = vshll.u32 %v2763_v62, 16  ;;  %3126 = vmatprep.mubr.msk.bf16.mxu1 %vm694_vm1, %v2706_v36  ;;  %v2707_v39 = vcombine.low %v4298_v6, %v3571_v12  ;;  %v1773_v25 = vsel %vm3511_vm4, %v1768_v63, %v3657_v3  ;;  %v1792_v10 = vrot.slane %v1791_v55, 4  ;;  %v4303_v12 = vld [vmem:[#allocation4_spill] sm:$0xff]  ;;  %v4313_v62 = vld [vmem:[#allocation27_spill] sm:$0xff]  ;;  %v2775_v55 = vld [vmem:[%s3471_s25 + $0xa4] sm:$0x1] }
  0x91   : > { %v1802_v51 = vrot.slane %v1801_v22, 4  ;;  %v1783_v44 = vsel %vm3511_vm4, %v1778_v48, %v1782_v31  ;;  %v1815_v61 = vor.u32 %v4300_v43, %v4299_v28  ;;  %v1825_v34 = vor.u32 %v4302_v33, %v4301_v14  ;;  %v4315_v22 = vld [vmem:[#allocation8_spill] sm:$0xff]  ;;  %v4318_v6 = vld [vmem:[#allocation30_spill] sm:$0xff]  ;;  %v4321_v33 = vld [vmem:[#allocation25_spill] sm:$0xff] }
  0x92   : > { %v1806_v9 = vrot.slane %v1804_v60, 5  ;;  %3199 = vmatmul.mubr.msk.bf16.gmra.mrb[8].mxu0 %vm694_vm1, %v2827_v21  ;;  %v2708_v58 = vcombine.low %v4304_v19, %v4303_v12  ;;  %v2829_v3 = vcombine.low %v1773_v25, %v1783_v44  ;;  %v1797_v49 = vsel %vm3511_vm4, %v1792_v10, %v3680_v16  ;;  %v4309_v16 = vld [vmem:[#allocation6_spill] sm:$0xff]  ;;  %v2778_v25 = vld [vmem:[%s3471_s25 + $0xb0] sm:$0x1]  ;;  %v4323_v12 = vld [vmem:[#allocation35_spill] sm:$0xff] }
  0x93   : > { %v1828_v0 = vshll.u32 %v2766_v59, 16  ;;  %3202 = vmatprep.mubr.msk.bf16.mxu0 %vm694_vm1, %v2828_v56  ;;  %v1816_v27 = vrot.slane %v1815_v61, 4  ;;  %v1826_v54 = vrot.slane %v1825_v34, 4  ;;  %v1839_v20 = vor.u32 %v4306_v41, %v4305_v29  ;;  %v4316_v56 = vld [vmem:[#allocation7_spill] sm:$0xff]  ;;  %v4317_v59 = vld [vmem:[#allocation29_spill] sm:$0xff]  ;;  %v4320_v28 = vld [vmem:[#allocation34_spill] sm:$0xff] }
  0x94   : > { %v1807_v46 = vsel %vm3511_vm4, %v1802_v51, %v1806_v9  ;;  %v1849_v15 = vor.u32 %v4308_v52, %v4307_v4  ;;  %v1852_v7 = vshll.u32 %v2769_v45, 16  ;;  %v2709_v50 = vcombine.low %v4310_v2, %v4309_v16  ;;  %v4319_v9 = vld [vmem:[#allocation32_spill] sm:$0xff]  ;;  %v4329_v16 = vld [vmem:[#allocation41_spill] sm:$0xff]  ;;  %v4330_v2 = vld [vmem:[#allocation43_spill] sm:$0xff] }
  0x95   : > { %v2830_v32 = vcombine.low %v1797_v49, %v1807_v46  ;;  %v1830_v57 = vrot.slane %v1828_v0, 5  ;;  %v1821_v18 = vsel %vm3511_vm4, %v1816_v27, %v4301_v14  ;;  %v1840_v36 = vrot.slane %v1839_v20, 4  ;;  %v4322_v34 = vld [vmem:[#allocation24_spill] sm:$0xff]  ;;  %v4325_v46 = vld [vmem:[#allocation38_spill] sm:$0xff] }
  0x96   : > { %v1863_v21 = vor.u32 %v4312_v5, %v4311_v8  ;;  %v1850_v26 = vrot.slane %v1849_v15, 4  ;;  %v1854_v13 = vrot.slane %v1852_v7, 5  ;;  %v1873_v37 = vor.u32 %v4314_v53, %v4313_v62  ;;  %v4324_v19 = vld [vmem:[#allocation36_spill] sm:$0xff]  ;;  %v4328_v7 = vld [vmem:[#allocation31_spill] sm:$0xff] }
  0x97   : > { %v1831_v38 = vsel %vm3511_vm4, %v1826_v54, %v1830_v57  ;;  %3127 = vmatmul.mubr.msk.bf16.gmra.mrb[4].mxu1 %vm694_vm1, %v2707_v39  ;;  %v1845_v40 = vsel %vm3511_vm4, %v1840_v36, %v4307_v4  ;;  %v1876_v63 = vshll.u32 %v2772_v1, 16  ;;  %v2710_v48 = vcombine.low %v4316_v56, %v4315_v22  ;;  %v4326_v27 = vld [vmem:[#allocation40_spill] sm:$0xff] }
  0x98   : > { %v2831_v23 = vcombine.low %v1821_v18, %v1831_v38  ;;  %v1864_v30 = vrot.slane %v1863_v21, 4  ;;  %3130 = vmatprep.mubr.msk.bf16.mxu1 %vm694_vm1, %v2708_v58  ;;  %v1855_v31 = vsel %vm3511_vm4, %v1850_v26, %v1854_v13  ;;  %v1874_v60 = vrot.slane %v1873_v37, 4  ;;  %v4331_v5 = vld [vmem:[#allocation44_spill] sm:$0xff]  ;;  %v4332_v21 = vld [vmem:[#allocation46_spill] sm:$0xff]  ;;  %v2784_v13 = vld [vmem:[%s3471_s25 + $0xc8] sm:$0x1] }
  0x99   : > { %v1887_v39 = vor.u32 %v4318_v6, %v4317_v59  ;;  %v2832_v10 = vcombine.low %v1845_v40, %v1855_v31  ;;  %v1878_v44 = vrot.slane %v1876_v63, 5  ;;  %v1897_v43 = vor.u32 %v4320_v28, %v4319_v9  ;;  %v4333_v40 = vld [vmem:[#allocation39_spill] sm:$0xff]  ;;  %v4339_v28 = vld [vmem:[#allocation48_spill] sm:$0xff] }
  0x9a   : > { %v1869_v51 = vsel %vm3511_vm4, %v1864_v30, %v4313_v62  ;;  %3203 = vmatmul.mubr.msk.bf16.gmra.mrb[12].mxu0 %vm694_vm1, %v2829_v3  ;;  %v1900_v14 = vshll.u32 %v2775_v55, 16  ;;  %v2714_v45 = vcombine.low %v4322_v34, %v4321_v33  ;;  %v1911_v58 = vor.u32 %v4324_v19, %v4323_v12  ;;  %v2781_v3 = vld [vmem:[%s3471_s25 + $0xbc] sm:$0x1]  ;;  %v4335_v31 = vld [vmem:[#allocation47_spill] sm:$0xff] }
  0x9b   : > { %v1888_v61 = vrot.slane %v1887_v39, 4  ;;  %3206 = vmatprep.mubr.msk.bf16.mxu0 %vm694_vm1, %v2830_v32  ;;  %v1879_v49 = vsel %vm3511_vm4, %v1874_v60, %v1878_v44  ;;  %v1898_v0 = vrot.slane %v1897_v43, 4  ;;  %v1921_v54 = vor.u32 %v4326_v27, %v4325_v46  ;;  %v4327_v32 = vld [vmem:[#allocation33_spill] sm:$0xff]  ;;  %v4342_v19 = vld [vmem:[#allocation15_spill] sm:$0xff] }
  0x9c   : > { %v1924_v29 = vshll.u32 %v2778_v25, 16  ;;  %v2833_v41 = vcombine.low %v1869_v51, %v1879_v49  ;;  %v1902_v57 = vrot.slane %v1900_v14, 5  ;;  %v1912_v4 = vrot.slane %v1911_v58, 4  ;;  %v4334_v30 = vld [vmem:[#allocation37_spill] sm:$0xff]  ;;  %v4337_v25 = vld [vmem:[#allocation42_spill] sm:$0xff] }
  0x9d   : > { %v1893_v20 = vsel %vm3511_vm4, %v1888_v61, %v4319_v9  ;;  %v1922_v52 = vrot.slane %v1921_v54, 4  ;;  %v2715_v1 = vcombine.low %v4328_v7, %v4327_v32  ;;  %v1935_v18 = vor.u32 %v4330_v2, %v4329_v16  ;;  %v4336_v39 = vld [vmem:[#allocation45_spill] sm:$0xff]  ;;  %v4340_v61 = vld [vmem:[#allocation10_spill] sm:$0xff] }
  0x9e   : > { %v1926_v15 = vrot.slane %v1924_v29, 5  ;;  %v1903_v36 = vsel %vm3511_vm4, %v1898_v0, %v1902_v57  ;;  %v1917_v8 = vsel %vm3511_vm4, %v1912_v4, %v4325_v46  ;;  %v1945_v38 = vor.u32 %v4332_v21, %v4331_v5  ;;  %v4338_v9 = vld [vmem:[#allocation49_spill] sm:$0xff]  ;;  %v4146_v57 = vld [vmem:[%s4213_s2] ss:$0 sm:$0xff] }
  0x9f   : > { %v1948_v26 = vshll.u32 %v2781_v3, 16  ;;  %3131 = vmatmul.mubr.msk.bf16.gmra.mrb[8].mxu1 %vm694_vm1, %v2709_v50  ;;  %v2834_v62 = vcombine.low %v1893_v20, %v1903_v36  ;;  %v1936_v37 = vrot.slane %v1935_v18, 4  ;;  %v2716_v63 = vcombine.low %v4334_v30, %v4333_v40  ;;  %v4341_v14 = vld [vmem:[#allocation9_spill] sm:$0xff] }
  0xa0   : > { %v1927_v53 = vsel %vm3511_vm4, %v1922_v52, %v1926_v15  ;;  %3134 = vmatprep.mubr.msk.bf16.mxu1 %vm694_vm1, %v2710_v48  ;;  %v1946_v22 = vrot.slane %v1945_v38, 4  ;;  %v1959_v60 = vor.u32 %v3931_v42, %v4335_v31  ;;  %v1969_v59 = vor.u32 %v3997_v24, %v3960_v35 }
  0xa1   : > { %v2835_v55 = vcombine.low %v1917_v8, %v1927_v53  ;;  %v1950_v56 = vrot.slane %v1948_v26, 5  ;;  %v1941_v50 = vsel %vm3511_vm4, %v1936_v37, %v4331_v5  ;;  %v1972_v6 = vshll.u32 %v2784_v13, 16 }
  0xa2   : > { %v2717_v51 = vcombine.low %v4337_v25, %v4336_v39  ;;  %3207 = vmatmul.mubr.msk.bf16.gmra.mrb[16].mxu0 %vm694_vm1, %v2831_v23  ;;  %v1960_v44 = vrot.slane %v1959_v60, 4  ;;  %v2718_v42 = vcombine.low %v4339_v28, %v4338_v9  ;;  %v2719_v43 = vcombine.low %v3891_v17, %v3897_v11  ;;  %v4343_v23 = vld [vmem:[#allocation13_spill] sm:$0xff]  ;;  %v4344_v17 = vld [vmem:[#allocation19_spill] sm:$0xff]  ;;  %v4345_v11 = vld [vmem:[#allocation18_spill] sm:$0xff] }
  0xa3   : > { %v1951_v48 = vsel %vm3511_vm4, %v1946_v22, %v1950_v56  ;;  %v2711_v33 = vcombine.low %v4341_v14, %v4340_v61  ;;  %3210 = vmatprep.mubr.msk.bf16.mxu0 %vm694_vm1, %v2832_v10  ;;  %v1970_v34 = vrot.slane %v1969_v59, 4  ;;  %v1974_v12 = vrot.slane %v1972_v6, 5 }
  0xa4   : > { %v2836_v24 = vcombine.low %v1941_v50, %v1951_v48  ;;  %v2712_v58 = vcombine.low %v4343_v23, %v4342_v19  ;;  %v1965_v49 = vsel %vm3511_vm4, %v1960_v44, %v3960_v35  ;;  %v2713_v10 = vcombine.low %v4345_v11, %v4344_v17 }
  0xa5   : > { %v1975_v0 = vsel %vm3511_vm4, %v1970_v34, %v1974_v12 }
  0xa6   : > { %v2837_v46 = vcombine.low %v1965_v49, %v1975_v0 }
  0xa7   : > { %3135 = vmatmul.mubr.msk.bf16.gmra.mrb[12].mxu1 %vm694_vm1, %v2711_v33 }
  0xa8   : > { %3138 = vmatprep.mubr.msk.bf16.mxu1 %vm694_vm1, %v2712_v58 }
  0xaa   : > { %3211 = vmatmul.mubr.msk.bf16.gmra.mrb[20].mxu0 %vm694_vm1, %v2833_v41 }
  0xab   : > { %3214 = vmatprep.mubr.msk.bf16.mxu0 %vm694_vm1, %v2834_v62 }
  0xaf   : > { %3139 = vmatmul.mubr.msk.bf16.gmra.mrb[16].mxu1 %vm694_vm1, %v2713_v10 }
  0xb0   : > { %3142 = vmatprep.mubr.msk.bf16.mxu1 %vm694_vm1, %v2714_v45 }
  0xb2   : > { %3215 = vmatmul.mubr.msk.bf16.gmra.mrb[24].mxu0 %vm694_vm1, %v2835_v55 }
  0xb3   : > { %3218 = vmatprep.mubr.msk.bf16.mxu0 %vm694_vm1, %v2836_v24 }
  0xb7   : > { %3143 = vmatmul.mubr.msk.bf16.gmra.mrb[20].mxu1 %vm694_vm1, %v2715_v1 }
  0xb8   : > { %3146 = vmatprep.mubr.msk.bf16.mxu1 %vm694_vm1, %v2716_v63 }
  0xba   : > { %3219 = vmatmul.mubr.msk.bf16.gmra.mrb[28].mxu0 %vm694_vm1, %v2837_v46 }
  0xbf   : > { %3147 = vmatmul.mubr.msk.bf16.gmra.mrb[24].mxu1 %vm694_vm1, %v2717_v51 }
  0xc0   : > { %3150 = vmatprep.mubr.msk.bf16.mxu1 %vm694_vm1, %v2718_v42 }
  0xc7   : > { %3151 = vmatmul.mubr.msk.bf16.gmra.mrb[28].mxu1 %vm694_vm1, %v2719_v43 }
 0x153   : > { %v3192_v47 = vpop.f32.mrb[0].mxu0 }
 0x154   : > { %v2114_v35 = vpop.f32.mrb[1].mxu0 }
 0x155   : > { %v3193_v27 = vpop.f32.mrb[2].mxu0 }
 0x156   : > { %v2117_v45 = vpop.f32.mrb[3].mxu0 }
 0x15d   : > { %v3196_v54 = vpop.f32.mrb[4].mxu0 }
 0x15e   : > { %v2130_v29 = vpop.f32.mrb[5].mxu0 }
 0x15f   : > { %v3197_v3 = vpop.f32.mrb[6].mxu0 }
 0x160   : > { %v2133_v41 = vpop.f32.mrb[7].mxu0 }
 0x162   : > { %v3124_v20 = vpop.f32.mrb[0].mxu1 }
 0x163   : > { %v3222_v4 = vadd.f32 %v3192_v47, %v3124_v20  ;;  %v1078_v52 = vpop.f32.mrb[1].mxu1 }
 0x164   : > { %v3223_v15 = vadd.f32 %v2114_v35, %v1078_v52  ;;  %v3125_v32 = vpop.f32.mrb[2].mxu1 }
 0x165   : > { %v2282_v7 = vadd.f32 %v3222_v4, %v4146_v57  ;;  %v3224_v1 = vadd.f32 %v3193_v27, %v3125_v32  ;;  %v1081_v16 = vpop.f32.mrb[3].mxu1  ;;  %v3200_v2 = vpop.f32.mrb[8].mxu0 }
 0x166   : > { %v2280_v18 = vadd.f32 %v3223_v15, %v4146_v57  ;;  %v3225_v36 = vadd.f32 %v2117_v45, %v1081_v16  ;;  %v2146_v8 = vpop.f32.mrb[9].mxu0 }
 0x167   : > { %v2346_v5 = vmul.f32 0.2, %v2282_v7  ;;  %v2283_v21 = vadd.f32 %v3224_v1, %v4146_v57  ;;  %v3201_v38 = vpop.f32.mrb[10].mxu0  ;;  %vm2314_vm5 = vcmp.ge.f32.partialorder %v2282_v7, 0.0 }
 0x168   : > { %v2344_v26 = vmul.f32 0.2, %v2280_v18  ;;  %v2281_v13 = vadd.f32 %v3225_v36, %v4146_v57  ;;  %v2149_v62 = vpop.f32.mrb[11].mxu0  ;;  %vm2312_vm6 = vcmp.ge.f32.partialorder %v2280_v18, 0.0 }
 0x169   : > { %vm2315_vm7 = vcmp.ge.f32.partialorder %v2283_v21, 0.0  ;;  %v2347_v53 = vmul.f32 0.2, %v2283_v21  ;;  %v2378_v30 = vsel %vm2314_vm5, %v2282_v7, %v2346_v5 }
 0x16a   : > { %vm2313_vm8 = vcmp.ge.f32.partialorder %v2281_v13, 0.0  ;;  %v2345_v37 = vmul.f32 0.2, %v2281_v13  ;;  %v3128_v40 = vpop.f32.mrb[4].mxu1  ;;  %v2376_v56 = vsel %vm2312_vm6, %v2280_v18, %v2344_v26 }
 0x16b   : > { %v2379_v63 = vsel %vm2315_vm7, %v2283_v21, %v2347_v53  ;;  %v3226_v55 = vadd.f32 %v3196_v54, %v3128_v40  ;;  %v1094_v22 = vpop.f32.mrb[5].mxu1 }
 0x16c   : > { %v2931_v31 = vpack.c.bf16 %v2379_v63, %v2378_v30  ;;  %v2377_v60 = vsel %vm2313_vm8, %v2281_v13, %v2345_v37  ;;  %v3227_v50 = vadd.f32 %v2130_v29, %v1094_v22  ;;  %v3129_v59 = vpop.f32.mrb[6].mxu1 }
 0x16d   : > { %v2926_v6 = vpack.c.bf16 %v2377_v60, %v2376_v56  ;;  %v2286_v39 = vadd.f32 %v3226_v55, %v4146_v57  ;;  %v3228_v25 = vadd.f32 %v3197_v3, %v3129_v59  ;;  %v1097_v51 = vpop.f32.mrb[7].mxu1  ;;  %v3204_v48 = vpop.f32.mrb[12].mxu0 }
 0x16e   : > { %3003 = vst [vmem:[%s4156_s6 + $0x8] sm:$0xff] %v2931_v31   ;;  %v2284_v44 = vadd.f32 %v3227_v50, %v4146_v57  ;;  %v3229_v9 = vadd.f32 %v2133_v41, %v1097_v51  ;;  %v2162_v28 = vpop.f32.mrb[13].mxu0 }
 0x16f   : > { %2927 = vst [vmem:[%s4156_s6] sm:$0xff] %v2926_v6   ;;  %v2350_v42 = vmul.f32 0.2, %v2286_v39  ;;  %v2287_v43 = vadd.f32 %v3228_v25, %v4146_v57  ;;  %v3205_v61 = vpop.f32.mrb[14].mxu0  ;;  %vm2318_vm9 = vcmp.ge.f32.partialorder %v2286_v39, 0.0 }
 0x170   : > { %v2348_v14 = vmul.f32 0.2, %v2284_v44  ;;  %v2285_v33 = vadd.f32 %v3229_v9, %v4146_v57  ;;  %v2165_v24 = vpop.f32.mrb[15].mxu0  ;;  %vm2316_vm10 = vcmp.ge.f32.partialorder %v2284_v44, 0.0 }
 0x171   : > { %vm2319_vm11 = vcmp.ge.f32.partialorder %v2287_v43, 0.0  ;;  %v2351_v34 = vmul.f32 0.2, %v2287_v43  ;;  %v2382_v23 = vsel %vm2318_vm9, %v2286_v39, %v2350_v42 }
 0x172   : > { %vm2317_vm12 = vcmp.ge.f32.partialorder %v2285_v33, 0.0  ;;  %v2349_v12 = vmul.f32 0.2, %v2285_v33  ;;  %v3132_v19 = vpop.f32.mrb[8].mxu1  ;;  %v2380_v46 = vsel %vm2316_vm10, %v2284_v44, %v2348_v14 }
 0x173   : > { %v2383_v58 = vsel %vm2319_vm11, %v2287_v43, %v2351_v34  ;;  %v3230_v49 = vadd.f32 %v3200_v2, %v3132_v19  ;;  %v1110_v0 = vpop.f32.mrb[9].mxu1 }
 0x174   : > { %v2941_v17 = vpack.c.bf16 %v2383_v58, %v2382_v23  ;;  %v2381_v11 = vsel %vm2317_vm12, %v2285_v33, %v2349_v12  ;;  %v3231_v10 = vadd.f32 %v2146_v8, %v1110_v0  ;;  %v3133_v47 = vpop.f32.mrb[10].mxu1 }
 0x175   : > { %v2936_v35 = vpack.c.bf16 %v2381_v11, %v2380_v46  ;;  %v2290_v27 = vadd.f32 %v3230_v49, %v4146_v57  ;;  %v3232_v45 = vadd.f32 %v3201_v38, %v3133_v47  ;;  %v1113_v54 = vpop.f32.mrb[11].mxu1  ;;  %v3208_v29 = vpop.f32.mrb[16].mxu0 }
 0x176   : > { %3005 = vst [vmem:[%s4156_s6 + $0x18] sm:$0xff] %v2941_v17   ;;  %v2288_v3 = vadd.f32 %v3231_v10, %v4146_v57  ;;  %v3233_v41 = vadd.f32 %v2149_v62, %v1113_v54  ;;  %v2178_v20 = vpop.f32.mrb[17].mxu0 }
 0x177   : > { %3004 = vst [vmem:[%s4156_s6 + $0x10] sm:$0xff] %v2936_v35   ;;  %v2354_v4 = vmul.f32 0.2, %v2290_v27  ;;  %v2291_v52 = vadd.f32 %v3232_v45, %v4146_v57  ;;  %v3209_v15 = vpop.f32.mrb[18].mxu0  ;;  %vm2322_vm13 = vcmp.ge.f32.partialorder %v2290_v27, 0.0 }
 0x178   : > { %v2352_v32 = vmul.f32 0.2, %v2288_v3  ;;  %v2289_v7 = vadd.f32 %v3233_v41, %v4146_v57  ;;  %v2181_v1 = vpop.f32.mrb[19].mxu0  ;;  %vm2320_vm14 = vcmp.ge.f32.partialorder %v2288_v3, 0.0 }
 0x179   : > { %vm2323_vm15 = vcmp.ge.f32.partialorder %v2291_v52, 0.0  ;;  %v2355_v16 = vmul.f32 0.2, %v2291_v52  ;;  %v2386_v36 = vsel %vm2322_vm13, %v2290_v27, %v2354_v4 }
 0x17a   : > { %vm2321_vm0 = vcmp.ge.f32.partialorder %v2289_v7, 0.0  ;;  %v2353_v2 = vmul.f32 0.2, %v2289_v7  ;;  %v3136_v18 = vpop.f32.mrb[12].mxu1  ;;  %v2384_v38 = vsel %vm2320_vm14, %v2288_v3, %v2352_v32 }
 0x17b   : > { %v2387_v8 = vsel %vm2323_vm15, %v2291_v52, %v2355_v16  ;;  %v3234_v5 = vadd.f32 %v3204_v48, %v3136_v18  ;;  %v1126_v21 = vpop.f32.mrb[13].mxu1 }
 0x17c   : > { %v2951_v26 = vpack.c.bf16 %v2387_v8, %v2386_v36  ;;  %v2385_v13 = vsel %vm2321_vm0, %v2289_v7, %v2353_v2  ;;  %v3235_v62 = vadd.f32 %v2162_v28, %v1126_v21  ;;  %v3137_v53 = vpop.f32.mrb[14].mxu1 }
 0x17d   : > { %v2946_v37 = vpack.c.bf16 %v2385_v13, %v2384_v38  ;;  %v2294_v40 = vadd.f32 %v3234_v5, %v4146_v57  ;;  %v3236_v30 = vadd.f32 %v3205_v61, %v3137_v53  ;;  %v1129_v63 = vpop.f32.mrb[15].mxu1  ;;  %v3212_v55 = vpop.f32.mrb[20].mxu0 }
 0x17e   : > { %3007 = vst [vmem:[%s4156_s6 + $0x28] sm:$0xff] %v2951_v26   ;;  %v2292_v22 = vadd.f32 %v3235_v62, %v4146_v57  ;;  %v3237_v56 = vadd.f32 %v2165_v24, %v1129_v63  ;;  %v2194_v31 = vpop.f32.mrb[21].mxu0 }
 0x17f   : > { %3006 = vst [vmem:[%s4156_s6 + $0x20] sm:$0xff] %v2946_v37   ;;  %v2358_v60 = vmul.f32 0.2, %v2294_v40  ;;  %v2295_v50 = vadd.f32 %v3236_v30, %v4146_v57  ;;  %v3213_v59 = vpop.f32.mrb[22].mxu0  ;;  %vm2326_vm1 = vcmp.ge.f32.partialorder %v2294_v40, 0.0 }
 0x180   : > { %v2356_v6 = vmul.f32 0.2, %v2292_v22  ;;  %v2293_v39 = vadd.f32 %v3237_v56, %v4146_v57  ;;  %v2197_v25 = vpop.f32.mrb[23].mxu0  ;;  %vm2324_vm2 = vcmp.ge.f32.partialorder %v2292_v22, 0.0 }
 0x181   : > { %vm2327_vm3 = vcmp.ge.f32.partialorder %v2295_v50, 0.0  ;;  %v2359_v51 = vmul.f32 0.2, %v2295_v50  ;;  %v2390_v9 = vsel %vm2326_vm1, %v2294_v40, %v2358_v60 }
 0x182   : > { %vm2325_vm4 = vcmp.ge.f32.partialorder %v2293_v39, 0.0  ;;  %v2357_v48 = vmul.f32 0.2, %v2293_v39  ;;  %v3140_v44 = vpop.f32.mrb[16].mxu1  ;;  %v2388_v61 = vsel %vm2324_vm2, %v2292_v22, %v2356_v6 }
 0x183   : > { %v2391_v28 = vsel %vm2327_vm3, %v2295_v50, %v2359_v51  ;;  %v3238_v42 = vadd.f32 %v3208_v29, %v3140_v44  ;;  %v1142_v43 = vpop.f32.mrb[17].mxu1 }
 0x184   : > { %v2961_v14 = vpack.c.bf16 %v2391_v28, %v2390_v9  ;;  %v2389_v33 = vsel %vm2325_vm4, %v2293_v39, %v2357_v48  ;;  %v3239_v24 = vadd.f32 %v2178_v20, %v1142_v43  ;;  %v3141_v34 = vpop.f32.mrb[18].mxu1 }
 0x185   : > { %v2956_v12 = vpack.c.bf16 %v2389_v33, %v2388_v61  ;;  %v2298_v19 = vadd.f32 %v3238_v42, %v4146_v57  ;;  %v3240_v23 = vadd.f32 %v3209_v15, %v3141_v34  ;;  %v1145_v58 = vpop.f32.mrb[19].mxu1  ;;  %v3216_v49 = vpop.f32.mrb[24].mxu0 }
 0x186   : > { %3009 = vst [vmem:[%s4156_s6 + $0x38] sm:$0xff] %v2961_v14   ;;  %v2296_v0 = vadd.f32 %v3239_v24, %v4146_v57  ;;  %v3241_v46 = vadd.f32 %v2181_v1, %v1145_v58  ;;  %v2210_v17 = vpop.f32.mrb[25].mxu0 }
 0x187   : > { %3008 = vst [vmem:[%s4156_s6 + $0x30] sm:$0xff] %v2956_v12   ;;  %v2362_v11 = vmul.f32 0.2, %v2298_v19  ;;  %v2299_v10 = vadd.f32 %v3240_v23, %v4146_v57  ;;  %v3217_v47 = vpop.f32.mrb[26].mxu0  ;;  %vm2330_vm5 = vcmp.ge.f32.partialorder %v2298_v19, 0.0 }
 0x188   : > { %v2360_v35 = vmul.f32 0.2, %v2296_v0  ;;  %v2297_v27 = vadd.f32 %v3241_v46, %v4146_v57  ;;  %v2213_v45 = vpop.f32.mrb[27].mxu0  ;;  %vm2328_vm6 = vcmp.ge.f32.partialorder %v2296_v0, 0.0 }
 0x189   : > { %vm2331_vm7 = vcmp.ge.f32.partialorder %v2299_v10, 0.0  ;;  %v2363_v54 = vmul.f32 0.2, %v2299_v10  ;;  %v2394_v41 = vsel %vm2330_vm5, %v2298_v19, %v2362_v11 }
 0x18a   : > { %vm2329_vm8 = vcmp.ge.f32.partialorder %v2297_v27, 0.0  ;;  %v2361_v29 = vmul.f32 0.2, %v2297_v27  ;;  %v3144_v3 = vpop.f32.mrb[20].mxu1  ;;  %v2392_v15 = vsel %vm2328_vm6, %v2296_v0, %v2360_v35 }
 0x18b   : > { %v2395_v20 = vsel %vm2331_vm7, %v2299_v10, %v2363_v54  ;;  %v3242_v4 = vadd.f32 %v3212_v55, %v3144_v3  ;;  %v1158_v52 = vpop.f32.mrb[21].mxu1 }
 0x18c   : > { %v2971_v32 = vpack.c.bf16 %v2395_v20, %v2394_v41  ;;  %v2393_v7 = vsel %vm2329_vm8, %v2297_v27, %v2361_v29  ;;  %v3243_v1 = vadd.f32 %v2194_v31, %v1158_v52  ;;  %v3145_v16 = vpop.f32.mrb[22].mxu1 }
 0x18d   : > { %v2966_v2 = vpack.c.bf16 %v2393_v7, %v2392_v15  ;;  %v2302_v18 = vadd.f32 %v3242_v4, %v4146_v57  ;;  %v3244_v36 = vadd.f32 %v3213_v59, %v3145_v16  ;;  %v1161_v8 = vpop.f32.mrb[23].mxu1  ;;  %v3220_v5 = vpop.f32.mrb[28].mxu0 }
 0x18e   : > { %3011 = vst [vmem:[%s4156_s6 + $0x48] sm:$0xff] %v2971_v32   ;;  %v2300_v21 = vadd.f32 %v3243_v1, %v4146_v57  ;;  %v3245_v38 = vadd.f32 %v2197_v25, %v1161_v8  ;;  %v2226_v26 = vpop.f32.mrb[29].mxu0 }
 0x18f   : > { %3010 = vst [vmem:[%s4156_s6 + $0x40] sm:$0xff] %v2966_v2   ;;  %v2366_v13 = vmul.f32 0.2, %v2302_v18  ;;  %v2303_v62 = vadd.f32 %v3244_v36, %v4146_v57  ;;  %v3221_v53 = vpop.f32.mrb[30].mxu0  ;;  %vm2334_vm9 = vcmp.ge.f32.partialorder %v2302_v18, 0.0 }
 0x190   : > { %v2364_v37 = vmul.f32 0.2, %v2300_v21  ;;  %v2301_v40 = vadd.f32 %v3245_v38, %v4146_v57  ;;  %v2229_v30 = vpop.f32.mrb[31].mxu0  ;;  %vm2332_vm10 = vcmp.ge.f32.partialorder %v2300_v21, 0.0 }
 0x191   : > { %vm2335_vm11 = vcmp.ge.f32.partialorder %v2303_v62, 0.0  ;;  %v2367_v63 = vmul.f32 0.2, %v2303_v62  ;;  %v2398_v56 = vsel %vm2334_vm9, %v2302_v18, %v2366_v13 }
 0x192   : > { %vm2333_vm12 = vcmp.ge.f32.partialorder %v2301_v40, 0.0  ;;  %v2365_v55 = vmul.f32 0.2, %v2301_v40  ;;  %v3148_v22 = vpop.f32.mrb[24].mxu1  ;;  %v2396_v59 = vsel %vm2332_vm10, %v2300_v21, %v2364_v37 }
 0x193   : > { %v2399_v31 = vsel %vm2335_vm11, %v2303_v62, %v2367_v63  ;;  %v3246_v60 = vadd.f32 %v3216_v49, %v3148_v22  ;;  %v1174_v50 = vpop.f32.mrb[25].mxu1 }
 0x194   : > { %v2981_v6 = vpack.c.bf16 %v2399_v31, %v2398_v56  ;;  %v2397_v39 = vsel %vm2333_vm12, %v2301_v40, %v2365_v55  ;;  %v3247_v25 = vadd.f32 %v2210_v17, %v1174_v50  ;;  %v3149_v51 = vpop.f32.mrb[26].mxu1 }
 0x195   : > { %v2976_v48 = vpack.c.bf16 %v2397_v39, %v2396_v59  ;;  %v2306_v44 = vadd.f32 %v3246_v60, %v4146_v57  ;;  %v3248_v9 = vadd.f32 %v3217_v47, %v3149_v51  ;;  %v1177_v28 = vpop.f32.mrb[27].mxu1 }
 0x196   : > { %3013 = vst [vmem:[%s4156_s6 + $0x58] sm:$0xff] %v2981_v6   ;;  %v2304_v42 = vadd.f32 %v3247_v25, %v4146_v57  ;;  %v3249_v43 = vadd.f32 %v2213_v45, %v1177_v28 }
 0x197   : > { %3012 = vst [vmem:[%s4156_s6 + $0x50] sm:$0xff] %v2976_v48   ;;  %v2370_v61 = vmul.f32 0.2, %v2306_v44  ;;  %v2307_v14 = vadd.f32 %v3248_v9, %v4146_v57  ;;  %vm2338_vm13 = vcmp.ge.f32.partialorder %v2306_v44, 0.0 }
 0x198   : > { %v2368_v33 = vmul.f32 0.2, %v2304_v42  ;;  %v2305_v24 = vadd.f32 %v3249_v43, %v4146_v57  ;;  %vm2336_vm14 = vcmp.ge.f32.partialorder %v2304_v42, 0.0 }
 0x199   : > { %vm2339_vm15 = vcmp.ge.f32.partialorder %v2307_v14, 0.0  ;;  %v2371_v34 = vmul.f32 0.2, %v2307_v14  ;;  %v2402_v23 = vsel %vm2338_vm13, %v2306_v44, %v2370_v61 }
 0x19a   : > { %vm2337_vm0 = vcmp.ge.f32.partialorder %v2305_v24, 0.0  ;;  %v2369_v12 = vmul.f32 0.2, %v2305_v24  ;;  %v3152_v19 = vpop.f32.mrb[28].mxu1  ;;  %v2400_v46 = vsel %vm2336_vm14, %v2304_v42, %v2368_v33 }
 0x19b   : > { %v2403_v58 = vsel %vm2339_vm15, %v2307_v14, %v2371_v34  ;;  %v3250_v49 = vadd.f32 %v3220_v5, %v3152_v19  ;;  %v1190_v0 = vpop.f32.mrb[29].mxu1 }
 0x19c   : > { %v2991_v17 = vpack.c.bf16 %v2403_v58, %v2402_v23  ;;  %v2401_v11 = vsel %vm2337_vm0, %v2305_v24, %v2369_v12  ;;  %v3251_v10 = vadd.f32 %v2226_v26, %v1190_v0  ;;  %v3153_v47 = vpop.f32.mrb[30].mxu1 }
 0x19d   : > { %v2986_v35 = vpack.c.bf16 %v2401_v11, %v2400_v46  ;;  %v2310_v27 = vadd.f32 %v3250_v49, %v4146_v57  ;;  %v3252_v45 = vadd.f32 %v3221_v53, %v3153_v47  ;;  %v1193_v54 = vpop.f32.mrb[31].mxu1 }
 0x19e   : > { %3015 = vst [vmem:[%s4156_s6 + $0x68] sm:$0xff] %v2991_v17   ;;  %v2308_v29 = vadd.f32 %v3251_v10, %v4146_v57  ;;  %v3253_v3 = vadd.f32 %v2229_v30, %v1193_v54 }
 0x19f   : > { %3014 = vst [vmem:[%s4156_s6 + $0x60] sm:$0xff] %v2986_v35   ;;  %v2374_v41 = vmul.f32 0.2, %v2310_v27  ;;  %v2311_v20 = vadd.f32 %v3252_v45, %v4146_v57  ;;  %vm2342_vm1 = vcmp.ge.f32.partialorder %v2310_v27, 0.0 }
 0x1a0   : > { %v2372_v4 = vmul.f32 0.2, %v2308_v29  ;;  %v2309_v52 = vadd.f32 %v3253_v3, %v4146_v57  ;;  %vm2340_vm2 = vcmp.ge.f32.partialorder %v2308_v29, 0.0 }
 0x1a1   : > { %vm2343_vm3 = vcmp.ge.f32.partialorder %v2311_v20, 0.0  ;;  %v2375_v15 = vmul.f32 0.2, %v2311_v20  ;;  %v2406_v7 = vsel %vm2342_vm1, %v2310_v27, %v2374_v41 }
 0x1a2   : > { %vm2341_vm4 = vcmp.ge.f32.partialorder %v2309_v52, 0.0  ;;  %v2373_v32 = vmul.f32 0.2, %v2309_v52  ;;  %v2404_v16 = vsel %vm2340_vm2, %v2308_v29, %v2372_v4 }
 0x1a3   : > { %v2407_v1 = vsel %vm2343_vm3, %v2311_v20, %v2375_v15 }
 0x1a4   : > { %v3001_v2 = vpack.c.bf16 %v2407_v1, %v2406_v7  ;;  %v2405_v18 = vsel %vm2341_vm4, %v2309_v52, %v2373_v32 }
 0x1a5   : > { %v2996_v36 = vpack.c.bf16 %v2405_v18, %v2404_v16 }
 0x1a6   : > { %3017 = vst [vmem:[%s4156_s6 + $0x78] sm:$0xff] %v3001_v2  }
 0x1a7   : > { %3016 = vst [vmem:[%s4156_s6 + $0x70] sm:$0xff] %v2996_v36  }
 0x1a8 PF: > { %s13_s14 = sadd.s32 1, %s3410_s14   ;;  %s4346_s12 = smov %s3406_s13 }
 0x1a9   : > { %p10_p5 = scmp.ge.s32.totalorder %s13_s14, 4   ;;  %s4347_s13 = smov %s4349_s15 }
 0x1ab   :  { %12 = sbr.rel (!%p10_p5) target bundleno = 2 (0x2), region = 67 }

// kernel: _lambda_.6
= control target key start
LH: loop header
LB: loop body
LE: loop exit
PB: predicated region body
PF: predicated region fallthrough
CT: control target
= control target key end

     0   :  { %s3787_s15 = smov 0   ;;  %s3789_s16 = smov 0   ;;  %s4627_s0 = inlined_call_operand.vmem [shape: bf16[2,9,9,512], index: 0, kind: input, shape index: {}]   ;;  %s4628_s1 = inlined_call_operand.vmem [shape: bf16[4,512,128], index: 1, kind: input, shape index: {}]   ;;  %s4629_s2 = inlined_call_operand.vmem [shape: f32[1,128], index: 2, kind: input, shape index: {}]   ;;  %s4630_s3 = inlined_call_operand.vmem [shape: bf16[2,8,8,128], index: 3, kind: output, shape index: {0}]   ;;  %s4631_s4 = inlined_call_operand.vmem [shape: f32[2,1,2,128], index: 4, kind: output, shape index: {1}]  }
   0x1   :  { %s3791_s17 = smov 0  }
   0x2 LB: > { %s27_s18 = sadd.s32 1, %s3756_s16  ;;  %p2817_p0 = scmp.ge.s32.totalorder %s3760_s17, 1  ;;  %s3760_s17 = sphi %s3791_s17, %s15_s17   ;;  %s3756_s16 = sphi %s3789_s16, %s4635_s16   ;;  %s3752_s15 = sphi %s3787_s15, %s4634_s15  }
   0x3   : > { %p29_p1 = scmp.ge.s32.totalorder %s27_s18, 2  ;;  %p181_p2 = scmp.lt.s32.totalorder %s3760_s17, 3 }
   0x5   : > { %s4637_s18 = smov (%p29_p1, %s27_s18), 0  ;;  %p182_p3 = pnand %p2817_p0, %p181_p2 }
   0x6   : > { %v3610_v0 = vld [vmem:[%s4628_s1 + $0x140] sm:$0xff] (!%p182_p3)   ;;  %v3614_v4 = vld [vmem:[%s4628_s1 + $0x148] sm:$0xff] (!%p182_p3)   ;;  %v3618_v8 = vld [vmem:[%s4628_s1 + $0x150] sm:$0xff] (!%p182_p3)   ;;  %p218_p4 = scmp.lt.s32.totalorder (!%p182_p3), %s3752_s15, 1  ;;  %vm406_vm0 = vsmask.f32 (!%p182_p3), 3328 }
   0x7   : > { %185 = sbr.rel (%p182_p3) target bundleno = 410 (0x19a), region = 32  ;;  %v3611_v1 = vld [vmem:[%s4628_s1 + $0x1c0] sm:$0xff] (!%p182_p3)   ;;  %3265 = vmatprep.subr.bf16.mxu0 (!%p182_p3), %v3610_v0  ;;  %v3615_v5 = vld [vmem:[%s4628_s1 + $0x1c8] sm:$0xff] (!%p182_p3)   ;;  %v3619_v9 = vld [vmem:[%s4628_s1 + $0x1d0] sm:$0xff] (!%p182_p3)   ;;  %vm407_vm1 = vsmask.f32 (!%p182_p3), 7440 }
   0x8   : > { %v3612_v2 = vld [vmem:[%s4628_s1 + $0x100] sm:$0xff] (!%p182_p3)   ;;  %3305 = vmatprep.subr.bf16.mxu1 (!%p182_p3), %v3611_v1  ;;  %v3616_v6 = vld [vmem:[%s4628_s1 + $0x108] sm:$0xff] (!%p182_p3)   ;;  %v3620_v10 = vld [vmem:[%s4628_s1 + $0x110] sm:$0xff] (!%p182_p3)  }
   0x9   : > { %v3613_v3 = vld [vmem:[%s4628_s1 + $0x180] sm:$0xff] (!%p182_p3)   ;;  %3266 = vmatpush3.bf16.msra.mxu0 (!%p182_p3), %v3612_v2  ;;  %v3617_v7 = vld [vmem:[%s4628_s1 + $0x188] sm:$0xff] (!%p182_p3)   ;;  %v3621_v11 = vld [vmem:[%s4628_s1 + $0x190] sm:$0xff] (!%p182_p3)  }
   0xa   : > { %3306 = vmatpush3.bf16.msra.mxu1 (!%p182_p3), %v3613_v3  ;;  %3267 = vmatprep.subr.bf16.mxu0 (!%p182_p3), %v3614_v4  ;;  %v3622_v12 = vld [vmem:[%s4628_s1 + $0x158] sm:$0xff] (!%p182_p3)   ;;  %v3626_v16 = vld [vmem:[%s4628_s1 + $0x160] sm:$0xff] (!%p182_p3)   ;;  %v3630_v20 = vld [vmem:[%s4628_s1 + $0x168] sm:$0xff] (!%p182_p3)  }
   0xb   : > { %3307 = vmatprep.subr.bf16.mxu1 (!%p182_p3), %v3615_v5  ;;  %v3623_v13 = vld [vmem:[%s4628_s1 + $0x1d8] sm:$0xff] (!%p182_p3)   ;;  %v3627_v17 = vld [vmem:[%s4628_s1 + $0x1e0] sm:$0xff] (!%p182_p3)   ;;  %v3631_v21 = vld [vmem:[%s4628_s1 + $0x1e8] sm:$0xff] (!%p182_p3)  }
   0xc   : > { %v3624_v14 = vld [vmem:[%s4628_s1 + $0x118] sm:$0xff] (!%p182_p3)   ;;  %v3628_v18 = vld [vmem:[%s4628_s1 + $0x120] sm:$0xff] (!%p182_p3)   ;;  %v3632_v22 = vld [vmem:[%s4628_s1 + $0x128] sm:$0xff] (!%p182_p3)  }
   0xd   : > { %3268 = vmatpush3.bf16.msra.mxu0 (!%p182_p3), %v3616_v6  ;;  %v3625_v15 = vld [vmem:[%s4628_s1 + $0x198] sm:$0xff] (!%p182_p3)   ;;  %v3629_v19 = vld [vmem:[%s4628_s1 + $0x1a0] sm:$0xff] (!%p182_p3)   ;;  %v3633_v23 = vld [vmem:[%s4628_s1 + $0x1a8] sm:$0xff] (!%p182_p3)  }
   0xe   : > { %3308 = vmatpush3.bf16.msra.mxu1 %v3617_v7  ;;  %3269 = vmatprep.subr.bf16.mxu0 %v3618_v8  ;;  %s4639_s15 = smov (!%p218_p4, %s3752_s15), 1  ;;  %v3634_v24 = vld [vmem:[%s4628_s1 + $0x170] sm:$0xff]   ;;  %v3638_v28 = vld [vmem:[%s4628_s1 + $0x178] sm:$0xff]   ;;  %v3642_v56 = vld [vmem:[%s4628_s1 + $0x40] sm:$0xff]  }
   0xf   : > { %3309 = vmatprep.subr.bf16.mxu1 %v3619_v9  ;;  %v3635_v25 = vld [vmem:[%s4628_s1 + $0x1f0] sm:$0xff]   ;;  %s3585_s27 = smul.u32 288, %s4639_s15  ;;  %v3639_v29 = vld [vmem:[%s4628_s1 + $0x1f8] sm:$0xff]   ;;  %vm3940_vm2 = vmor %vm406_vm0, %vm407_vm1  ;;  %s3241_s25 = sshll.u32 %s4639_s15, 5 }
  0x10   : > { %v3636_v26 = vld [vmem:[%s4628_s1 + $0x130] sm:$0xff]   ;;  %v3640_v30 = vld [vmem:[%s4628_s1 + $0x138] sm:$0xff]   ;;  %v3643_v62 = vld [vmem:[%s4628_s1 + $0xc0] sm:$0xff]   ;;  %s4596_s28 = scalar_lea.vmem %s4630_s3, %s3241_s25  ;;  %s2821_s29 = sshll.u32 %s4639_s15, 1 }
  0x11   : > { %3270 = vmatpush3.bf16.msra.mxu0 %v3620_v10  ;;  %v3637_v27 = vld [vmem:[%s4628_s1 + $0x1b0] sm:$0xff]   ;;  %s3905_s12 = scalar_lea.vmem %s4627_s0, %s3585_s27  ;;  %v3641_v31 = vld [vmem:[%s4628_s1 + $0x1b8] sm:$0xff]   ;;  %s239_s6 = scalar_lea.vmem %s4631_s4, %s2821_s29 }
  0x12   : > { %3310 = vmatpush3.bf16.msra.mxu1 %v3621_v11  ;;  %3271 = vmatprep.subr.bf16.mxu0 %v3622_v12  ;;  %v3914_v32 = vld [vmem:[%s3905_s12] sm:$0xff]  ;;  %v247_v33 = vld [vmem:[%s3905_s12 + $0x10] sm:$0x11]  ;;  %v3926_v42 = vld [vmem:[%s3905_s12 + $0x8] sm:$0xff] }
  0x13   : > { %3311 = vmatprep.subr.bf16.mxu1 %v3623_v13  ;;  %v3918_v34 = vld [vmem:[%s3905_s12 + $0x20] sm:$0xff]  ;;  %v251_v35 = vld [vmem:[%s3905_s12 + $0x30] sm:$0x11]  ;;  %v410_v36 = vshrl.u32 %v3914_v32, 16  ;;  %v413_v37 = vshll.u32 %v3914_v32, 16  ;;  %v419_v38 = vshll.u32 %v247_v33, 16 }
  0x14   : > { %v438_v39 = vshrl.u32 %v3918_v34, 16  ;;  %v441_v40 = vshll.u32 %v3918_v34, 16  ;;  %v447_v41 = vshll.u32 %v251_v35, 16  ;;  %v3929_v43 = vld [vmem:[%s3905_s12 + $0x28] sm:$0xff]  ;;  %v248_v46 = vld [vmem:[%s3905_s12 + $0x18] sm:$0x11] }
  0x15   : > { %3272 = vmatpush3.bf16.msra.mxu0 %v3624_v14  ;;  %v412_v44 = vrot.slane %v410_v36, 4  ;;  %v415_v45 = vrot.slane %v413_v37, 5  ;;  %v252_v47 = vld [vmem:[%s3905_s12 + $0x38] sm:$0x11]  ;;  %v421_v48 = vrot.slane %v419_v38, 5  ;;  %v424_v53 = vshrl.u32 %v3926_v42, 16 }
  0x16   : > { %3312 = vmatpush3.bf16.msra.mxu1 %v3625_v15  ;;  %3273 = vmatprep.subr.bf16.mxu0 %v3626_v16  ;;  %v440_v49 = vrot.slane %v438_v39, 4  ;;  %v443_v50 = vrot.slane %v441_v40, 5  ;;  %v449_v51 = vrot.slane %v447_v41, 5  ;;  %v427_v54 = vshll.u32 %v3926_v42, 16  ;;  %v3644_v14 = vld [vmem:[%s4628_s1] sm:$0xff]   ;;  %v3646_v16 = vld [vmem:[%s4628_s1 + $0x48] sm:$0xff]  }
  0x17   : > { %3313 = vmatprep.subr.bf16.mxu1 %v3627_v17  ;;  %v416_v52 = vor.u32 %v415_v45, %v412_v44  ;;  %v433_v55 = vshll.u32 %v248_v46, 16  ;;  %v452_v59 = vshrl.u32 %v3929_v43, 16  ;;  %v455_v60 = vshll.u32 %v3929_v43, 16  ;;  %v3993_v36 = vld [vmem:[%s3905_s12 + $0x48] sm:$0xff]  ;;  %v256_v41 = vld [vmem:[%s3905_s12 + $0x58] sm:$0x11] }
  0x18   : > { %v444_v58 = vor.u32 %v443_v50, %v440_v49  ;;  %v461_v61 = vshll.u32 %v252_v47, 16  ;;  %v426_v0 = vrot.slane %v424_v53, 4  ;;  %v429_v1 = vrot.slane %v427_v54, 5  ;;  %v3996_v37 = vld [vmem:[%s3905_s12 + $0x68] sm:$0xff]  ;;  %v260_v44 = vld [vmem:[%s3905_s12 + $0x78] sm:$0x11] }
  0x19   : > { %3274 = vmatpush3.bf16.msra.mxu0 %v3628_v18  ;;  %v417_v63 = vrot.slane %v416_v52, 4  ;;  %v454_v3 = vrot.slane %v452_v59, 4  ;;  %v457_v4 = vrot.slane %v455_v60, 5  ;;  %v435_v7 = vrot.slane %v433_v55, 5  ;;  %v3645_v18 = vld [vmem:[%s4628_s1 + $0x80] sm:$0xff]   ;;  %v3649_v38 = vld [vmem:[%s4628_s1 + $0x88] sm:$0xff]  }
  0x1a   : > { %3314 = vmatpush3.bf16.msra.mxu1 %v3629_v19  ;;  %3275 = vmatprep.subr.bf16.mxu0 %v3630_v20  ;;  %v3949_v2 = vrot.slane %v444_v58, 4  ;;  %v430_v6 = vor.u32 %v429_v1, %v426_v0  ;;  %v463_v10 = vrot.slane %v461_v61, 5  ;;  %v3647_v20 = vld [vmem:[%s4628_s1 + $0xc8] sm:$0xff]   ;;  %v480_v50 = vshrl.u32 %v3993_v36, 16  ;;  %v3650_v58 = vld [vmem:[%s4628_s1 + $0x50] sm:$0xff]  }
  0x1b   : > { %3315 = vmatprep.subr.bf16.mxu1 %v3631_v21  ;;  %v422_v5 = vsel %vm3940_vm2, %v417_v63, %v421_v48  ;;  %v458_v9 = vor.u32 %v457_v4, %v454_v3  ;;  %v3648_v21 = vld [vmem:[%s4628_s1 + $0x8] sm:$0xff]   ;;  %v489_v52 = vshll.u32 %v256_v41, 16  ;;  %v508_v55 = vshrl.u32 %v3996_v37, 16  ;;  %v3651_v59 = vld [vmem:[%s4628_s1 + $0xd0] sm:$0xff]  }
  0x1c   : > { %v450_v8 = vsel %vm3940_vm2, %v3949_v2, %v449_v51  ;;  %v431_v13 = vrot.slane %v430_v6, 4  ;;  %v483_v51 = vshll.u32 %v3993_v36, 16  ;;  %v482_v60 = vrot.slane %v480_v50, 4 }
  0x1d   : > { %3276 = vmatpush3.bf16.msra.mxu0 %v3632_v22  ;;  %v2886_v11 = vcombine.low %v422_v5, %v450_v8  ;;  %v2887_v12 = vcombine.high %v422_v5, %v450_v8  ;;  %v3959_v15 = vrot.slane %v458_v9, 4  ;;  %v3979_v22 = vld [vmem:[%s3905_s12 + $0x40] sm:$0xff]  ;;  %v517_v63 = vshll.u32 %v260_v44, 16 }
  0x1e   : > { %3316 = vmatpush3.bf16.msra.mxu1 %v3633_v23  ;;  %3277 = vmatprep.subr.bf16.mxu0 %v3634_v24  ;;  %v436_v17 = vsel %vm3940_vm2, %v431_v13, %v435_v7  ;;  %v485_v61 = vrot.slane %v483_v51, 5  ;;  %v510_v3 = vrot.slane %v508_v55, 4  ;;  %v3652_v7 = vld [vmem:[%s4628_s1 + $0x10] sm:$0xff]   ;;  %v264_v51 = vld [vmem:[%s3905_s12 + $0x98] sm:$0x11] }
  0x1f   : > { %3317 = vmatprep.subr.bf16.mxu1 %v3635_v25  ;;  %921 = vmatprep.mubr.bf16.mxu0 %v2887_v12  ;;  %v464_v19 = vsel %vm3940_vm2, %v3959_v15, %v463_v10  ;;  %v255_v25 = vld [vmem:[%s3905_s12 + $0x50] sm:$0x11]  ;;  %v519_v6 = vrot.slane %v517_v63, 5  ;;  %v3081_v12 = vcombine.high %v3929_v43, %v3993_v36 }
  0x20   : > { %v2888_v23 = vcombine.low %v436_v17, %v464_v19  ;;  %v2889_v24 = vcombine.high %v436_v17, %v464_v19  ;;  %v486_v5 = vor.u32 %v485_v61, %v482_v60  ;;  %v3654_v17 = vld [vmem:[%s4628_s1 + $0x58] sm:$0xff]   ;;  %v545_v61 = vshll.u32 %v264_v51, 16 }
  0x21   : > { %3278 = vmatpush3.bf16.msra.mxu0 %v3636_v26  ;;  %v3983_v26 = vld [vmem:[%s3905_s12 + $0x60] sm:$0xff] }
  0x22   : > { %3318 = vmatpush3.bf16.msra.mxu1 %v3637_v27  ;;  %3279 = vmatprep.subr.bf16.mxu0 %v3638_v28  ;;  %v259_v27 = vld [vmem:[%s3905_s12 + $0x70] sm:$0x11]  ;;  %v466_v28 = vshrl.u32 %v3979_v22, 16  ;;  %v494_v33 = vshrl.u32 %v3983_v26, 16  ;;  %v497_v35 = vshll.u32 %v3983_v26, 16 }
  0x23   : > { %3319 = vmatprep.subr.bf16.mxu1 %v3639_v29  ;;  %v3079_v29 = vcombine.high %v3918_v34, %v3979_v22  ;;  %986 = vmatprep.mubr.bf16.mxu1 %v2889_v24  ;;  %v503_v40 = vshll.u32 %v259_v27, 16  ;;  %v3656_v24 = vld [vmem:[%s4628_s1 + $0x18] sm:$0xff]  }
  0x24   : > { %v468_v39 = vrot.slane %v466_v28, 4  ;;  %v496_v47 = vrot.slane %v494_v33, 4  ;;  %v499_v48 = vrot.slane %v497_v35, 5  ;;  %v3657_v27 = vld [vmem:[%s4628_s1 + $0x98] sm:$0xff]   ;;  %v4058_v28 = vld [vmem:[%s3905_s12 + $0x80] sm:$0xff] }
  0x25   : > { %3280 = vmatpush3.bf16.msra.mxu0 %v3640_v30  ;;  %v469_v30 = vshll.u32 %v3979_v22, 16  ;;  %v505_v49 = vrot.slane %v503_v40, 5  ;;  %v263_v33 = vld [vmem:[%s3905_s12 + $0x90] sm:$0x11]  ;;  %v4062_v35 = vld [vmem:[%s3905_s12 + $0xa0] sm:$0xff]  ;;  %v3083_v40 = vcombine.high %v3983_v26, %v4058_v28  ;;  %v525_v41 = vshll.u32 %v4058_v28, 16 }
  0x26   : > { %3320 = vmatpush3.bf16.msra.mxu1 %v3641_v31  ;;  %3345 = vmatprep.subr.bf16.mxu0 %v3642_v56  ;;  %v475_v31 = vshll.u32 %v255_v25, 16  ;;  %v500_v54 = vor.u32 %v499_v48, %v496_v47  ;;  %v511_v56 = vshll.u32 %v3996_v37, 16  ;;  %v531_v44 = vshll.u32 %v263_v33, 16  ;;  %v4072_v47 = vld [vmem:[%s3905_s12 + $0x88] sm:$0xff] }
  0x27   : > { %3385 = vmatprep.subr.bf16.mxu1 %v3643_v62  ;;  %v471_v45 = vrot.slane %v469_v30, 5  ;;  %v491_v62 = vrot.slane %v489_v52, 5  ;;  %v4075_v48 = vld [vmem:[%s3905_s12 + $0xa8] sm:$0xff]  ;;  %v268_v52 = vld [vmem:[%s3905_s12 + $0xb8] sm:$0x11]  ;;  %v539_v60 = vshll.u32 %v4072_v47, 16  ;;  %v3085_v33 = vcombine.high %v3996_v37, %v4072_v47 }
  0x28   : > { %922 = vmatmul.mubr.bf16.vlgmr.msra.gmra.mrb[0].mxu0 %v2886_v11  ;;  %v477_v46 = vrot.slane %v475_v31, 5  ;;  %v4015_v1 = vrot.slane %v500_v54, 4  ;;  %v513_v4 = vrot.slane %v511_v56, 5  ;;  %v3653_v11 = vld [vmem:[%s4628_s1 + $0x90] sm:$0xff]   ;;  %v533_v54 = vrot.slane %v531_v44, 5  ;;  %v3662_v44 = vld [vmem:[%s4628_s1 + $0x68] sm:$0xff]  }
  0x29   : > { %3346 = vmatpush3.bf16.msra.mxu0 %v3644_v14  ;;  %987 = vmatmul.mubr.bf16.vlgmr.msra.gmra.mrb[0].mxu1 %v2888_v23  ;;  %v472_v53 = vor.u32 %v471_v45, %v468_v39  ;;  %v4031_v14 = vrot.slane %v486_v5, 4  ;;  %v522_v39 = vshrl.u32 %v4058_v28, 16  ;;  %v550_v45 = vshrl.u32 %v4062_v35, 16  ;;  %v3658_v5 = vld [vmem:[%s4628_s1 + $0x60] sm:$0xff]  }
  0x2a   : > { %3347 = vmatprep.subr.bf16.mxu0 %v3646_v16  ;;  %3386 = vmatpush3.bf16.msra.mxu1 %v3645_v18  ;;  %v506_v9 = vsel %vm3940_vm2, %v4015_v1, %v505_v49  ;;  %v514_v10 = vor.u32 %v513_v4, %v510_v3  ;;  %v3078_v18 = vcombine.low %v3918_v34, %v3979_v22  ;;  %v564_v3 = vshrl.u32 %v4075_v48, 16 }
  0x2b   : > { %3387 = vmatprep.subr.bf16.mxu1 %v3647_v20  ;;  %v4013_v0 = vrot.slane %v472_v53, 4  ;;  %v3655_v20 = vld [vmem:[%s4628_s1 + $0xd8] sm:$0xff]   ;;  %v492_v23 = vsel %vm3940_vm2, %v4031_v14, %v491_v62  ;;  %v524_v49 = vrot.slane %v522_v39, 4  ;;  %v527_v53 = vrot.slane %v525_v41, 5 }
  0x2c   : > { %v4038_v19 = vrot.slane %v514_v10, 4  ;;  %v552_v55 = vrot.slane %v550_v45, 4  ;;  %v567_v4 = vshll.u32 %v4075_v48, 16  ;;  %v573_v10 = vshll.u32 %v268_v52, 16  ;;  %v3664_v52 = vld [vmem:[%s4628_s1 + $0x28] sm:$0xff]  }
  0x2d   : > { %3348 = vmatpush3.bf16.msra.mxu0 %v3648_v21  ;;  %v478_v8 = vsel %vm3940_vm2, %v4013_v0, %v477_v46  ;;  %v3080_v21 = vcombine.low %v3929_v43, %v3993_v36  ;;  %v553_v46 = vshll.u32 %v4062_v35, 16  ;;  %v528_v62 = vor.u32 %v527_v53, %v524_v49  ;;  %v3663_v49 = vld [vmem:[%s4628_s1 + $0xe8] sm:$0xff]  }
  0x2e   : > { %3349 = vmatprep.subr.bf16.mxu0 %v3650_v58  ;;  %3388 = vmatpush3.bf16.msra.mxu1 %v3649_v38  ;;  %v2891_v13 = vcombine.high %v478_v8, %v506_v9  ;;  %v2890_v16 = vcombine.low %v478_v8, %v506_v9  ;;  %v520_v25 = vsel %vm3940_vm2, %v4038_v19, %v519_v6  ;;  %v267_v38 = vld [vmem:[%s3905_s12 + $0xb0] sm:$0x11]  ;;  %v3659_v6 = vld [vmem:[%s4628_s1 + $0xe0] sm:$0xff]   ;;  %v541_v8 = vrot.slane %v539_v60, 5 }
  0x2f   : > { %3389 = vmatprep.subr.bf16.mxu1 %v3651_v59  ;;  %v2893_v30 = vcombine.high %v492_v23, %v520_v25  ;;  %v2892_v31 = vcombine.low %v492_v23, %v520_v25  ;;  %v559_v50 = vshll.u32 %v267_v38, 16  ;;  %v555_v56 = vrot.slane %v553_v46, 5  ;;  %v4138_v60 = vld [vmem:[%s3905_s12 + $0xe0] sm:$0xff] }
  0x30   : > { %929 = vmatprep.mubr.bf16.mxu0 %v2891_v13  ;;  %v536_v59 = vshrl.u32 %v4072_v47, 16  ;;  %v547_v9 = vrot.slane %v545_v61, 5  ;;  %v575_v23 = vrot.slane %v573_v10, 5  ;;  %v3082_v45 = vcombine.low %v3983_v26, %v4058_v28  ;;  %v275_v61 = vld [vmem:[%s3905_s12 + $0xf0] sm:$0x11] }
  0x31   : > { %3350 = vmatpush3.bf16.msra.mxu0 %v3652_v7  ;;  %994 = vmatprep.mubr.bf16.mxu1 %v2893_v30  ;;  %v561_v58 = vrot.slane %v559_v50, 5  ;;  %v556_v63 = vor.u32 %v555_v56, %v552_v55  ;;  %v3084_v50 = vcombine.low %v3996_v37, %v4072_v47  ;;  %v4134_v55 = vld [vmem:[%s3905_s12 + $0xc0] sm:$0xff]  ;;  %v272_v10 = vld [vmem:[%s3905_s12 + $0xd8] sm:$0x11] }
  0x32   : > { %3390 = vmatpush3.bf16.msra.mxu1 %v3653_v11  ;;  %930 = vmatmul.mubr.bf16.gmra.mrb[4].mxu0 %v2890_v16  ;;  %v538_v7 = vrot.slane %v536_v59, 4  ;;  %v4089_v11 = vrot.slane %v528_v62, 4  ;;  %v566_v16 = vrot.slane %v564_v3, 4  ;;  %v271_v59 = vld [vmem:[%s3905_s12 + $0xd0] sm:$0x11]  ;;  %v578_v62 = vshrl.u32 %v4134_v55, 16 }
  0x33   : > { %3351 = vmatprep.subr.bf16.mxu0 %v3654_v17  ;;  %3391 = vmatprep.subr.bf16.mxu1 %v3655_v20  ;;  %v4091_v13 = vrot.slane %v556_v63, 4  ;;  %v569_v17 = vrot.slane %v567_v4, 5  ;;  %v581_v63 = vshll.u32 %v4134_v55, 16  ;;  %v587_v3 = vshll.u32 %v271_v59, 16 }
  0x34   : > { %995 = vmatmul.mubr.bf16.gmra.mrb[4].mxu1 %v2892_v31  ;;  %v542_v20 = vor.u32 %v541_v8, %v538_v7  ;;  %v534_v25 = vsel %vm3940_vm2, %v4089_v11, %v533_v54  ;;  %v3661_v31 = vld [vmem:[%s4628_s1 + $0xa0] sm:$0xff]   ;;  %v3665_v54 = vld [vmem:[%s4628_s1 + $0xa8] sm:$0xff]   ;;  %v606_v4 = vshrl.u32 %v4138_v60, 16  ;;  %v580_v8 = vrot.slane %v578_v62, 4 }
  0x35   : > { %3352 = vmatpush3.bf16.msra.mxu0 %v3656_v24  ;;  %v3660_v24 = vld [vmem:[%s4628_s1 + $0x20] sm:$0xff]   ;;  %v570_v30 = vor.u32 %v569_v17, %v566_v16  ;;  %v4149_v7 = vld [vmem:[%s3905_s12 + $0xe8] sm:$0xff]  ;;  %v276_v16 = vld [vmem:[%s3905_s12 + $0xf8] sm:$0x11]  ;;  %v583_v17 = vrot.slane %v581_v63, 5 }
  0x36   : > { %3392 = vmatpush3.bf16.msra.mxu1 %v3657_v27  ;;  %3353 = vmatprep.subr.bf16.mxu0 %v3658_v5  ;;  %v562_v27 = vsel %vm3940_vm2, %v4091_v13, %v561_v58  ;;  %v4107_v39 = vrot.slane %v542_v20, 4  ;;  %v609_v5 = vshll.u32 %v4138_v60, 16  ;;  %v589_v20 = vrot.slane %v587_v3, 5 }
  0x37   : > { %3393 = vmatprep.subr.bf16.mxu1 %v3659_v6  ;;  %v2895_v38 = vcombine.high %v534_v25, %v562_v27  ;;  %v2894_v41 = vcombine.low %v534_v25, %v562_v27  ;;  %v4114_v46 = vrot.slane %v570_v30, 4  ;;  %v4146_v6 = vld [vmem:[%s3905_s12 + $0xc8] sm:$0xff] }
  0x38   : > { %v548_v51 = vsel %vm3940_vm2, %v4107_v39, %v547_v9  ;;  %v615_v9 = vshll.u32 %v275_v61, 16  ;;  %v592_v27 = vshrl.u32 %v4146_v6, 16  ;;  %v595_v30 = vshll.u32 %v4146_v6, 16 }
  0x39   : > { %3354 = vmatpush3.bf16.msra.mxu0 %v3660_v24  ;;  %937 = vmatprep.mubr.bf16.mxu0 %v2895_v38  ;;  %v576_v53 = vsel %vm3940_vm2, %v4114_v46, %v575_v23  ;;  %v608_v23 = vrot.slane %v606_v4, 4  ;;  %v611_v24 = vrot.slane %v609_v5, 5  ;;  %v584_v38 = vor.u32 %v583_v17, %v580_v8  ;;  %v3668_v4 = vld [vmem:[%s4628_s1 + $0x30] sm:$0xff]  }
  0x3a   : > { %3394 = vmatpush3.bf16.msra.mxu1 %v3661_v31  ;;  %3355 = vmatprep.subr.bf16.mxu0 %v3662_v44  ;;  %v2897_v56 = vcombine.high %v548_v51, %v576_v53  ;;  %v2896_v58 = vcombine.low %v548_v51, %v576_v53  ;;  %v617_v25 = vrot.slane %v615_v9, 5  ;;  %v601_v31 = vshll.u32 %v272_v10, 16  ;;  %v3666_v51 = vld [vmem:[%s4628_s1 + $0x70] sm:$0xff]  }
  0x3b   : > { %938 = vmatmul.mubr.bf16.gmra.mrb[8].mxu0 %v2894_v41  ;;  %3395 = vmatprep.subr.bf16.mxu1 %v3663_v49  ;;  %v612_v41 = vor.u32 %v611_v24, %v608_v23  ;;  %v620_v44 = vshrl.u32 %v4149_v7, 16  ;;  %v623_v49 = vshll.u32 %v4149_v7, 16  ;;  %v594_v53 = vrot.slane %v592_v27, 4  ;;  %v3669_v17 = vld [vmem:[%s4628_s1 + $0xb0] sm:$0xff]  }
  0x3c   : > { %1002 = vmatprep.mubr.bf16.mxu1 %v2897_v56  ;;  %v629_v56 = vshll.u32 %v276_v16, 16  ;;  %v603_v3 = vrot.slane %v601_v31, 5  ;;  %v2935_v5 = vcombine.high %v3914_v32, %v3918_v34 }
  0x3d   : > { %3356 = vmatpush3.bf16.msra.mxu0 %v3664_v52  ;;  %1003 = vmatmul.mubr.bf16.gmra.mrb[8].mxu1 %v2896_v58  ;;  %v3667_v52 = vld [vmem:[%s4628_s1 + $0xf0] sm:$0xff]   ;;  %v4163_v58 = vrot.slane %v584_v38, 4  ;;  %v4165_v59 = vrot.slane %v612_v41, 4  ;;  %v622_v61 = vrot.slane %v620_v44, 4  ;;  %v625_v62 = vrot.slane %v623_v49, 5  ;;  %v3672_v44 = vld [vmem:[%s4628_s1 + $0x38] sm:$0xff]  }
  0x3e   : > { %3396 = vmatpush3.bf16.msra.mxu1 %v3665_v54  ;;  %v597_v54 = vrot.slane %v595_v30, 5  ;;  %3357 = vmatprep.subr.bf16.mxu0 %v3666_v51  ;;  %v631_v16 = vrot.slane %v629_v56, 5  ;;  %v3670_v30 = vld [vmem:[%s4628_s1 + $0x78] sm:$0xff]   ;;  %v3088_v38 = vcombine.low %v4075_v48, %v4146_v6  ;;  %v3674_v56 = vld [vmem:[%s4628_s1 + $0x240] sm:$0xff]  }
  0x3f   : > { %3397 = vmatprep.subr.bf16.mxu1 %v3667_v52  ;;  %v590_v8 = vsel %vm3940_vm2, %v4163_v58, %v589_v20  ;;  %v618_v9 = vsel %vm3940_vm2, %v4165_v59, %v617_v25  ;;  %v626_v10 = vor.u32 %v625_v62, %v622_v61  ;;  %v3086_v20 = vcombine.low %v4062_v35, %v4134_v55  ;;  %v3671_v25 = vld [vmem:[%s4628_s1 + $0xf8] sm:$0xff]   ;;  %v3675_v61 = vld [vmem:[%s4628_s1 + $0x2c0] sm:$0xff]  }
  0x40   : > { %v598_v63 = vor.u32 %v597_v54, %v594_v53  ;;  %v2899_v23 = vcombine.high %v590_v8, %v618_v9  ;;  %v2898_v27 = vcombine.low %v590_v8, %v618_v9  ;;  %v3673_v51 = vld [vmem:[%s4628_s1 + $0xb8] sm:$0xff]   ;;  %v2937_v54 = vcombine.high %v3926_v42, %v3929_v43  ;;  %v3680_v8 = vld [vmem:[%s4628_s1 + $0x208] sm:$0xff]  }
  0x41   : > { %3358 = vmatpush3.bf16.msra.mxu0 %v3668_v4  ;;  %v4188_v31 = vrot.slane %v626_v10, 4  ;;  %v2934_v62 = vcombine.low %v3914_v32, %v3918_v34  ;;  %v3678_v4 = vld [vmem:[%s4628_s1 + $0x248] sm:$0xff]   ;;  %v3677_v32 = vld [vmem:[%s4628_s1 + $0x280] sm:$0xff]   ;;  %v2941_v10 = vcombine.high %v3993_v36, %v3996_v37 }
  0x42   : > { %v4181_v24 = vrot.slane %v598_v63, 4  ;;  %3398 = vmatpush3.bf16.msra.mxu1 %v3669_v17  ;;  %945 = vmatprep.mubr.bf16.mxu0 %v2899_v23  ;;  %v3676_v63 = vld [vmem:[%s4628_s1 + $0x200] sm:$0xff]   ;;  %v3679_v9 = vld [vmem:[%s4628_s1 + $0x2c8] sm:$0xff]   ;;  %v2938_v17 = vcombine.low %v3979_v22, %v3983_v26  ;;  %v3683_v23 = vld [vmem:[%s4628_s1 + $0x2d0] sm:$0xff]  }
  0x43   : > { %3359 = vmatprep.subr.bf16.mxu0 %v3670_v30  ;;  %v632_v49 = vsel %vm3940_vm2, %v4188_v31, %v631_v16  ;;  %946 = vmatmul.mubr.bf16.gmra.mrb[12].mxu0 %v2898_v27  ;;  %v3682_v16 = vld [vmem:[%s4628_s1 + $0x250] sm:$0xff]   ;;  %v3686_v30 = vld [vmem:[%s4628_s1 + $0x258] sm:$0xff]   ;;  %v3713_v34 = vld [vmem:[%s4628_s1 + $0x388] sm:$0xff]  }
  0x44   : > { %v604_v41 = vsel %vm3940_vm2, %v4181_v24, %v603_v3  ;;  %3399 = vmatprep.subr.bf16.mxu1 %v3671_v25  ;;  %1323 = vmatprep.mubr.bf16.mxu0 %v2935_v5  ;;  %v2939_v3 = vcombine.high %v3979_v22, %v3983_v26  ;;  %v2936_v5 = vcombine.low %v3926_v42, %v3929_v43  ;;  %v3681_v42 = vld [vmem:[%s4628_s1 + $0x288] sm:$0xff]   ;;  %v3684_v27 = vld [vmem:[%s4628_s1 + $0x210] sm:$0xff]   ;;  %v3718_v43 = vld [vmem:[%s4628_s1 + $0x358] sm:$0xff]  }
  0x45   : > { %v2901_v52 = vcombine.high %v604_v41, %v632_v49  ;;  %v2900_v53 = vcombine.low %v604_v41, %v632_v49  ;;  %3360 = vmatpush3.bf16.msra.mxu0 %v3672_v44  ;;  %v2943_v25 = vcombine.high %v4058_v28, %v4062_v35  ;;  %v2940_v41 = vcombine.low %v3993_v36, %v3996_v37  ;;  %v3685_v44 = vld [vmem:[%s4628_s1 + $0x290] sm:$0xff]   ;;  %v3688_v49 = vld [vmem:[%s4628_s1 + $0x218] sm:$0xff]   ;;  %v3725_v37 = vld [vmem:[%s4628_s1 + $0x3a0] sm:$0xff]  }
  0x46   : > { %3400 = vmatpush3.bf16.msra.mxu1 %v3673_v51  ;;  %3425 = vmatprep.subr.bf16.mxu0 %v3674_v56  ;;  %v3687_v51 = vld [vmem:[%s4628_s1 + $0x2d8] sm:$0xff]   ;;  %v2942_v56 = vcombine.low %v4058_v28, %v4062_v35  ;;  %v3714_v22 = vld [vmem:[%s4628_s1 + $0x350] sm:$0xff]   ;;  %v3087_v36 = vcombine.high %v4062_v35, %v4134_v55  ;;  %v3089_v26 = vcombine.high %v4075_v48, %v4146_v6  ;;  %v3727_v35 = vld [vmem:[%s4628_s1 + $0x3e8] sm:$0xff]  }
  0x47   : > { %1010 = vmatprep.mubr.bf16.mxu1 %v2901_v52  ;;  %3465 = vmatprep.subr.bf16.mxu1 %v3675_v61  ;;  %v2945_v52 = vcombine.high %v4072_v47, %v4075_v48  ;;  %v3691_v61 = vld [vmem:[%s4628_s1 + $0x2e0] sm:$0xff]   ;;  %v3721_v28 = vld [vmem:[%s4628_s1 + $0x398] sm:$0xff]  }
  0x48   : > { %1011 = vmatmul.mubr.bf16.gmra.mrb[12].mxu1 %v2900_v53  ;;  %v3689_v53 = vld [vmem:[%s4628_s1 + $0x298] sm:$0xff]  }
  0x49   : > { %1388 = vmatprep.mubr.bf16.mxu1 %v2937_v54  ;;  %v3690_v54 = vld [vmem:[%s4628_s1 + $0x260] sm:$0xff]  }
  0x4b   : > { %1324 = vmatmul.mubr.bf16.vlgmr.msra.gmra.mrb[16].mxu0 %v2934_v62  ;;  %v3692_v62 = vld [vmem:[%s4628_s1 + $0x220] sm:$0xff]  }
  0x4c   : > { %3426 = vmatpush3.bf16.msra.mxu0 %v3676_v63  ;;  %1331 = vmatprep.mubr.bf16.mxu0 %v2939_v3  ;;  %v3694_v63 = vld [vmem:[%s4628_s1 + $0x268] sm:$0xff]   ;;  %v2947_v3 = vcombine.high %v4134_v55, %v4138_v60 }
  0x4d   : > { %3427 = vmatprep.subr.bf16.mxu0 %v3678_v4  ;;  %v2944_v4 = vcombine.low %v4072_v47, %v4075_v48  ;;  %v3010_v47 = vld [vmem:[%s3905_s12 + $0x100] sm:$0xff]  ;;  %v3734_v48 = vld [vmem:[%s4628_s1 + $0x378] sm:$0xff]  }
  0x50   : > { %1389 = vmatmul.mubr.bf16.vlgmr.msra.gmra.mrb[16].mxu1 %v2936_v5  ;;  %3428 = vmatpush3.bf16.msra.mxu0 %v3680_v8  ;;  %v3693_v5 = vld [vmem:[%s4628_s1 + $0x2a0] sm:$0xff]   ;;  %v3695_v8 = vld [vmem:[%s4628_s1 + $0x2e8] sm:$0xff]  }
  0x51   : > { %3466 = vmatpush3.bf16.msra.mxu1 %v3677_v32  ;;  %1396 = vmatprep.mubr.bf16.mxu1 %v2941_v10  ;;  %v3696_v32 = vld [vmem:[%s4628_s1 + $0x228] sm:$0xff]  }
  0x52   : > { %3467 = vmatprep.subr.bf16.mxu1 %v3679_v9  ;;  %3429 = vmatprep.subr.bf16.mxu0 %v3682_v16  ;;  %v2949_v9 = vcombine.high %v4146_v6, %v4149_v7  ;;  %v3697_v10 = vld [vmem:[%s4628_s1 + $0x2a8] sm:$0xff]   ;;  %v2946_v16 = vcombine.low %v4134_v55, %v4138_v60 }
  0x53   : > { %1332 = vmatmul.mubr.bf16.gmra.mrb[20].mxu0 %v2938_v17  ;;  %v3699_v17 = vld [vmem:[%s4628_s1 + $0x2f0] sm:$0xff]  }
  0x54   : > { %3430 = vmatpush3.bf16.msra.mxu0 %v3684_v27  ;;  %1339 = vmatprep.mubr.bf16.mxu0 %v2943_v25  ;;  %v3702_v27 = vld [vmem:[%s4628_s1 + $0x278] sm:$0xff]   ;;  %v3701_v25 = vld [vmem:[%s4628_s1 + $0x2b0] sm:$0xff]  }
  0x55   : > { %3468 = vmatpush3.bf16.msra.mxu1 %v3681_v42  ;;  %3431 = vmatprep.subr.bf16.mxu0 %v3686_v30  ;;  %v3698_v42 = vld [vmem:[%s4628_s1 + $0x270] sm:$0xff]   ;;  %v2948_v30 = vcombine.low %v4146_v6, %v4149_v7 }
  0x56   : > { %3469 = vmatprep.subr.bf16.mxu1 %v3683_v23  ;;  %v3700_v23 = vld [vmem:[%s4628_s1 + $0x230] sm:$0xff]  }
  0x58   : > { %1397 = vmatmul.mubr.bf16.gmra.mrb[20].mxu1 %v2940_v41  ;;  %3432 = vmatpush3.bf16.msra.mxu0 %v3688_v49  ;;  %v3704_v41 = vld [vmem:[%s4628_s1 + $0x238] sm:$0xff]  }
  0x59   : > { %3470 = vmatpush3.bf16.msra.mxu1 %v3685_v44  ;;  %1404 = vmatprep.mubr.bf16.mxu1 %v2945_v52  ;;  %v3703_v44 = vld [vmem:[%s4628_s1 + $0x2f8] sm:$0xff]   ;;  %v3707_v52 = vld [vmem:[%s4628_s1 + $0x3c0] sm:$0xff]  }
  0x5a   : > { %3471 = vmatprep.subr.bf16.mxu1 %v3687_v51  ;;  %3433 = vmatprep.subr.bf16.mxu0 %v3690_v54  ;;  %v3705_v49 = vld [vmem:[%s4628_s1 + $0x2b8] sm:$0xff]   ;;  %v3706_v51 = vld [vmem:[%s4628_s1 + $0x340] sm:$0xff]  }
  0x5b   : > { %1340 = vmatmul.mubr.bf16.gmra.mrb[24].mxu0 %v2942_v56  ;;  %v3709_v54 = vld [vmem:[%s4628_s1 + $0x380] sm:$0xff]   ;;  %v3712_v56 = vld [vmem:[%s4628_s1 + $0x308] sm:$0xff]  }
  0x5c   : > { %3434 = vmatpush3.bf16.msra.mxu0 %v3692_v62  ;;  %1347 = vmatprep.mubr.bf16.mxu0 %v2947_v3  ;;  %v3723_v62 = vld [vmem:[%s4628_s1 + $0x3e0] sm:$0xff]   ;;  %v3726_v3 = vld [vmem:[%s4628_s1 + $0x368] sm:$0xff]  }
  0x5d   : > { %3472 = vmatpush3.bf16.msra.mxu1 %v3689_v53  ;;  %3435 = vmatprep.subr.bf16.mxu0 %v3694_v63  ;;  %v3708_v53 = vld [vmem:[%s4628_s1 + $0x300] sm:$0xff]  }
  0x5e   : > { %3473 = vmatprep.subr.bf16.mxu1 %v3691_v61  ;;  %v3716_v61 = vld [vmem:[%s4628_s1 + $0x310] sm:$0xff]   ;;  %v3724_v63 = vld [vmem:[%s4628_s1 + $0x320] sm:$0xff]  }
  0x60   : > { %1405 = vmatmul.mubr.bf16.gmra.mrb[24].mxu1 %v2944_v4  ;;  %3436 = vmatpush3.bf16.msra.mxu0 %v3696_v32  ;;  %v3091_v4 = vcombine.high %v4138_v60, %v3010_v47  ;;  %v2194_v32 = vshrl.u32 %v3010_v47, 16 }
  0x61   : > { %3474 = vmatpush3.bf16.msra.mxu1 %v3693_v5  ;;  %1412 = vmatprep.mubr.bf16.mxu1 %v2949_v9  ;;  %v3011_v5 = vld [vmem:[%s3905_s12 + $0x108] sm:$0xff]  ;;  %v2197_v9 = vshll.u32 %v3010_v47, 16 }
  0x62   : > { %3475 = vmatprep.subr.bf16.mxu1 %v3695_v8  ;;  %3437 = vmatprep.subr.bf16.mxu0 %v3698_v42  ;;  %v3093_v55 = vcombine.high %v4149_v7, %v3011_v5  ;;  %v3730_v8 = vld [vmem:[%s4628_s1 + $0x370] sm:$0xff]   ;;  %v4456_v6 = vrot.slane %v2194_v32, 4  ;;  %v3005_v32 = vld [vmem:[%s3905_s12 + $0xd8] sm:$0x11] }
  0x63   : > { %1348 = vmatmul.mubr.bf16.gmra.mrb[28].mxu0 %v2946_v16  ;;  %v3731_v42 = vld [vmem:[%s4628_s1 + $0x3f0] sm:$0xff]   ;;  %v2208_v16 = vshrl.u32 %v3011_v5, 16 }
  0x64   : > { %3438 = vmatpush3.bf16.msra.mxu0 %v3700_v23  ;;  %1826 = vmatprep.mubr.bf16.mxu0 %v3079_v29  ;;  %v3710_v29 = vld [vmem:[%s4628_s1 + $0x348] sm:$0xff]   ;;  %v3733_v23 = vld [vmem:[%s4628_s1 + $0x3b0] sm:$0xff]  }
  0x65   : > { %3476 = vmatpush3.bf16.msra.mxu1 %v3697_v10  ;;  %3439 = vmatprep.subr.bf16.mxu0 %v3702_v27  ;;  %v3090_v10 = vcombine.low %v4138_v60, %v3010_v47  ;;  %v2211_v60 = vshll.u32 %v3011_v5, 16  ;;  %v4462_v27 = vrot.slane %v2197_v9, 5 }
  0x66   : > { %3477 = vmatprep.subr.bf16.mxu1 %v3699_v17  ;;  %v3732_v17 = vld [vmem:[%s4628_s1 + $0x330] sm:$0xff]  }
  0x68   : > { %1413 = vmatmul.mubr.bf16.gmra.mrb[28].mxu1 %v2948_v30  ;;  %3440 = vmatpush3.bf16.msra.mxu0 %v3704_v41  ;;  %v3736_v30 = vld [vmem:[%s4628_s1 + $0x338] sm:$0xff]   ;;  %v4468_v41 = vrot.slane %v2208_v16, 4  ;;  %v3012_v16 = vld [vmem:[%s3905_s12 + $0x110] sm:$0x11] }
  0x69   : > { %3478 = vmatpush3.bf16.msra.mxu1 %v3701_v25  ;;  %1891 = vmatprep.mubr.bf16.mxu1 %v3081_v12  ;;  %v3711_v12 = vld [vmem:[%s4628_s1 + $0x3c8] sm:$0xff]   ;;  %v2984_v25 = vld [vmem:[%s3905_s12 + $0x30] sm:$0x11] }
  0x6a   : > { %3479 = vmatprep.subr.bf16.mxu1 %v3703_v44  ;;  %3505 = vmatprep.subr.bf16.mxu0 %v3706_v51  ;;  %v2988_v44 = vld [vmem:[%s3905_s12 + $0x50] sm:$0x11]  ;;  %v2985_v51 = vld [vmem:[%s3905_s12 + $0x38] sm:$0x11] }
  0x6b   : > { %1827 = vmatmul.mubr.bf16.vlgmr.msra.gmra.mrb[32].mxu0 %v3078_v18  ;;  %v3715_v18 = vld [vmem:[%s4628_s1 + $0x3d0] sm:$0xff]  }
  0x6c   : > { %3506 = vmatpush3.bf16.msra.mxu0 %v3708_v53  ;;  %1834 = vmatprep.mubr.bf16.mxu0 %v3083_v40  ;;  %v3720_v40 = vld [vmem:[%s4628_s1 + $0x318] sm:$0xff]  }
  0x6d   : > { %3480 = vmatpush3.bf16.msra.mxu1 %v3705_v49  ;;  %3507 = vmatprep.subr.bf16.mxu0 %v3710_v29  ;;  %v2007_v49 = vshll.u32 %v2984_v25, 16  ;;  %v2989_v53 = vld [vmem:[%s3905_s12 + $0x58] sm:$0x11]  ;;  %v2021_v29 = vshll.u32 %v2985_v51, 16 }
  0x6e   : > { %3545 = vmatprep.subr.bf16.mxu1 %v3707_v52  ;;  %v2035_v52 = vshll.u32 %v2988_v44, 16  ;;  %v3013_v44 = vld [vmem:[%s3905_s12 + $0x118] sm:$0x11] }
  0x70   : > { %1892 = vmatmul.mubr.bf16.vlgmr.msra.gmra.mrb[32].mxu1 %v3080_v21  ;;  %3508 = vmatpush3.bf16.msra.mxu0 %v3712_v56  ;;  %v3717_v21 = vld [vmem:[%s4628_s1 + $0x390] sm:$0xff]   ;;  %v2009_v56 = vrot.slane %v2007_v49, 5 }
  0x71   : > { %3546 = vmatpush3.bf16.msra.mxu1 %v3709_v54  ;;  %1899 = vmatprep.mubr.bf16.mxu1 %v3085_v33  ;;  %v3719_v33 = vld [vmem:[%s4628_s1 + $0x3d8] sm:$0xff]   ;;  %v2992_v54 = vld [vmem:[%s3905_s12 + $0x70] sm:$0x11] }
  0x72   : > { %3547 = vmatprep.subr.bf16.mxu1 %v3711_v12  ;;  %3509 = vmatprep.subr.bf16.mxu0 %v3714_v22  ;;  %v2049_v12 = vshll.u32 %v2989_v53, 16  ;;  %v2063_v22 = vshll.u32 %v2992_v54, 16 }
  0x73   : > { %1835 = vmatmul.mubr.bf16.gmra.mrb[36].mxu0 %v3082_v45  ;;  %v3722_v45 = vld [vmem:[%s4628_s1 + $0x360] sm:$0xff]  }
  0x74   : > { %3510 = vmatpush3.bf16.msra.mxu0 %v3716_v61  ;;  %1842 = vmatprep.mubr.bf16.mxu0 %v3087_v36  ;;  %v3737_v61 = vld [vmem:[%s4628_s1 + $0x3b8] sm:$0xff]   ;;  %v2023_v36 = vrot.slane %v2021_v29, 5 }
  0x75   : > { %3548 = vmatpush3.bf16.msra.mxu1 %v3713_v34  ;;  %3511 = vmatprep.subr.bf16.mxu0 %v3718_v43  ;;  %v2996_v34 = vld [vmem:[%s3905_s12 + $0x90] sm:$0x11]  ;;  %v2037_v43 = vrot.slane %v2035_v52, 5 }
  0x76   : > { %3549 = vmatprep.subr.bf16.mxu1 %v3715_v18  ;;  %v4478_v18 = vrot.slane %v2211_v60, 5 }
  0x78   : > { %1900 = vmatmul.mubr.bf16.gmra.mrb[36].mxu1 %v3084_v50  ;;  %3512 = vmatpush3.bf16.msra.mxu0 %v3720_v40  ;;  %v3728_v50 = vld [vmem:[%s4628_s1 + $0x328] sm:$0xff]   ;;  %v2993_v40 = vld [vmem:[%s3905_s12 + $0x78] sm:$0x11]  ;;  %v2214_v54 = vor.u32 %v4478_v18, %v4468_v41 }
  0x79   : > { %3550 = vmatpush3.bf16.msra.mxu1 %v3717_v21  ;;  %1907 = vmatprep.mubr.bf16.mxu1 %v3089_v26  ;;  %v2091_v21 = vshll.u32 %v2996_v34, 16  ;;  %v2010_v26 = vsel %vm3940_vm2, %v3949_v2, %v2009_v56  ;;  %v2217_v34 = vshll.u32 %v3013_v44, 16 }
  0x7a   : > { %3551 = vmatprep.subr.bf16.mxu1 %v3719_v33  ;;  %3513 = vmatprep.subr.bf16.mxu0 %v3722_v45  ;;  %v2200_v33 = vor.u32 %v4462_v27, %v4456_v6  ;;  %v2065_v45 = vrot.slane %v2063_v22, 5  ;;  %v3009_v27 = vld [vmem:[%s3905_s12 + $0xf8] sm:$0x11] }
  0x7b   : > { %1843 = vmatmul.mubr.bf16.gmra.mrb[40].mxu0 %v3086_v20  ;;  %v3729_v20 = vld [vmem:[%s4628_s1 + $0x3a8] sm:$0xff]   ;;  %v2093_v47 = vrot.slane %v2091_v21, 5 }
  0x7c   : > { %3514 = vmatpush3.bf16.msra.mxu0 %v3724_v63  ;;  %1850 = vmatprep.mubr.bf16.mxu0 %v3091_v4  ;;  %v2077_v63 = vshll.u32 %v2993_v40, 16  ;;  %v3000_v4 = vld [vmem:[%s3905_s12 + $0xb0] sm:$0x11] }
  0x7d   : > { %3552 = vmatpush3.bf16.msra.mxu1 %v3721_v28  ;;  %3515 = vmatprep.subr.bf16.mxu0 %v3726_v3  ;;  %v2051_v28 = vrot.slane %v2049_v12, 5  ;;  %v2038_v3 = vsel %vm3940_vm2, %v4013_v0, %v2037_v43  ;;  %v3004_v0 = vld [vmem:[%s3905_s12 + $0xd0] sm:$0x11]  ;;  %v2094_v9 = vsel %vm3940_vm2, %v4089_v11, %v2093_v47  ;;  %v2189_v12 = vshll.u32 %v3009_v27, 16 }
  0x7e   : > { %3553 = vmatprep.subr.bf16.mxu1 %v3723_v62  ;;  %v2997_v62 = vld [vmem:[%s3905_s12 + $0x98] sm:$0x11]  ;;  %v3191_v2 = vcombine.high %v2010_v26, %v2038_v3  ;;  %v2147_v6 = vshll.u32 %v3004_v0, 16  ;;  %v2201_v43 = vrot.slane %v2200_v33, 4 }
  0x7f   : > { %v2191_v40 = vrot.slane %v2189_v12, 5 }
  0x80   : > { %1908 = vmatmul.mubr.bf16.gmra.mrb[40].mxu1 %v3088_v38  ;;  %3516 = vmatpush3.bf16.msra.mxu0 %v3728_v50  ;;  %v3092_v38 = vcombine.low %v4149_v7, %v3011_v5  ;;  %v3735_v7 = vld [vmem:[%s4628_s1 + $0x3f8] sm:$0xff]   ;;  %v2105_v50 = vshll.u32 %v2997_v62, 16  ;;  %v3190_v5 = vcombine.low %v2010_v26, %v2038_v3  ;;  %v2149_v52 = vrot.slane %v2147_v6, 5 }
  0x81   : > { %3554 = vmatpush3.bf16.msra.mxu1 %v3725_v37  ;;  %1915 = vmatprep.mubr.bf16.mxu1 %v3093_v55  ;;  %v2024_v37 = vsel %vm3940_vm2, %v3959_v15, %v2023_v36  ;;  %v2066_v55 = vsel %vm3940_vm2, %v4015_v1, %v2065_v45  ;;  %v2119_v1 = vshll.u32 %v3000_v4, 16  ;;  %v2215_v26 = vrot.slane %v2214_v54, 4 }
  0x82   : > { %3555 = vmatprep.subr.bf16.mxu1 %v3727_v35  ;;  %3517 = vmatprep.subr.bf16.mxu0 %v3730_v8  ;;  %v2052_v35 = vsel %vm3940_vm2, %v4031_v14, %v2051_v28  ;;  %v3195_v14 = vcombine.high %v2066_v55, %v2094_v9  ;;  %v2192_v33 = vsel %vm3940_vm2, %v4188_v31, %v2191_v40 }
  0x83   : > { %1851 = vmatmul.mubr.bf16.gmra.mrb[44].mxu0 %v3090_v10  ;;  %v3192_v15 = vcombine.low %v2024_v37, %v2052_v35  ;;  %v3193_v8 = vcombine.high %v2024_v37, %v2052_v35  ;;  %v2079_v10 = vrot.slane %v2077_v63, 5 }
  0x84   : > { %3518 = vmatpush3.bf16.msra.mxu0 %v3732_v17  ;;  %2509 = vmatprep.mubr.bf16.mxu0 %v3191_v2  ;;  %v2107_v17 = vrot.slane %v2105_v50, 5 }
  0x85   : > { %3556 = vmatpush3.bf16.msra.mxu1 %v3729_v20  ;;  %3519 = vmatprep.subr.bf16.mxu0 %v3734_v48  ;;  %v3001_v20 = vld [vmem:[%s3905_s12 + $0xb8] sm:$0x11]  ;;  %v3194_v48 = vcombine.low %v2066_v55, %v2094_v9  ;;  %v2080_v60 = vsel %vm3940_vm2, %v4038_v19, %v2079_v10 }
  0x86   : > { %3557 = vmatprep.subr.bf16.mxu1 %v3731_v42  ;;  %v3008_v42 = vld [vmem:[%s3905_s12 + $0xf0] sm:$0x11]  ;;  %v2108_v11 = vsel %vm3940_vm2, %v4107_v39, %v2107_v17  ;;  %v2150_v39 = vsel %vm3940_vm2, %v4163_v58, %v2149_v52  ;;  %v2219_v58 = vrot.slane %v2217_v34, 5 }
  0x87   : > { %v2175_v25 = vshll.u32 %v3008_v42, 16  ;;  %v3197_v49 = vcombine.high %v2080_v60, %v2108_v11  ;;  %v3196_v51 = vcombine.low %v2080_v60, %v2108_v11 }
  0x88   : > { %1916 = vmatmul.mubr.bf16.gmra.mrb[44].mxu1 %v3092_v38  ;;  %3520 = vmatpush3.bf16.msra.mxu0 %v3736_v30  ;;  %v2133_v38 = vshll.u32 %v3001_v20, 16  ;;  %v2121_v30 = vrot.slane %v2119_v1, 5  ;;  %v2220_v28 = vsel %vm3940_vm2, %v2215_v26, %v2219_v58 }
  0x89   : > { %3558 = vmatpush3.bf16.msra.mxu1 %v3733_v23  ;;  %2574 = vmatprep.mubr.bf16.mxu1 %v3193_v8  ;;  %v2161_v23 = vshll.u32 %v3005_v32, 16  ;;  %v2177_v18 = vrot.slane %v2175_v25, 5  ;;  %v3205_v62 = vcombine.high %v2192_v33, %v2220_v28  ;;  %v3204_v3 = vcombine.low %v2192_v33, %v2220_v28 }
  0x8a   : > { %3559 = vmatprep.subr.bf16.mxu1 %v3735_v7  ;;  %v2203_v7 = vshll.u32 %v3012_v16, 16  ;;  %v2135_v53 = vrot.slane %v2133_v38, 5  ;;  %v2122_v19 = vsel %vm3940_vm2, %v4091_v13, %v2121_v30 }
  0x8b   : > { %2510 = vmatmul.mubr.bf16.vlgmr.msra.gmra.mrb[48].mxu0 %v3190_v5  ;;  %v2163_v29 = vrot.slane %v2161_v23, 5  ;;  %v3199_v22 = vcombine.high %v2122_v19, %v2150_v39 }
  0x8c   : > { %2517 = vmatprep.mubr.bf16.mxu0 %v3195_v14  ;;  %v2136_v56 = vsel %vm3940_vm2, %v4114_v46, %v2135_v53  ;;  %v2205_v21 = vrot.slane %v2203_v7, 5  ;;  %v2178_v46 = vsel %vm3940_vm2, %v4165_v59, %v2177_v18 }
  0x8d   : > { %3560 = vmatpush3.bf16.msra.mxu1 %v3737_v61  ;;  %v2164_v13 = vsel %vm3940_vm2, %v4181_v24, %v2163_v29  ;;  %v3198_v61 = vcombine.low %v2122_v19, %v2150_v39 }
  0x8e   : > { %v3201_v36 = vcombine.high %v2136_v56, %v2164_v13  ;;  %v3200_v41 = vcombine.low %v2136_v56, %v2164_v13  ;;  %v2206_v24 = vsel %vm3940_vm2, %v2201_v43, %v2205_v21 }
  0x8f   : > { %v3203_v45 = vcombine.high %v2178_v46, %v2206_v24  ;;  %v3202_v63 = vcombine.low %v2178_v46, %v2206_v24 }
  0x90   : > { %2575 = vmatmul.mubr.bf16.vlgmr.msra.gmra.mrb[48].mxu1 %v3192_v15 }
  0x91   : > { %2582 = vmatprep.mubr.bf16.mxu1 %v3197_v49 }
  0x93   : > { %2518 = vmatmul.mubr.bf16.gmra.mrb[52].mxu0 %v3194_v48 }
  0x94   : > { %2525 = vmatprep.mubr.bf16.mxu0 %v3199_v22 }
  0x98   : > { %2583 = vmatmul.mubr.bf16.gmra.mrb[52].mxu1 %v3196_v51 }
  0x99   : > { %2590 = vmatprep.mubr.bf16.mxu1 %v3201_v36 }
  0x9b   : > { %2526 = vmatmul.mubr.bf16.gmra.mrb[56].mxu0 %v3198_v61 }
  0x9c   : > { %2533 = vmatprep.mubr.bf16.mxu0 %v3203_v45 }
  0xa0   : > { %2591 = vmatmul.mubr.bf16.gmra.mrb[56].mxu1 %v3200_v41 }
  0xa1   : > { %2598 = vmatprep.mubr.bf16.mxu1 %v3205_v62 }
  0xa3   : > { %2534 = vmatmul.mubr.bf16.gmra.mrb[60].mxu0 %v3202_v63 }
  0xa8   : > { %2599 = vmatmul.mubr.bf16.gmra.mrb[60].mxu1 %v3204_v3 }
  0xfb   : > { %v3281_v59 = vpop.f32.mrb[0].mxu0 }
  0xfc   : > { %v3282_v37 = vpop.f32.mrb[1].mxu0  ;;  %v3321_v5 = vpop.f32.mrb[0].mxu1 }
  0xfd   : > { %v3283_v47 = vadd.f32 %v3282_v37, %v3281_v59  ;;  %v3284_v50 = vpop.f32.mrb[2].mxu0  ;;  %v3322_v2 = vpop.f32.mrb[1].mxu1 }
  0xfe   : > { %v3285_v4 = vpop.f32.mrb[3].mxu0  ;;  %v3323_v57 = vadd.f32 %v3322_v2, %v3321_v5  ;;  %v3324_v35 = vpop.f32.mrb[2].mxu1 }
  0xff   : > { %v3286_v31 = vadd.f32 %v3285_v4, %v3284_v50  ;;  %v3325_v55 = vpop.f32.mrb[3].mxu1 }
 0x100   : > { %v989_v0 = vadd.f32 %v3323_v57, %v3283_v47  ;;  %v3326_v20 = vadd.f32 %v3325_v55, %v3324_v35 }
 0x102   : > { %v992_v32 = vadd.f32 %v3326_v20, %v3286_v31 }
 0x105   : > { %v3287_v15 = vpop.f32.mrb[4].mxu0 }
 0x106   : > { %v3288_v8 = vpop.f32.mrb[5].mxu0 }
 0x107   : > { %v3289_v9 = vadd.f32 %v3288_v8, %v3287_v15  ;;  %v3290_v10 = vpop.f32.mrb[6].mxu0  ;;  %v3327_v16 = vpop.f32.mrb[4].mxu1 }
 0x108   : > { %v3291_v42 = vpop.f32.mrb[7].mxu0  ;;  %v3328_v17 = vpop.f32.mrb[5].mxu1 }
 0x109   : > { %v3292_v14 = vadd.f32 %v3291_v42, %v3290_v10  ;;  %v3329_v48 = vadd.f32 %v3328_v17, %v3327_v16  ;;  %v3330_v1 = vpop.f32.mrb[6].mxu1 }
 0x10a   : > { %v3331_v60 = vpop.f32.mrb[7].mxu1 }
 0x10b   : > { %v997_v6 = vadd.f32 %v3329_v48, %v3289_v9  ;;  %v3332_v38 = vadd.f32 %v3331_v60, %v3330_v1 }
 0x10d   : > { %v1000_v23 = vadd.f32 %v3332_v38, %v3292_v14 }
 0x10e   : > { %v3293_v27 = vpop.f32.mrb[8].mxu0 }
 0x10f   : > { %v3294_v11 = vpop.f32.mrb[9].mxu0 }
 0x110   : > { %v3295_v30 = vadd.f32 %v3294_v11, %v3293_v27  ;;  %v3296_v25 = vpop.f32.mrb[10].mxu0  ;;  %v3333_v44 = vpop.f32.mrb[8].mxu1 }
 0x111   : > { %v3297_v7 = vpop.f32.mrb[11].mxu0  ;;  %v3334_v51 = vpop.f32.mrb[9].mxu1 }
 0x112   : > { %v3298_v49 = vadd.f32 %v3297_v7, %v3296_v25  ;;  %v3335_v52 = vadd.f32 %v3334_v51, %v3333_v44  ;;  %v3336_v53 = vpop.f32.mrb[10].mxu1 }
 0x113   : > { %v3337_v19 = vpop.f32.mrb[11].mxu1 }
 0x114   : > { %v1005_v29 = vadd.f32 %v3335_v52, %v3295_v30  ;;  %v3338_v54 = vadd.f32 %v3337_v19, %v3336_v53 }
 0x116   : > { %v1008_v39 = vadd.f32 %v3338_v54, %v3298_v49  ;;  %v3299_v56 = vpop.f32.mrb[12].mxu0 }
 0x117   : > { %v3300_v12 = vpop.f32.mrb[13].mxu0 }
 0x118   : > { %v3301_v34 = vadd.f32 %v3300_v12, %v3299_v56  ;;  %v3302_v22 = vpop.f32.mrb[14].mxu0 }
 0x119   : > { %v3303_v13 = vpop.f32.mrb[15].mxu0 }
 0x11a   : > { %v3304_v43 = vadd.f32 %v3303_v13, %v3302_v22 }
 0x11b   : > { %v3339_v61 = vpop.f32.mrb[12].mxu1 }
 0x11c   : > { %v3340_v36 = vpop.f32.mrb[13].mxu1 }
 0x11d   : > { %v3341_v41 = vadd.f32 %v3340_v36, %v3339_v61  ;;  %v3342_v18 = vpop.f32.mrb[14].mxu1 }
 0x11e   : > { %v3343_v21 = vpop.f32.mrb[15].mxu1  ;;  %v3361_v58 = vpop.f32.mrb[16].mxu0 }
 0x11f   : > { %v1013_v40 = vadd.f32 %v3341_v41, %v3301_v34  ;;  %v3344_v26 = vadd.f32 %v3343_v21, %v3342_v18  ;;  %v3362_v46 = vpop.f32.mrb[17].mxu0 }
 0x120   : > { %v3363_v33 = vadd.f32 %v3362_v46, %v3361_v58  ;;  %v3364_v28 = vpop.f32.mrb[18].mxu0 }
 0x121   : > { %v1016_v24 = vadd.f32 %v3344_v26, %v3304_v43  ;;  %v3365_v45 = vpop.f32.mrb[19].mxu0 }
 0x122   : > { %v1326_v63 = vadd.f32 %v3363_v33, %v989_v0  ;;  %v3366_v3 = vadd.f32 %v3365_v45, %v3364_v28 }
 0x123   : > { %v3401_v62 = vpop.f32.mrb[16].mxu1 }
 0x124   : > { %v3402_v59 = vpop.f32.mrb[17].mxu1  ;;  %v1329_v50 = vadd.f32 %v3366_v3, %v992_v32 }
 0x125   : > { %v3403_v37 = vadd.f32 %v3402_v59, %v3401_v62  ;;  %v3404_v47 = vpop.f32.mrb[18].mxu1 }
 0x126   : > { %v3405_v4 = vpop.f32.mrb[19].mxu1  ;;  %v3367_v2 = vpop.f32.mrb[20].mxu0 }
 0x127   : > { %v4543_v5 = vadd.f32 %v3403_v37, %v1326_v63  ;;  %v3406_v31 = vadd.f32 %v3405_v4, %v3404_v47  ;;  %v3368_v57 = vpop.f32.mrb[21].mxu0 }
 0x128   : > { %v3369_v55 = vadd.f32 %v3368_v57, %v3367_v2  ;;  %v3370_v20 = vpop.f32.mrb[22].mxu0 }
 0x129   : > { %v4545_v35 = vadd.f32 %v3406_v31, %v1329_v50  ;;  %v3371_v15 = vpop.f32.mrb[23].mxu0 }
 0x12a   : > { %v1334_v9 = vadd.f32 %v3369_v55, %v997_v6  ;;  %v3372_v10 = vadd.f32 %v3371_v15, %v3370_v20 }
 0x12b   : > { %v3407_v8 = vpop.f32.mrb[20].mxu1 }
 0x12c   : > { %v3408_v0 = vpop.f32.mrb[21].mxu1  ;;  %v1337_v14 = vadd.f32 %v3372_v10, %v1000_v23 }
 0x12d   : > { %v3409_v42 = vadd.f32 %v3408_v0, %v3407_v8  ;;  %v3410_v16 = vpop.f32.mrb[22].mxu1 }
 0x12e   : > { %v3411_v17 = vpop.f32.mrb[23].mxu1  ;;  %v3373_v1 = vpop.f32.mrb[24].mxu0 }
 0x12f   : > { %v4547_v32 = vadd.f32 %v3409_v42, %v1334_v9  ;;  %v3412_v48 = vadd.f32 %v3411_v17, %v3410_v16  ;;  %v3374_v60 = vpop.f32.mrb[25].mxu0 }
 0x130   : > { %v3375_v27 = vadd.f32 %v3374_v60, %v3373_v1  ;;  %v3376_v11 = vpop.f32.mrb[26].mxu0 }
 0x131   : > { %v4549_v38 = vadd.f32 %v3412_v48, %v1337_v14  ;;  %v3377_v30 = vpop.f32.mrb[27].mxu0 }
 0x132   : > { %v1342_v7 = vadd.f32 %v3375_v27, %v1005_v29  ;;  %v3378_v44 = vadd.f32 %v3377_v30, %v3376_v11 }
 0x133   : > { %v3413_v25 = vpop.f32.mrb[24].mxu1 }
 0x134   : > { %v3414_v6 = vpop.f32.mrb[25].mxu1  ;;  %v1345_v52 = vadd.f32 %v3378_v44, %v1008_v39 }
 0x135   : > { %v3415_v49 = vadd.f32 %v3414_v6, %v3413_v25  ;;  %v3416_v51 = vpop.f32.mrb[26].mxu1 }
 0x136   : > { %v3417_v53 = vpop.f32.mrb[27].mxu1  ;;  %v3379_v54 = vpop.f32.mrb[28].mxu0 }
 0x137   : > { %v4551_v23 = vadd.f32 %v3415_v49, %v1342_v7  ;;  %v3418_v19 = vadd.f32 %v3417_v53, %v3416_v51  ;;  %v3380_v56 = vpop.f32.mrb[29].mxu0 }
 0x138   : > { %v3381_v34 = vadd.f32 %v3380_v56, %v3379_v54  ;;  %v3382_v22 = vpop.f32.mrb[30].mxu0 }
 0x139   : > { %v4553_v12 = vadd.f32 %v3418_v19, %v1345_v52  ;;  %v3383_v13 = vpop.f32.mrb[31].mxu0 }
 0x13a   : > { %v1350_v43 = vadd.f32 %v3381_v34, %v1013_v40  ;;  %v3384_v36 = vadd.f32 %v3383_v13, %v3382_v22 }
 0x13b   : > { %v3419_v61 = vpop.f32.mrb[28].mxu1 }
 0x13c   : > { %v3420_v29 = vpop.f32.mrb[29].mxu1  ;;  %v1353_v21 = vadd.f32 %v3384_v36, %v1016_v24 }
 0x13d   : > { %v3421_v41 = vadd.f32 %v3420_v29, %v3419_v61  ;;  %v3422_v18 = vpop.f32.mrb[30].mxu1 }
 0x13e   : > { %v3423_v26 = vpop.f32.mrb[31].mxu1  ;;  %v3441_v46 = vpop.f32.mrb[32].mxu0 }
 0x13f   : > { %v4555_v39 = vadd.f32 %v3421_v41, %v1350_v43  ;;  %v3424_v58 = vadd.f32 %v3423_v26, %v3422_v18  ;;  %v3442_v33 = vpop.f32.mrb[33].mxu0 }
 0x140   : > { %v3443_v45 = vadd.f32 %v3442_v33, %v3441_v46  ;;  %v3444_v62 = vpop.f32.mrb[34].mxu0 }
 0x141   : > { %v4557_v28 = vadd.f32 %v3424_v58, %v1353_v21  ;;  %v3445_v63 = vpop.f32.mrb[35].mxu0 }
 0x142   : > { %v3446_v59 = vadd.f32 %v3445_v63, %v3444_v62 }
 0x143   : > { %v3481_v3 = vpop.f32.mrb[32].mxu1 }
 0x144   : > { %v3482_v37 = vpop.f32.mrb[33].mxu1 }
 0x145   : > { %v3483_v40 = vadd.f32 %v3482_v37, %v3481_v3  ;;  %v3484_v47 = vpop.f32.mrb[34].mxu1 }
 0x146   : > { %v3485_v50 = vpop.f32.mrb[35].mxu1  ;;  %v3447_v24 = vpop.f32.mrb[36].mxu0 }
 0x147   : > { %v1894_v4 = vadd.f32 %v3483_v40, %v3443_v45  ;;  %v3486_v31 = vadd.f32 %v3485_v50, %v3484_v47  ;;  %v3448_v2 = vpop.f32.mrb[37].mxu0 }
 0x148   : > { %v3449_v20 = vadd.f32 %v3448_v2, %v3447_v24  ;;  %v3450_v15 = vpop.f32.mrb[38].mxu0 }
 0x149   : > { %v4560_v57 = vadd.f32 %v1894_v4, %v4543_v5  ;;  %v1897_v55 = vadd.f32 %v3486_v31, %v3446_v59  ;;  %v3451_v8 = vpop.f32.mrb[39].mxu0 }
 0x14a   : > { %v3452_v0 = vadd.f32 %v3451_v8, %v3450_v15 }
 0x14b   : > { %v4563_v9 = vadd.f32 %v1897_v55, %v4545_v35  ;;  %v3487_v10 = vpop.f32.mrb[36].mxu1 }
 0x14c   : > { %v3488_v42 = vpop.f32.mrb[37].mxu1 }
 0x14d   : > { %v3489_v16 = vadd.f32 %v3488_v42, %v3487_v10  ;;  %v3490_v14 = vpop.f32.mrb[38].mxu1 }
 0x14e   : > { %v3491_v17 = vpop.f32.mrb[39].mxu1  ;;  %v3453_v60 = vpop.f32.mrb[40].mxu0 }
 0x14f   : > { %v1902_v48 = vadd.f32 %v3489_v16, %v3449_v20  ;;  %v3492_v1 = vadd.f32 %v3491_v17, %v3490_v14  ;;  %v3454_v27 = vpop.f32.mrb[41].mxu0 }
 0x150   : > { %v3455_v30 = vadd.f32 %v3454_v27, %v3453_v60  ;;  %v3456_v25 = vpop.f32.mrb[42].mxu0 }
 0x151   : > { %v4566_v5 = vadd.f32 %v1902_v48, %v4547_v32  ;;  %v1905_v11 = vadd.f32 %v3492_v1, %v3452_v0  ;;  %v3457_v7 = vpop.f32.mrb[43].mxu0 }
 0x152   : > { %v3458_v6 = vadd.f32 %v3457_v7, %v3456_v25 }
 0x153   : > { %v4569_v35 = vadd.f32 %v1905_v11, %v4549_v38  ;;  %v3493_v44 = vpop.f32.mrb[40].mxu1 }
 0x154   : > { %v3494_v49 = vpop.f32.mrb[41].mxu1 }
 0x155   : > { %v3495_v51 = vadd.f32 %v3494_v49, %v3493_v44  ;;  %v3496_v52 = vpop.f32.mrb[42].mxu1 }
 0x156   : > { %v3497_v53 = vpop.f32.mrb[43].mxu1  ;;  %v3459_v56 = vpop.f32.mrb[44].mxu0 }
 0x157   : > { %v1910_v19 = vadd.f32 %v3495_v51, %v3455_v30  ;;  %v3498_v54 = vadd.f32 %v3497_v53, %v3496_v52  ;;  %v3460_v34 = vpop.f32.mrb[45].mxu0 }
 0x158   : > { %v3461_v13 = vadd.f32 %v3460_v34, %v3459_v56  ;;  %v3462_v61 = vpop.f32.mrb[46].mxu0 }
 0x159   : > { %v4572_v32 = vadd.f32 %v1910_v19, %v4551_v23  ;;  %v1913_v22 = vadd.f32 %v3498_v54, %v3458_v6  ;;  %v3463_v43 = vpop.f32.mrb[47].mxu0 }
 0x15a   : > { %v3464_v29 = vadd.f32 %v3463_v43, %v3462_v61 }
 0x15b   : > { %v4575_v38 = vadd.f32 %v1913_v22, %v4553_v12  ;;  %v3499_v36 = vpop.f32.mrb[44].mxu1 }
 0x15c   : > { %v3500_v41 = vpop.f32.mrb[45].mxu1 }
 0x15d   : > { %v3501_v18 = vadd.f32 %v3500_v41, %v3499_v36  ;;  %v3502_v21 = vpop.f32.mrb[46].mxu1 }
 0x15e   : > { %v3503_v26 = vpop.f32.mrb[47].mxu1  ;;  %v3521_v45 = vpop.f32.mrb[48].mxu0 }
 0x15f   : > { %v1918_v58 = vadd.f32 %v3501_v18, %v3461_v13  ;;  %v3504_v46 = vadd.f32 %v3503_v26, %v3502_v21  ;;  %v3522_v3 = vpop.f32.mrb[49].mxu0 }
 0x160   : > { %v3523_v12 = vadd.f32 %v3522_v3, %v3521_v45  ;;  %v3524_v37 = vpop.f32.mrb[50].mxu0 }
 0x161   : > { %v4578_v33 = vadd.f32 %v1918_v58, %v4555_v39  ;;  %v1921_v23 = vadd.f32 %v3504_v46, %v3464_v29  ;;  %v3525_v50 = vpop.f32.mrb[51].mxu0  ;;  %v4586_v39 = vld [vmem:[%s4629_s2] ss:$0 sm:$0xff] }
 0x162   : > { %v3526_v4 = vadd.f32 %v3525_v50, %v3524_v37 }
 0x163   : > { %v4581_v62 = vadd.f32 %v1921_v23, %v4557_v28  ;;  %v3561_v63 = vpop.f32.mrb[48].mxu1 }
 0x164   : > { %v3562_v59 = vpop.f32.mrb[49].mxu1 }
 0x165   : > { %v3563_v40 = vadd.f32 %v3562_v59, %v3561_v63  ;;  %v3564_v47 = vpop.f32.mrb[50].mxu1 }
 0x166   : > { %v3565_v31 = vpop.f32.mrb[51].mxu1  ;;  %v3527_v20 = vpop.f32.mrb[52].mxu0 }
 0x167   : > { %v2577_v24 = vadd.f32 %v3563_v40, %v3523_v12  ;;  %v3566_v2 = vadd.f32 %v3565_v31, %v3564_v47  ;;  %v3528_v0 = vpop.f32.mrb[53].mxu0 }
 0x168   : > { %v3529_v42 = vadd.f32 %v3528_v0, %v3527_v20  ;;  %v3530_v14 = vpop.f32.mrb[54].mxu0 }
 0x169   : > { %v2607_v28 = vadd.f32 %v2577_v24, %v4560_v57  ;;  %v2580_v55 = vadd.f32 %v3566_v2, %v3526_v4  ;;  %v3531_v60 = vpop.f32.mrb[55].mxu0 }
 0x16a   : > { %v3532_v57 = vadd.f32 %v3531_v60, %v3530_v14 }
 0x16b   : > { %v2622_v15 = vadd.f32 %v4586_v39, %v2607_v28  ;;  %v2608_v8 = vadd.f32 %v2580_v55, %v4563_v9  ;;  %v3567_v10 = vpop.f32.mrb[52].mxu1 }
 0x16c   : > { %v3568_v16 = vpop.f32.mrb[53].mxu1 }
 0x16d   : > { %v2623_v17 = vadd.f32 %v4586_v39, %v2608_v8  ;;  %v3569_v48 = vadd.f32 %v3568_v16, %v3567_v10  ;;  %v3570_v1 = vpop.f32.mrb[54].mxu1  ;;  %v2643_v27 = vmul.f32 %v2622_v15, %v2622_v15 }
 0x16e   : > { %v3571_v11 = vpop.f32.mrb[55].mxu1  ;;  %v3533_v52 = vpop.f32.mrb[56].mxu0 }
 0x16f   : > { %v2630_v9 = vadd.f32 %v2623_v17, %v2622_v15  ;;  %v2644_v30 = vmul.f32 %v2623_v17, %v2623_v17  ;;  %v3245_v25 = vpack.c.bf16 %v2623_v17, %v2622_v15  ;;  %v2585_v7 = vadd.f32 %v3569_v48, %v3529_v42  ;;  %v3534_v54 = vpop.f32.mrb[57].mxu0 }
 0x170   : > { %v3572_v44 = vadd.f32 %v3571_v11, %v3570_v1  ;;  %v3535_v34 = vadd.f32 %v3534_v54, %v3533_v52  ;;  %v3536_v13 = vpop.f32.mrb[58].mxu0 }
 0x171   : > { %v2651_v6 = vadd.f32 %v2644_v30, %v2643_v27  ;;  %3246 = vst [vmem:[%s4596_s28] sm:$0xff] %v3245_v25   ;;  %v2609_v49 = vadd.f32 %v2585_v7, %v4566_v5  ;;  %v3537_v41 = vpop.f32.mrb[59].mxu0 }
 0x172   : > { %v2588_v51 = vadd.f32 %v3572_v44, %v3532_v57  ;;  %v3538_v5 = vadd.f32 %v3537_v41, %v3536_v13 }
 0x173   : > { %v2624_v53 = vadd.f32 %v4586_v39, %v2609_v49  ;;  %v3573_v19 = vpop.f32.mrb[56].mxu1 }
 0x174   : > { %v2610_v56 = vadd.f32 %v2588_v51, %v4569_v35  ;;  %v3574_v22 = vpop.f32.mrb[57].mxu1 }
 0x175   : > { %v2631_v61 = vadd.f32 %v2630_v9, %v2624_v53  ;;  %v2645_v43 = vmul.f32 %v2624_v53, %v2624_v53  ;;  %v3575_v36 = vadd.f32 %v3574_v22, %v3573_v19  ;;  %v3576_v29 = vpop.f32.mrb[58].mxu1 }
 0x176   : > { %v2625_v18 = vadd.f32 %v4586_v39, %v2610_v56  ;;  %v3577_v21 = vpop.f32.mrb[59].mxu1  ;;  %v3539_v59 = vpop.f32.mrb[60].mxu0 }
 0x177   : > { %v2652_v26 = vadd.f32 %v2651_v6, %v2645_v43  ;;  %v2593_v58 = vadd.f32 %v3575_v36, %v3535_v34  ;;  %v3578_v46 = vadd.f32 %v3577_v21, %v3576_v29  ;;  %v3540_v50 = vpop.f32.mrb[61].mxu0 }
 0x178   : > { %v2632_v23 = vadd.f32 %v2631_v61, %v2625_v18  ;;  %v2646_v45 = vmul.f32 %v2625_v18, %v2625_v18  ;;  %v3250_v63 = vpack.c.bf16 %v2625_v18, %v2624_v53  ;;  %v3541_v4 = vadd.f32 %v3540_v50, %v3539_v59  ;;  %v3542_v24 = vpop.f32.mrb[62].mxu0 }
 0x179   : > { %v2611_v35 = vadd.f32 %v2593_v58, %v4572_v32  ;;  %v2596_v3 = vadd.f32 %v3578_v46, %v3538_v5  ;;  %v3543_v15 = vpop.f32.mrb[63].mxu0 }
 0x17a   : > { %v2653_v12 = vadd.f32 %v2652_v26, %v2646_v45  ;;  %3262 = vst [vmem:[%s4596_s28 + $0x8] sm:$0xff] %v3250_v63   ;;  %v3544_v8 = vadd.f32 %v3543_v15, %v3542_v24 }
 0x17b   : > { %v2626_v37 = vadd.f32 %v4586_v39, %v2611_v35  ;;  %v2612_v40 = vadd.f32 %v2596_v3, %v4575_v38  ;;  %v3579_v47 = vpop.f32.mrb[60].mxu1 }
 0x17c   : > { %v3580_v31 = vpop.f32.mrb[61].mxu1 }
 0x17d   : > { %v2633_v2 = vadd.f32 %v2632_v23, %v2626_v37  ;;  %v2647_v28 = vmul.f32 %v2626_v37, %v2626_v37  ;;  %v2627_v55 = vadd.f32 %v4586_v39, %v2612_v40  ;;  %v3581_v20 = vadd.f32 %v3580_v31, %v3579_v47  ;;  %v3582_v32 = vpop.f32.mrb[62].mxu1 }
 0x17e   : > { %v3583_v10 = vpop.f32.mrb[63].mxu1 }
 0x17f   : > { %v2654_v0 = vadd.f32 %v2653_v12, %v2647_v28  ;;  %v2634_v42 = vadd.f32 %v2633_v2, %v2627_v55  ;;  %v2648_v16 = vmul.f32 %v2627_v55, %v2627_v55  ;;  %v3255_v14 = vpack.c.bf16 %v2627_v55, %v2626_v37 }
 0x180   : > { %v2601_v38 = vadd.f32 %v3581_v20, %v3541_v4  ;;  %v3584_v17 = vadd.f32 %v3583_v10, %v3582_v32 }
 0x181   : > { %v2655_v48 = vadd.f32 %v2654_v0, %v2648_v16  ;;  %3263 = vst [vmem:[%s4596_s28 + $0x10] sm:$0xff] %v3255_v14  }
 0x182   : > { %v2613_v1 = vadd.f32 %v2601_v38, %v4578_v33  ;;  %v2604_v60 = vadd.f32 %v3584_v17, %v3544_v8  ;;  %v2664_v33 = vlaneseq }
 0x184   : > { %v2628_v27 = vadd.f32 %v4586_v39, %v2613_v1  ;;  %v2614_v57 = vadd.f32 %v2604_v60, %v4581_v62  ;;  %v2665_v62 = vshrl.u32 %v2664_v33, 7 }
 0x186   : > { %v2635_v11 = vadd.f32 %v2634_v42, %v2628_v27  ;;  %v2649_v9 = vmul.f32 %v2628_v27, %v2628_v27  ;;  %v2629_v30 = vadd.f32 %v4586_v39, %v2614_v57  ;;  %vm2666_vm3 = vcmp.eq.s32.totalorder %v2665_v62, 0 }
 0x188   : > { %v2656_v25 = vadd.f32 %v2655_v48, %v2649_v9  ;;  %v2636_v7 = vadd.f32 %v2635_v11, %v2629_v30  ;;  %v2650_v44 = vmul.f32 %v2629_v30, %v2629_v30  ;;  %v3260_v6 = vpack.c.bf16 %v2629_v30, %v2628_v27 }
 0x18a   : > { %v2637_v49 = vrot.slane %v2636_v7, 4  ;;  %v2657_v51 = vadd.f32 %v2656_v25, %v2650_v44  ;;  %3264 = vst [vmem:[%s4596_s28 + $0x18] sm:$0xff] %v3260_v6  }
 0x18c   : > { %v2638_v52 = vadd.f32 %v2637_v49, %v2636_v7  ;;  %v2658_v53 = vrot.slane %v2657_v51, 4 }
 0x18e   : > { %v2639_v19 = vrot.slane %v2638_v52, 2  ;;  %v2659_v54 = vadd.f32 %v2658_v53, %v2657_v51 }
 0x190   : > { %v2640_v56 = vadd.f32 %v2639_v19, %v2638_v52  ;;  %v2660_v34 = vrot.slane %v2659_v54, 2 }
 0x192   : > { %v2641_v22 = vrot.slane %v2640_v56, 1  ;;  %v2661_v13 = vadd.f32 %v2660_v34, %v2659_v54 }
 0x194   : > { %v2662_v39 = vrot.slane %v2661_v13, 1  ;;  %v2642_v61 = vadd.f32 %v2641_v22, %v2640_v56 }
 0x196   : > { %v2663_v43 = vadd.f32 %v2662_v39, %v2661_v13 }
 0x198   : > { %v2667_v36 = vsel %vm2666_vm3, %v2642_v61, %v2663_v43 }
 0x199   : > { %2668 = vst [vmem:[%s239_s6] sm:$0x3] %v2667_v36 }
 0x19a PF: > { %s15_s17 = sadd.s32 1, %s3760_s17   ;;  %s4634_s15 = smov %s3756_s16 }
 0x19b   : > { %p12_p5 = scmp.ge.s32.totalorder %s15_s17, 4   ;;  %s4635_s16 = smov %s4637_s18 }
 0x19d   :  { %14 = sbr.rel (!%p12_p5) target bundleno = 2 (0x2), region = 79 }

// kernel: _lambda_.7
= control target key start
LH: loop header
LB: loop body
LE: loop exit
PB: predicated region body
PF: predicated region fallthrough
CT: control target
= control target key end

     0   :  { %s2997_s15 = smov 0   ;;  %s2999_s16 = smov 0   ;;  %s3601_s0 = inlined_call_operand.vmem [shape: bf16[2,5,5,512], index: 0, kind: input, shape index: {}]   ;;  %s3602_s1 = inlined_call_operand.vmem [shape: bf16[4,512,128], index: 1, kind: input, shape index: {}]   ;;  %s3603_s2 = inlined_call_operand.vmem [shape: f32[1,128], index: 2, kind: input, shape index: {}]   ;;  %s3604_s3 = inlined_call_operand.vmem [shape: bf16[2,4,4,128], index: 3, kind: output, shape index: {0}]   ;;  %s3605_s4 = inlined_call_operand.vmem [shape: f32[2,1,2,128], index: 4, kind: output, shape index: {1}]  }
   0x1   :  { %s3001_s17 = smov 0  }
   0x2 LB: > { %s27_s18 = sadd.s32 1, %s2965_s16  ;;  %p2256_p0 = scmp.ge.s32.totalorder %s2969_s17, 1  ;;  %s2969_s17 = sphi %s3001_s17, %s15_s17   ;;  %s2965_s16 = sphi %s2999_s16, %s3611_s16   ;;  %s2961_s15 = sphi %s2997_s15, %s3610_s15  }
   0x3   : > { %p29_p1 = scmp.ge.s32.totalorder %s27_s18, 2  ;;  %p181_p2 = scmp.lt.s32.totalorder %s2969_s17, 3 }
   0x5   : > { %s3613_s18 = smov (%p29_p1, %s27_s18), 0  ;;  %p182_p3 = pnand %p2256_p0, %p181_p2 }
   0x6   : > { %v2819_v0 = vld [vmem:[%s3602_s1 + $0x140] sm:$0xff] (!%p182_p3)   ;;  %v2823_v4 = vld [vmem:[%s3602_s1 + $0x148] sm:$0xff] (!%p182_p3)   ;;  %v2827_v8 = vld [vmem:[%s3602_s1 + $0x150] sm:$0xff] (!%p182_p3)   ;;  %p218_p4 = scmp.lt.s32.totalorder (!%p182_p3), %s2961_s15, 1  ;;  %vm454_vm0 = vsmask.f32 (!%p182_p3), 1280  ;;  %v524_v56 = vlaneseq (!%p182_p3) }
   0x7   : > { %185 = sbr.rel (%p182_p3) target bundleno = 388 (0x184), region = 32  ;;  %v2820_v1 = vld [vmem:[%s3602_s1 + $0x1c0] sm:$0xff] (!%p182_p3)   ;;  %2617 = vmatprep.subr.bf16.mxu0 (!%p182_p3), %v2819_v0  ;;  %v2824_v5 = vld [vmem:[%s3602_s1 + $0x1c8] sm:$0xff] (!%p182_p3)   ;;  %v2828_v9 = vld [vmem:[%s3602_s1 + $0x1d0] sm:$0xff] (!%p182_p3)   ;;  %vm455_vm1 = vsmask.f32 (!%p182_p3), 3336 }
   0x8   : > { %v2821_v2 = vld [vmem:[%s3602_s1 + $0x100] sm:$0xff] (!%p182_p3)   ;;  %2639 = vmatprep.subr.bf16.mxu1 (!%p182_p3), %v2820_v1  ;;  %v2825_v6 = vld [vmem:[%s3602_s1 + $0x108] sm:$0xff] (!%p182_p3)   ;;  %v2829_v10 = vld [vmem:[%s3602_s1 + $0x110] sm:$0xff] (!%p182_p3)   ;;  %vm457_vm2 = vsmask.f32 (!%p182_p3), 5392  ;;  %vm2080_vm7 = vcmask (!%p182_p3), 1043456  }
   0x9   : > { %v2822_v3 = vld [vmem:[%s3602_s1 + $0x180] sm:$0xff] (!%p182_p3)   ;;  %2618 = vmatpush3.bf16.msra.mxu0 (!%p182_p3), %v2821_v2  ;;  %v2826_v7 = vld [vmem:[%s3602_s1 + $0x188] sm:$0xff] (!%p182_p3)   ;;  %v2830_v11 = vld [vmem:[%s3602_s1 + $0x190] sm:$0xff] (!%p182_p3)   ;;  %vm459_vm3 = vsmask.f32 (!%p182_p3), 7448 }
   0xa   : > { %2640 = vmatpush3.bf16.msra.mxu1 (!%p182_p3), %v2822_v3  ;;  %2619 = vmatprep.subr.bf16.mxu0 (!%p182_p3), %v2823_v4  ;;  %v2831_v12 = vld [vmem:[%s3602_s1 + $0x158] sm:$0xff] (!%p182_p3)   ;;  %v2835_v16 = vld [vmem:[%s3602_s1 + $0x160] sm:$0xff] (!%p182_p3)   ;;  %v2839_v20 = vld [vmem:[%s3602_s1 + $0x168] sm:$0xff] (!%p182_p3)  }
   0xb   : > { %2641 = vmatprep.subr.bf16.mxu1 (!%p182_p3), %v2824_v5  ;;  %v2832_v13 = vld [vmem:[%s3602_s1 + $0x1d8] sm:$0xff] (!%p182_p3)   ;;  %v2836_v17 = vld [vmem:[%s3602_s1 + $0x1e0] sm:$0xff] (!%p182_p3)   ;;  %v2840_v21 = vld [vmem:[%s3602_s1 + $0x1e8] sm:$0xff] (!%p182_p3)  }
   0xc   : > { %v2833_v14 = vld [vmem:[%s3602_s1 + $0x118] sm:$0xff] (!%p182_p3)   ;;  %v2837_v18 = vld [vmem:[%s3602_s1 + $0x120] sm:$0xff] (!%p182_p3)   ;;  %v2841_v22 = vld [vmem:[%s3602_s1 + $0x128] sm:$0xff] (!%p182_p3)  }
   0xd   : > { %2620 = vmatpush3.bf16.msra.mxu0 (!%p182_p3), %v2825_v6  ;;  %v2834_v15 = vld [vmem:[%s3602_s1 + $0x198] sm:$0xff] (!%p182_p3)   ;;  %v2838_v19 = vld [vmem:[%s3602_s1 + $0x1a0] sm:$0xff] (!%p182_p3)   ;;  %v2842_v23 = vld [vmem:[%s3602_s1 + $0x1a8] sm:$0xff] (!%p182_p3)  }
   0xe   : > { %2642 = vmatpush3.bf16.msra.mxu1 %v2826_v7  ;;  %2621 = vmatprep.subr.bf16.mxu0 %v2827_v8  ;;  %s3615_s15 = smov (!%p218_p4, %s2961_s15), 1  ;;  %v2843_v24 = vld [vmem:[%s3602_s1 + $0x170] sm:$0xff]   ;;  %v2847_v28 = vld [vmem:[%s3602_s1 + $0x178] sm:$0xff]   ;;  %vm456_vm4 = vmor %vm454_vm0, %vm455_vm1 }
   0xf   : > { %2643 = vmatprep.subr.bf16.mxu1 %v2828_v9  ;;  %v2844_v25 = vld [vmem:[%s3602_s1 + $0x1f0] sm:$0xff]   ;;  %s2793_s27 = smul.u32 80, %s3615_s15  ;;  %v2848_v29 = vld [vmem:[%s3602_s1 + $0x1f8] sm:$0xff]   ;;  %v2851_v45 = vld [vmem:[%s3602_s1 + $0x40] sm:$0xff]   ;;  %s2616_s22 = sshll.u32 %s3615_s15, 3 }
  0x10   : > { %v2845_v26 = vld [vmem:[%s3602_s1 + $0x130] sm:$0xff]   ;;  %v2849_v30 = vld [vmem:[%s3602_s1 + $0x138] sm:$0xff]   ;;  %vm3165_vm5 = vmor %vm456_vm4, %vm457_vm2  ;;  %s231_s25 = scalar_lea.vmem %s3604_s3, %s2616_s22  ;;  %s2260_s26 = sshll.u32 %s3615_s15, 1 }
  0x11   : > { %2622 = vmatpush3.bf16.msra.mxu0 %v2829_v10  ;;  %v2846_v27 = vld [vmem:[%s3602_s1 + $0x1b0] sm:$0xff]   ;;  %s3115_s12 = scalar_lea.vmem %s3601_s0, %s2793_s27  ;;  %v2850_v31 = vld [vmem:[%s3602_s1 + $0x1b8] sm:$0xff]   ;;  %v2852_v62 = vld [vmem:[%s3602_s1 + $0xc0] sm:$0xff]   ;;  %s239_s29 = scalar_lea.vmem %s3605_s4, %s2260_s26 }
  0x12   : > { %2644 = vmatpush3.bf16.msra.mxu1 %v2830_v11  ;;  %2623 = vmatprep.subr.bf16.mxu0 %v2831_v12  ;;  %v3124_v32 = vld.sshfl [vmem:[%s3115_s12] sm:$0x5f pattern:$0x76325410]  ;;  %vm3181_vm6 = vmor %vm3165_vm5, %vm459_vm3 }
  0x13   : > { %2645 = vmatprep.subr.bf16.mxu1 %v2832_v13  ;;  %v3127_v33 = vld.sshfl [vmem:[%s3115_s12 + $0x8] sm:$0x5f pattern:$0x76325410] }
  0x14   : > { %v3130_v34 = vld.sshfl [vmem:[%s3115_s12 + $0x10] sm:$0x5f pattern:$0x76325410]  ;;  %v404_v35 = vcombine.low %v3124_v32, %v3127_v33  ;;  %v405_v36 = vcombine.high %v3124_v32, %v3127_v33 }
  0x15   : > { %2624 = vmatpush3.bf16.msra.mxu0 %v2833_v14  ;;  %v3137_v37 = vld.sshfl [vmem:[%s3115_s12 + $0x18] sm:$0x5f pattern:$0x76325410] }
  0x16   : > { %2646 = vmatpush3.bf16.msra.mxu1 %v2834_v15  ;;  %2625 = vmatprep.subr.bf16.mxu0 %v2835_v16  ;;  %v3140_v38 = vld.sshfl [vmem:[%s3115_s12 + $0x20] sm:$0x5f pattern:$0x76325410]  ;;  %v420_v39 = vcombine.low %v3130_v34, %v3137_v37  ;;  %v462_v40 = vshrl.u32 %v404_v35, 16  ;;  %v465_v41 = vshll.u32 %v404_v35, 16  ;;  %v421_v43 = vcombine.high %v3130_v34, %v3137_v37 }
  0x17   : > { %2647 = vmatprep.subr.bf16.mxu1 %v2836_v17  ;;  %v3145_v42 = vld.sshfl [vmem:[%s3115_s12 + $0x28] sm:$0x5f pattern:$0x76325410]  ;;  %v471_v44 = vshll.u32 %v405_v36, 16  ;;  %v2481_v46 = vcombine.low %v3130_v34, %v3140_v38 }
  0x18   : > { %v3155_v47 = vld.sshfl [vmem:[%s3115_s12 + $0x30] sm:$0x5f pattern:$0x76325410]  ;;  %v436_v48 = vcombine.low %v3140_v38, %v3145_v42  ;;  %v437_v49 = vcombine.high %v3140_v38, %v3145_v42  ;;  %v464_v50 = vrot.slane %v462_v40, 6  ;;  %v467_v51 = vrot.slane %v465_v41, 7 }
  0x19   : > { %2626 = vmatpush3.bf16.msra.mxu0 %v2837_v18  ;;  %v3162_v52 = vld.sshfl [vmem:[%s3115_s12 + $0x38] sm:$0x5f pattern:$0x76325410]  ;;  %v473_v54 = vrot.slane %v471_v44, 7  ;;  %v476_v55 = vshrl.u32 %v420_v39, 16  ;;  %v2482_v57 = vcombine.low %v3137_v37, %v3145_v42 }
  0x1a   : > { %2648 = vmatpush3.bf16.msra.mxu1 %v2838_v19  ;;  %2627 = vmatprep.subr.bf16.mxu0 %v2839_v20  ;;  %v452_v58 = vcombine.low %v3155_v47, %v3162_v52  ;;  %v453_v59 = vcombine.high %v3155_v47, %v3162_v52  ;;  %v468_v60 = vor.u32 %v467_v51, %v464_v50  ;;  %v479_v61 = vshll.u32 %v420_v39, 16 }
  0x1b   : > { %2649 = vmatprep.subr.bf16.mxu1 %v2840_v21  ;;  %v478_v63 = vrot.slane %v476_v55, 6  ;;  %v485_v0 = vshll.u32 %v421_v43, 16  ;;  %v490_v1 = vshrl.u32 %v436_v48, 16  ;;  %v493_v2 = vshll.u32 %v436_v48, 16  ;;  %v2853_v55 = vld [vmem:[%s3602_s1] sm:$0xff]  }
  0x1c   : > { %v469_v3 = vrot.slane %v468_v60, 2  ;;  %v481_v4 = vrot.slane %v479_v61, 7  ;;  %v499_v5 = vshll.u32 %v437_v49, 16  ;;  %v504_v6 = vshrl.u32 %v452_v58, 16 }
  0x1d   : > { %2628 = vmatpush3.bf16.msra.mxu0 %v2841_v22  ;;  %v492_v8 = vrot.slane %v490_v1, 6  ;;  %v495_v9 = vrot.slane %v493_v2, 7  ;;  %v507_v10 = vshll.u32 %v452_v58, 16  ;;  %v487_v12 = vrot.slane %v485_v0, 7  ;;  %v2855_v0 = vld [vmem:[%s3602_s1 + $0x48] sm:$0xff]  }
  0x1e   : > { %2650 = vmatpush3.bf16.msra.mxu1 %v2842_v23  ;;  %2629 = vmatprep.subr.bf16.mxu0 %v2843_v24  ;;  %v482_v11 = vor.u32 %v481_v4, %v478_v63  ;;  %v501_v13 = vrot.slane %v499_v5, 7  ;;  %v506_v14 = vrot.slane %v504_v6, 6  ;;  %v513_v17 = vshll.u32 %v453_v59, 16  ;;  %v2854_v59 = vld [vmem:[%s3602_s1 + $0x80] sm:$0xff]   ;;  %v2856_v1 = vld [vmem:[%s3602_s1 + $0xc8] sm:$0xff]   ;;  %v2859_v6 = vld [vmem:[%s3602_s1 + $0x50] sm:$0xff]  }
  0x1f   : > { %2651 = vmatprep.subr.bf16.mxu1 %v2844_v25  ;;  %v496_v15 = vor.u32 %v495_v9, %v492_v8  ;;  %v509_v16 = vrot.slane %v507_v10, 7  ;;  %v474_v18 = vsel %vm3181_vm6, %v469_v3, %v473_v54  ;;  %v2971_v20 = vmov 1983009808   ;;  %v2857_v2 = vld [vmem:[%s3602_s1 + $0x8] sm:$0xff]   ;;  %v2860_v8 = vld [vmem:[%s3602_s1 + $0xd0] sm:$0xff]  }
  0x20   : > { %v483_v19 = vrot.slane %v482_v11, 2  ;;  %v522_v21 = vunpack.c.l.s4 %v2971_v20  ;;  %v3187_v22 = vshrl.u32 %v524_v56, 7  ;;  %v515_v25 = vrot.slane %v513_v17, 7  ;;  %v2858_v5 = vld [vmem:[%s3602_s1 + $0x88] sm:$0xff]   ;;  %v2861_v9 = vld [vmem:[%s3602_s1 + $0x10] sm:$0xff]   ;;  %v2863_v11 = vld [vmem:[%s3602_s1 + $0x58] sm:$0xff]  }
  0x21   : > { %2630 = vmatpush3.bf16.msra.mxu0 %v2845_v26  ;;  %v497_v23 = vrot.slane %v496_v15, 2  ;;  %v510_v24 = vor.u32 %v509_v16, %v506_v14  ;;  %v2365_v26 = vcombine.low %v3124_v32, %v3130_v34  ;;  %v2368_v40 = vcombine.low %v3145_v42, %v3162_v52  ;;  %v2862_v10 = vld [vmem:[%s3602_s1 + $0x90] sm:$0xff]   ;;  %v2866_v14 = vld [vmem:[%s3602_s1 + $0x98] sm:$0xff]   ;;  %v2867_v15 = vld [vmem:[%s3602_s1 + $0x60] sm:$0xff]  }
  0x22   : > { %2652 = vmatpush3.bf16.msra.mxu1 %v2846_v27  ;;  %2631 = vmatprep.subr.bf16.mxu0 %v2847_v28  ;;  %v3193_v27 = vsel %vm3181_vm6, %v483_v19, %v487_v12  ;;  %v523_v28 = vunpack.c.0.s8 %v522_v21  ;;  %v2864_v12 = vld [vmem:[%s3602_s1 + $0xd8] sm:$0xff]   ;;  %v2868_v16 = vld [vmem:[%s3602_s1 + $0xe0] sm:$0xff]   ;;  %v2871_v19 = vld [vmem:[%s3602_s1 + $0x68] sm:$0xff]   ;;  %vm2113_vm8 = vcmp.eq.s32.totalorder %v3187_v22, 0 }
  0x23   : > { %2653 = vmatprep.subr.bf16.mxu1 %v2848_v29  ;;  %v2367_v29 = vcombine.low %v3140_v38, %v3155_v47  ;;  %v511_v35 = vrot.slane %v510_v24, 2  ;;  %v517_v36 = vcombine.low %v474_v18, %v3193_v27  ;;  %v518_v32 = vcombine.high %v474_v18, %v3193_v27  ;;  %v2869_v17 = vld [vmem:[%s3602_s1 + $0x20] sm:$0xff]   ;;  %v2872_v20 = vld [vmem:[%s3602_s1 + $0xe8] sm:$0xff]   ;;  %v2875_v24 = vld [vmem:[%s3602_s1 + $0x70] sm:$0xff]  }
  0x24   : > { %v3206_v39 = vsub.s32 %v523_v28, %v3187_v22  ;;  %v2870_v18 = vld [vmem:[%s3602_s1 + $0xa0] sm:$0xff]   ;;  %v2873_v21 = vld [vmem:[%s3602_s1 + $0x28] sm:$0xff]   ;;  %v2878_v28 = vld [vmem:[%s3602_s1 + $0xb0] sm:$0xff]  }
  0x25   : > { %2632 = vmatpush3.bf16.msra.mxu0 %v2849_v30  ;;  %v2366_v30 = vcombine.low %v3127_v33, %v3137_v37  ;;  %v3216_v43 = vsel %vm3181_vm6, %v511_v35, %v515_v25  ;;  %v2876_v25 = vld [vmem:[%s3602_s1 + $0xf0] sm:$0xff]   ;;  %v2881_v35 = vld [vmem:[%s3602_s1 + $0x38] sm:$0xff]  }
  0x26   : > { %2654 = vmatpush3.bf16.msra.mxu1 %v2850_v31  ;;  %2661 = vmatprep.subr.bf16.mxu0 %v2851_v45  ;;  %v3201_v31 = vsel %vm3181_vm6, %v497_v23, %v501_v13  ;;  %v527_v45 = vrot.slane %v517_v36, %v3206_v39  ;;  %v534_v49 = vrot.slane %v518_v32, %v3206_v39  ;;  %v2865_v13 = vld [vmem:[%s3602_s1 + $0x18] sm:$0xff]   ;;  %v2874_v23 = vld [vmem:[%s3602_s1 + $0xa8] sm:$0xff]   ;;  %v2883_v32 = vld [vmem:[%s3602_s1 + $0x240] sm:$0xff]  }
  0x27   : > { %2683 = vmatprep.subr.bf16.mxu1 %v2852_v62  ;;  %v1745_v41 = vcombine.low %v3193_v27, %v3201_v31  ;;  %v1746_v33 = vcombine.high %v3193_v27, %v3201_v31  ;;  %v519_v44 = vcombine.low %v3201_v31, %v3216_v43  ;;  %v520_v48 = vcombine.high %v3201_v31, %v3216_v43  ;;  %v2882_v36 = vld [vmem:[%s3602_s1 + $0xb8] sm:$0xff]   ;;  %v2910_v34 = vld [vmem:[%s3602_s1 + $0x2b0] sm:$0xff]   ;;  %v2922_v27 = vld [vmem:[%s3602_s1 + $0x388] sm:$0xff]  }
  0x28   : > { %v3225_v50 = vrot.slane %v2365_v26, %v3206_v39  ;;  %v3228_v51 = vrot.slane %v2367_v29, %v3206_v39  ;;  %v3236_v56 = vrot.slane %v2366_v30, %v3206_v39  ;;  %v3239_v58 = vrot.slane %v2368_v40, %v3206_v39  ;;  %v2877_v26 = vld [vmem:[%s3602_s1 + $0x30] sm:$0xff]   ;;  %v2879_v29 = vld [vmem:[%s3602_s1 + $0x78] sm:$0xff]   ;;  %v2884_v40 = vld [vmem:[%s3602_s1 + $0x2c0] sm:$0xff]  }
  0x29   : > { %v541_v53 = vrot.slane %v519_v44, %v3206_v39  ;;  %v548_v54 = vrot.slane %v520_v48, %v3206_v39  ;;  %v2880_v30 = vld [vmem:[%s3602_s1 + $0xf8] sm:$0xff]   ;;  %v2885_v44 = vld [vmem:[%s3602_s1 + $0x200] sm:$0xff]   ;;  %v3475_v7 = vrot.slane %v1746_v33, %v3206_v39  ;;  %v2923_v31 = vld [vmem:[%s3602_s1 + $0x350] sm:$0xff]  }
  0x2a   : > { %v864_v3 = vcombine.high %v3225_v50, %v3228_v51  ;;  %v866_v4 = vcombine.high %v3236_v56, %v3239_v58  ;;  %v865_v48 = vcombine.low %v3236_v56, %v3239_v58  ;;  %v2892_v56 = vld [vmem:[%s3602_s1 + $0x2d0] sm:$0xff]   ;;  %v2911_v37 = vld [vmem:[%s3602_s1 + $0x278] sm:$0xff]  }
  0x2b   : > { %v550_v60 = vcombine.high %v527_v45, %v541_v53  ;;  %v552_v61 = vcombine.high %v534_v49, %v548_v54  ;;  %v549_v62 = vcombine.low %v527_v45, %v541_v53  ;;  %v551_v63 = vcombine.low %v534_v49, %v548_v54  ;;  %v2886_v49 = vld [vmem:[%s3602_s1 + $0x280] sm:$0xff]   ;;  %v2887_v53 = vld [vmem:[%s3602_s1 + $0x248] sm:$0xff]   ;;  %v2893_v58 = vld [vmem:[%s3602_s1 + $0x210] sm:$0xff]  }
  0x2c   : > { %v863_v45 = vcombine.low %v3225_v50, %v3228_v51  ;;  %v2888_v54 = vld [vmem:[%s3602_s1 + $0x2c8] sm:$0xff]  }
  0x2d   : > { %781 = vmatprep.mubr.bf16.mxu0 %v550_v60  ;;  %822 = vmatprep.mubr.bf16.mxu1 %v552_v61  ;;  %v2889_v50 = vld [vmem:[%s3602_s1 + $0x208] sm:$0xff]   ;;  %v2895_v60 = vld [vmem:[%s3602_s1 + $0x258] sm:$0xff]  }
  0x2e   : > { %782 = vmatmul.mubr.bf16.vlgmr.msra.gmra.mrb[0].mxu0 %v549_v62  ;;  %823 = vmatmul.mubr.bf16.vlgmr.msra.gmra.mrb[0].mxu1 %v551_v63  ;;  %v2890_v51 = vld [vmem:[%s3602_s1 + $0x288] sm:$0xff]   ;;  %v2896_v61 = vld [vmem:[%s3602_s1 + $0x2d8] sm:$0xff]  }
  0x2f   : > { %2662 = vmatpush3.bf16.msra.mxu0 %v2853_v55  ;;  %2684 = vmatpush3.bf16.msra.mxu1 %v2854_v59  ;;  %v2891_v55 = vld [vmem:[%s3602_s1 + $0x250] sm:$0xff]   ;;  %v2897_v62 = vld [vmem:[%s3602_s1 + $0x218] sm:$0xff]  }
  0x30   : > { %2663 = vmatprep.subr.bf16.mxu0 %v2855_v0  ;;  %2685 = vmatprep.subr.bf16.mxu1 %v2856_v1  ;;  %v2894_v59 = vld [vmem:[%s3602_s1 + $0x290] sm:$0xff]   ;;  %v2898_v63 = vld [vmem:[%s3602_s1 + $0x298] sm:$0xff]   ;;  %v2899_v0 = vld [vmem:[%s3602_s1 + $0x260] sm:$0xff]  }
  0x31   : > { %1095 = vmatprep.mubr.bf16.mxu0 %v864_v3  ;;  %1136 = vmatprep.mubr.bf16.mxu1 %v866_v4  ;;  %v2900_v1 = vld [vmem:[%s3602_s1 + $0x2e0] sm:$0xff]   ;;  %v2903_v4 = vld [vmem:[%s3602_s1 + $0x268] sm:$0xff]  }
  0x32   : > { %v2902_v3 = vld [vmem:[%s3602_s1 + $0x2a0] sm:$0xff]  }
  0x33   : > { %2664 = vmatpush3.bf16.msra.mxu0 %v2857_v2  ;;  %2686 = vmatpush3.bf16.msra.mxu1 %v2858_v5  ;;  %v2901_v2 = vld [vmem:[%s3602_s1 + $0x220] sm:$0xff]   ;;  %v2904_v5 = vld [vmem:[%s3602_s1 + $0x2e8] sm:$0xff]  }
  0x34   : > { %2665 = vmatprep.subr.bf16.mxu0 %v2859_v6  ;;  %2687 = vmatprep.subr.bf16.mxu1 %v2860_v8  ;;  %v2905_v6 = vld [vmem:[%s3602_s1 + $0x228] sm:$0xff]  }
  0x35   : > { %v2906_v8 = vld [vmem:[%s3602_s1 + $0x2a8] sm:$0xff]  }
  0x37   : > { %2666 = vmatpush3.bf16.msra.mxu0 %v2861_v9  ;;  %2688 = vmatpush3.bf16.msra.mxu1 %v2862_v10  ;;  %v2479_v9 = vld.sshfl [vmem:[%s3115_s12 + $0x40] sm:$0x5f pattern:$0x76325410]  ;;  %v2907_v10 = vld [vmem:[%s3602_s1 + $0x270] sm:$0xff]  }
  0x38   : > { %2667 = vmatprep.subr.bf16.mxu0 %v2863_v11  ;;  %2689 = vmatprep.subr.bf16.mxu1 %v2864_v12  ;;  %v2908_v11 = vld [vmem:[%s3602_s1 + $0x2f0] sm:$0xff]   ;;  %v2483_v12 = vcombine.low %v3155_v47, %v2479_v9 }
  0x39   : > { %v2909_v47 = vld [vmem:[%s3602_s1 + $0x230] sm:$0xff]  }
  0x3a   : > { %v1320_v38 = vrot.slane %v2483_v12, %v3206_v39  ;;  %v2942_v12 = vld [vmem:[%s3602_s1 + $0x3b0] sm:$0xff]  }
  0x3b   : > { %2668 = vmatpush3.bf16.msra.mxu0 %v2865_v13  ;;  %2690 = vmatpush3.bf16.msra.mxu1 %v2866_v14  ;;  %v1306_v13 = vrot.slane %v2481_v46, %v3206_v39  ;;  %v2480_v14 = vld.sshfl [vmem:[%s3115_s12 + $0x48] sm:$0x5f pattern:$0x76325410] }
  0x3c   : > { %2669 = vmatprep.subr.bf16.mxu0 %v2867_v15  ;;  %2691 = vmatprep.subr.bf16.mxu1 %v2868_v16  ;;  %v1313_v15 = vrot.slane %v2482_v57, %v3206_v39  ;;  %v1295_v16 = vcombine.low %v2479_v9, %v2480_v14 }
  0x3e   : > { %v1732_v46 = vshrl.u32 %v1295_v16, 16  ;;  %v1735_v57 = vshll.u32 %v1295_v16, 16  ;;  %v2946_v16 = vld [vmem:[%s3602_s1 + $0x3b8] sm:$0xff]  }
  0x3f   : > { %2670 = vmatpush3.bf16.msra.mxu0 %v2869_v17  ;;  %2692 = vmatpush3.bf16.msra.mxu1 %v2870_v18  ;;  %v2484_v17 = vcombine.low %v3162_v52, %v2480_v14  ;;  %v1688_v18 = vcombine.high %v2479_v9, %v2480_v14  ;;  %v2939_v9 = vld [vmem:[%s3602_s1 + $0x370] sm:$0xff]   ;;  %v2944_v14 = vld [vmem:[%s3602_s1 + $0x3f8] sm:$0xff]  }
  0x40   : > { %2671 = vmatprep.subr.bf16.mxu0 %v2871_v19  ;;  %2693 = vmatprep.subr.bf16.mxu1 %v2872_v20  ;;  %v2912_v19 = vld [vmem:[%s3602_s1 + $0x2f8] sm:$0xff]   ;;  %v1329_v20 = vcombine.high %v1306_v13, %v1320_v38 }
  0x41   : > { %v1327_v42 = vrot.slane %v2484_v17, %v3206_v39  ;;  %v1741_v52 = vshll.u32 %v1688_v18, 16 }
  0x43   : > { %2672 = vmatpush3.bf16.msra.mxu0 %v2873_v21  ;;  %2694 = vmatpush3.bf16.msra.mxu1 %v2874_v23  ;;  %v1331_v21 = vcombine.high %v1313_v15, %v1327_v42  ;;  %v1734_v23 = vrot.slane %v1732_v46, 6 }
  0x44   : > { %2673 = vmatprep.subr.bf16.mxu0 %v2875_v24  ;;  %2695 = vmatprep.subr.bf16.mxu1 %v2876_v25  ;;  %v1737_v24 = vrot.slane %v1735_v57, 7  ;;  %v2913_v25 = vld [vmem:[%s3602_s1 + $0x238] sm:$0xff]  }
  0x47   : > { %2674 = vmatpush3.bf16.msra.mxu0 %v2877_v26  ;;  %2696 = vmatpush3.bf16.msra.mxu1 %v2878_v28  ;;  %v2914_v26 = vld [vmem:[%s3602_s1 + $0x2b8] sm:$0xff]   ;;  %v1738_v28 = vor.u32 %v1737_v24, %v1734_v23 }
  0x48   : > { %2675 = vmatprep.subr.bf16.mxu0 %v2879_v29  ;;  %2697 = vmatprep.subr.bf16.mxu1 %v2880_v30  ;;  %v1743_v29 = vrot.slane %v1741_v52, 7  ;;  %v2915_v30 = vld [vmem:[%s3602_s1 + $0x340] sm:$0xff]  }
  0x4b   : > { %2676 = vmatpush3.bf16.msra.mxu0 %v2881_v35  ;;  %2698 = vmatpush3.bf16.msra.mxu1 %v2882_v36  ;;  %v2916_v35 = vld [vmem:[%s3602_s1 + $0x3c0] sm:$0xff]   ;;  %v1739_v36 = vrot.slane %v1738_v28, 2 }
  0x4c   : > { %2705 = vmatprep.subr.bf16.mxu0 %v2883_v32  ;;  %2727 = vmatprep.subr.bf16.mxu1 %v2884_v40  ;;  %v2917_v32 = vld [vmem:[%s3602_s1 + $0x300] sm:$0xff]   ;;  %v1328_v40 = vcombine.low %v1306_v13, %v1320_v38  ;;  %v2943_v13 = vld [vmem:[%s3602_s1 + $0x378] sm:$0xff]  }
  0x4e   : > { %1096 = vmatmul.mubr.bf16.vlgmr.msra.gmra.mrb[4].mxu0 %v863_v45  ;;  %1137 = vmatmul.mubr.bf16.vlgmr.msra.gmra.mrb[4].mxu1 %v865_v48  ;;  %v2918_v45 = vld [vmem:[%s3602_s1 + $0x380] sm:$0xff]   ;;  %v1744_v48 = vsel %vm3181_vm6, %v1739_v36, %v1743_v29 }
  0x4f   : > { %2706 = vmatpush3.bf16.msra.mxu0 %v2885_v44  ;;  %2728 = vmatpush3.bf16.msra.mxu1 %v2886_v49  ;;  %v1330_v44 = vcombine.low %v1313_v15, %v1327_v42  ;;  %v3464_v49 = vrot.slane %v1745_v41, %v3206_v39  ;;  %v2920_v41 = vld [vmem:[%s3602_s1 + $0x3c8] sm:$0xff]   ;;  %v2945_v15 = vld [vmem:[%s3602_s1 + $0x338] sm:$0xff]  }
  0x50   : > { %2707 = vmatprep.subr.bf16.mxu0 %v2887_v53  ;;  %2729 = vmatprep.subr.bf16.mxu1 %v2888_v54  ;;  %v2919_v53 = vld [vmem:[%s3602_s1 + $0x348] sm:$0xff]   ;;  %v1747_v54 = vcombine.low %v3216_v43, %v1744_v48 }
  0x51   : > { %1560 = vmatprep.mubr.bf16.mxu0 %v1329_v20  ;;  %1601 = vmatprep.mubr.bf16.mxu1 %v1331_v21 }
  0x53   : > { %2708 = vmatpush3.bf16.msra.mxu0 %v2889_v50  ;;  %2730 = vmatpush3.bf16.msra.mxu1 %v2890_v51  ;;  %v1748_v50 = vcombine.high %v3216_v43, %v1744_v48  ;;  %v2921_v51 = vld [vmem:[%s3602_s1 + $0x308] sm:$0xff]  }
  0x54   : > { %2709 = vmatprep.subr.bf16.mxu0 %v2891_v55  ;;  %2731 = vmatprep.subr.bf16.mxu1 %v2892_v56  ;;  %v3484_v55 = vrot.slane %v1747_v54, %v3206_v39 }
  0x55   : > { %v3487_v43 = vrot.slane %v1748_v50, %v3206_v39  ;;  %v2924_v39 = vld [vmem:[%s3602_s1 + $0x3d0] sm:$0xff]  }
  0x56   : > { %v1778_v33 = vcombine.high %v3464_v49, %v3484_v55  ;;  %v1777_v17 = vcombine.low %v3464_v49, %v3484_v55 }
  0x57   : > { %2710 = vmatpush3.bf16.msra.mxu0 %v2893_v58  ;;  %2732 = vmatpush3.bf16.msra.mxu1 %v2894_v59  ;;  %v1780_v56 = vcombine.high %v3475_v7, %v3487_v43  ;;  %v2925_v58 = vld [vmem:[%s3602_s1 + $0x310] sm:$0xff]   ;;  %v1779_v18 = vcombine.low %v3475_v7, %v3487_v43 }
  0x58   : > { %2711 = vmatprep.subr.bf16.mxu0 %v2895_v60  ;;  %2733 = vmatprep.subr.bf16.mxu1 %v2896_v61  ;;  %v2926_v59 = vld [vmem:[%s3602_s1 + $0x390] sm:$0xff]   ;;  %v2927_v60 = vld [vmem:[%s3602_s1 + $0x358] sm:$0xff]  }
  0x59   : > { %v2928_v61 = vld [vmem:[%s3602_s1 + $0x3d8] sm:$0xff]  }
  0x5b   : > { %2712 = vmatpush3.bf16.msra.mxu0 %v2897_v62  ;;  %2734 = vmatpush3.bf16.msra.mxu1 %v2898_v63  ;;  %v2929_v62 = vld [vmem:[%s3602_s1 + $0x318] sm:$0xff]  }
  0x5c   : > { %2713 = vmatprep.subr.bf16.mxu0 %v2899_v0  ;;  %2735 = vmatprep.subr.bf16.mxu1 %v2900_v1  ;;  %v2930_v63 = vld [vmem:[%s3602_s1 + $0x398] sm:$0xff]   ;;  %v2931_v0 = vld [vmem:[%s3602_s1 + $0x360] sm:$0xff]  }
  0x5d   : > { %v2932_v1 = vld [vmem:[%s3602_s1 + $0x3e0] sm:$0xff]  }
  0x5f   : > { %2714 = vmatpush3.bf16.msra.mxu0 %v2901_v2  ;;  %2736 = vmatpush3.bf16.msra.mxu1 %v2902_v3  ;;  %v2933_v2 = vld [vmem:[%s3602_s1 + $0x320] sm:$0xff]  }
  0x60   : > { %2715 = vmatprep.subr.bf16.mxu0 %v2903_v4  ;;  %2737 = vmatprep.subr.bf16.mxu1 %v2904_v5  ;;  %v2934_v3 = vld [vmem:[%s3602_s1 + $0x3a0] sm:$0xff]   ;;  %v2935_v4 = vld [vmem:[%s3602_s1 + $0x368] sm:$0xff]  }
  0x61   : > { %v2936_v5 = vld [vmem:[%s3602_s1 + $0x3e8] sm:$0xff]  }
  0x63   : > { %2716 = vmatpush3.bf16.msra.mxu0 %v2905_v6  ;;  %2738 = vmatpush3.bf16.msra.mxu1 %v2906_v8  ;;  %v2937_v6 = vld [vmem:[%s3602_s1 + $0x328] sm:$0xff]  }
  0x64   : > { %2717 = vmatprep.subr.bf16.mxu0 %v2907_v10  ;;  %2739 = vmatprep.subr.bf16.mxu1 %v2908_v11  ;;  %v2938_v8 = vld [vmem:[%s3602_s1 + $0x3a8] sm:$0xff]   ;;  %v2940_v10 = vld [vmem:[%s3602_s1 + $0x3f0] sm:$0xff]  }
  0x65   : > { %v2941_v11 = vld [vmem:[%s3602_s1 + $0x330] sm:$0xff]  }
  0x67   : > { %2718 = vmatpush3.bf16.msra.mxu0 %v2909_v47  ;;  %2740 = vmatpush3.bf16.msra.mxu1 %v2910_v34 }
  0x68   : > { %2719 = vmatprep.subr.bf16.mxu0 %v2911_v37  ;;  %2741 = vmatprep.subr.bf16.mxu1 %v2912_v19 }
  0x6b   : > { %2720 = vmatpush3.bf16.msra.mxu0 %v2913_v25  ;;  %2742 = vmatpush3.bf16.msra.mxu1 %v2914_v26 }
  0x6c   : > { %2749 = vmatprep.subr.bf16.mxu0 %v2915_v30  ;;  %2771 = vmatprep.subr.bf16.mxu1 %v2916_v35 }
  0x6e   : > { %1561 = vmatmul.mubr.bf16.vlgmr.msra.gmra.mrb[8].mxu0 %v1328_v40  ;;  %1602 = vmatmul.mubr.bf16.vlgmr.msra.gmra.mrb[8].mxu1 %v1330_v44 }
  0x6f   : > { %2750 = vmatpush3.bf16.msra.mxu0 %v2917_v32  ;;  %2772 = vmatpush3.bf16.msra.mxu1 %v2918_v45 }
  0x70   : > { %2751 = vmatprep.subr.bf16.mxu0 %v2919_v53  ;;  %2773 = vmatprep.subr.bf16.mxu1 %v2920_v41 }
  0x71   : > { %2009 = vmatprep.mubr.bf16.mxu0 %v1778_v33  ;;  %2050 = vmatprep.mubr.bf16.mxu1 %v1780_v56 }
  0x73   : > { %2752 = vmatpush3.bf16.msra.mxu0 %v2921_v51  ;;  %2774 = vmatpush3.bf16.msra.mxu1 %v2922_v27 }
  0x74   : > { %2753 = vmatprep.subr.bf16.mxu0 %v2923_v31  ;;  %2775 = vmatprep.subr.bf16.mxu1 %v2924_v39 }
  0x77   : > { %2754 = vmatpush3.bf16.msra.mxu0 %v2925_v58  ;;  %2776 = vmatpush3.bf16.msra.mxu1 %v2926_v59 }
  0x78   : > { %2755 = vmatprep.subr.bf16.mxu0 %v2927_v60  ;;  %2777 = vmatprep.subr.bf16.mxu1 %v2928_v61 }
  0x7b   : > { %2756 = vmatpush3.bf16.msra.mxu0 %v2929_v62  ;;  %2778 = vmatpush3.bf16.msra.mxu1 %v2930_v63 }
  0x7c   : > { %2757 = vmatprep.subr.bf16.mxu0 %v2931_v0  ;;  %2779 = vmatprep.subr.bf16.mxu1 %v2932_v1 }
  0x7f   : > { %2758 = vmatpush3.bf16.msra.mxu0 %v2933_v2  ;;  %2780 = vmatpush3.bf16.msra.mxu1 %v2934_v3 }
  0x80   : > { %2759 = vmatprep.subr.bf16.mxu0 %v2935_v4  ;;  %2781 = vmatprep.subr.bf16.mxu1 %v2936_v5 }
  0x83   : > { %2760 = vmatpush3.bf16.msra.mxu0 %v2937_v6  ;;  %2782 = vmatpush3.bf16.msra.mxu1 %v2938_v8 }
  0x84   : > { %2761 = vmatprep.subr.bf16.mxu0 %v2939_v9  ;;  %2783 = vmatprep.subr.bf16.mxu1 %v2940_v10 }
  0x87   : > { %2762 = vmatpush3.bf16.msra.mxu0 %v2941_v11  ;;  %2784 = vmatpush3.bf16.msra.mxu1 %v2942_v12 }
  0x88   : > { %2763 = vmatprep.subr.bf16.mxu0 %v2943_v13  ;;  %2785 = vmatprep.subr.bf16.mxu1 %v2944_v14 }
  0x8b   : > { %2764 = vmatpush3.bf16.msra.mxu0 %v2945_v15  ;;  %2786 = vmatpush3.bf16.msra.mxu1 %v2946_v16 }
  0x8e   : > { %2010 = vmatmul.mubr.bf16.vlgmr.msra.gmra.mrb[12].mxu0 %v1777_v17  ;;  %2051 = vmatmul.mubr.bf16.vlgmr.msra.gmra.mrb[12].mxu1 %v1779_v18 }
 0x101   : > { %v2633_v47 = vpop.f32.mrb[0].mxu0  ;;  %v2655_v34 = vpop.f32.mrb[0].mxu1 }
 0x102   : > { %v2634_v38 = vpop.f32.mrb[1].mxu0  ;;  %v2656_v37 = vpop.f32.mrb[1].mxu1 }
 0x103   : > { %v2635_v42 = vadd.f32 %v2634_v38, %v2633_v47  ;;  %v2657_v46 = vadd.f32 %v2656_v37, %v2655_v34  ;;  %v2636_v57 = vpop.f32.mrb[2].mxu0  ;;  %v2658_v52 = vpop.f32.mrb[2].mxu1  ;;  %v2613_v38 = vld [vmem:[%s3603_s2] ss:$0 sm:$0xff] }
 0x104   : > { %v2637_v19 = vpop.f32.mrb[3].mxu0  ;;  %v2659_v20 = vpop.f32.mrb[3].mxu1 }
 0x105   : > { %v825_v21 = vadd.f32 %v2657_v46, %v2635_v42  ;;  %v2638_v23 = vadd.f32 %v2637_v19, %v2636_v57  ;;  %v2660_v24 = vadd.f32 %v2659_v20, %v2658_v52 }
 0x107   : > { %v828_v25 = vadd.f32 %v2660_v24, %v2638_v23 }
 0x121   : > { %v2677_v26 = vpop.f32.mrb[4].mxu0  ;;  %v2699_v28 = vpop.f32.mrb[4].mxu1 }
 0x122   : > { %v2678_v29 = vpop.f32.mrb[5].mxu0  ;;  %v2700_v30 = vpop.f32.mrb[5].mxu1 }
 0x123   : > { %v2679_v35 = vadd.f32 %v2678_v29, %v2677_v26  ;;  %v2701_v36 = vadd.f32 %v2700_v30, %v2699_v28  ;;  %v2680_v32 = vpop.f32.mrb[6].mxu0  ;;  %v2702_v40 = vpop.f32.mrb[6].mxu1 }
 0x124   : > { %v2681_v44 = vpop.f32.mrb[7].mxu0  ;;  %v2703_v45 = vpop.f32.mrb[7].mxu1 }
 0x125   : > { %v1098_v48 = vadd.f32 %v2679_v35, %v825_v21  ;;  %v2682_v49 = vadd.f32 %v2681_v44, %v2680_v32  ;;  %v2704_v53 = vadd.f32 %v2703_v45, %v2702_v40 }
 0x127   : > { %v1139_v54 = vadd.f32 %v2701_v36, %v1098_v48  ;;  %v1101_v50 = vadd.f32 %v2682_v49, %v828_v25 }
 0x129   : > { %v1142_v7 = vadd.f32 %v2704_v53, %v1101_v50  ;;  %v1147_v62 = vcombine.high %v1139_v54, %v1139_v54 }
 0x12b   : > { %v1148_v2 = vcombine.high %v1142_v7, %v1142_v7 }
 0x141   : > { %v2721_v41 = vpop.f32.mrb[8].mxu0  ;;  %v2743_v51 = vpop.f32.mrb[8].mxu1 }
 0x142   : > { %v2722_v55 = vpop.f32.mrb[9].mxu0  ;;  %v2744_v43 = vpop.f32.mrb[9].mxu1 }
 0x143   : > { %v2723_v27 = vadd.f32 %v2722_v55, %v2721_v41  ;;  %v2745_v31 = vadd.f32 %v2744_v43, %v2743_v51  ;;  %v2724_v33 = vpop.f32.mrb[10].mxu0  ;;  %v2746_v56 = vpop.f32.mrb[10].mxu1 }
 0x144   : > { %v2725_v39 = vpop.f32.mrb[11].mxu0  ;;  %v2747_v58 = vpop.f32.mrb[11].mxu1 }
 0x145   : > { %v1604_v59 = vadd.f32 %v2745_v31, %v2723_v27  ;;  %v2726_v60 = vadd.f32 %v2725_v39, %v2724_v33  ;;  %v2748_v61 = vadd.f32 %v2747_v58, %v2746_v56 }
 0x147   : > { %v1612_v63 = vcombine.high %v1604_v59, %v1604_v59  ;;  %v1616_v0 = vadd.f32 %v1604_v59, %v1139_v54  ;;  %v1607_v1 = vadd.f32 %v2748_v61, %v2726_v60 }
 0x149   : > { %v1617_v3 = vadd.f32 %v1612_v63, %v1147_v62  ;;  %v1613_v4 = vcombine.high %v1607_v1, %v1607_v1  ;;  %v1618_v5 = vadd.f32 %v1607_v1, %v1142_v7 }
 0x14b   : > { %v1619_v6 = vadd.f32 %v1613_v4, %v1148_v2 }
 0x161   : > { %v2765_v8 = vpop.f32.mrb[12].mxu0  ;;  %v2787_v9 = vpop.f32.mrb[12].mxu1 }
 0x162   : > { %v2766_v10 = vpop.f32.mrb[13].mxu0  ;;  %v2788_v11 = vpop.f32.mrb[13].mxu1 }
 0x163   : > { %v2767_v12 = vadd.f32 %v2766_v10, %v2765_v8  ;;  %v2789_v13 = vadd.f32 %v2788_v11, %v2787_v9  ;;  %v2768_v14 = vpop.f32.mrb[14].mxu0  ;;  %v2790_v15 = vpop.f32.mrb[14].mxu1 }
 0x164   : > { %v2769_v16 = vpop.f32.mrb[15].mxu0  ;;  %v2791_v17 = vpop.f32.mrb[15].mxu1 }
 0x165   : > { %v2053_v18 = vadd.f32 %v2789_v13, %v2767_v12  ;;  %v2770_v47 = vadd.f32 %v2769_v16, %v2768_v14  ;;  %v2792_v34 = vadd.f32 %v2791_v17, %v2790_v15 }
 0x167   : > { %v2061_v37 = vcombine.high %v2053_v18, %v2053_v18  ;;  %v2065_v42 = vadd.f32 %v2053_v18, %v1616_v0  ;;  %v2056_v46 = vadd.f32 %v2792_v34, %v2770_v47 }
 0x169   : > { %v2066_v57 = vadd.f32 %v2061_v37, %v1617_v3  ;;  %v2076_v52 = vadd.f32 %v2613_v38, %v2065_v42  ;;  %v2062_v19 = vcombine.high %v2056_v46, %v2056_v46  ;;  %v2067_v20 = vadd.f32 %v2056_v46, %v1618_v5 }
 0x16b   : > { %v2077_v21 = vadd.f32 %v2613_v38, %v2066_v57  ;;  %v2094_v23 = vmul.f32 %v2076_v52, %v2076_v52  ;;  %v2116_v24 = vpack.c.bf16 %v2076_v52, %v2076_v52  ;;  %v2068_v25 = vadd.f32 %v2062_v19, %v1619_v6 }
 0x16c   : > { %v2078_v26 = vadd.f32 %v2613_v38, %v2067_v20  ;;  %v2081_v28 = vsel %vm2080_vm7, %v2076_v52, 0.0 }
 0x16d   : > { %v2082_v29 = vsel %vm2080_vm7, %v2077_v21, 0.0  ;;  %v2095_v30 = vmul.f32 %v2077_v21, %v2077_v21  ;;  %v2117_v35 = vpack.c.bf16 %v2077_v21, %v2077_v21  ;;  %2120 = vst [vmem:[%s231_s25] sm:$0x3] %v2116_v24  ;;  %v2079_v32 = vadd.f32 %v2613_v38, %v2068_v25 }
 0x16e   : > { %v2083_v36 = vadd.f32 %v2082_v29, %v2081_v28  ;;  %v2096_v40 = vmul.f32 %v2078_v26, %v2078_v26  ;;  %v2098_v44 = vsel %vm2080_vm7, %v2094_v23, 0.0  ;;  %v2084_v48 = vsel %vm2080_vm7, %v2078_v26, 0.0 }
 0x16f   : > { %v2099_v45 = vsel %vm2080_vm7, %v2095_v30, 0.0  ;;  %2121 = vst [vmem:[%s231_s25 + $0x2] sm:$0x3] %v2117_v35  ;;  %v2118_v49 = vpack.c.bf16 %v2078_v26, %v2078_v26  ;;  %v2097_v50 = vmul.f32 %v2079_v32, %v2079_v32  ;;  %v2086_v7 = vsel %vm2080_vm7, %v2079_v32, 0.0 }
 0x170   : > { %v2100_v53 = vadd.f32 %v2099_v45, %v2098_v44  ;;  %v2085_v54 = vadd.f32 %v2084_v48, %v2083_v36  ;;  %v2101_v41 = vsel %vm2080_vm7, %v2096_v40, 0.0  ;;  %v2119_v51 = vpack.c.bf16 %v2079_v32, %v2079_v32 }
 0x171   : > { %2122 = vst [vmem:[%s231_s25 + $0x4] sm:$0x3] %v2118_v49  ;;  %v2103_v27 = vsel %vm2080_vm7, %v2097_v50, 0.0 }
 0x172   : > { %v2087_v55 = vadd.f32 %v2086_v7, %v2085_v54  ;;  %v2102_v43 = vadd.f32 %v2101_v41, %v2100_v53  ;;  %2123 = vst [vmem:[%s231_s25 + $0x6] sm:$0x3] %v2119_v51 }
 0x174   : > { %v2088_v31 = vrot.slane %v2087_v55, 4  ;;  %v2104_v33 = vadd.f32 %v2103_v27, %v2102_v43 }
 0x176   : > { %v2089_v56 = vadd.f32 %v2088_v31, %v2087_v55  ;;  %v2105_v39 = vrot.slane %v2104_v33, 4 }
 0x178   : > { %v2090_v58 = vrot.slane %v2089_v56, 2  ;;  %v2106_v59 = vadd.f32 %v2105_v39, %v2104_v33 }
 0x17a   : > { %v2091_v60 = vadd.f32 %v2090_v58, %v2089_v56  ;;  %v2107_v61 = vrot.slane %v2106_v59, 2 }
 0x17c   : > { %v2092_v62 = vrot.slane %v2091_v60, 1  ;;  %v2108_v63 = vadd.f32 %v2107_v61, %v2106_v59 }
 0x17e   : > { %v2109_v0 = vrot.slane %v2108_v63, 1  ;;  %v2093_v1 = vadd.f32 %v2092_v62, %v2091_v60 }
 0x180   : > { %v2110_v2 = vadd.f32 %v2109_v0, %v2108_v63 }
 0x182   : > { %v2114_v3 = vsel %vm2113_vm8, %v2093_v1, %v2110_v2 }
 0x183   : > { %2115 = vst [vmem:[%s239_s29] sm:$0x3] %v2114_v3 }
 0x184 PF: > { %s15_s17 = sadd.s32 1, %s2969_s17   ;;  %s3610_s15 = smov %s2965_s16 }
 0x185   : > { %p12_p5 = scmp.ge.s32.totalorder %s15_s17, 4   ;;  %s3611_s16 = smov %s3613_s18 }
 0x187   :  { %14 = sbr.rel (!%p12_p5) target bundleno = 2 (0x2), region = 79 }

// kernel: _lambda_.9
= control target key start
LH: loop header
LB: loop body
LE: loop exit
PB: predicated region body
PF: predicated region fallthrough
CT: control target
= control target key end

     0   :  { %s3863_s12 = smov 0   ;;  %s3865_s13 = smov 0   ;;  %s4668_s0 = inlined_call_operand.vmem [shape: bf16[2,5,5,128], index: 0, kind: input, shape index: {}]   ;;  %s4669_s1 = inlined_call_operand.vmem [shape: bf16[16,128,128], index: 1, kind: input, shape index: {}]   ;;  %s4670_s2 = inlined_call_operand.vmem [shape: f32[1,128], index: 2, kind: input, shape index: {}]   ;;  %s4671_s3 = inlined_call_operand.vmem [shape: bf16[2,2,2,128], index: 3, kind: output, shape index: {}]  }
   0x1   :  { %s3867_s14 = smov 0  }
   0x2 LB: > { %s25_s15 = sadd.s32 1, %s3833_s13  ;;  %p2790_p0 = scmp.ge.s32.totalorder %s3837_s14, 1  ;;  %s3837_s14 = sphi %s3867_s14, %s13_s14   ;;  %s3833_s13 = sphi %s3865_s13, %s4675_s13   ;;  %s3829_s12 = sphi %s3863_s12, %s4674_s12  }
   0x3   : > { %p27_p1 = scmp.ge.s32.totalorder %s25_s15, 2  ;;  %p151_p2 = scmp.lt.s32.totalorder %s3837_s14, 3 }
   0x5   : > { %s4677_s15 = smov (%p27_p1, %s25_s15), 0  ;;  %p152_p3 = pnand %p2790_p0, %p151_p2 }
   0x6   : > { %v3683_v0 = vld [vmem:[%s4669_s1 + $0x40] sm:$0xff] (!%p152_p3)   ;;  %v3839_v1 = vmov (!%p152_p3), 0.0   ;;  %v3685_v3 = vld [vmem:[%s4669_s1 + $0x48] sm:$0xff] (!%p152_p3)   ;;  %vm3840_vm0 = vmmov (!%p152_p3), 0   ;;  %p178_p4 = scmp.lt.s32.totalorder (!%p152_p3), %s3829_s12, 1  ;;  %v3687_v5 = vld [vmem:[%s4669_s1 + $0x50] sm:$0xff] (!%p152_p3)   ;;  %v236_v9 = vlaneseq (!%p152_p3) }
   0x7   : > { %155 = sbr.rel (%p152_p3) target bundleno = 488 (0x1e8), region = 32  ;;  %3330 = vmatprep.subr.bf16.mxu0 (!%p152_p3), %v3839_v1  ;;  %3370 = vmatprep.subr.bf16.mxu1 (!%p152_p3), %v3839_v1  ;;  %v3684_v2 = vld [vmem:[%s4669_s1 + $0x80] sm:$0xff] (!%p152_p3)   ;;  %v3686_v4 = vld [vmem:[%s4669_s1 + $0x88] sm:$0xff] (!%p152_p3)   ;;  %v3688_v6 = vld [vmem:[%s4669_s1 + $0x90] sm:$0xff] (!%p152_p3)   ;;  %v3841_v13 = vmov (!%p152_p3), 1966171168  }
   0x8   : > { %3331 = vmatpush3.bf16.msra.mxu0 (!%p152_p3), %v3683_v0  ;;  %3386 = vmatprep.mubr.msk.bf16.mxu1 (!%p152_p3), %vm3840_vm0, %v3839_v1  ;;  %v3689_v7 = vld [vmem:[%s4669_s1 + $0x58] sm:$0xff] (!%p152_p3)   ;;  %v3691_v10 = vld [vmem:[%s4669_s1 + $0x60] sm:$0xff] (!%p152_p3)   ;;  %v3937_v12 = vshrl.u32 (!%p152_p3), %v236_v9, 7  ;;  %v234_v14 = vunpack.c.l.s4 (!%p152_p3), %v3841_v13  ;;  %vm277_vm1 = vsmask.f32 (!%p152_p3), 256  ;;  %v3693_v15 = vld [vmem:[%s4669_s1 + $0x68] sm:$0xff] (!%p152_p3)  }
   0x9   : > { %3371 = vmatpush3.bf16.msra.mxu1 (!%p152_p3), %v3684_v2  ;;  %3332 = vmatprep.subr.bf16.mxu0 (!%p152_p3), %v3839_v1  ;;  %v3690_v8 = vld [vmem:[%s4669_s1 + $0x98] sm:$0xff] (!%p152_p3)   ;;  %v3692_v11 = vld [vmem:[%s4669_s1 + $0xa0] sm:$0xff] (!%p152_p3)   ;;  %vm278_vm2 = vsmask.f32 (!%p152_p3), 1284  ;;  %vm280_vm3 = vsmask.f32 (!%p152_p3), 2312 }
   0xa   : > { %3372 = vmatprep.subr.bf16.mxu1 (!%p152_p3), %v3839_v1  ;;  %3346 = vmatprep.mubr.msk.bf16.mxu0 (!%p152_p3), %vm3840_vm0, %v3839_v1  ;;  %v3694_v16 = vld [vmem:[%s4669_s1 + $0xa8] sm:$0xff] (!%p152_p3)   ;;  %vm279_vm4 = vmor (!%p152_p3), %vm277_vm1, %vm278_vm2  ;;  %vm282_vm5 = vsmask.f32 (!%p152_p3), 3340  ;;  %vm284_vm6 = vsmask.f32 (!%p152_p3), 4368  ;;  %v235_v18 = vunpack.c.0.s8 (!%p152_p3), %v234_v14  ;;  %v3695_v21 = vld [vmem:[%s4669_s1 + $0x70] sm:$0xff] (!%p152_p3)  }
   0xb   : > { %vm281_vm7 = vmor (!%p152_p3), %vm279_vm4, %vm280_vm3  ;;  %vm286_vm8 = vsmask.f32 (!%p152_p3), 5396  ;;  %vm288_vm11 = vsmask.f32 (!%p152_p3), 6424  ;;  %v3696_v22 = vld [vmem:[%s4669_s1 + $0xb0] sm:$0xff] (!%p152_p3)   ;;  %v3697_v29 = vld [vmem:[%s4669_s1 + $0x78] sm:$0xff] (!%p152_p3)  }
   0xc   : > { %3333 = vmatpush3.bf16.msra.mxu0 (!%p152_p3), %v3685_v3  ;;  %vm283_vm9 = vmor (!%p152_p3), %vm281_vm7, %vm282_vm5  ;;  %v3954_v20 = vsub.s32 (!%p152_p3), %v235_v18, %v3937_v12  ;;  %vm290_vm14 = vsmask.f32 (!%p152_p3), 7452  ;;  %v3698_v30 = vld [vmem:[%s4669_s1 + $0xb8] sm:$0xff] (!%p152_p3)   ;;  %v3700_v43 = vld [vmem:[%s4669_s1 + $0xc0] sm:$0xff] (!%p152_p3)  }
   0xd   : > { %3373 = vmatpush3.bf16.msra.mxu1 (!%p152_p3), %v3686_v4  ;;  %3334 = vmatprep.subr.bf16.mxu0 (!%p152_p3), %v3839_v1  ;;  %vm285_vm10 = vmor (!%p152_p3), %vm283_vm9, %vm284_vm6  ;;  %v3699_v46 = vld [vmem:[%s4669_s1] sm:$0xff] (!%p152_p3)   ;;  %v3702_v48 = vld [vmem:[%s4669_s1 + $0xc8] sm:$0xff] (!%p152_p3)  }
   0xe   : > { %3374 = vmatprep.subr.bf16.mxu1 %v3839_v1  ;;  %s4679_s12 = smov (!%p178_p4, %s3829_s12), 1  ;;  %vm287_vm12 = vmor %vm285_vm10, %vm286_vm8  ;;  %v3701_v49 = vld [vmem:[%s4669_s1 + $0x8] sm:$0xff]   ;;  %v3704_v50 = vld [vmem:[%s4669_s1 + $0xd0] sm:$0xff]  }
   0xf   : > { %s3654_s5 = smul.u32 20, %s4679_s12  ;;  %vm289_vm13 = vmor %vm287_vm12, %vm288_vm11  ;;  %v3703_v51 = vld [vmem:[%s4669_s1 + $0x10] sm:$0xff]   ;;  %v3706_v53 = vld [vmem:[%s4669_s1 + $0xd8] sm:$0xff]  }
  0x10   : > { %3335 = vmatpush3.bf16.msra.mxu0 %v3687_v5  ;;  %vm3979_vm15 = vmor %vm289_vm13, %vm290_vm14  ;;  %v3705_v55 = vld [vmem:[%s4669_s1 + $0x18] sm:$0xff]   ;;  %v3708_v56 = vld [vmem:[%s4669_s1 + $0xe0] sm:$0xff]  }
  0x11   : > { %3375 = vmatpush3.bf16.msra.mxu1 %v3688_v6  ;;  %3336 = vmatprep.subr.bf16.mxu0 %v3839_v1  ;;  %s3935_s16 = scalar_lea.vmem %s4668_s0, %s3654_s5  ;;  %v3707_v61 = vld [vmem:[%s4669_s1 + $0x20] sm:$0xff]   ;;  %v3710_v62 = vld [vmem:[%s4669_s1 + $0xe8] sm:$0xff]   ;;  %v3712_v4 = vld [vmem:[%s4669_s1 + $0xf0] sm:$0xff]   ;;  %s2792_s5 = sshll.u32 %s4679_s12, 1 }
  0x12   : > { %3376 = vmatprep.subr.bf16.mxu1 %v3839_v1  ;;  %v3947_v17 = vld [vmem:[%s3935_s16] sm:$0x7]  ;;  %v3951_v19 = vld [vmem:[%s3935_s16 + $0x4] sm:$0x7]  ;;  %v3709_v2 = vld [vmem:[%s4669_s1 + $0x28] sm:$0xff]   ;;  %s190_s8 = scalar_lea.vmem %s4671_s3, %s2792_s5 }
  0x13   : > { %v239_v23 = vrot.slane %v3947_v17, %v3954_v20  ;;  %v261_v24 = vrot.slane %v3951_v19, %v3954_v20  ;;  %v414_v5 = vcombine.low %v3947_v17, %v3951_v19  ;;  %v3711_v6 = vld [vmem:[%s4669_s1 + $0x30] sm:$0xff]   ;;  %v3713_v9 = vld [vmem:[%s4669_s1 + $0x38] sm:$0xff]   ;;  %v3717_v13 = vld [vmem:[%s4669_s1 + $0x140] sm:$0xff]  }
  0x14   : > { %3337 = vmatpush3.bf16.msra.mxu0 %v3689_v7  ;;  %v4073_v14 = vld [vmem:[%s3935_s16 + $0x4] sm:$0x7]  ;;  %v3719_v18 = vld [vmem:[%s4669_s1 + $0x148] sm:$0xff]  }
  0x15   : > { %3377 = vmatpush3.bf16.msra.mxu1 %v3690_v8  ;;  %3338 = vmatprep.subr.bf16.mxu0 %v3839_v1  ;;  %v240_v25 = vcombine.high %v239_v23, %v239_v23  ;;  %v262_v26 = vcombine.high %v261_v24, %v261_v24  ;;  %v247_v27 = vrot.slane %v239_v23, %v3954_v20  ;;  %v3714_v8 = vld [vmem:[%s4669_s1 + $0xf8] sm:$0xff]   ;;  %v3716_v17 = vld [vmem:[%s4669_s1 + $0x100] sm:$0xff]   ;;  %v3721_v23 = vld [vmem:[%s4669_s1 + $0x150] sm:$0xff]  }
  0x16   : > { %3378 = vmatprep.subr.bf16.mxu1 %v3839_v1  ;;  %v269_v28 = vrot.slane %v261_v24, %v3954_v20  ;;  %v979_v19 = vrot.slane %v4073_v14, %v3954_v20 }
  0x17   : > { %v254_v31 = vrot.slane %v240_v25, %v3954_v20  ;;  %v276_v32 = vrot.slane %v262_v26, %v3954_v20  ;;  %v293_v34 = vshrl.u32 %v247_v27, 16  ;;  %v680_v52 = vcombine.high %v247_v27, %v247_v27  ;;  %v3720_v26 = vld [vmem:[%s4669_s1 + $0x110] sm:$0xff]  }
  0x18   : > { %3339 = vmatpush3.bf16.msra.mxu0 %v3691_v10  ;;  %v302_v35 = vshrl.u32 %v269_v28, 16  ;;  %v681_v54 = vcombine.high %v269_v28, %v269_v28  ;;  %v421_v10 = vrot.slane %v414_v5, %v3954_v20  ;;  %v980_v24 = vcombine.high %v979_v19, %v979_v19 }
  0x19   : > { %3379 = vmatpush3.bf16.msra.mxu1 %v3692_v11  ;;  %3340 = vmatprep.subr.bf16.mxu0 %v3839_v1  ;;  %v546_v36 = vcombine.low %v254_v31, %v276_v32  ;;  %v298_v37 = vshll.u32 %v254_v31, 16  ;;  %v307_v38 = vshll.u32 %v276_v32, 16  ;;  %v682_v57 = vshrl.u32 %v254_v31, 16 }
  0x1a   : > { %3380 = vmatprep.subr.bf16.mxu1 %v3839_v1  ;;  %v687_v58 = vshll.u32 %v680_v52, 16  ;;  %v690_v59 = vshrl.u32 %v276_v32, 16  ;;  %v695_v60 = vshll.u32 %v681_v54, 16  ;;  %v4108_v27 = vrot.slane %v979_v19, %v3954_v20  ;;  %v3722_v32 = vld [vmem:[%s4669_s1 + $0x118] sm:$0xff]  }
  0x1b   : > { %v553_v39 = vrot.slane %v546_v36, %v3954_v20  ;;  %v300_v40 = vsel %vm3979_vm15, %v293_v34, %v298_v37  ;;  %v309_v41 = vsel %vm3979_vm15, %v302_v35, %v307_v38  ;;  %v3725_v34 = vld [vmem:[%s4669_s1 + $0x160] sm:$0xff]   ;;  %v3747_v19 = vld [vmem:[%s4669_s1 + $0x1b8] sm:$0xff]  }
  0x1c   : > { %3341 = vmatpush3.bf16.msra.mxu0 %v3693_v15  ;;  %v310_v42 = vcombine.low %v300_v40, %v309_v41  ;;  %v689_v63 = vsel %vm3979_vm15, %v682_v57, %v687_v58  ;;  %v697_v0 = vsel %vm3979_vm15, %v690_v59, %v695_v60  ;;  %v4077_v15 = vld [vmem:[%s3935_s16 + $0x8] sm:$0x7]  ;;  %v1018_v35 = vshrl.u32 %v4108_v27, 16  ;;  %v3738_v58 = vld [vmem:[%s4669_s1 + $0x1d0] sm:$0xff]  }
  0x1d   : > { %3381 = vmatpush3.bf16.msra.mxu1 %v3694_v16  ;;  %3342 = vmatprep.subr.bf16.mxu0 %v3839_v1  ;;  %v560_v44 = vrot.slane %v553_v39, %v3954_v20  ;;  %v698_v3 = vcombine.low %v689_v63, %v697_v0  ;;  %v428_v16 = vrot.slane %v421_v10, %v3954_v20  ;;  %v3724_v39 = vld [vmem:[%s4669_s1 + $0x120] sm:$0xff]   ;;  %v3727_v40 = vld [vmem:[%s4669_s1 + $0x168] sm:$0xff]   ;;  %v3737_v59 = vld [vmem:[%s4669_s1 + $0x190] sm:$0xff]  }
  0x1e   : > { %3382 = vmatprep.subr.bf16.mxu1 %v3839_v1  ;;  %v317_v45 = vrot.slane %v310_v42, %v3954_v20  ;;  %v3735_v57 = vld [vmem:[%s4669_s1 + $0x188] sm:$0xff]   ;;  %v1303_v60 = vcombine.high %v4108_v27, %v4108_v27  ;;  %v3739_v63 = vld [vmem:[%s4669_s1 + $0x198] sm:$0xff]  }
  0x1f   : > { %v705_v7 = vrot.slane %v698_v3, %v3954_v20  ;;  %v3743_v10 = vld [vmem:[%s4669_s1 + $0x1a8] sm:$0xff]  }
  0x20   : > { %3343 = vmatpush3.bf16.msra.mxu0 %v3695_v21  ;;  %v324_v47 = vrot.slane %v317_v45, %v3954_v20  ;;  %v1001_v21 = vrot.slane %v4077_v15, %v3954_v20  ;;  %v3729_v45 = vld [vmem:[%s4669_s1 + $0x170] sm:$0xff]   ;;  %v1310_v3 = vshll.u32 %v1303_v60, 16  ;;  %v3752_v27 = vld [vmem:[%s4669_s1 + $0x248] sm:$0xff]  }
  0x21   : > { %3383 = vmatpush3.bf16.msra.mxu1 %v3696_v22  ;;  %3344 = vmatprep.subr.bf16.mxu0 %v3839_v1  ;;  %v712_v11 = vrot.slane %v705_v7, %v3954_v20  ;;  %v3718_v22 = vld [vmem:[%s4669_s1 + $0x108] sm:$0xff]  }
  0x22   : > { %3384 = vmatprep.subr.bf16.mxu1 %v3839_v1  ;;  %v1002_v25 = vcombine.high %v1001_v21, %v1001_v21  ;;  %v4111_v28 = vrot.slane %v1001_v21, %v3954_v20  ;;  %v3744_v7 = vld [vmem:[%s4669_s1 + $0x1e8] sm:$0xff]  }
  0x24   : > { %3345 = vmatpush3.bf16.msra.mxu0 %v3697_v29  ;;  %v3723_v29 = vld [vmem:[%s4669_s1 + $0x158] sm:$0xff]   ;;  %v4121_v31 = vrot.slane %v1002_v25, %v3954_v20  ;;  %v1027_v36 = vshrl.u32 %v4111_v28, 16 }
  0x25   : > { %3385 = vmatpush3.bf16.msra.mxu1 %v3698_v30  ;;  %3350 = vmatprep.subr.bf16.mxu0 %v3839_v1  ;;  %v4118_v30 = vrot.slane %v980_v24, %v3954_v20  ;;  %v4265_v24 = vld [vmem:[%s3935_s16 + $0xc] sm:$0x7] }
  0x26   : > { %3390 = vmatprep.subr.bf16.mxu1 %v3839_v1  ;;  %v1032_v38 = vshll.u32 %v4121_v31, 16 }
  0x27   : > { %3347 = vmatmul.mubr.bf16.vlgmr.msra.gmra.mrb[0].mxu0 %v324_v47  ;;  %v1023_v37 = vshll.u32 %v4118_v30, 16  ;;  %v3728_v47 = vld [vmem:[%s4669_s1 + $0x130] sm:$0xff]   ;;  %v1305_v0 = vshrl.u32 %v4118_v30, 16 }
  0x28   : > { %3387 = vmatmul.mubr.bf16.vlgmr.msra.gmra.mrb[0].mxu1 %v560_v44  ;;  %3351 = vmatpush3.bf16.msra.mxu0 %v3699_v46  ;;  %v1034_v42 = vsel %vm3979_vm15, %v1027_v36, %v1032_v38  ;;  %v839_v46 = vcombine.low %v4073_v14, %v4077_v15  ;;  %v1169_v14 = vcombine.low %v4118_v30, %v4121_v31  ;;  %v3745_v15 = vld [vmem:[%s4669_s1 + $0x1b0] sm:$0xff]   ;;  %v3751_v30 = vld [vmem:[%s4669_s1 + $0x208] sm:$0xff]  }
  0x29   : > { %3391 = vmatpush3.bf16.msra.mxu1 %v3700_v43  ;;  %3406 = vmatprep.mubr.msk.bf16.mxu1 %vm3840_vm0, %v3839_v1  ;;  %v1025_v41 = vsel %vm3979_vm15, %v1018_v35, %v1023_v37  ;;  %v3726_v43 = vld [vmem:[%s4669_s1 + $0x128] sm:$0xff]   ;;  %v3753_v35 = vld [vmem:[%s4669_s1 + $0x210] sm:$0xff]   ;;  %v3756_v37 = vld [vmem:[%s4669_s1 + $0x258] sm:$0xff]  }
  0x2a   : > { %3392 = vmatprep.subr.bf16.mxu1 %v3839_v1  ;;  %3366 = vmatprep.mubr.msk.bf16.mxu0 %vm3840_vm0, %v3839_v1  ;;  %v1035_v44 = vcombine.low %v1025_v41, %v1034_v42  ;;  %v3755_v41 = vld [vmem:[%s4669_s1 + $0x218] sm:$0xff]   ;;  %v3758_v42 = vld [vmem:[%s4669_s1 + $0x260] sm:$0xff]  }
  0x2b   : > { %3352 = vmatprep.subr.bf16.mxu0 %v3839_v1 }
  0x2c   : > { %3353 = vmatpush3.bf16.msra.mxu0 %v3701_v49  ;;  %v3731_v49 = vld [vmem:[%s4669_s1 + $0x178] sm:$0xff]  }
  0x2d   : > { %3393 = vmatpush3.bf16.msra.mxu1 %v3702_v48  ;;  %3354 = vmatprep.subr.bf16.mxu0 %v3839_v1  ;;  %v1042_v48 = vrot.slane %v1035_v44, %v3954_v20 }
  0x2e   : > { %3394 = vmatprep.subr.bf16.mxu1 %v3839_v1 }
  0x2f   : > { %v1049_v52 = vrot.slane %v1042_v48, %v3954_v20  ;;  %v3760_v48 = vld [vmem:[%s4669_s1 + $0x268] sm:$0xff]  }
  0x30   : > { %3355 = vmatpush3.bf16.msra.mxu0 %v3703_v51  ;;  %v3730_v51 = vld [vmem:[%s4669_s1 + $0x138] sm:$0xff]  }
  0x31   : > { %3395 = vmatpush3.bf16.msra.mxu1 %v3704_v50  ;;  %3356 = vmatprep.subr.bf16.mxu0 %v3839_v1  ;;  %v846_v50 = vrot.slane %v839_v46, %v3954_v20 }
  0x32   : > { %3396 = vmatprep.subr.bf16.mxu1 %v3839_v1 }
  0x33   : > { %v853_v54 = vrot.slane %v846_v50, %v3954_v20 }
  0x34   : > { %3357 = vmatpush3.bf16.msra.mxu0 %v3705_v55  ;;  %v3733_v55 = vld [vmem:[%s4669_s1 + $0x180] sm:$0xff]  }
  0x35   : > { %3397 = vmatpush3.bf16.msra.mxu1 %v3706_v53  ;;  %3358 = vmatprep.subr.bf16.mxu0 %v3839_v1  ;;  %v3734_v53 = vld [vmem:[%s4669_s1 + $0x1c0] sm:$0xff]  }
  0x36   : > { %3398 = vmatprep.subr.bf16.mxu1 %v3839_v1 }
  0x38   : > { %3359 = vmatpush3.bf16.msra.mxu0 %v3707_v61  ;;  %v3740_v61 = vld [vmem:[%s4669_s1 + $0x1d8] sm:$0xff]  }
  0x39   : > { %3399 = vmatpush3.bf16.msra.mxu1 %v3708_v56  ;;  %3360 = vmatprep.subr.bf16.mxu0 %v3839_v1  ;;  %v3736_v56 = vld [vmem:[%s4669_s1 + $0x1c8] sm:$0xff]  }
  0x3a   : > { %3400 = vmatprep.subr.bf16.mxu1 %v3839_v1 }
  0x3c   : > { %3361 = vmatpush3.bf16.msra.mxu0 %v3709_v2  ;;  %v3742_v2 = vld [vmem:[%s4669_s1 + $0x1e0] sm:$0xff]  }
  0x3d   : > { %3401 = vmatpush3.bf16.msra.mxu1 %v3710_v62  ;;  %3362 = vmatprep.subr.bf16.mxu0 %v3839_v1  ;;  %v1304_v62 = vcombine.high %v4111_v28, %v4111_v28 }
  0x3e   : > { %3402 = vmatprep.subr.bf16.mxu1 %v3839_v1 }
  0x3f   : > { %v1318_v5 = vshll.u32 %v1304_v62, 16 }
  0x40   : > { %3363 = vmatpush3.bf16.msra.mxu0 %v3711_v6  ;;  %v3741_v6 = vld [vmem:[%s4669_s1 + $0x1a0] sm:$0xff]  }
  0x41   : > { %3403 = vmatpush3.bf16.msra.mxu1 %v3712_v4  ;;  %3364 = vmatprep.subr.bf16.mxu0 %v3839_v1  ;;  %v1313_v4 = vshrl.u32 %v4121_v31, 16  ;;  %v3754_v31 = vld [vmem:[%s4669_s1 + $0x250] sm:$0xff]  }
  0x42   : > { %3404 = vmatprep.subr.bf16.mxu1 %v3839_v1 }
  0x44   : > { %3365 = vmatpush3.bf16.msra.mxu0 %v3713_v9  ;;  %v1320_v9 = vsel %vm3979_vm15, %v1313_v4, %v1318_v5  ;;  %v3770_v4 = vld [vmem:[%s4669_s1 + $0x290] sm:$0xff]   ;;  %v3773_v5 = vld [vmem:[%s4669_s1 + $0x2d8] sm:$0xff]  }
  0x45   : > { %3405 = vmatpush3.bf16.msra.mxu1 %v3714_v8  ;;  %3410 = vmatprep.subr.bf16.mxu0 %v3839_v1  ;;  %v1312_v8 = vsel %vm3979_vm15, %v1305_v0, %v1310_v3  ;;  %v3769_v0 = vld [vmem:[%s4669_s1 + $0x2c8] sm:$0xff]   ;;  %v3771_v3 = vld [vmem:[%s4669_s1 + $0x2d0] sm:$0xff]  }
  0x46   : > { %3430 = vmatprep.subr.bf16.mxu1 %v3839_v1 }
  0x47   : > { %3367 = vmatmul.mubr.bf16.vlgmr.msra.gmra.mrb[0].mxu0 %v428_v16 }
  0x48   : > { %3407 = vmatmul.mubr.bf16.vlgmr.msra.gmra.mrb[4].mxu1 %v712_v11  ;;  %3411 = vmatpush3.bf16.msra.mxu0 %v3716_v17  ;;  %v1321_v11 = vcombine.low %v1312_v8, %v1320_v9  ;;  %v3748_v17 = vld [vmem:[%s4669_s1 + $0x1f8] sm:$0xff]   ;;  %v3775_v9 = vld [vmem:[%s4669_s1 + $0x2e0] sm:$0xff]  }
  0x49   : > { %3431 = vmatpush3.bf16.msra.mxu1 %v3717_v13  ;;  %3446 = vmatprep.mubr.msk.bf16.mxu1 %vm3840_vm0, %v3839_v1  ;;  %v3746_v13 = vld [vmem:[%s4669_s1 + $0x1f0] sm:$0xff]   ;;  %v3772_v8 = vld [vmem:[%s4669_s1 + $0x298] sm:$0xff]  }
  0x4a   : > { %3432 = vmatprep.subr.bf16.mxu1 %v3839_v1  ;;  %3426 = vmatprep.mubr.msk.bf16.mxu0 %vm3840_vm0, %v3839_v1  ;;  %v1328_v16 = vrot.slane %v1321_v11, %v3954_v20 }
  0x4b   : > { %3412 = vmatprep.subr.bf16.mxu0 %v3839_v1 }
  0x4c   : > { %3413 = vmatpush3.bf16.msra.mxu0 %v3718_v22  ;;  %v1335_v21 = vrot.slane %v1328_v16, %v3954_v20  ;;  %v3750_v22 = vld [vmem:[%s4669_s1 + $0x240] sm:$0xff]   ;;  %v3777_v16 = vld [vmem:[%s4669_s1 + $0x2e8] sm:$0xff]  }
  0x4d   : > { %3433 = vmatpush3.bf16.msra.mxu1 %v3719_v18  ;;  %3414 = vmatprep.subr.bf16.mxu0 %v3839_v1  ;;  %v1176_v18 = vrot.slane %v1169_v14, %v3954_v20 }
  0x4e   : > { %3434 = vmatprep.subr.bf16.mxu1 %v3839_v1 }
  0x4f   : > { %v1183_v25 = vrot.slane %v1176_v18, %v3954_v20 }
  0x50   : > { %3415 = vmatpush3.bf16.msra.mxu0 %v3720_v26  ;;  %v3749_v26 = vld [vmem:[%s4669_s1 + $0x200] sm:$0xff]  }
  0x51   : > { %3435 = vmatpush3.bf16.msra.mxu1 %v3721_v23  ;;  %3416 = vmatprep.subr.bf16.mxu0 %v3839_v1  ;;  %v4262_v23 = vld [vmem:[%s3935_s16 + $0x8] sm:$0x7] }
  0x52   : > { %3436 = vmatprep.subr.bf16.mxu1 %v3839_v1  ;;  %v1602_v28 = vrot.slane %v4262_v23, %v3954_v20 }
  0x54   : > { %3417 = vmatpush3.bf16.msra.mxu0 %v3722_v32  ;;  %v1603_v32 = vcombine.high %v1602_v28, %v1602_v28  ;;  %v4296_v36 = vrot.slane %v1602_v28, %v3954_v20  ;;  %v3780_v28 = vld [vmem:[%s4669_s1 + $0x2b8] sm:$0xff]  }
  0x55   : > { %3437 = vmatpush3.bf16.msra.mxu1 %v3723_v29  ;;  %3418 = vmatprep.subr.bf16.mxu0 %v3839_v1  ;;  %v1624_v29 = vrot.slane %v4265_v24, %v3954_v20 }
  0x56   : > { %3438 = vmatprep.subr.bf16.mxu1 %v3839_v1  ;;  %v4303_v38 = vrot.slane %v1603_v32, %v3954_v20  ;;  %v4453_v32 = vld [vmem:[%s3935_s16 + $0x10] sm:$0x7] }
  0x58   : > { %3419 = vmatpush3.bf16.msra.mxu0 %v3724_v39  ;;  %v4306_v39 = vrot.slane %v1624_v29, %v3954_v20  ;;  %v1646_v44 = vshll.u32 %v4303_v38, 16 }
  0x59   : > { %3439 = vmatpush3.bf16.msra.mxu1 %v3725_v34  ;;  %3420 = vmatprep.subr.bf16.mxu0 %v3839_v1  ;;  %v1625_v34 = vcombine.high %v1624_v29, %v1624_v29 }
  0x5a   : > { %3440 = vmatprep.subr.bf16.mxu1 %v3839_v1 }
  0x5c   : > { %3421 = vmatpush3.bf16.msra.mxu0 %v3726_v43  ;;  %v1641_v43 = vshrl.u32 %v4296_v36, 16 }
  0x5d   : > { %3441 = vmatpush3.bf16.msra.mxu1 %v3727_v40  ;;  %3422 = vmatprep.subr.bf16.mxu0 %v3839_v1  ;;  %v4309_v40 = vrot.slane %v1625_v34, %v3954_v20 }
  0x5e   : > { %3442 = vmatprep.subr.bf16.mxu1 %v3839_v1 }
  0x5f   : > { %v1655_v46 = vshll.u32 %v4309_v40, 16 }
  0x60   : > { %3423 = vmatpush3.bf16.msra.mxu0 %v3728_v47  ;;  %v3757_v47 = vld [vmem:[%s4669_s1 + $0x220] sm:$0xff]  }
  0x61   : > { %3443 = vmatpush3.bf16.msra.mxu1 %v3729_v45  ;;  %3424 = vmatprep.subr.bf16.mxu0 %v3839_v1  ;;  %v1650_v45 = vshrl.u32 %v4306_v39, 16 }
  0x62   : > { %3444 = vmatprep.subr.bf16.mxu1 %v3839_v1 }
  0x63   : > { %v1657_v50 = vsel %vm3979_vm15, %v1650_v45, %v1655_v46  ;;  %v3789_v45 = vld [vmem:[%s4669_s1 + $0x358] sm:$0xff]  }
  0x64   : > { %3425 = vmatpush3.bf16.msra.mxu0 %v3730_v51  ;;  %v3759_v51 = vld [vmem:[%s4669_s1 + $0x228] sm:$0xff]  }
  0x65   : > { %3445 = vmatpush3.bf16.msra.mxu1 %v3731_v49  ;;  %3450 = vmatprep.subr.bf16.mxu0 %v3839_v1  ;;  %v1648_v49 = vsel %vm3979_vm15, %v1641_v43, %v1646_v44  ;;  %v3786_v43 = vld [vmem:[%s4669_s1 + $0x310] sm:$0xff]  }
  0x66   : > { %3470 = vmatprep.subr.bf16.mxu1 %v3839_v1 }
  0x67   : > { %3427 = vmatmul.mubr.bf16.vlgmr.msra.gmra.mrb[4].mxu0 %v853_v54  ;;  %v1462_v54 = vcombine.low %v4262_v23, %v4265_v24  ;;  %v1792_v23 = vcombine.low %v4303_v38, %v4309_v40  ;;  %v3778_v24 = vld [vmem:[%s4669_s1 + $0x2b0] sm:$0xff]  }
  0x68   : > { %3447 = vmatmul.mubr.bf16.vlgmr.msra.gmra.mrb[8].mxu1 %v1049_v52  ;;  %3451 = vmatpush3.bf16.msra.mxu0 %v3733_v55  ;;  %v1658_v52 = vcombine.low %v1648_v49, %v1657_v50  ;;  %v3761_v55 = vld [vmem:[%s4669_s1 + $0x230] sm:$0xff]   ;;  %v3788_v49 = vld [vmem:[%s4669_s1 + $0x318] sm:$0xff]   ;;  %v3791_v50 = vld [vmem:[%s4669_s1 + $0x360] sm:$0xff]  }
  0x69   : > { %3471 = vmatpush3.bf16.msra.mxu1 %v3734_v53  ;;  %3486 = vmatprep.mubr.msk.bf16.mxu1 %vm3840_vm0, %v3839_v1  ;;  %v3762_v53 = vld [vmem:[%s4669_s1 + $0x270] sm:$0xff]  }
  0x6a   : > { %3472 = vmatprep.subr.bf16.mxu1 %v3839_v1  ;;  %3466 = vmatprep.mubr.msk.bf16.mxu0 %vm3840_vm0, %v3839_v1 }
  0x6b   : > { %3452 = vmatprep.subr.bf16.mxu0 %v3839_v1 }
  0x6c   : > { %3453 = vmatpush3.bf16.msra.mxu0 %v3735_v57  ;;  %v3764_v57 = vld [vmem:[%s4669_s1 + $0x278] sm:$0xff]  }
  0x6d   : > { %3473 = vmatpush3.bf16.msra.mxu1 %v3736_v56  ;;  %3454 = vmatprep.subr.bf16.mxu0 %v3839_v1  ;;  %v1665_v56 = vrot.slane %v1658_v52, %v3954_v20 }
  0x6e   : > { %3474 = vmatprep.subr.bf16.mxu1 %v3839_v1 }
  0x6f   : > { %v1672_v60 = vrot.slane %v1665_v56, %v3954_v20  ;;  %v3793_v56 = vld [vmem:[%s4669_s1 + $0x368] sm:$0xff]  }
  0x70   : > { %3455 = vmatpush3.bf16.msra.mxu0 %v3737_v59  ;;  %v3763_v59 = vld [vmem:[%s4669_s1 + $0x238] sm:$0xff]  }
  0x71   : > { %3475 = vmatpush3.bf16.msra.mxu1 %v3738_v58  ;;  %3456 = vmatprep.subr.bf16.mxu0 %v3839_v1  ;;  %v1469_v58 = vrot.slane %v1462_v54, %v3954_v20 }
  0x72   : > { %3476 = vmatprep.subr.bf16.mxu1 %v3839_v1 }
  0x73   : > { %v1476_v62 = vrot.slane %v1469_v58, %v3954_v20 }
  0x74   : > { %3457 = vmatpush3.bf16.msra.mxu0 %v3739_v63  ;;  %v3766_v63 = vld [vmem:[%s4669_s1 + $0x280] sm:$0xff]  }
  0x75   : > { %3477 = vmatpush3.bf16.msra.mxu1 %v3740_v61  ;;  %3458 = vmatprep.subr.bf16.mxu0 %v3839_v1  ;;  %v3767_v61 = vld [vmem:[%s4669_s1 + $0x2c0] sm:$0xff]  }
  0x76   : > { %3478 = vmatprep.subr.bf16.mxu1 %v3839_v1 }
  0x78   : > { %3459 = vmatpush3.bf16.msra.mxu0 %v3741_v6  ;;  %v1926_v6 = vcombine.high %v4296_v36, %v4296_v36  ;;  %v3785_v36 = vld [vmem:[%s4669_s1 + $0x348] sm:$0xff]  }
  0x79   : > { %3479 = vmatpush3.bf16.msra.mxu1 %v3742_v2  ;;  %3460 = vmatprep.subr.bf16.mxu0 %v3839_v1  ;;  %v3768_v2 = vld [vmem:[%s4669_s1 + $0x288] sm:$0xff]  }
  0x7a   : > { %3480 = vmatprep.subr.bf16.mxu1 %v3839_v1  ;;  %v1933_v11 = vshll.u32 %v1926_v6, 16  ;;  %v3800_v6 = vld [vmem:[%s4669_s1 + $0x3c0] sm:$0xff]  }
  0x7c   : > { %3461 = vmatpush3.bf16.msra.mxu0 %v3743_v10  ;;  %v1928_v10 = vshrl.u32 %v4303_v38, 16  ;;  %v2247_v38 = vrot.slane %v4453_v32, %v3954_v20 }
  0x7d   : > { %3481 = vmatpush3.bf16.msra.mxu1 %v3744_v7  ;;  %3462 = vmatprep.subr.bf16.mxu0 %v3839_v1  ;;  %v1927_v7 = vcombine.high %v4306_v39, %v4306_v39  ;;  %v3784_v39 = vld [vmem:[%s4669_s1 + $0x308] sm:$0xff]  }
  0x7e   : > { %3482 = vmatprep.subr.bf16.mxu1 %v3839_v1 }
  0x7f   : > { %v1941_v14 = vshll.u32 %v1927_v7, 16 }
  0x80   : > { %3463 = vmatpush3.bf16.msra.mxu0 %v3745_v15  ;;  %v3774_v15 = vld [vmem:[%s4669_s1 + $0x2a0] sm:$0xff]  }
  0x81   : > { %3483 = vmatpush3.bf16.msra.mxu1 %v3746_v13  ;;  %3464 = vmatprep.subr.bf16.mxu0 %v3839_v1  ;;  %v1936_v13 = vshrl.u32 %v4309_v40, 16  ;;  %v3787_v40 = vld [vmem:[%s4669_s1 + $0x350] sm:$0xff]  }
  0x82   : > { %3484 = vmatprep.subr.bf16.mxu1 %v3839_v1 }
  0x83   : > { %v1943_v18 = vsel %vm3979_vm15, %v1936_v13, %v1941_v14  ;;  %v3803_v13 = vld [vmem:[%s4669_s1 + $0x390] sm:$0xff]   ;;  %v3806_v14 = vld [vmem:[%s4669_s1 + $0x3d8] sm:$0xff]  }
  0x84   : > { %3465 = vmatpush3.bf16.msra.mxu0 %v3747_v19  ;;  %v3776_v19 = vld [vmem:[%s4669_s1 + $0x2a8] sm:$0xff]  }
  0x85   : > { %3485 = vmatpush3.bf16.msra.mxu1 %v3748_v17  ;;  %3490 = vmatprep.subr.bf16.mxu0 %v3839_v1  ;;  %v1935_v17 = vsel %vm3979_vm15, %v1928_v10, %v1933_v11  ;;  %v3801_v10 = vld [vmem:[%s4669_s1 + $0x388] sm:$0xff]   ;;  %v3804_v11 = vld [vmem:[%s4669_s1 + $0x3d0] sm:$0xff]  }
  0x86   : > { %3510 = vmatprep.subr.bf16.mxu1 %v3839_v1 }
  0x87   : > { %3467 = vmatmul.mubr.bf16.vlgmr.msra.gmra.mrb[8].mxu0 %v1183_v25 }
  0x88   : > { %3487 = vmatmul.mubr.bf16.vlgmr.msra.gmra.mrb[12].mxu1 %v1335_v21  ;;  %3491 = vmatpush3.bf16.msra.mxu0 %v3749_v26  ;;  %v1944_v21 = vcombine.low %v1935_v17, %v1943_v18  ;;  %v3781_v26 = vld [vmem:[%s4669_s1 + $0x2f8] sm:$0xff]   ;;  %v3808_v18 = vld [vmem:[%s4669_s1 + $0x3e0] sm:$0xff]  }
  0x89   : > { %3511 = vmatpush3.bf16.msra.mxu1 %v3750_v22  ;;  %3526 = vmatprep.mubr.msk.bf16.mxu1 %vm3840_vm0, %v3839_v1  ;;  %v3779_v22 = vld [vmem:[%s4669_s1 + $0x2f0] sm:$0xff]   ;;  %v3805_v17 = vld [vmem:[%s4669_s1 + $0x398] sm:$0xff]  }
  0x8a   : > { %3512 = vmatprep.subr.bf16.mxu1 %v3839_v1  ;;  %3506 = vmatprep.mubr.msk.bf16.mxu0 %vm3840_vm0, %v3839_v1  ;;  %v1951_v25 = vrot.slane %v1944_v21, %v3954_v20 }
  0x8b   : > { %3492 = vmatprep.subr.bf16.mxu0 %v3839_v1 }
  0x8c   : > { %3493 = vmatpush3.bf16.msra.mxu0 %v3751_v30  ;;  %v1958_v29 = vrot.slane %v1951_v25, %v3954_v20  ;;  %v3783_v30 = vld [vmem:[%s4669_s1 + $0x340] sm:$0xff]   ;;  %v3810_v25 = vld [vmem:[%s4669_s1 + $0x3e8] sm:$0xff]  }
  0x8d   : > { %3513 = vmatpush3.bf16.msra.mxu1 %v3752_v27  ;;  %3494 = vmatprep.subr.bf16.mxu0 %v3839_v1  ;;  %v1799_v27 = vrot.slane %v1792_v23, %v3954_v20 }
  0x8e   : > { %3514 = vmatprep.subr.bf16.mxu1 %v3839_v1 }
  0x8f   : > { %v1806_v34 = vrot.slane %v1799_v27, %v3954_v20 }
  0x90   : > { %3495 = vmatpush3.bf16.msra.mxu0 %v3753_v35  ;;  %v3782_v35 = vld [vmem:[%s4669_s1 + $0x300] sm:$0xff]  }
  0x91   : > { %3515 = vmatpush3.bf16.msra.mxu1 %v3754_v31  ;;  %3496 = vmatprep.subr.bf16.mxu0 %v3839_v1  ;;  %v4450_v31 = vld [vmem:[%s3935_s16 + $0xc] sm:$0x7] }
  0x92   : > { %3516 = vmatprep.subr.bf16.mxu1 %v3839_v1 }
  0x94   : > { %3497 = vmatpush3.bf16.msra.mxu0 %v3755_v41 }
  0x95   : > { %3517 = vmatpush3.bf16.msra.mxu1 %v3756_v37  ;;  %3498 = vmatprep.subr.bf16.mxu0 %v3839_v1  ;;  %v2225_v37 = vrot.slane %v4450_v31, %v3954_v20 }
  0x96   : > { %3518 = vmatprep.subr.bf16.mxu1 %v3839_v1 }
  0x97   : > { %v2226_v41 = vcombine.high %v2225_v37, %v2225_v37  ;;  %v4484_v44 = vrot.slane %v2225_v37, %v3954_v20 }
  0x98   : > { %3499 = vmatpush3.bf16.msra.mxu0 %v3757_v47  ;;  %v4494_v47 = vrot.slane %v2247_v38, %v3954_v20 }
  0x99   : > { %3519 = vmatpush3.bf16.msra.mxu1 %v3758_v42  ;;  %3500 = vmatprep.subr.bf16.mxu0 %v3839_v1  ;;  %v2248_v42 = vcombine.high %v2247_v38, %v2247_v38  ;;  %v4491_v46 = vrot.slane %v2226_v41, %v3954_v20  ;;  %v3814_v38 = vld [vmem:[%s4669_s1 + $0x3f8] sm:$0xff]  }
  0x9a   : > { %3520 = vmatprep.subr.bf16.mxu1 %v3839_v1 }
  0x9b   : > { %v2269_v52 = vshll.u32 %v4491_v46, 16 }
  0x9c   : > { %3501 = vmatpush3.bf16.msra.mxu0 %v3759_v51  ;;  %v2264_v51 = vshrl.u32 %v4484_v44, 16 }
  0x9d   : > { %3521 = vmatpush3.bf16.msra.mxu1 %v3760_v48  ;;  %3502 = vmatprep.subr.bf16.mxu0 %v3839_v1  ;;  %v4497_v48 = vrot.slane %v2248_v42, %v3954_v20 }
  0x9e   : > { %3522 = vmatprep.subr.bf16.mxu1 %v3839_v1 }
  0x9f   : > { %v2278_v54 = vshll.u32 %v4497_v48, 16 }
  0xa0   : > { %3503 = vmatpush3.bf16.msra.mxu0 %v3761_v55  ;;  %v3790_v55 = vld [vmem:[%s4669_s1 + $0x320] sm:$0xff]  }
  0xa1   : > { %3523 = vmatpush3.bf16.msra.mxu1 %v3762_v53  ;;  %3504 = vmatprep.subr.bf16.mxu0 %v3839_v1  ;;  %v2273_v53 = vshrl.u32 %v4494_v47, 16 }
  0xa2   : > { %3524 = vmatprep.subr.bf16.mxu1 %v3839_v1 }
  0xa3   : > { %v2280_v58 = vsel %vm3979_vm15, %v2273_v53, %v2278_v54 }
  0xa4   : > { %3505 = vmatpush3.bf16.msra.mxu0 %v3763_v59  ;;  %v3792_v59 = vld [vmem:[%s4669_s1 + $0x328] sm:$0xff]  }
  0xa5   : > { %3525 = vmatpush3.bf16.msra.mxu1 %v3764_v57  ;;  %3530 = vmatprep.subr.bf16.mxu0 %v3839_v1  ;;  %v2271_v57 = vsel %vm3979_vm15, %v2264_v51, %v2269_v52 }
  0xa6   : > { %3550 = vmatprep.subr.bf16.mxu1 %v3839_v1 }
  0xa7   : > { %3507 = vmatmul.mubr.bf16.vlgmr.msra.gmra.mrb[12].mxu0 %v1476_v62  ;;  %v2085_v62 = vcombine.low %v4450_v31, %v4453_v32 }
  0xa8   : > { %3527 = vmatmul.mubr.bf16.vlgmr.msra.gmra.mrb[16].mxu1 %v1672_v60  ;;  %3531 = vmatpush3.bf16.msra.mxu0 %v3766_v63  ;;  %v2281_v60 = vcombine.low %v2271_v57, %v2280_v58  ;;  %v3794_v63 = vld [vmem:[%s4669_s1 + $0x330] sm:$0xff]  }
  0xa9   : > { %3551 = vmatpush3.bf16.msra.mxu1 %v3767_v61  ;;  %3566 = vmatprep.mubr.msk.bf16.mxu1 %vm3840_vm0, %v3839_v1  ;;  %v3795_v61 = vld [vmem:[%s4669_s1 + $0x370] sm:$0xff]  }
  0xaa   : > { %3552 = vmatprep.subr.bf16.mxu1 %v3839_v1  ;;  %3546 = vmatprep.mubr.msk.bf16.mxu0 %vm3840_vm0, %v3839_v1 }
  0xab   : > { %3532 = vmatprep.subr.bf16.mxu0 %v3839_v1 }
  0xac   : > { %3533 = vmatpush3.bf16.msra.mxu0 %v3768_v2  ;;  %v3797_v2 = vld [vmem:[%s4669_s1 + $0x378] sm:$0xff]  }
  0xad   : > { %3553 = vmatpush3.bf16.msra.mxu1 %v3769_v0  ;;  %3534 = vmatprep.subr.bf16.mxu0 %v3839_v1  ;;  %v2288_v0 = vrot.slane %v2281_v60, %v3954_v20 }
  0xae   : > { %3554 = vmatprep.subr.bf16.mxu1 %v3839_v1 }
  0xb0   : > { %3535 = vmatpush3.bf16.msra.mxu0 %v3770_v4  ;;  %v3796_v4 = vld [vmem:[%s4669_s1 + $0x338] sm:$0xff]  }
  0xb1   : > { %3555 = vmatpush3.bf16.msra.mxu1 %v3771_v3  ;;  %3536 = vmatprep.subr.bf16.mxu0 %v3839_v1  ;;  %v2092_v3 = vrot.slane %v2085_v62, %v3954_v20 }
  0xb2   : > { %3556 = vmatprep.subr.bf16.mxu1 %v3839_v1 }
  0xb3   : > { %v2099_v7 = vrot.slane %v2092_v3, %v3954_v20 }
  0xb4   : > { %3537 = vmatpush3.bf16.msra.mxu0 %v3772_v8  ;;  %v3799_v8 = vld [vmem:[%s4669_s1 + $0x380] sm:$0xff]  }
  0xb5   : > { %3557 = vmatpush3.bf16.msra.mxu1 %v3773_v5  ;;  %3538 = vmatprep.subr.bf16.mxu0 %v3839_v1  ;;  %v2295_v5 = vrot.slane %v2288_v0, %v3954_v20 }
  0xb6   : > { %3558 = vmatprep.subr.bf16.mxu1 %v3839_v1 }
  0xb8   : > { %3539 = vmatpush3.bf16.msra.mxu0 %v3774_v15  ;;  %v2549_v15 = vcombine.high %v4484_v44, %v4484_v44 }
  0xb9   : > { %3559 = vmatpush3.bf16.msra.mxu1 %v3775_v9  ;;  %3540 = vmatprep.subr.bf16.mxu0 %v3839_v1  ;;  %v3802_v9 = vld [vmem:[%s4669_s1 + $0x3c8] sm:$0xff]  }
  0xba   : > { %3560 = vmatprep.subr.bf16.mxu1 %v3839_v1  ;;  %v2556_v21 = vshll.u32 %v2549_v15, 16 }
  0xbc   : > { %3541 = vmatpush3.bf16.msra.mxu0 %v3776_v19  ;;  %v2551_v19 = vshrl.u32 %v4491_v46, 16 }
  0xbd   : > { %3561 = vmatpush3.bf16.msra.mxu1 %v3777_v16  ;;  %3542 = vmatprep.subr.bf16.mxu0 %v3839_v1  ;;  %v2550_v16 = vcombine.high %v4494_v47, %v4494_v47 }
  0xbe   : > { %3562 = vmatprep.subr.bf16.mxu1 %v3839_v1 }
  0xbf   : > { %v2564_v23 = vshll.u32 %v2550_v16, 16 }
  0xc0   : > { %3543 = vmatpush3.bf16.msra.mxu0 %v3778_v24  ;;  %v3807_v24 = vld [vmem:[%s4669_s1 + $0x3a0] sm:$0xff]  }
  0xc1   : > { %3563 = vmatpush3.bf16.msra.mxu1 %v3779_v22  ;;  %3544 = vmatprep.subr.bf16.mxu0 %v3839_v1  ;;  %v2559_v22 = vshrl.u32 %v4497_v48, 16 }
  0xc2   : > { %3564 = vmatprep.subr.bf16.mxu1 %v3839_v1 }
  0xc3   : > { %v2566_v27 = vsel %vm3979_vm15, %v2559_v22, %v2564_v23 }
  0xc4   : > { %3545 = vmatpush3.bf16.msra.mxu0 %v3780_v28 }
  0xc5   : > { %3565 = vmatpush3.bf16.msra.mxu1 %v3781_v26  ;;  %3570 = vmatprep.subr.bf16.mxu0 %v3839_v1  ;;  %v2558_v26 = vsel %vm3979_vm15, %v2551_v19, %v2556_v21 }
  0xc6   : > { %3590 = vmatprep.subr.bf16.mxu1 %v3839_v1  ;;  %v2567_v31 = vcombine.low %v2558_v26, %v2566_v27 }
  0xc7   : > { %3547 = vmatmul.mubr.bf16.vlgmr.msra.gmra.mrb[16].mxu0 %v1806_v34  ;;  %v3812_v34 = vld [vmem:[%s4669_s1 + $0x3f0] sm:$0xff]  }
  0xc8   : > { %3567 = vmatmul.mubr.bf16.vlgmr.msra.gmra.mrb[20].mxu1 %v1958_v29  ;;  %3571 = vmatpush3.bf16.msra.mxu0 %v3782_v35  ;;  %v2415_v35 = vcombine.low %v4491_v46, %v4497_v48  ;;  %v2574_v37 = vrot.slane %v2567_v31, %v3954_v20 }
  0xc9   : > { %3591 = vmatpush3.bf16.msra.mxu1 %v3783_v30  ;;  %3606 = vmatprep.mubr.msk.bf16.mxu1 %vm3840_vm0, %v3839_v1  ;;  %v3809_v30 = vld [vmem:[%s4669_s1 + $0x3a8] sm:$0xff]  }
  0xca   : > { %3592 = vmatprep.subr.bf16.mxu1 %v3839_v1  ;;  %3586 = vmatprep.mubr.msk.bf16.mxu0 %vm3840_vm0, %v3839_v1  ;;  %v2581_v41 = vrot.slane %v2574_v37, %v3954_v20 }
  0xcb   : > { %3572 = vmatprep.subr.bf16.mxu0 %v3839_v1 }
  0xcc   : > { %3573 = vmatpush3.bf16.msra.mxu0 %v3784_v39  ;;  %v2422_v39 = vrot.slane %v2415_v35, %v3954_v20 }
  0xcd   : > { %3593 = vmatpush3.bf16.msra.mxu1 %v3785_v36  ;;  %3574 = vmatprep.subr.bf16.mxu0 %v3839_v1  ;;  %v3811_v36 = vld [vmem:[%s4669_s1 + $0x3b0] sm:$0xff]  }
  0xce   : > { %3594 = vmatprep.subr.bf16.mxu1 %v3839_v1  ;;  %v2429_v42 = vrot.slane %v2422_v39, %v3954_v20 }
  0xd0   : > { %3575 = vmatpush3.bf16.msra.mxu0 %v3786_v43  ;;  %v3842_v43 = vmov 1983009808  }
  0xd1   : > { %3595 = vmatpush3.bf16.msra.mxu1 %v3787_v40  ;;  %3576 = vmatprep.subr.bf16.mxu0 %v3839_v1  ;;  %v3813_v40 = vld [vmem:[%s4669_s1 + $0x3b8] sm:$0xff]   ;;  %v520_v44 = vunpack.c.l.s4 %v3842_v43 }
  0xd2   : > { %3596 = vmatprep.subr.bf16.mxu1 %v3839_v1 }
  0xd4   : > { %3577 = vmatpush3.bf16.msra.mxu0 %v3788_v49 }
  0xd5   : > { %3597 = vmatpush3.bf16.msra.mxu1 %v3789_v45  ;;  %3578 = vmatprep.subr.bf16.mxu0 %v3839_v1  ;;  %v521_v45 = vunpack.c.0.s8 %v520_v44 }
  0xd6   : > { %3598 = vmatprep.subr.bf16.mxu1 %v3839_v1 }
  0xd7   : > { %v4635_v46 = vsub.s32 %v521_v45, %v3937_v12 }
  0xd8   : > { %3579 = vmatpush3.bf16.msra.mxu0 %v3790_v55 }
  0xd9   : > { %3599 = vmatpush3.bf16.msra.mxu1 %v3791_v50  ;;  %3580 = vmatprep.subr.bf16.mxu0 %v3839_v1 }
  0xda   : > { %3600 = vmatprep.subr.bf16.mxu1 %v3839_v1 }
  0xdc   : > { %3581 = vmatpush3.bf16.msra.mxu0 %v3792_v59 }
  0xdd   : > { %3601 = vmatpush3.bf16.msra.mxu1 %v3793_v56  ;;  %3582 = vmatprep.subr.bf16.mxu0 %v3839_v1 }
  0xde   : > { %3602 = vmatprep.subr.bf16.mxu1 %v3839_v1 }
  0xe0   : > { %3583 = vmatpush3.bf16.msra.mxu0 %v3794_v63 }
  0xe1   : > { %3603 = vmatpush3.bf16.msra.mxu1 %v3795_v61  ;;  %3584 = vmatprep.subr.bf16.mxu0 %v3839_v1 }
  0xe2   : > { %3604 = vmatprep.subr.bf16.mxu1 %v3839_v1 }
  0xe4   : > { %3585 = vmatpush3.bf16.msra.mxu0 %v3796_v4 }
  0xe5   : > { %3605 = vmatpush3.bf16.msra.mxu1 %v3797_v2  ;;  %3610 = vmatprep.subr.bf16.mxu0 %v3839_v1 }
  0xe6   : > { %3630 = vmatprep.subr.bf16.mxu1 %v3839_v1 }
  0xe7   : > { %3587 = vmatmul.mubr.bf16.vlgmr.msra.gmra.mrb[20].mxu0 %v2099_v7 }
  0xe8   : > { %3607 = vmatmul.mubr.bf16.vlgmr.msra.gmra.mrb[24].mxu1 %v2295_v5  ;;  %3611 = vmatpush3.bf16.msra.mxu0 %v3799_v8 }
  0xe9   : > { %3631 = vmatpush3.bf16.msra.mxu1 %v3800_v6  ;;  %3646 = vmatprep.mubr.msk.bf16.mxu1 %vm3840_vm0, %v3839_v1 }
  0xea   : > { %3632 = vmatprep.subr.bf16.mxu1 %v3839_v1  ;;  %3626 = vmatprep.mubr.msk.bf16.mxu0 %vm3840_vm0, %v3839_v1 }
  0xeb   : > { %3612 = vmatprep.subr.bf16.mxu0 %v3839_v1 }
  0xec   : > { %3613 = vmatpush3.bf16.msra.mxu0 %v3801_v10 }
  0xed   : > { %3633 = vmatpush3.bf16.msra.mxu1 %v3802_v9  ;;  %3614 = vmatprep.subr.bf16.mxu0 %v3839_v1 }
  0xee   : > { %3634 = vmatprep.subr.bf16.mxu1 %v3839_v1 }
  0xf0   : > { %3615 = vmatpush3.bf16.msra.mxu0 %v3803_v13 }
  0xf1   : > { %3635 = vmatpush3.bf16.msra.mxu1 %v3804_v11  ;;  %3616 = vmatprep.subr.bf16.mxu0 %v3839_v1 }
  0xf2   : > { %3636 = vmatprep.subr.bf16.mxu1 %v3839_v1 }
  0xf4   : > { %3617 = vmatpush3.bf16.msra.mxu0 %v3805_v17 }
  0xf5   : > { %3637 = vmatpush3.bf16.msra.mxu1 %v3806_v14  ;;  %3618 = vmatprep.subr.bf16.mxu0 %v3839_v1 }
  0xf6   : > { %3638 = vmatprep.subr.bf16.mxu1 %v3839_v1 }
  0xf8   : > { %3619 = vmatpush3.bf16.msra.mxu0 %v3807_v24 }
  0xf9   : > { %3639 = vmatpush3.bf16.msra.mxu1 %v3808_v18  ;;  %3620 = vmatprep.subr.bf16.mxu0 %v3839_v1 }
  0xfa   : > { %3640 = vmatprep.subr.bf16.mxu1 %v3839_v1 }
  0xfb   : > { %v644_v28 = vpop.f32.mrb[0].mxu1 }
  0xfc   : > { %v3388_v29 = vpop.f32.mrb[1].mxu1  ;;  %3621 = vmatpush3.bf16.msra.mxu0 %v3809_v30  ;;  %v657_v49 = vrot.slane %v644_v28, %v4635_v46 }
  0xfd   : > { %v647_v32 = vpop.f32.mrb[2].mxu1  ;;  %3641 = vmatpush3.bf16.msra.mxu1 %v3810_v25  ;;  %3622 = vmatprep.subr.bf16.mxu0 %v3839_v1 }
  0xfe   : > { %v3389_v33 = vpop.f32.mrb[3].mxu1  ;;  %3642 = vmatprep.subr.bf16.mxu1 %v3839_v1  ;;  %v658_v55 = vcombine.high %v657_v49, %v657_v49 }
 0x100   : > { %3623 = vmatpush3.bf16.msra.mxu0 %v3811_v36 }
 0x101   : > { %3643 = vmatpush3.bf16.msra.mxu1 %v3812_v34  ;;  %3624 = vmatprep.subr.bf16.mxu0 %v3839_v1 }
 0x102   : > { %3644 = vmatprep.subr.bf16.mxu1 %v3839_v1 }
 0x104   : > { %3625 = vmatpush3.bf16.msra.mxu0 %v3813_v40 }
 0x105   : > { %3645 = vmatpush3.bf16.msra.mxu1 %v3814_v38 }
 0x107   : > { %3627 = vmatmul.mubr.bf16.vlgmr.msra.gmra.mrb[24].mxu0 %v2429_v42 }
 0x108   : > { %3647 = vmatmul.mubr.bf16.vlgmr.msra.gmra.mrb[28].mxu1 %v2581_v41 }
 0x11a   : > { %v512_v1 = vpop.f32.mrb[0].mxu0 }
 0x11b   : > { %v796_v47 = vpop.f32.mrb[4].mxu1  ;;  %v525_v20 = vrot.slane %v512_v1, %v4635_v46  ;;  %v3368_v53 = vpop.f32.mrb[1].mxu0 }
 0x11c   : > { %v3408_v48 = vpop.f32.mrb[5].mxu1  ;;  %v809_v50 = vrot.slane %v796_v47, %v4635_v46  ;;  %v515_v54 = vpop.f32.mrb[2].mxu0 }
 0x11d   : > { %v799_v51 = vpop.f32.mrb[6].mxu1  ;;  %v526_v56 = vcombine.high %v525_v20, %v525_v20  ;;  %v661_v57 = vadd.f32 %v657_v49, %v525_v20  ;;  %v3369_v59 = vpop.f32.mrb[3].mxu0 }
 0x11e   : > { %v3409_v52 = vpop.f32.mrb[7].mxu1  ;;  %v810_v58 = vcombine.high %v809_v50, %v809_v50 }
 0x11f   : > { %v662_v12 = vadd.f32 %v658_v55, %v526_v56  ;;  %v813_v60 = vadd.f32 %v809_v50, %v661_v57 }
 0x121   : > { %v814_v61 = vadd.f32 %v810_v58, %v662_v12 }
 0x13a   : > { %v937_v3 = vpop.f32.mrb[4].mxu0 }
 0x13b   : > { %v1133_v62 = vpop.f32.mrb[8].mxu1  ;;  %v950_v5 = vrot.slane %v937_v3, %v4635_v46  ;;  %v3428_v6 = vpop.f32.mrb[5].mxu0 }
 0x13c   : > { %v3448_v63 = vpop.f32.mrb[9].mxu1  ;;  %v1146_v0 = vrot.slane %v1133_v62, %v4635_v46  ;;  %v940_v7 = vpop.f32.mrb[6].mxu0 }
 0x13d   : > { %v1136_v2 = vpop.f32.mrb[10].mxu1  ;;  %v951_v8 = vcombine.high %v950_v5, %v950_v5  ;;  %v954_v9 = vadd.f32 %v950_v5, %v813_v60  ;;  %v3429_v11 = vpop.f32.mrb[7].mxu0 }
 0x13e   : > { %v3449_v4 = vpop.f32.mrb[11].mxu1  ;;  %v1147_v10 = vcombine.high %v1146_v0, %v1146_v0 }
 0x13f   : > { %v955_v13 = vadd.f32 %v951_v8, %v814_v61  ;;  %v1150_v14 = vadd.f32 %v1146_v0, %v954_v9 }
 0x141   : > { %v1151_v15 = vadd.f32 %v1147_v10, %v955_v13 }
 0x15a   : > { %v1267_v21 = vpop.f32.mrb[8].mxu0 }
 0x15b   : > { %v1419_v16 = vpop.f32.mrb[12].mxu1  ;;  %v1280_v23 = vrot.slane %v1267_v21, %v4635_v46  ;;  %v3468_v24 = vpop.f32.mrb[9].mxu0 }
 0x15c   : > { %v3488_v17 = vpop.f32.mrb[13].mxu1  ;;  %v1432_v18 = vrot.slane %v1419_v16, %v4635_v46  ;;  %v1270_v25 = vpop.f32.mrb[10].mxu0 }
 0x15d   : > { %v1422_v19 = vpop.f32.mrb[14].mxu1  ;;  %v1281_v26 = vcombine.high %v1280_v23, %v1280_v23  ;;  %v1284_v27 = vadd.f32 %v1280_v23, %v1150_v14  ;;  %v3469_v29 = vpop.f32.mrb[11].mxu0 }
 0x15e   : > { %v3489_v22 = vpop.f32.mrb[15].mxu1  ;;  %v1433_v28 = vcombine.high %v1432_v18, %v1432_v18 }
 0x15f   : > { %v1285_v30 = vadd.f32 %v1281_v26, %v1151_v15  ;;  %v1436_v31 = vadd.f32 %v1432_v18, %v1284_v27 }
 0x161   : > { %v1437_v32 = vadd.f32 %v1433_v28, %v1285_v30 }
 0x17a   : > { %v1560_v37 = vpop.f32.mrb[12].mxu0 }
 0x17b   : > { %v1756_v34 = vpop.f32.mrb[16].mxu1  ;;  %v1573_v39 = vrot.slane %v1560_v37, %v4635_v46  ;;  %v3508_v40 = vpop.f32.mrb[13].mxu0 }
 0x17c   : > { %v3528_v33 = vpop.f32.mrb[17].mxu1  ;;  %v1769_v35 = vrot.slane %v1756_v34, %v4635_v46  ;;  %v1563_v41 = vpop.f32.mrb[14].mxu0 }
 0x17d   : > { %v1759_v36 = vpop.f32.mrb[18].mxu1  ;;  %v1574_v42 = vcombine.high %v1573_v39, %v1573_v39  ;;  %v1577_v43 = vadd.f32 %v1573_v39, %v1436_v31  ;;  %v3509_v45 = vpop.f32.mrb[15].mxu0  ;;  %v3183_v31 = vld [vmem:[%s4670_s2] ss:$0 sm:$0xff] }
 0x17e   : > { %v3529_v38 = vpop.f32.mrb[19].mxu1  ;;  %v1770_v44 = vcombine.high %v1769_v35, %v1769_v35 }
 0x17f   : > { %v1578_v47 = vadd.f32 %v1574_v42, %v1437_v32  ;;  %v1773_v48 = vadd.f32 %v1769_v35, %v1577_v43 }
 0x181   : > { %v1774_v49 = vadd.f32 %v1770_v44, %v1578_v47 }
 0x19a   : > { %v1890_v20 = vpop.f32.mrb[16].mxu0 }
 0x19b   : > { %v2042_v50 = vpop.f32.mrb[20].mxu1  ;;  %v1903_v54 = vrot.slane %v1890_v20, %v4635_v46  ;;  %v3548_v55 = vpop.f32.mrb[17].mxu0 }
 0x19c   : > { %v3568_v51 = vpop.f32.mrb[21].mxu1  ;;  %v2055_v1 = vrot.slane %v2042_v50, %v4635_v46  ;;  %v1893_v56 = vpop.f32.mrb[18].mxu0 }
 0x19d   : > { %v2045_v52 = vpop.f32.mrb[22].mxu1  ;;  %v1904_v57 = vcombine.high %v1903_v54, %v1903_v54  ;;  %v1907_v58 = vadd.f32 %v1903_v54, %v1773_v48  ;;  %v3549_v12 = vpop.f32.mrb[19].mxu0 }
 0x19e   : > { %v3569_v53 = vpop.f32.mrb[23].mxu1  ;;  %v2056_v59 = vcombine.high %v2055_v1, %v2055_v1 }
 0x19f   : > { %v1908_v60 = vadd.f32 %v1904_v57, %v1774_v49  ;;  %v2059_v61 = vadd.f32 %v2055_v1, %v1907_v58 }
 0x1a1   : > { %v2060_v62 = vadd.f32 %v2056_v59, %v1908_v60 }
 0x1ba   : > { %v2183_v4 = vpop.f32.mrb[20].mxu0 }
 0x1bb   : > { %v2379_v63 = vpop.f32.mrb[24].mxu1  ;;  %v2196_v6 = vrot.slane %v2183_v4, %v4635_v46  ;;  %v3588_v7 = vpop.f32.mrb[21].mxu0 }
 0x1bc   : > { %v3608_v0 = vpop.f32.mrb[25].mxu1  ;;  %v2392_v2 = vrot.slane %v2379_v63, %v4635_v46  ;;  %v2186_v8 = vpop.f32.mrb[22].mxu0 }
 0x1bd   : > { %v2382_v3 = vpop.f32.mrb[26].mxu1  ;;  %v2197_v9 = vcombine.high %v2196_v6, %v2196_v6  ;;  %v2200_v10 = vadd.f32 %v2196_v6, %v2059_v61  ;;  %v3589_v13 = vpop.f32.mrb[23].mxu0 }
 0x1be   : > { %v3609_v5 = vpop.f32.mrb[27].mxu1  ;;  %v2393_v11 = vcombine.high %v2392_v2, %v2392_v2 }
 0x1bf   : > { %v2201_v14 = vadd.f32 %v2197_v9, %v2060_v62  ;;  %v2396_v15 = vadd.f32 %v2392_v2, %v2200_v10 }
 0x1c1   : > { %v2397_v16 = vadd.f32 %v2393_v11, %v2201_v14 }
 0x1da   : > { %v2513_v22 = vpop.f32.mrb[24].mxu0 }
 0x1db   : > { %v2665_v17 = vpop.f32.mrb[28].mxu1  ;;  %v2526_v24 = vrot.slane %v2513_v22, %v4635_v46  ;;  %v3628_v25 = vpop.f32.mrb[25].mxu0 }
 0x1dc   : > { %v3648_v18 = vpop.f32.mrb[29].mxu1  ;;  %v2678_v19 = vrot.slane %v2665_v17, %v4635_v46  ;;  %v2516_v26 = vpop.f32.mrb[26].mxu0 }
 0x1dd   : > { %v2668_v21 = vpop.f32.mrb[30].mxu1  ;;  %v2527_v27 = vcombine.high %v2526_v24, %v2526_v24  ;;  %v2530_v28 = vadd.f32 %v2526_v24, %v2396_v15  ;;  %v3629_v30 = vpop.f32.mrb[27].mxu0 }
 0x1de   : > { %v3649_v23 = vpop.f32.mrb[31].mxu1  ;;  %v2679_v29 = vcombine.high %v2678_v19, %v2678_v19 }
 0x1df   : > { %v2531_v32 = vadd.f32 %v2527_v27, %v2397_v16  ;;  %v2682_v34 = vadd.f32 %v2678_v19, %v2530_v28 }
 0x1e1   : > { %v2683_v33 = vadd.f32 %v2679_v29, %v2531_v32  ;;  %v2691_v35 = vadd.f32 %v3183_v31, %v2682_v34 }
 0x1e3   : > { %v2692_v46 = vadd.f32 %v3183_v31, %v2683_v33  ;;  %v2693_v36 = vpack.c.bf16 %v2691_v35, %v2691_v35 }
 0x1e5   : > { %v2694_v37 = vpack.c.bf16 %v2692_v46, %v2692_v46  ;;  %2695 = vst [vmem:[%s190_s8] sm:$0x1] %v2693_v36 }
 0x1e7   : > { %2696 = vst [vmem:[%s190_s8 + $0x1] sm:$0x1] %v2694_v37 }
 0x1e8 PF: > { %s13_s14 = sadd.s32 1, %s3837_s14   ;;  %s4674_s12 = smov %s3833_s13 }
 0x1e9   : > { %p10_p5 = scmp.ge.s32.totalorder %s13_s14, 4   ;;  %s4675_s13 = smov %s4677_s15 }
 0x1eb   :  { %12 = sbr.rel (!%p10_p5) target bundleno = 2 (0x2), region = 81 }

// kernel: _lambda_.8
= control target key start
LH: loop header
LB: loop body
LE: loop exit
PB: predicated region body
PF: predicated region fallthrough
CT: control target
= control target key end

     0   :  { %s5776_s15 = smov 0   ;;  %s5778_s16 = smov 0   ;;  %s6951_s0 = inlined_call_operand.vmem [shape: bf16[2,6,6,128], index: 0, kind: input, shape index: {}]   ;;  %s6952_s1 = inlined_call_operand.vmem [shape: bf16[16,128,128], index: 1, kind: input, shape index: {}]   ;;  %s6953_s2 = inlined_call_operand.vmem [shape: f32[1,128], index: 2, kind: input, shape index: {}]   ;;  %s6954_s3 = inlined_call_operand.vmem [shape: bf16[2,3,3,128], index: 3, kind: output, shape index: {0}]   ;;  %s6955_s4 = inlined_call_operand.vmem [shape: f32[2,1,2,128], index: 4, kind: output, shape index: {1}]  }
   0x1   :  { %s5780_s17 = smov 0  }
   0x2 LB: > { %s27_s18 = sadd.s32 1, %s5742_s16  ;;  %p4671_p0 = scmp.ge.s32.totalorder %s5746_s17, 1  ;;  %s5746_s17 = sphi %s5780_s17, %s15_s17   ;;  %s5742_s16 = sphi %s5778_s16, %s6959_s16   ;;  %s5738_s15 = sphi %s5776_s15, %s6958_s15  }
   0x3   : > { %p29_p1 = scmp.ge.s32.totalorder %s27_s18, 2  ;;  %p181_p2 = scmp.lt.s32.totalorder %s5746_s17, 3 }
   0x5   : > { %s6961_s18 = smov (%p29_p1, %s27_s18), 0  ;;  %p182_p3 = pnand %p4671_p0, %p181_p2 }
   0x6   : > { %v5596_v0 = vld [vmem:[%s6952_s1 + $0x40] sm:$0xff] (!%p182_p3)   ;;  %v5748_v1 = vmov (!%p182_p3), 0.0   ;;  %v5598_v3 = vld [vmem:[%s6952_s1 + $0x48] sm:$0xff] (!%p182_p3)   ;;  %vm5749_vm0 = vmmov (!%p182_p3), 0   ;;  %p218_p4 = scmp.lt.s32.totalorder (!%p182_p3), %s5738_s15, 1  ;;  %v5600_v5 = vld [vmem:[%s6952_s1 + $0x50] sm:$0xff] (!%p182_p3)   ;;  %v294_v9 = vlaneseq (!%p182_p3) }
   0x7   : > { %185 = sbr.rel (%p182_p3) target bundleno = 526 (0x20e), region = 32  ;;  %5243 = vmatprep.subr.bf16.mxu0 (!%p182_p3), %v5748_v1  ;;  %5283 = vmatprep.subr.bf16.mxu1 (!%p182_p3), %v5748_v1  ;;  %v5597_v2 = vld [vmem:[%s6952_s1 + $0x80] sm:$0xff] (!%p182_p3)   ;;  %v5599_v4 = vld [vmem:[%s6952_s1 + $0x88] sm:$0xff] (!%p182_p3)   ;;  %v5601_v6 = vld [vmem:[%s6952_s1 + $0x90] sm:$0xff] (!%p182_p3)   ;;  %v5750_v16 = vmov (!%p182_p3), 1966171168  }
   0x8   : > { %5244 = vmatpush3.bf16.msra.mxu0 (!%p182_p3), %v5596_v0  ;;  %5299 = vmatprep.mubr.msk.bf16.mxu1 (!%p182_p3), %vm5749_vm0, %v5748_v1  ;;  %v5602_v7 = vld [vmem:[%s6952_s1 + $0x58] sm:$0xff] (!%p182_p3)   ;;  %v5604_v10 = vld [vmem:[%s6952_s1 + $0x60] sm:$0xff] (!%p182_p3)   ;;  %v5845_v12 = vshrl.u32 (!%p182_p3), %v294_v9, 7  ;;  %v5606_v13 = vld [vmem:[%s6952_s1 + $0x68] sm:$0xff] (!%p182_p3)   ;;  %v292_v17 = vunpack.c.l.s4 (!%p182_p3), %v5750_v16  ;;  %vm4519_vm1 = vcmask (!%p182_p3), 1041408   ;;  %vm4398_vm2 = vcmask (!%p182_p3), 1042432  }
   0x9   : > { %5284 = vmatpush3.bf16.msra.mxu1 (!%p182_p3), %v5597_v2  ;;  %5245 = vmatprep.subr.bf16.mxu0 (!%p182_p3), %v5748_v1  ;;  %v5603_v8 = vld [vmem:[%s6952_s1 + $0x98] sm:$0xff] (!%p182_p3)   ;;  %v5605_v11 = vld [vmem:[%s6952_s1 + $0xa0] sm:$0xff] (!%p182_p3)   ;;  %v5607_v19 = vld [vmem:[%s6952_s1 + $0xa8] sm:$0xff] (!%p182_p3)   ;;  %vm4520_vm3 = vsmask.f32 (!%p182_p3), 1280 }
   0xa   : > { %5285 = vmatprep.subr.bf16.mxu1 (!%p182_p3), %v5748_v1  ;;  %5259 = vmatprep.mubr.msk.bf16.mxu0 (!%p182_p3), %vm5749_vm0, %v5748_v1  ;;  %v293_v21 = vunpack.c.0.s8 (!%p182_p3), %v292_v17  ;;  %v5608_v25 = vld [vmem:[%s6952_s1 + $0x70] sm:$0xff] (!%p182_p3)   ;;  %v5610_v37 = vld [vmem:[%s6952_s1 + $0x78] sm:$0xff] (!%p182_p3)   ;;  %vm6906_vm4 = vmand (!%p182_p3), %vm4519_vm1, %vm4520_vm3  ;;  %vm4513_vm5 = vcmp.eq.s32.totalorder (!%p182_p3), %v5845_v12, 0 }
   0xb   : > { %v5609_v26 = vld [vmem:[%s6952_s1 + $0xb0] sm:$0xff] (!%p182_p3)   ;;  %v5611_v42 = vld [vmem:[%s6952_s1 + $0xb8] sm:$0xff] (!%p182_p3)  }
   0xc   : > { %5246 = vmatpush3.bf16.msra.mxu0 (!%p182_p3), %v5598_v3  ;;  %v5860_v24 = vsub.s32 (!%p182_p3), %v293_v21, %v5845_v12  ;;  %v5612_v3 = vld [vmem:[%s6952_s1] sm:$0xff] (!%p182_p3)   ;;  %v5617_v21 = vld [vmem:[%s6952_s1 + $0xd0] sm:$0xff] (!%p182_p3)  }
   0xd   : > { %5286 = vmatpush3.bf16.msra.mxu1 (!%p182_p3), %v5599_v4  ;;  %5247 = vmatprep.subr.bf16.mxu0 (!%p182_p3), %v5748_v1  ;;  %v5613_v4 = vld [vmem:[%s6952_s1 + $0xc0] sm:$0xff] (!%p182_p3)  }
   0xe   : > { %s6963_s15 = smov (!%p218_p4, %s5738_s15), 1  ;;  %5287 = vmatprep.subr.bf16.mxu1 %v5748_v1 }
   0xf   : > { %s5567_s5 = smul.u32 24, %s6963_s15  ;;  %s4674_s25 = sshll.u32 %s6963_s15, 1 }
  0x10   : > { %5248 = vmatpush3.bf16.msra.mxu0 %v5600_v5  ;;  %s5568_s21 = smul.u32 6, %s6963_s15  ;;  %s239_s28 = scalar_lea.vmem %s6955_s4, %s4674_s25 }
  0x11   : > { %5288 = vmatpush3.bf16.msra.mxu1 %v5601_v6  ;;  %5249 = vmatprep.subr.bf16.mxu0 %v5748_v1  ;;  %s5836_s12 = scalar_lea.vmem %s6951_s0, %s5567_s5 }
  0x12   : > { %5289 = vmatprep.subr.bf16.mxu1 %v5748_v1  ;;  %v4691_v14 = vld.sshfl [vmem:[%s5836_s12] sm:$0x13 pattern:$0x75316420]  ;;  %s6889_s24 = scalar_lea.vmem %s6954_s3, %s5568_s21 }
  0x13   : > { %v4692_v15 = vld.sshfl [vmem:[%s5836_s12 + $0x4] sm:$0x13 pattern:$0x75316420]  ;;  %v290_v20 = vcombine.high %v4691_v14, %v4691_v14  ;;  %v5870_v27 = vrot.slane %v4691_v14, %v5860_v24 }
  0x14   : > { %5250 = vmatpush3.bf16.msra.mxu0 %v5602_v7  ;;  %v4693_v18 = vld.sshfl [vmem:[%s5836_s12 + $0x8] sm:$0x13 pattern:$0x75316420]  ;;  %v312_v22 = vcombine.high %v4692_v15, %v4692_v15  ;;  %v5876_v29 = vrot.slane %v4692_v15, %v5860_v24 }
  0x15   : > { %5290 = vmatpush3.bf16.msra.mxu1 %v5603_v8  ;;  %5251 = vmatprep.subr.bf16.mxu0 %v5748_v1  ;;  %v334_v23 = vcombine.high %v4693_v18, %v4693_v18  ;;  %v5873_v28 = vrot.slane %v290_v20, %v5860_v24  ;;  %v5883_v31 = vrot.slane %v4693_v18, %v5860_v24  ;;  %v349_v35 = vunpack.i.h.s16 %v5870_v27  ;;  %v5615_v15 = vld [vmem:[%s6952_s1 + $0xc8] sm:$0xff]   ;;  %v5616_v18 = vld [vmem:[%s6952_s1 + $0x10] sm:$0xff]  }
  0x16   : > { %5291 = vmatprep.subr.bf16.mxu1 %v5748_v1  ;;  %v5880_v30 = vrot.slane %v312_v22, %v5860_v24  ;;  %v5890_v33 = vcombine.high %v5870_v27, %v5870_v27  ;;  %v5894_v34 = vcombine.high %v5876_v29, %v5876_v29  ;;  %v352_v40 = vunpack.i.h.s16 %v5876_v29 }
  0x17   : > { %v5886_v32 = vrot.slane %v334_v23, %v5860_v24  ;;  %v351_v36 = vunpack.i.h.s16 %v5873_v28  ;;  %v5906_v39 = vcombine.high %v5883_v31, %v5883_v31  ;;  %v355_v41 = vunpack.i.h.s16 %v5883_v31 }
  0x18   : > { %5252 = vmatpush3.bf16.msra.mxu0 %v5604_v10  ;;  %v5902_v38 = vunpack.i.h.s16 %v5880_v30  ;;  %v4730_v43 = vpack.i.b16 %v5880_v30, %v5890_v33  ;;  %v4694_v45 = vpack.i.b16 %v5873_v28, %v349_v35  ;;  %v4788_v5 = vpack.i.b16 %v5883_v31, %v5880_v30  ;;  %v5618_v35 = vld [vmem:[%s6952_s1 + $0x18] sm:$0xff]  }
  0x19   : > { %5292 = vmatpush3.bf16.msra.mxu1 %v5605_v11  ;;  %5253 = vmatprep.subr.bf16.mxu0 %v5748_v1  ;;  %v5917_v44 = vunpack.i.h.s16 %v5886_v32  ;;  %v725_v46 = vunpack.i.l.s16 %v5906_v39  ;;  %v359_v48 = vpack.i.b16 %v352_v40, %v351_v36  ;;  %v5931_v49 = vpack.i.b16 %v5886_v32, %v355_v41 }
  0x1a   : > { %5293 = vmatprep.subr.bf16.mxu1 %v5748_v1  ;;  %v5924_v47 = vpack.i.b16 %v5894_v34, %v5902_v38  ;;  %v731_v50 = vcombine.low %v5873_v28, %v4730_v43  ;;  %v5960_v6 = vpack.i.b16 %v355_v41, %v5902_v38  ;;  %v4840_v7 = vpack.i.b16 %v5886_v32, %v5894_v34  ;;  %v5621_v43 = vld [vmem:[%s6952_s1 + $0xe0] sm:$0xff]  }
  0x1b   : > { %v385_v51 = vrot.slane %v5917_v44, %v5860_v24  ;;  %v753_v53 = vrot.slane %v725_v46, %v5860_v24  ;;  %v363_v54 = vcombine.low %v4694_v45, %v359_v48  ;;  %v364_v55 = vcombine.low %v5880_v30, %v5931_v49 }
  0x1c   : > { %5254 = vmatpush3.bf16.msra.mxu0 %v5606_v13  ;;  %v732_v52 = vcombine.low %v5924_v47, %v5886_v32  ;;  %v739_v56 = vrot.slane %v731_v50, %v5860_v24  ;;  %v5965_v10 = vcombine.low %v5876_v29, %v4788_v5  ;;  %v5968_v11 = vcombine.low %v5880_v30, %v4840_v7  ;;  %v5614_v13 = vld [vmem:[%s6952_s1 + $0x8] sm:$0xff]  }
  0x1d   : > { %5294 = vmatpush3.bf16.msra.mxu1 %v5607_v19  ;;  %5255 = vmatprep.subr.bf16.mxu0 %v5748_v1  ;;  %v371_v58 = vrot.slane %v363_v54, %v5860_v24  ;;  %v378_v59 = vrot.slane %v364_v55, %v5860_v24  ;;  %v768_v61 = vrot.slane %v753_v53, %v5860_v24  ;;  %v1992_v14 = vunpack.i.h.s16 %v5894_v34 }
  0x1e   : > { %5295 = vmatprep.subr.bf16.mxu1 %v5748_v1  ;;  %v746_v57 = vrot.slane %v732_v52, %v5860_v24  ;;  %v400_v63 = vrot.slane %v385_v51, %v5860_v24  ;;  %v960_v17 = vunpack.i.h.s16 %v5890_v33  ;;  %v4704_v19 = vpack.i.b16 %v5876_v29, %v5873_v28  ;;  %v5619_v29 = vld [vmem:[%s6952_s1 + $0xd8] sm:$0xff]   ;;  %v4787_v28 = vld.sshfl [vmem:[%s5836_s12 + $0xc] sm:$0x13 pattern:$0x75316420] }
  0x1f   : > { %v386_v62 = vcombine.low %v371_v58, %v378_v59  ;;  %v5980_v16 = vpack.i.b16 %v5917_v44, %v1992_v14  ;;  %v5999_v22 = vpack.i.b16 %v5906_v39, %v5917_v44  ;;  %v4705_v23 = vpack.i.b16 %v5880_v30, %v352_v40  ;;  %v5620_v40 = vld [vmem:[%s6952_s1 + $0x20] sm:$0xff]   ;;  %v5622_v59 = vld [vmem:[%s6952_s1 + $0x28] sm:$0xff]  }
  0x20   : > { %5256 = vmatpush3.bf16.msra.mxu0 %v5608_v25  ;;  %v754_v60 = vcombine.low %v739_v56, %v746_v57  ;;  %v4756_v25 = vpack.i.b16 %v5890_v33, %v351_v36  ;;  %v356_v41 = vunpack.i.l.s16 %v5886_v32  ;;  %v1294_v48 = vrot.slane %v5965_v10, %v5860_v24  ;;  %v5624_v10 = vld [vmem:[%s6952_s1 + $0x30] sm:$0xff]  }
  0x21   : > { %5296 = vmatpush3.bf16.msra.mxu1 %v5609_v26  ;;  %5257 = vmatprep.subr.bf16.mxu0 %v5748_v1  ;;  %v393_v2 = vrot.slane %v386_v62, %v5860_v24  ;;  %v2000_v20 = vcombine.low %v5924_v47, %v5980_v16  ;;  %v964_v26 = vpack.i.b16 %v5902_v38, %v960_v17  ;;  %v962_v51 = vunpack.i.h.s16 %v5906_v39  ;;  %v5625_v17 = vld [vmem:[%s6952_s1 + $0xf0] sm:$0xff]  }
  0x22   : > { %5297 = vmatprep.subr.bf16.mxu1 %v5748_v1  ;;  %v761_v0 = vrot.slane %v754_v60, %v5860_v24  ;;  %v969_v30 = vcombine.low %v5894_v34, %v5999_v22  ;;  %v501_v33 = vcombine.low %v4705_v23, %v5883_v31  ;;  %v1257_v38 = vcombine.high %v4787_v28, %v4787_v28 }
  0x23   : > { %v401_v9 = vcombine.low %v393_v2, %v400_v63  ;;  %v968_v36 = vcombine.low %v4756_v25, %v964_v26  ;;  %v1771_v62 = vrot.slane %v5968_v11, %v5860_v24 }
  0x24   : > { %5258 = vmatpush3.bf16.msra.mxu0 %v5610_v37  ;;  %v769_v8 = vcombine.low %v761_v0, %v768_v61  ;;  %v500_v37 = vcombine.low %v5870_v27, %v4704_v19  ;;  %v6024_v27 = vrot.slane %v4787_v28, %v5860_v24  ;;  %v6036_v45 = vrot.slane %v1257_v38, %v5860_v24  ;;  %v5623_v0 = vld [vmem:[%s6952_s1 + $0xe8] sm:$0xff]  }
  0x25   : > { %5298 = vmatpush3.bf16.msra.mxu1 %v5611_v42  ;;  %5263 = vmatprep.subr.bf16.mxu0 %v5748_v1  ;;  %v1523_v42 = vcombine.low %v4705_v23, %v5960_v6  ;;  %v983_v52 = vrot.slane %v969_v30, %v5860_v24  ;;  %v515_v55 = vrot.slane %v501_v33, %v5860_v24 }
  0x26   : > { %5303 = vmatprep.subr.bf16.mxu1 %v5748_v1  ;;  %v508_v34 = vrot.slane %v500_v37, %v5860_v24  ;;  %v1287_v46 = vcombine.low %v5931_v49, %v6024_v27  ;;  %v1279_v50 = vunpack.i.h.s16 %v6024_v27  ;;  %v6049_v53 = vcombine.high %v6024_v27, %v6024_v27 }
  0x27   : > { %5260 = vmatmul.mubr.bf16.vlgmr.msra.gmra.mrb[0].mxu0 %v401_v9  ;;  %v4898_v54 = vpack.i.b16 %v6024_v27, %v5886_v32  ;;  %v976_v56 = vrot.slane %v968_v36, %v5860_v24  ;;  %v6063_v60 = vunpack.i.h.s16 %v6036_v45  ;;  %v1764_v61 = vcombine.low %v5999_v22, %v6036_v45  ;;  %v5628_v36 = vld [vmem:[%s6952_s1 + $0x100] sm:$0xff]  }
  0x28   : > { %5300 = vmatmul.mubr.bf16.vlgmr.msra.gmra.mrb[0].mxu1 %v769_v8  ;;  %5264 = vmatpush3.bf16.msra.mxu0 %v5612_v3  ;;  %v1301_v57 = vrot.slane %v1287_v46, %v5860_v24  ;;  %v6057_v58 = vpack.i.b16 %v6036_v45, %v1279_v50  ;;  %v522_v6 = vrot.slane %v356_v41, %v5860_v24  ;;  %v5632_v41 = vld [vmem:[%s6952_s1 + $0x110] sm:$0xff]  }
  0x29   : > { %5304 = vmatpush3.bf16.msra.mxu1 %v5613_v4  ;;  %5265 = vmatprep.subr.bf16.mxu0 %v5748_v1  ;;  %v6070_v63 = vcombine.low %v5883_v31, %v4898_v54  ;;  %v6080_v4 = vrot.slane %v1523_v42, %v5860_v24  ;;  %v6086_v31 = vpack.i.b16 %v6049_v53, %v6063_v60  ;;  %v5634_v42 = vld [vmem:[%s6952_s1 + $0x118] sm:$0xff]   ;;  %v4897_v46 = vld.sshfl [vmem:[%s5836_s12 + $0x10] sm:$0x13 pattern:$0x75316420] }
  0x2a   : > { %5305 = vmatprep.subr.bf16.mxu1 %v5748_v1  ;;  %5279 = vmatprep.mubr.msk.bf16.mxu0 %vm5749_vm0, %v5748_v1  ;;  %v6075_v2 = vcombine.low %v1294_v48, %v1301_v57  ;;  %v1524_v3 = vcombine.low %v5886_v32, %v6057_v58  ;;  %v1778_v5 = vrot.slane %v1764_v61, %v5860_v24  ;;  %v5636_v48 = vld [vmem:[%s6952_s1 + $0x120] sm:$0xff]   ;;  %v1280_v61 = vunpack.i.l.s16 %v6036_v45 }
  0x2b   : > { %5319 = vmatprep.mubr.msk.bf16.mxu1 %vm5749_vm0, %v5748_v1  ;;  %v523_v7 = vcombine.low %v508_v34, %v515_v55  ;;  %v990_v8 = vrot.slane %v962_v51, %v5860_v24  ;;  %v991_v11 = vcombine.low %v976_v56, %v983_v52  ;;  %v2001_v14 = vcombine.low %v5906_v39, %v6086_v31  ;;  %v5633_v34 = vld [vmem:[%s6952_s1 + $0x150] sm:$0xff]   ;;  %v5637_v52 = vld [vmem:[%s6952_s1 + $0x160] sm:$0xff]  }
  0x2c   : > { %5266 = vmatpush3.bf16.msra.mxu0 %v5614_v13  ;;  %v6092_v9 = vrot.slane %v1524_v3, %v5860_v24  ;;  %v6097_v13 = vcombine.low %v1771_v62, %v1778_v5  ;;  %v537_v47 = vrot.slane %v522_v6, %v5860_v24  ;;  %v6119_v16 = vpack.i.b16 %v1279_v50, %v5917_v44  ;;  %v5627_v44 = vld [vmem:[%s6952_s1 + $0xf8] sm:$0xff]  }
  0x2d   : > { %5306 = vmatpush3.bf16.msra.mxu1 %v5615_v15  ;;  %5267 = vmatprep.subr.bf16.mxu0 %v5748_v1  ;;  %v6105_v15 = vrot.slane %v2000_v20, %v5860_v24  ;;  %v6115_v19 = vrot.slane %v2001_v14, %v5860_v24  ;;  %v5626_v20 = vld [vmem:[%s6952_s1 + $0x38] sm:$0xff]   ;;  %v998_v23 = vrot.slane %v991_v11, %v5860_v24 }
  0x2e   : > { %5307 = vmatprep.subr.bf16.mxu1 %v5748_v1  ;;  %v1005_v25 = vrot.slane %v990_v8, %v5860_v24  ;;  %v4950_v37 = vpack.i.b16 %v6036_v45, %v5906_v39  ;;  %v6142_v30 = vpack.i.b16 %v6063_v60, %v962_v51  ;;  %v5629_v39 = vld [vmem:[%s6952_s1 + $0x140] sm:$0xff]   ;;  %v2289_v50 = vcombine.high %v4897_v46, %v4897_v46 }
  0x2f   : > { %v2023_v26 = vcombine.low %v6105_v15, %v6115_v19  ;;  %v6187_v51 = vrot.slane %v4897_v46, %v5860_v24  ;;  %v2326_v55 = vrot.slane %v6070_v63, %v5860_v24  ;;  %v5639_v63 = vld [vmem:[%s6952_s1 + $0x168] sm:$0xff]   ;;  %v1308_v11 = vrot.slane %v1280_v61, %v5860_v24  ;;  %v5652_v46 = vld [vmem:[%s6952_s1 + $0x1a0] sm:$0xff]  }
  0x30   : > { %5268 = vmatpush3.bf16.msra.mxu0 %v5616_v18  ;;  %v1546_v18 = vcombine.low %v6080_v4, %v6092_v9  ;;  %v1006_v33 = vcombine.low %v998_v23, %v1005_v25  ;;  %v3032_v38 = vcombine.low %v5999_v22, %v6142_v30  ;;  %v6199_v56 = vrot.slane %v2289_v50, %v5860_v24 }
  0x31   : > { %5308 = vmatpush3.bf16.msra.mxu1 %v5617_v21  ;;  %5269 = vmatprep.subr.bf16.mxu0 %v5748_v1  ;;  %v530_v21 = vrot.slane %v523_v7, %v5860_v24  ;;  %v2319_v54 = vcombine.low %v6057_v58, %v6187_v51  ;;  %v6203_v57 = vcombine.high %v6187_v51, %v6187_v51 }
  0x32   : > { %5309 = vmatprep.subr.bf16.mxu1 %v5748_v1  ;;  %v2796_v3 = vcombine.low %v6086_v31, %v6199_v56  ;;  %v1545_v14 = vrot.slane %v6063_v60, %v5860_v24  ;;  %v6249_v23 = vrot.slane %v3032_v38, %v5860_v24  ;;  %v1316_v25 = vrot.slane %v6075_v2, %v5860_v24  ;;  %v5647_v38 = vld [vmem:[%s6952_s1 + $0x1c8] sm:$0xff]  }
  0x33   : > { %v538_v28 = vcombine.low %v530_v21, %v537_v47  ;;  %v2333_v62 = vrot.slane %v2319_v54, %v5860_v24  ;;  %v2311_v47 = vunpack.i.h.s16 %v6187_v51  ;;  %v5653_v54 = vld [vmem:[%s6952_s1 + $0x1e0] sm:$0xff]  }
  0x34   : > { %5270 = vmatpush3.bf16.msra.mxu0 %v5618_v35  ;;  %v2555_v35 = vcombine.low %v5931_v49, %v6119_v16  ;;  %v2810_v8 = vrot.slane %v2796_v3, %v5860_v24  ;;  %v1560_v22 = vrot.slane %v1545_v14, %v5860_v24  ;;  %v5654_v3 = vld [vmem:[%s6952_s1 + $0x1a8] sm:$0xff]  }
  0x35   : > { %5310 = vmatpush3.bf16.msra.mxu1 %v5619_v29  ;;  %5271 = vmatprep.subr.bf16.mxu0 %v5748_v1  ;;  %v6139_v29 = vcombine.low %v5886_v32, %v4950_v37  ;;  %v5630_v32 = vld [vmem:[%s6952_s1 + $0x108] sm:$0xff]   ;;  %v6222_v6 = vcombine.low %v2326_v55, %v2333_v62  ;;  %v5642_v37 = vld [vmem:[%s6952_s1 + $0x138] sm:$0xff]   ;;  %v6321_v50 = vpack.i.b16 %v6199_v56, %v2311_v47  ;;  %v1757_v62 = vunpack.i.l.s16 %v6049_v53 }
  0x36   : > { %5311 = vmatprep.subr.bf16.mxu1 %v5748_v1 }
  0x37   : > { %v2803_v5 = vrot.slane %v6139_v29, %v5860_v24  ;;  %v1323_v29 = vrot.slane %v1308_v11, %v5860_v24  ;;  %v5655_v11 = vld [vmem:[%s6952_s1 + $0x1e8] sm:$0xff]  }
  0x38   : > { %5272 = vmatpush3.bf16.msra.mxu0 %v5620_v40  ;;  %v5631_v40 = vld [vmem:[%s6952_s1 + $0x148] sm:$0xff]  }
  0x39   : > { %5312 = vmatpush3.bf16.msra.mxu1 %v5621_v43  ;;  %5273 = vmatprep.subr.bf16.mxu0 %v5748_v1  ;;  %v5635_v43 = vld [vmem:[%s6952_s1 + $0x158] sm:$0xff]   ;;  %v1324_v9 = vcombine.low %v1316_v25, %v1323_v29  ;;  %v1785_v25 = vrot.slane %v1757_v62, %v5860_v24  ;;  %v5656_v29 = vld [vmem:[%s6952_s1 + $0x1b0] sm:$0xff]   ;;  %v5668_v62 = vld [vmem:[%s6952_s1 + $0x220] sm:$0xff]  }
  0x3a   : > { %5313 = vmatprep.subr.bf16.mxu1 %v5748_v1 }
  0x3c   : > { %5274 = vmatpush3.bf16.msra.mxu0 %v5622_v59  ;;  %v5638_v59 = vld [vmem:[%s6952_s1 + $0x128] sm:$0xff]  }
  0x3d   : > { %5314 = vmatpush3.bf16.msra.mxu1 %v5623_v0  ;;  %5275 = vmatprep.subr.bf16.mxu0 %v5748_v1  ;;  %v6214_v0 = vunpack.i.h.s16 %v6199_v56 }
  0x3e   : > { %5315 = vmatprep.subr.bf16.mxu1 %v5748_v1 }
  0x3f   : > { %v6226_v7 = vpack.i.b16 %v6203_v57, %v6214_v0  ;;  %v2577_v49 = vrot.slane %v6214_v0, %v5860_v24 }
  0x40   : > { %5276 = vmatpush3.bf16.msra.mxu0 %v5624_v10  ;;  %v5640_v10 = vld [vmem:[%s6952_s1 + $0x130] sm:$0xff]  }
  0x41   : > { %5316 = vmatpush3.bf16.msra.mxu1 %v5625_v17  ;;  %5277 = vmatprep.subr.bf16.mxu0 %v5748_v1  ;;  %v5641_v17 = vld [vmem:[%s6952_s1 + $0x170] sm:$0xff]   ;;  %v3033_v21 = vcombine.low %v6049_v53, %v6226_v7 }
  0x42   : > { %5317 = vmatprep.subr.bf16.mxu1 %v5748_v1 }
  0x43   : > { %v6266_v30 = vrot.slane %v3033_v21, %v5860_v24 }
  0x44   : > { %5278 = vmatpush3.bf16.msra.mxu0 %v5626_v20  ;;  %v6239_v20 = vcombine.low %v2803_v5, %v2810_v8  ;;  %v1994_v5 = vunpack.i.h.s16 %v6049_v53 }
  0x45   : > { %5318 = vmatpush3.bf16.msra.mxu1 %v5627_v44  ;;  %5323 = vmatprep.subr.bf16.mxu0 %v5748_v1  ;;  %v6254_v44 = vpack.i.b16 %v2311_v47, %v6063_v60  ;;  %v5643_v60 = vld [vmem:[%s6952_s1 + $0x178] sm:$0xff]   ;;  %v3055_v4 = vcombine.low %v6249_v23, %v6266_v30  ;;  %v5692_v23 = vld [vmem:[%s6952_s1 + $0x300] sm:$0xff]  }
  0x46   : > { %5343 = vmatprep.subr.bf16.mxu1 %v5748_v1  ;;  %v5693_v30 = vld [vmem:[%s6952_s1 + $0x340] sm:$0xff]  }
  0x47   : > { %5280 = vmatmul.mubr.bf16.vlgmr.msra.gmra.mrb[0].mxu0 %v538_v28  ;;  %v1553_v28 = vrot.slane %v1546_v18, %v5860_v24  ;;  %v3587_v2 = vcombine.low %v6057_v58, %v6254_v44  ;;  %v5060_v58 = vpack.i.b16 %v6199_v56, %v6049_v53  ;;  %v5657_v44 = vld [vmem:[%s6952_s1 + $0x1f0] sm:$0xff]  }
  0x48   : > { %5320 = vmatmul.mubr.bf16.vlgmr.msra.gmra.mrb[4].mxu1 %v1006_v33  ;;  %5324 = vmatpush3.bf16.msra.mxu0 %v5628_v36  ;;  %v5644_v33 = vld [vmem:[%s6952_s1 + $0x180] sm:$0xff]  }
  0x49   : > { %5344 = vmatpush3.bf16.msra.mxu1 %v5629_v39  ;;  %5325 = vmatprep.subr.bf16.mxu0 %v5748_v1  ;;  %v1561_v18 = vcombine.low %v1553_v28, %v1560_v22  ;;  %v5645_v36 = vld [vmem:[%s6952_s1 + $0x1c0] sm:$0xff]   ;;  %v5646_v39 = vld [vmem:[%s6952_s1 + $0x188] sm:$0xff]   ;;  %v6356_v21 = vrot.slane %v3587_v2, %v5860_v24  ;;  %v2022_v28 = vrot.slane %v1994_v5, %v5860_v24 }
  0x4a   : > { %5345 = vmatprep.subr.bf16.mxu1 %v5748_v1  ;;  %5339 = vmatprep.mubr.msk.bf16.mxu0 %vm5749_vm0, %v5748_v1 }
  0x4b   : > { %5359 = vmatprep.mubr.msk.bf16.mxu1 %vm5749_vm0, %v5748_v1 }
  0x4c   : > { %5326 = vmatpush3.bf16.msra.mxu0 %v5630_v32  ;;  %v5648_v32 = vld [vmem:[%s6952_s1 + $0x190] sm:$0xff]  }
  0x4d   : > { %5346 = vmatpush3.bf16.msra.mxu1 %v5631_v40  ;;  %5327 = vmatprep.subr.bf16.mxu0 %v5748_v1  ;;  %v5649_v40 = vld [vmem:[%s6952_s1 + $0x1d0] sm:$0xff]  }
  0x4e   : > { %5347 = vmatprep.subr.bf16.mxu1 %v5748_v1 }
  0x50   : > { %5328 = vmatpush3.bf16.msra.mxu0 %v5632_v41  ;;  %v5008_v41 = vpack.i.b16 %v6187_v51, %v6036_v45 }
  0x51   : > { %5348 = vmatpush3.bf16.msra.mxu1 %v5633_v34  ;;  %5329 = vmatprep.subr.bf16.mxu0 %v5748_v1  ;;  %v5650_v34 = vld [vmem:[%s6952_s1 + $0x198] sm:$0xff]  }
  0x52   : > { %5349 = vmatprep.subr.bf16.mxu1 %v5748_v1 }
  0x54   : > { %5330 = vmatpush3.bf16.msra.mxu0 %v5634_v42  ;;  %v5651_v42 = vld [vmem:[%s6952_s1 + $0x1d8] sm:$0xff]  }
  0x55   : > { %5350 = vmatpush3.bf16.msra.mxu1 %v5635_v43  ;;  %5331 = vmatprep.subr.bf16.mxu0 %v5748_v1  ;;  %v3350_v43 = vcombine.low %v6024_v27, %v5008_v41 }
  0x56   : > { %5351 = vmatprep.subr.bf16.mxu1 %v5748_v1 }
  0x58   : > { %5332 = vmatpush3.bf16.msra.mxu0 %v5636_v48  ;;  %v5007_v48 = vld.sshfl [vmem:[%s5836_s12 + $0x14] sm:$0x13 pattern:$0x75316420] }
  0x59   : > { %5352 = vmatpush3.bf16.msra.mxu1 %v5637_v52  ;;  %5333 = vmatprep.subr.bf16.mxu0 %v5748_v1  ;;  %v3321_v51 = vcombine.high %v5007_v48, %v5007_v48  ;;  %v3328_v52 = vrot.slane %v5007_v48, %v5860_v24  ;;  %v5662_v48 = vld [vmem:[%s6952_s1 + $0x208] sm:$0xff]  }
  0x5a   : > { %5353 = vmatprep.subr.bf16.mxu1 %v5748_v1 }
  0x5b   : > { %v6330_v27 = vrot.slane %v3321_v51, %v5860_v24  ;;  %v3351_v55 = vcombine.low %v6321_v50, %v3328_v52  ;;  %v3343_v61 = vunpack.i.h.s16 %v3328_v52  ;;  %v5663_v51 = vld [vmem:[%s6952_s1 + $0x248] sm:$0xff]  }
  0x5c   : > { %5334 = vmatpush3.bf16.msra.mxu0 %v5638_v59  ;;  %v3358_v59 = vrot.slane %v3350_v43, %v5860_v24  ;;  %v5660_v43 = vld [vmem:[%s6952_s1 + $0x200] sm:$0xff]  }
  0x5d   : > { %5354 = vmatpush3.bf16.msra.mxu1 %v5639_v63  ;;  %5335 = vmatprep.subr.bf16.mxu0 %v5748_v1  ;;  %v6335_v63 = vcombine.high %v3328_v52, %v3328_v52  ;;  %v3365_v8 = vrot.slane %v3351_v55, %v5860_v24  ;;  %v3581_v14 = vunpack.i.h.s16 %v6330_v27  ;;  %v3828_v53 = vcombine.low %v6226_v7, %v6330_v27  ;;  %v5664_v52 = vld [vmem:[%s6952_s1 + $0x210] sm:$0xff]   ;;  %v5666_v55 = vld [vmem:[%s6952_s1 + $0x218] sm:$0xff]  }
  0x5e   : > { %5355 = vmatprep.subr.bf16.mxu1 %v5748_v1 }
  0x5f   : > { %v3842_v41 = vrot.slane %v3828_v53, %v5860_v24  ;;  %v5680_v53 = vld [vmem:[%s6952_s1 + $0x290] sm:$0xff]  }
  0x60   : > { %5336 = vmatpush3.bf16.msra.mxu0 %v5640_v10  ;;  %v5035_v10 = vpack.i.b16 %v6330_v27, %v3343_v61  ;;  %v2556_v61 = vcombine.low %v6036_v45, %v6321_v50 }
  0x61   : > { %5356 = vmatpush3.bf16.msra.mxu1 %v5641_v17  ;;  %5337 = vmatprep.subr.bf16.mxu0 %v5748_v1  ;;  %v6349_v17 = vcombine.low %v3358_v59, %v3365_v8  ;;  %v5667_v59 = vld [vmem:[%s6952_s1 + $0x258] sm:$0xff]   ;;  %v5670_v8 = vld [vmem:[%s6952_s1 + $0x228] sm:$0xff]  }
  0x62   : > { %5357 = vmatprep.subr.bf16.mxu1 %v5748_v1  ;;  %v3588_v47 = vcombine.low %v6199_v56, %v5035_v10  ;;  %v2570_v50 = vrot.slane %v2556_v61, %v5860_v24  ;;  %v5671_v10 = vld [vmem:[%s6952_s1 + $0x268] sm:$0xff]  }
  0x63   : > { %v5695_v61 = vld [vmem:[%s6952_s1 + $0x348] sm:$0xff]  }
  0x64   : > { %5338 = vmatpush3.bf16.msra.mxu0 %v5642_v37  ;;  %v5087_v37 = vpack.i.b16 %v6335_v63, %v3581_v14  ;;  %v6367_v22 = vrot.slane %v3588_v47, %v5860_v24  ;;  %v2348_v47 = vrot.slane %v6222_v6, %v5860_v24 }
  0x65   : > { %5358 = vmatpush3.bf16.msra.mxu1 %v5643_v60  ;;  %5363 = vmatprep.subr.bf16.mxu0 %v5748_v1  ;;  %v4060_v60 = vpack.i.b16 %v6214_v0, %v1994_v5  ;;  %v2312_v5 = vunpack.i.l.s16 %v6199_v56 }
  0x66   : > { %5383 = vmatprep.subr.bf16.mxu1 %v5748_v1  ;;  %v3610_v2 = vcombine.low %v6356_v21, %v6367_v22  ;;  %v5708_v21 = vld [vmem:[%s6952_s1 + $0x380] sm:$0xff]  }
  0x67   : > { %5340 = vmatmul.mubr.bf16.vlgmr.msra.gmra.mrb[4].mxu0 %v1324_v9  ;;  %v3827_v9 = vcombine.low %v6036_v45, %v5060_v58  ;;  %v2563_v45 = vrot.slane %v2555_v35, %v5860_v24  ;;  %v2340_v56 = vrot.slane %v2312_v5, %v5860_v24  ;;  %v5672_v35 = vld [vmem:[%s6952_s1 + $0x230] sm:$0xff]   ;;  %v5698_v5 = vld [vmem:[%s6952_s1 + $0x318] sm:$0xff]   ;;  %v5709_v22 = vld [vmem:[%s6952_s1 + $0x3c0] sm:$0xff]  }
  0x68   : > { %5360 = vmatmul.mubr.bf16.vlgmr.msra.gmra.mrb[8].mxu1 %v1561_v18  ;;  %5364 = vmatpush3.bf16.msra.mxu0 %v5644_v33  ;;  %v1800_v18 = vrot.slane %v1785_v25, %v5860_v24  ;;  %v4064_v33 = vcombine.low %v6086_v31, %v4060_v60  ;;  %v5659_v31 = vld [vmem:[%s6952_s1 + $0x1f8] sm:$0xff]   ;;  %v5677_v60 = vld [vmem:[%s6952_s1 + $0x2c0] sm:$0xff]  }
  0x69   : > { %5384 = vmatpush3.bf16.msra.mxu1 %v5645_v36  ;;  %5365 = vmatprep.subr.bf16.mxu0 %v5748_v1  ;;  %v4065_v36 = vcombine.low %v6203_v57, %v5087_v37  ;;  %v3835_v7 = vrot.slane %v3827_v9, %v5860_v24  ;;  %v2578_v16 = vcombine.low %v2563_v45, %v2570_v50  ;;  %v5678_v9 = vld [vmem:[%s6952_s1 + $0x288] sm:$0xff]   ;;  %v5699_v45 = vld [vmem:[%s6952_s1 + $0x358] sm:$0xff]   ;;  %v5700_v50 = vld [vmem:[%s6952_s1 + $0x320] sm:$0xff]  }
  0x6a   : > { %5385 = vmatprep.subr.bf16.mxu1 %v5748_v1  ;;  %5379 = vmatprep.mubr.msk.bf16.mxu0 %vm5749_vm0, %v5748_v1  ;;  %v2355_v0 = vrot.slane %v2340_v56, %v5860_v24  ;;  %v2592_v37 = vrot.slane %v2577_v49, %v5860_v24  ;;  %v5702_v56 = vld [vmem:[%s6952_s1 + $0x328] sm:$0xff]  }
  0x6b   : > { %5399 = vmatprep.mubr.msk.bf16.mxu1 %vm5749_vm0, %v5748_v1  ;;  %v6408_v15 = vcombine.low %v3835_v7, %v3842_v41  ;;  %v2585_v25 = vrot.slane %v2578_v16, %v5860_v24  ;;  %v3026_v7 = vunpack.i.h.s16 %v6203_v57  ;;  %v5687_v41 = vld [vmem:[%s6952_s1 + $0x2e8] sm:$0xff]  }
  0x6c   : > { %5366 = vmatpush3.bf16.msra.mxu0 %v5646_v39  ;;  %v5658_v39 = vld [vmem:[%s6952_s1 + $0x1b8] sm:$0xff]   ;;  %v2356_v6 = vcombine.low %v2348_v47, %v2355_v0  ;;  %v5703_v49 = vld [vmem:[%s6952_s1 + $0x368] sm:$0xff]   ;;  %v5705_v47 = vld [vmem:[%s6952_s1 + $0x370] sm:$0xff]   ;;  %v3380_v0 = vrot.slane %v6349_v17, %v5860_v24 }
  0x6d   : > { %5386 = vmatpush3.bf16.msra.mxu1 %v5647_v38  ;;  %5367 = vmatprep.subr.bf16.mxu0 %v5748_v1  ;;  %v1793_v38 = vrot.slane %v6097_v13, %v5860_v24  ;;  %v6404_v13 = vrot.slane %v4065_v36, %v5860_v24  ;;  %v2593_v58 = vcombine.low %v2585_v25, %v2592_v37  ;;  %v5682_v36 = vld [vmem:[%s6952_s1 + $0x298] sm:$0xff]  }
  0x6e   : > { %5387 = vmatprep.subr.bf16.mxu1 %v5748_v1  ;;  %v5706_v37 = vld [vmem:[%s6952_s1 + $0x338] sm:$0xff]  }
  0x70   : > { %5368 = vmatpush3.bf16.msra.mxu0 %v5648_v32  ;;  %v2030_v32 = vrot.slane %v2023_v26, %v5860_v24  ;;  %v1801_v26 = vcombine.low %v1793_v38, %v1800_v18  ;;  %v5679_v18 = vld [vmem:[%s6952_s1 + $0x2c8] sm:$0xff]   ;;  %v5684_v38 = vld [vmem:[%s6952_s1 + $0x2a0] sm:$0xff]  }
  0x71   : > { %5388 = vmatpush3.bf16.msra.mxu1 %v5649_v40  ;;  %5369 = vmatprep.subr.bf16.mxu0 %v5748_v1  ;;  %v2037_v40 = vrot.slane %v2022_v28, %v5860_v24  ;;  %v5675_v28 = vld [vmem:[%s6952_s1 + $0x278] sm:$0xff]  }
  0x72   : > { %5389 = vmatprep.subr.bf16.mxu1 %v5748_v1 }
  0x74   : > { %5370 = vmatpush3.bf16.msra.mxu0 %v5650_v34  ;;  %v6401_v34 = vrot.slane %v4064_v33, %v5860_v24  ;;  %v5681_v33 = vld [vmem:[%s6952_s1 + $0x2d0] sm:$0xff]  }
  0x75   : > { %5390 = vmatpush3.bf16.msra.mxu1 %v5651_v42  ;;  %5371 = vmatprep.subr.bf16.mxu0 %v5748_v1  ;;  %v2038_v42 = vcombine.low %v2030_v32, %v2037_v40  ;;  %v5685_v32 = vld [vmem:[%s6952_s1 + $0x2e0] sm:$0xff]   ;;  %v2789_v40 = vunpack.i.l.s16 %v6203_v57  ;;  %v5688_v57 = vld [vmem:[%s6952_s1 + $0x2b0] sm:$0xff]  }
  0x76   : > { %5391 = vmatprep.subr.bf16.mxu1 %v5748_v1  ;;  %v4087_v19 = vcombine.low %v6401_v34, %v6404_v13 }
  0x78   : > { %5372 = vmatpush3.bf16.msra.mxu0 %v5652_v46  ;;  %v5661_v46 = vld [vmem:[%s6952_s1 + $0x240] sm:$0xff]  }
  0x79   : > { %5392 = vmatpush3.bf16.msra.mxu1 %v5653_v54  ;;  %5373 = vmatprep.subr.bf16.mxu0 %v5748_v1  ;;  %v5665_v54 = vld [vmem:[%s6952_s1 + $0x250] sm:$0xff]  }
  0x7a   : > { %5393 = vmatprep.subr.bf16.mxu1 %v5748_v1 }
  0x7c   : > { %5374 = vmatpush3.bf16.msra.mxu0 %v5654_v3  ;;  %v5669_v3 = vld [vmem:[%s6952_s1 + $0x260] sm:$0xff]  }
  0x7d   : > { %5394 = vmatpush3.bf16.msra.mxu1 %v5655_v11  ;;  %5375 = vmatprep.subr.bf16.mxu0 %v5748_v1  ;;  %v5673_v11 = vld [vmem:[%s6952_s1 + $0x270] sm:$0xff]  }
  0x7e   : > { %5395 = vmatprep.subr.bf16.mxu1 %v5748_v1 }
  0x80   : > { %5376 = vmatpush3.bf16.msra.mxu0 %v5656_v29  ;;  %v5674_v29 = vld [vmem:[%s6952_s1 + $0x238] sm:$0xff]  }
  0x81   : > { %5396 = vmatpush3.bf16.msra.mxu1 %v5657_v44  ;;  %5377 = vmatprep.subr.bf16.mxu0 %v5748_v1  ;;  %v5676_v44 = vld [vmem:[%s6952_s1 + $0x280] sm:$0xff]  }
  0x82   : > { %5397 = vmatprep.subr.bf16.mxu1 %v5748_v1 }
  0x84   : > { %5378 = vmatpush3.bf16.msra.mxu0 %v5658_v39  ;;  %v5683_v39 = vld [vmem:[%s6952_s1 + $0x2d8] sm:$0xff]  }
  0x85   : > { %5398 = vmatpush3.bf16.msra.mxu1 %v5659_v31  ;;  %5403 = vmatprep.subr.bf16.mxu0 %v5748_v1  ;;  %v5686_v31 = vld [vmem:[%s6952_s1 + $0x2a8] sm:$0xff]  }
  0x86   : > { %5423 = vmatprep.subr.bf16.mxu1 %v5748_v1 }
  0x87   : > { %5380 = vmatmul.mubr.bf16.vlgmr.msra.gmra.mrb[8].mxu0 %v1801_v26  ;;  %v2817_v26 = vrot.slane %v2789_v40, %v5860_v24 }
  0x88   : > { %5400 = vmatmul.mubr.bf16.vlgmr.msra.gmra.mrb[12].mxu1 %v2038_v42  ;;  %5404 = vmatpush3.bf16.msra.mxu0 %v5660_v43  ;;  %v3054_v42 = vrot.slane %v3026_v7, %v5860_v24  ;;  %v5689_v43 = vld [vmem:[%s6952_s1 + $0x2f0] sm:$0xff]  }
  0x89   : > { %5424 = vmatpush3.bf16.msra.mxu1 %v5661_v46  ;;  %5405 = vmatprep.subr.bf16.mxu0 %v5748_v1  ;;  %v2825_v46 = vrot.slane %v6239_v20, %v5860_v24 }
  0x8a   : > { %5425 = vmatprep.subr.bf16.mxu1 %v5748_v1  ;;  %5419 = vmatprep.mubr.msk.bf16.mxu0 %vm5749_vm0, %v5748_v1 }
  0x8b   : > { %5439 = vmatprep.mubr.msk.bf16.mxu1 %vm5749_vm0, %v5748_v1 }
  0x8c   : > { %5406 = vmatpush3.bf16.msra.mxu0 %v5662_v48  ;;  %v2832_v48 = vrot.slane %v2817_v26, %v5860_v24  ;;  %v5721_v26 = vld [vmem:[%s6952_s1 + $0x3f0] sm:$0xff]  }
  0x8d   : > { %5426 = vmatpush3.bf16.msra.mxu1 %v5663_v51  ;;  %5407 = vmatprep.subr.bf16.mxu0 %v5748_v1  ;;  %v3062_v51 = vrot.slane %v3055_v4, %v5860_v24  ;;  %v5694_v4 = vld [vmem:[%s6952_s1 + $0x308] sm:$0xff]  }
  0x8e   : > { %5427 = vmatprep.subr.bf16.mxu1 %v5748_v1  ;;  %v2833_v20 = vcombine.low %v2825_v46, %v2832_v48  ;;  %v4094_v46 = vrot.slane %v4087_v19, %v5860_v24 }
  0x90   : > { %5408 = vmatpush3.bf16.msra.mxu0 %v5664_v52  ;;  %v3069_v52 = vrot.slane %v3054_v42, %v5860_v24 }
  0x91   : > { %5428 = vmatpush3.bf16.msra.mxu1 %v5665_v54  ;;  %5409 = vmatprep.subr.bf16.mxu0 %v5748_v1  ;;  %v5690_v54 = vld [vmem:[%s6952_s1 + $0x2b8] sm:$0xff]  }
  0x92   : > { %5429 = vmatprep.subr.bf16.mxu1 %v5748_v1 }
  0x94   : > { %5410 = vmatpush3.bf16.msra.mxu0 %v5666_v55  ;;  %v5691_v55 = vld [vmem:[%s6952_s1 + $0x2f8] sm:$0xff]  }
  0x95   : > { %5430 = vmatpush3.bf16.msra.mxu1 %v5667_v59  ;;  %5411 = vmatprep.subr.bf16.mxu0 %v5748_v1  ;;  %v3070_v59 = vcombine.low %v3062_v51, %v3069_v52  ;;  %v5722_v51 = vld [vmem:[%s6952_s1 + $0x3b8] sm:$0xff]  }
  0x96   : > { %5431 = vmatprep.subr.bf16.mxu1 %v5748_v1  ;;  %v5723_v52 = vld [vmem:[%s6952_s1 + $0x3f8] sm:$0xff]  }
  0x98   : > { %5412 = vmatpush3.bf16.msra.mxu0 %v5668_v62  ;;  %v5696_v62 = vld [vmem:[%s6952_s1 + $0x310] sm:$0xff]  }
  0x99   : > { %5432 = vmatpush3.bf16.msra.mxu1 %v5669_v3  ;;  %5413 = vmatprep.subr.bf16.mxu0 %v5748_v1  ;;  %v5697_v3 = vld [vmem:[%s6952_s1 + $0x350] sm:$0xff]  }
  0x9a   : > { %5433 = vmatprep.subr.bf16.mxu1 %v5748_v1 }
  0x9c   : > { %5414 = vmatpush3.bf16.msra.mxu0 %v5670_v8  ;;  %v5701_v8 = vld [vmem:[%s6952_s1 + $0x360] sm:$0xff]  }
  0x9d   : > { %5434 = vmatpush3.bf16.msra.mxu1 %v5671_v10  ;;  %5415 = vmatprep.subr.bf16.mxu0 %v5748_v1  ;;  %v3344_v10 = vunpack.i.l.s16 %v6330_v27 }
  0x9e   : > { %5435 = vmatprep.subr.bf16.mxu1 %v5748_v1 }
  0x9f   : > { %v3372_v16 = vrot.slane %v3344_v10, %v5860_v24 }
  0xa0   : > { %5416 = vmatpush3.bf16.msra.mxu0 %v5672_v35  ;;  %v3609_v35 = vrot.slane %v3581_v14, %v5860_v24  ;;  %v3617_v14 = vrot.slane %v3610_v2, %v5860_v24  ;;  %v5710_v2 = vld [vmem:[%s6952_s1 + $0x388] sm:$0xff]  }
  0xa1   : > { %5436 = vmatpush3.bf16.msra.mxu1 %v5673_v11  ;;  %5417 = vmatprep.subr.bf16.mxu0 %v5748_v1  ;;  %v5704_v11 = vld [vmem:[%s6952_s1 + $0x330] sm:$0xff]   ;;  %v3387_v27 = vrot.slane %v3372_v16, %v5860_v24 }
  0xa2   : > { %5437 = vmatprep.subr.bf16.mxu1 %v5748_v1  ;;  %v3624_v25 = vrot.slane %v3609_v35, %v5860_v24 }
  0xa3   : > { %v3388_v17 = vcombine.low %v3380_v0, %v3387_v27 }
  0xa4   : > { %5418 = vmatpush3.bf16.msra.mxu0 %v5674_v29  ;;  %v5707_v29 = vld [vmem:[%s6952_s1 + $0x378] sm:$0xff]  }
  0xa5   : > { %5438 = vmatpush3.bf16.msra.mxu1 %v5675_v28  ;;  %5443 = vmatprep.subr.bf16.mxu0 %v5748_v1  ;;  %v3625_v28 = vcombine.low %v3617_v14, %v3624_v25 }
  0xa6   : > { %5463 = vmatprep.subr.bf16.mxu1 %v5748_v1 }
  0xa7   : > { %5420 = vmatmul.mubr.bf16.vlgmr.msra.gmra.mrb[12].mxu0 %v2356_v6  ;;  %v5711_v6 = vld [vmem:[%s6952_s1 + $0x3c8] sm:$0xff]  }
  0xa8   : > { %5440 = vmatmul.mubr.bf16.vlgmr.msra.gmra.mrb[16].mxu1 %v2593_v58  ;;  %5444 = vmatpush3.bf16.msra.mxu0 %v5676_v44  ;;  %v5712_v58 = vld [vmem:[%s6952_s1 + $0x390] sm:$0xff]  }
  0xa9   : > { %5464 = vmatpush3.bf16.msra.mxu1 %v5677_v60  ;;  %5445 = vmatprep.subr.bf16.mxu0 %v5748_v1  ;;  %v5713_v44 = vld [vmem:[%s6952_s1 + $0x3d0] sm:$0xff]   ;;  %v5714_v60 = vld [vmem:[%s6952_s1 + $0x398] sm:$0xff]  }
  0xaa   : > { %5465 = vmatprep.subr.bf16.mxu1 %v5748_v1  ;;  %5459 = vmatprep.mubr.msk.bf16.mxu0 %vm5749_vm0, %v5748_v1 }
  0xab   : > { %5479 = vmatprep.mubr.msk.bf16.mxu1 %vm5749_vm0, %v5748_v1 }
  0xac   : > { %5446 = vmatpush3.bf16.msra.mxu0 %v5678_v9  ;;  %v5715_v9 = vld [vmem:[%s6952_s1 + $0x3d8] sm:$0xff]  }
  0xad   : > { %5466 = vmatpush3.bf16.msra.mxu1 %v5679_v18  ;;  %5447 = vmatprep.subr.bf16.mxu0 %v5748_v1  ;;  %v5716_v18 = vld [vmem:[%s6952_s1 + $0x3a0] sm:$0xff]  }
  0xae   : > { %5467 = vmatprep.subr.bf16.mxu1 %v5748_v1 }
  0xb0   : > { %5448 = vmatpush3.bf16.msra.mxu0 %v5680_v53  ;;  %v5717_v53 = vld [vmem:[%s6952_s1 + $0x3e0] sm:$0xff]  }
  0xb1   : > { %5468 = vmatpush3.bf16.msra.mxu1 %v5681_v33  ;;  %5449 = vmatprep.subr.bf16.mxu0 %v5748_v1  ;;  %v3821_v33 = vunpack.i.l.s16 %v6335_v63 }
  0xb2   : > { %5469 = vmatprep.subr.bf16.mxu1 %v5748_v1 }
  0xb3   : > { %v3849_v7 = vrot.slane %v3821_v33, %v5860_v24 }
  0xb4   : > { %5450 = vmatpush3.bf16.msra.mxu0 %v5682_v36  ;;  %v4058_v36 = vunpack.i.h.s16 %v6335_v63 }
  0xb5   : > { %5470 = vmatpush3.bf16.msra.mxu1 %v5683_v39  ;;  %5451 = vmatprep.subr.bf16.mxu0 %v5748_v1  ;;  %v5718_v39 = vld [vmem:[%s6952_s1 + $0x3a8] sm:$0xff]  }
  0xb6   : > { %5471 = vmatprep.subr.bf16.mxu1 %v5748_v1  ;;  %v4086_v63 = vrot.slane %v4058_v36, %v5860_v24 }
  0xb8   : > { %5452 = vmatpush3.bf16.msra.mxu0 %v5684_v38  ;;  %v5719_v38 = vld [vmem:[%s6952_s1 + $0x3e8] sm:$0xff]   ;;  %v4101_v48 = vrot.slane %v4086_v63, %v5860_v24 }
  0xb9   : > { %5472 = vmatpush3.bf16.msra.mxu1 %v5685_v32  ;;  %5453 = vmatprep.subr.bf16.mxu0 %v5748_v1 }
  0xba   : > { %5473 = vmatprep.subr.bf16.mxu1 %v5748_v1 }
  0xbc   : > { %5454 = vmatpush3.bf16.msra.mxu0 %v5686_v31 }
  0xbd   : > { %5474 = vmatpush3.bf16.msra.mxu1 %v5687_v41  ;;  %5455 = vmatprep.subr.bf16.mxu0 %v5748_v1  ;;  %v5720_v41 = vld [vmem:[%s6952_s1 + $0x3b0] sm:$0xff]  }
  0xbe   : > { %5475 = vmatprep.subr.bf16.mxu1 %v5748_v1 }
  0xc0   : > { %5456 = vmatpush3.bf16.msra.mxu0 %v5688_v57  ;;  %v3857_v57 = vrot.slane %v6408_v15, %v5860_v24 }
  0xc1   : > { %5476 = vmatpush3.bf16.msra.mxu1 %v5689_v43  ;;  %5457 = vmatprep.subr.bf16.mxu0 %v5748_v1  ;;  %v3864_v43 = vrot.slane %v3849_v7, %v5860_v24 }
  0xc2   : > { %5477 = vmatprep.subr.bf16.mxu1 %v5748_v1 }
  0xc3   : > { %v3865_v15 = vcombine.low %v3857_v57, %v3864_v43 }
  0xc4   : > { %5458 = vmatpush3.bf16.msra.mxu0 %v5690_v54  ;;  %v4102_v54 = vcombine.low %v4094_v46, %v4101_v48 }
  0xc5   : > { %5478 = vmatpush3.bf16.msra.mxu1 %v5691_v55  ;;  %5483 = vmatprep.subr.bf16.mxu0 %v5748_v1 }
  0xc6   : > { %5503 = vmatprep.subr.bf16.mxu1 %v5748_v1 }
  0xc7   : > { %5460 = vmatmul.mubr.bf16.vlgmr.msra.gmra.mrb[16].mxu0 %v2833_v20 }
  0xc8   : > { %5480 = vmatmul.mubr.bf16.vlgmr.msra.gmra.mrb[20].mxu1 %v3070_v59  ;;  %5484 = vmatpush3.bf16.msra.mxu0 %v5692_v23 }
  0xc9   : > { %5504 = vmatpush3.bf16.msra.mxu1 %v5693_v30  ;;  %5485 = vmatprep.subr.bf16.mxu0 %v5748_v1 }
  0xca   : > { %5505 = vmatprep.subr.bf16.mxu1 %v5748_v1  ;;  %5499 = vmatprep.mubr.msk.bf16.mxu0 %vm5749_vm0, %v5748_v1 }
  0xcb   : > { %5519 = vmatprep.mubr.msk.bf16.mxu1 %vm5749_vm0, %v5748_v1 }
  0xcc   : > { %5486 = vmatpush3.bf16.msra.mxu0 %v5694_v4 }
  0xcd   : > { %5506 = vmatpush3.bf16.msra.mxu1 %v5695_v61  ;;  %5487 = vmatprep.subr.bf16.mxu0 %v5748_v1 }
  0xce   : > { %5507 = vmatprep.subr.bf16.mxu1 %v5748_v1 }
  0xd0   : > { %5488 = vmatpush3.bf16.msra.mxu0 %v5696_v62 }
  0xd1   : > { %5508 = vmatpush3.bf16.msra.mxu1 %v5697_v3  ;;  %5489 = vmatprep.subr.bf16.mxu0 %v5748_v1 }
  0xd2   : > { %5509 = vmatprep.subr.bf16.mxu1 %v5748_v1 }
  0xd4   : > { %5490 = vmatpush3.bf16.msra.mxu0 %v5698_v5 }
  0xd5   : > { %5510 = vmatpush3.bf16.msra.mxu1 %v5699_v45  ;;  %5491 = vmatprep.subr.bf16.mxu0 %v5748_v1 }
  0xd6   : > { %5511 = vmatprep.subr.bf16.mxu1 %v5748_v1 }
  0xd8   : > { %5492 = vmatpush3.bf16.msra.mxu0 %v5700_v50 }
  0xd9   : > { %5512 = vmatpush3.bf16.msra.mxu1 %v5701_v8  ;;  %5493 = vmatprep.subr.bf16.mxu0 %v5748_v1 }
  0xda   : > { %5513 = vmatprep.subr.bf16.mxu1 %v5748_v1 }
  0xdc   : > { %5494 = vmatpush3.bf16.msra.mxu0 %v5702_v56 }
  0xdd   : > { %5514 = vmatpush3.bf16.msra.mxu1 %v5703_v49  ;;  %5495 = vmatprep.subr.bf16.mxu0 %v5748_v1 }
  0xde   : > { %5515 = vmatprep.subr.bf16.mxu1 %v5748_v1 }
  0xe0   : > { %5496 = vmatpush3.bf16.msra.mxu0 %v5704_v11 }
  0xe1   : > { %5516 = vmatpush3.bf16.msra.mxu1 %v5705_v47  ;;  %5497 = vmatprep.subr.bf16.mxu0 %v5748_v1 }
  0xe2   : > { %5517 = vmatprep.subr.bf16.mxu1 %v5748_v1 }
  0xe4   : > { %5498 = vmatpush3.bf16.msra.mxu0 %v5706_v37 }
  0xe5   : > { %5518 = vmatpush3.bf16.msra.mxu1 %v5707_v29  ;;  %5523 = vmatprep.subr.bf16.mxu0 %v5748_v1 }
  0xe6   : > { %5543 = vmatprep.subr.bf16.mxu1 %v5748_v1 }
  0xe7   : > { %5500 = vmatmul.mubr.bf16.vlgmr.msra.gmra.mrb[20].mxu0 %v3388_v17 }
  0xe8   : > { %5520 = vmatmul.mubr.bf16.vlgmr.msra.gmra.mrb[24].mxu1 %v3625_v28  ;;  %5524 = vmatpush3.bf16.msra.mxu0 %v5708_v21 }
  0xe9   : > { %5544 = vmatpush3.bf16.msra.mxu1 %v5709_v22  ;;  %5525 = vmatprep.subr.bf16.mxu0 %v5748_v1 }
  0xea   : > { %5545 = vmatprep.subr.bf16.mxu1 %v5748_v1  ;;  %5539 = vmatprep.mubr.msk.bf16.mxu0 %vm5749_vm0, %v5748_v1 }
  0xeb   : > { %5559 = vmatprep.mubr.msk.bf16.mxu1 %vm5749_vm0, %v5748_v1 }
  0xec   : > { %5526 = vmatpush3.bf16.msra.mxu0 %v5710_v2 }
  0xed   : > { %5546 = vmatpush3.bf16.msra.mxu1 %v5711_v6  ;;  %5527 = vmatprep.subr.bf16.mxu0 %v5748_v1 }
  0xee   : > { %5547 = vmatprep.subr.bf16.mxu1 %v5748_v1 }
  0xf0   : > { %5528 = vmatpush3.bf16.msra.mxu0 %v5712_v58 }
  0xf1   : > { %5548 = vmatpush3.bf16.msra.mxu1 %v5713_v44  ;;  %5529 = vmatprep.subr.bf16.mxu0 %v5748_v1 }
  0xf2   : > { %5549 = vmatprep.subr.bf16.mxu1 %v5748_v1 }
  0xf4   : > { %5530 = vmatpush3.bf16.msra.mxu0 %v5714_v60 }
  0xf5   : > { %5550 = vmatpush3.bf16.msra.mxu1 %v5715_v9  ;;  %5531 = vmatprep.subr.bf16.mxu0 %v5748_v1 }
  0xf6   : > { %5551 = vmatprep.subr.bf16.mxu1 %v5748_v1 }
  0xf8   : > { %5532 = vmatpush3.bf16.msra.mxu0 %v5716_v18 }
  0xf9   : > { %5552 = vmatpush3.bf16.msra.mxu1 %v5717_v53  ;;  %5533 = vmatprep.subr.bf16.mxu0 %v5748_v1 }
  0xfa   : > { %5553 = vmatprep.subr.bf16.mxu1 %v5748_v1 }
  0xfb   : > { %v853_v32 = vpop.f32.mrb[0].mxu1 }
  0xfc   : > { %v5301_v40 = vpop.f32.mrb[1].mxu1  ;;  %5534 = vmatpush3.bf16.msra.mxu0 %v5718_v39  ;;  %v862_v34 = vcombine.high %v853_v32, %v853_v32  ;;  %v869_v13 = vrot.slane %v853_v32, %v5860_v24 }
  0xfd   : > { %v856_v31 = vpop.f32.mrb[2].mxu1  ;;  %5554 = vmatpush3.bf16.msra.mxu1 %v5719_v38  ;;  %5535 = vmatprep.subr.bf16.mxu0 %v5748_v1 }
  0xfe   : > { %v5302_v42 = vpop.f32.mrb[3].mxu1  ;;  %5555 = vmatprep.subr.bf16.mxu1 %v5748_v1  ;;  %v876_v19 = vrot.slane %v862_v34, %v5860_v24  ;;  %v877_v55 = vcombine.high %v869_v13, %v869_v13  ;;  %v885_v59 = vrot.slane %v869_v13, %v5860_v24  ;;  %v917_v4 = vrot.slane %v856_v31, %v5860_v24 }
 0x100   : > { %5536 = vmatpush3.bf16.msra.mxu0 %v5720_v41  ;;  %v878_v20 = vcombine.high %v876_v19, %v876_v19  ;;  %v892_v23 = vrot.slane %v876_v19, %v5860_v24  ;;  %v899_v30 = vrot.slane %v877_v55, %v5860_v24  ;;  %v907_v61 = vcombine.high %v885_v59, %v885_v59 }
 0x101   : > { %5556 = vmatpush3.bf16.msra.mxu1 %v5721_v26  ;;  %5537 = vmatprep.subr.bf16.mxu0 %v5748_v1  ;;  %v924_v11 = vrot.slane %v917_v4, %v5860_v24 }
 0x102   : > { %5557 = vmatprep.subr.bf16.mxu1 %v5748_v1  ;;  %v906_v1 = vrot.slane %v878_v20, %v5860_v24  ;;  %v908_v49 = vcombine.high %v892_v23, %v892_v23  ;;  %v909_v16 = vcombine.high %v899_v30, %v899_v30 }
 0x104   : > { %5538 = vmatpush3.bf16.msra.mxu0 %v5722_v51  ;;  %v910_v35 = vcombine.high %v906_v1, %v906_v1 }
 0x105   : > { %5558 = vmatpush3.bf16.msra.mxu1 %v5723_v52 }
 0x107   : > { %5540 = vmatmul.mubr.bf16.vlgmr.msra.gmra.mrb[24].mxu0 %v3865_v15 }
 0x108   : > { %5560 = vmatmul.mubr.bf16.vlgmr.msra.gmra.mrb[28].mxu1 %v4102_v54 }
 0x11a   : > { %v622_v62 = vpop.f32.mrb[0].mxu0 }
 0x11b   : > { %v1090_v3 = vpop.f32.mrb[4].mxu1  ;;  %v631_v5 = vcombine.high %v622_v62, %v622_v62  ;;  %v638_v45 = vrot.slane %v622_v62, %v5860_v24  ;;  %v5281_v10 = vpop.f32.mrb[1].mxu0 }
 0x11c   : > { %v1099_v50 = vcombine.high %v1090_v3, %v1090_v3  ;;  %v1106_v8 = vrot.slane %v1090_v3, %v5860_v24  ;;  %v5321_v56 = vpop.f32.mrb[5].mxu1  ;;  %v625_v47 = vpop.f32.mrb[2].mxu0 }
 0x11d   : > { %v1093_v0 = vpop.f32.mrb[6].mxu1  ;;  %v645_v27 = vrot.slane %v631_v5, %v5860_v24  ;;  %v646_v14 = vcombine.high %v638_v45, %v638_v45  ;;  %v654_v25 = vrot.slane %v638_v45, %v5860_v24  ;;  %v5282_v29 = vpop.f32.mrb[3].mxu0  ;;  %v686_v22 = vrot.slane %v625_v47, %v5860_v24 }
 0x11e   : > { %v1113_v37 = vrot.slane %v1099_v50, %v5860_v24  ;;  %v5322_v17 = vpop.f32.mrb[7].mxu1  ;;  %v1114_v28 = vcombine.high %v1106_v8, %v1106_v8  ;;  %v1122_v21 = vrot.slane %v1106_v8, %v5860_v24  ;;  %v1154_v2 = vrot.slane %v1093_v0, %v5860_v24 }
 0x11f   : > { %v647_v6 = vcombine.high %v645_v27, %v645_v27  ;;  %v661_v58 = vrot.slane %v645_v27, %v5860_v24  ;;  %v668_v44 = vrot.slane %v646_v14, %v5860_v24  ;;  %v676_v60 = vcombine.high %v654_v25, %v654_v25 }
 0x120   : > { %v934_v9 = vadd.f32 %v885_v59, %v654_v25  ;;  %v1115_v18 = vcombine.high %v1113_v37, %v1113_v37  ;;  %v1129_v53 = vrot.slane %v1113_v37, %v5860_v24  ;;  %v1136_v33 = vrot.slane %v1114_v28, %v5860_v24 }
 0x121   : > { %v675_v36 = vrot.slane %v647_v6, %v5860_v24  ;;  %v677_v39 = vcombine.high %v661_v58, %v661_v58  ;;  %v678_v38 = vcombine.high %v668_v44, %v668_v44  ;;  %v935_v32 = vadd.f32 %v899_v30, %v668_v44 }
 0x122   : > { %v936_v40 = vadd.f32 %v907_v61, %v676_v60  ;;  %v938_v7 = vadd.f32 %v892_v23, %v661_v58  ;;  %v1143_v63 = vrot.slane %v1115_v18, %v5860_v24  ;;  %v1144_v31 = vcombine.high %v1122_v21, %v1122_v21 }
 0x123   : > { %v679_v41 = vcombine.high %v675_v36, %v675_v36  ;;  %v937_v26 = vadd.f32 %v909_v16, %v678_v38  ;;  %v939_v42 = vadd.f32 %v906_v1, %v675_v36  ;;  %v940_v57 = vadd.f32 %v908_v49, %v677_v39 }
 0x124   : > { %v1145_v43 = vcombine.high %v1129_v53, %v1129_v53  ;;  %v1146_v46 = vcombine.high %v1136_v33, %v1136_v33  ;;  %v1147_v48 = vcombine.high %v1143_v63, %v1143_v63  ;;  %v1171_v51 = vadd.f32 %v1122_v21, %v934_v9 }
 0x125   : > { %v941_v52 = vadd.f32 %v910_v35, %v679_v41  ;;  %v1172_v15 = vadd.f32 %v1136_v33, %v935_v32  ;;  %v1173_v54 = vadd.f32 %v1144_v31, %v936_v40  ;;  %v1175_v34 = vadd.f32 %v1129_v53, %v938_v7 }
 0x126   : > { %v1174_v13 = vadd.f32 %v1146_v46, %v937_v26  ;;  %v1176_v19 = vadd.f32 %v1143_v63, %v939_v42  ;;  %v1177_v55 = vadd.f32 %v1145_v43, %v940_v57  ;;  %v693_v20 = vrot.slane %v686_v22, %v5860_v24 }
 0x127   : > { %v1178_v59 = vadd.f32 %v1147_v48, %v941_v52  ;;  %v1161_v23 = vrot.slane %v1154_v2, %v5860_v24 }
 0x128   : > { %v942_v30 = vadd.f32 %v924_v11, %v693_v20 }
 0x12a   : > { %v1179_v4 = vadd.f32 %v1161_v23, %v942_v30 }
 0x13a   : > { %v1408_v1 = vpop.f32.mrb[4].mxu0 }
 0x13b   : > { %v1645_v61 = vpop.f32.mrb[8].mxu1  ;;  %v1417_v62 = vcombine.high %v1408_v1, %v1408_v1  ;;  %v1424_v3 = vrot.slane %v1408_v1, %v5860_v24  ;;  %v5341_v50 = vpop.f32.mrb[5].mxu0 }
 0x13c   : > { %v1654_v5 = vcombine.high %v1645_v61, %v1645_v61  ;;  %v1661_v45 = vrot.slane %v1645_v61, %v5860_v24  ;;  %v5361_v8 = vpop.f32.mrb[9].mxu1  ;;  %v1411_v10 = vpop.f32.mrb[6].mxu0 }
 0x13d   : > { %v1648_v56 = vpop.f32.mrb[10].mxu1  ;;  %v1431_v49 = vrot.slane %v1417_v62, %v5860_v24  ;;  %v1432_v16 = vcombine.high %v1424_v3, %v1424_v3  ;;  %v1440_v35 = vrot.slane %v1424_v3, %v5860_v24  ;;  %v5342_v47 = vpop.f32.mrb[7].mxu0  ;;  %v1472_v25 = vrot.slane %v1411_v10, %v5860_v24 }
 0x13e   : > { %v1668_v11 = vrot.slane %v1654_v5, %v5860_v24  ;;  %v5362_v0 = vpop.f32.mrb[11].mxu1  ;;  %v1669_v27 = vcombine.high %v1661_v45, %v1661_v45  ;;  %v1677_v14 = vrot.slane %v1661_v45, %v5860_v24  ;;  %v1709_v37 = vrot.slane %v1648_v56, %v5860_v24 }
 0x13f   : > { %v1433_v29 = vcombine.high %v1431_v49, %v1431_v49  ;;  %v1447_v17 = vrot.slane %v1431_v49, %v5860_v24  ;;  %v1454_v28 = vrot.slane %v1432_v16, %v5860_v24  ;;  %v1462_v21 = vcombine.high %v1440_v35, %v1440_v35 }
 0x140   : > { %v1489_v22 = vadd.f32 %v1440_v35, %v1171_v51  ;;  %v1670_v2 = vcombine.high %v1668_v11, %v1668_v11  ;;  %v1684_v6 = vrot.slane %v1668_v11, %v5860_v24  ;;  %v1691_v58 = vrot.slane %v1669_v27, %v5860_v24 }
 0x141   : > { %v1461_v44 = vrot.slane %v1433_v29, %v5860_v24  ;;  %v1463_v60 = vcombine.high %v1447_v17, %v1447_v17  ;;  %v1464_v9 = vcombine.high %v1454_v28, %v1454_v28  ;;  %v1490_v18 = vadd.f32 %v1454_v28, %v1172_v15 }
 0x142   : > { %v1491_v53 = vadd.f32 %v1462_v21, %v1173_v54  ;;  %v1493_v33 = vadd.f32 %v1447_v17, %v1175_v34  ;;  %v1698_v36 = vrot.slane %v1670_v2, %v5860_v24  ;;  %v1699_v39 = vcombine.high %v1677_v14, %v1677_v14 }
 0x143   : > { %v1465_v38 = vcombine.high %v1461_v44, %v1461_v44  ;;  %v1492_v32 = vadd.f32 %v1464_v9, %v1174_v13  ;;  %v1494_v40 = vadd.f32 %v1461_v44, %v1176_v19  ;;  %v1495_v7 = vadd.f32 %v1463_v60, %v1177_v55 }
 0x144   : > { %v1700_v63 = vcombine.high %v1684_v6, %v1684_v6  ;;  %v1701_v31 = vcombine.high %v1691_v58, %v1691_v58  ;;  %v1702_v41 = vcombine.high %v1698_v36, %v1698_v36  ;;  %v1726_v26 = vadd.f32 %v1677_v14, %v1489_v22 }
 0x145   : > { %v1496_v42 = vadd.f32 %v1465_v38, %v1178_v59  ;;  %v1727_v57 = vadd.f32 %v1691_v58, %v1490_v18  ;;  %v1728_v43 = vadd.f32 %v1699_v39, %v1491_v53  ;;  %v1730_v46 = vadd.f32 %v1684_v6, %v1493_v33 }
 0x146   : > { %v1729_v48 = vadd.f32 %v1701_v31, %v1492_v32  ;;  %v1731_v51 = vadd.f32 %v1698_v36, %v1494_v40  ;;  %v1732_v52 = vadd.f32 %v1700_v63, %v1495_v7  ;;  %v1479_v15 = vrot.slane %v1472_v25, %v5860_v24 }
 0x147   : > { %v1733_v54 = vadd.f32 %v1702_v41, %v1496_v42  ;;  %v1716_v34 = vrot.slane %v1709_v37, %v5860_v24 }
 0x148   : > { %v1497_v20 = vadd.f32 %v1479_v15, %v1179_v4 }
 0x14a   : > { %v1734_v13 = vadd.f32 %v1716_v34, %v1497_v20 }
 0x15a   : > { %v1885_v19 = vpop.f32.mrb[8].mxu0 }
 0x15b   : > { %v2122_v55 = vpop.f32.mrb[12].mxu1  ;;  %v1894_v23 = vcombine.high %v1885_v19, %v1885_v19  ;;  %v1901_v30 = vrot.slane %v1885_v19, %v5860_v24  ;;  %v5381_v61 = vpop.f32.mrb[9].mxu0 }
 0x15c   : > { %v2131_v1 = vcombine.high %v2122_v55, %v2122_v55  ;;  %v2138_v59 = vrot.slane %v2122_v55, %v5860_v24  ;;  %v5401_v62 = vpop.f32.mrb[13].mxu1  ;;  %v1888_v3 = vpop.f32.mrb[10].mxu0 }
 0x15d   : > { %v2125_v5 = vpop.f32.mrb[14].mxu1  ;;  %v1908_v45 = vrot.slane %v1894_v23, %v5860_v24  ;;  %v1909_v50 = vcombine.high %v1901_v30, %v1901_v30  ;;  %v1917_v8 = vrot.slane %v1901_v30, %v5860_v24  ;;  %v5382_v10 = vpop.f32.mrb[11].mxu0  ;;  %v1949_v35 = vrot.slane %v1888_v3, %v5860_v24 }
 0x15e   : > { %v2145_v4 = vrot.slane %v2131_v1, %v5860_v24  ;;  %v5402_v56 = vpop.f32.mrb[15].mxu1  ;;  %v2146_v49 = vcombine.high %v2138_v59, %v2138_v59  ;;  %v2154_v16 = vrot.slane %v2138_v59, %v5860_v24  ;;  %v2186_v11 = vrot.slane %v2125_v5, %v5860_v24 }
 0x15f   : > { %v1910_v47 = vcombine.high %v1908_v45, %v1908_v45  ;;  %v1924_v0 = vrot.slane %v1908_v45, %v5860_v24  ;;  %v1931_v27 = vrot.slane %v1909_v50, %v5860_v24  ;;  %v1939_v14 = vcombine.high %v1917_v8, %v1917_v8 }
 0x160   : > { %v1966_v25 = vadd.f32 %v1917_v8, %v1726_v26  ;;  %v2147_v37 = vcombine.high %v2145_v4, %v2145_v4  ;;  %v2161_v29 = vrot.slane %v2145_v4, %v5860_v24  ;;  %v2168_v17 = vrot.slane %v2146_v49, %v5860_v24 }
 0x161   : > { %v1938_v28 = vrot.slane %v1910_v47, %v5860_v24  ;;  %v1940_v21 = vcombine.high %v1924_v0, %v1924_v0  ;;  %v1941_v22 = vcombine.high %v1931_v27, %v1931_v27  ;;  %v1967_v2 = vadd.f32 %v1931_v27, %v1727_v57 }
 0x162   : > { %v1968_v6 = vadd.f32 %v1939_v14, %v1728_v43  ;;  %v1970_v58 = vadd.f32 %v1924_v0, %v1730_v46  ;;  %v2175_v44 = vrot.slane %v2147_v37, %v5860_v24  ;;  %v2176_v60 = vcombine.high %v2154_v16, %v2154_v16 }
 0x163   : > { %v1942_v9 = vcombine.high %v1938_v28, %v1938_v28  ;;  %v1969_v18 = vadd.f32 %v1941_v22, %v1729_v48  ;;  %v1971_v53 = vadd.f32 %v1938_v28, %v1731_v51  ;;  %v1972_v33 = vadd.f32 %v1940_v21, %v1732_v52 }
 0x164   : > { %v2177_v36 = vcombine.high %v2161_v29, %v2161_v29  ;;  %v2178_v39 = vcombine.high %v2168_v17, %v2168_v17  ;;  %v2179_v38 = vcombine.high %v2175_v44, %v2175_v44  ;;  %v2203_v32 = vadd.f32 %v2154_v16, %v1966_v25 }
 0x165   : > { %v1973_v40 = vadd.f32 %v1942_v9, %v1733_v54  ;;  %v2204_v7 = vadd.f32 %v2168_v17, %v1967_v2  ;;  %v2205_v63 = vadd.f32 %v2176_v60, %v1968_v6  ;;  %v2207_v31 = vadd.f32 %v2161_v29, %v1970_v58 }
 0x166   : > { %v2206_v41 = vadd.f32 %v2178_v39, %v1969_v18  ;;  %v2208_v26 = vadd.f32 %v2175_v44, %v1971_v53  ;;  %v2209_v42 = vadd.f32 %v2177_v36, %v1972_v33  ;;  %v1956_v57 = vrot.slane %v1949_v35, %v5860_v24 }
 0x167   : > { %v2210_v43 = vadd.f32 %v2179_v38, %v1973_v40  ;;  %v2193_v46 = vrot.slane %v2186_v11, %v5860_v24 }
 0x168   : > { %v1974_v15 = vadd.f32 %v1956_v57, %v1734_v13 }
 0x16a   : > { %v2211_v48 = vadd.f32 %v2193_v46, %v1974_v15 }
 0x17a   : > { %v2440_v51 = vpop.f32.mrb[12].mxu0 }
 0x17b   : > { %v2677_v52 = vpop.f32.mrb[16].mxu1  ;;  %v2449_v34 = vcombine.high %v2440_v51, %v2440_v51  ;;  %v2456_v20 = vrot.slane %v2440_v51, %v5860_v24  ;;  %v5421_v55 = vpop.f32.mrb[13].mxu0 }
 0x17c   : > { %v2686_v19 = vcombine.high %v2677_v52, %v2677_v52  ;;  %v2693_v54 = vrot.slane %v2677_v52, %v5860_v24  ;;  %v5441_v23 = vpop.f32.mrb[17].mxu1  ;;  %v2443_v30 = vpop.f32.mrb[14].mxu0 }
 0x17d   : > { %v2680_v1 = vpop.f32.mrb[18].mxu1  ;;  %v2463_v59 = vrot.slane %v2449_v34, %v5860_v24  ;;  %v2464_v61 = vcombine.high %v2456_v20, %v2456_v20  ;;  %v2472_v62 = vrot.slane %v2456_v20, %v5860_v24  ;;  %v5422_v3 = vpop.f32.mrb[15].mxu0  ;;  %v2504_v8 = vrot.slane %v2443_v30, %v5860_v24 }
 0x17e   : > { %v2700_v13 = vrot.slane %v2686_v19, %v5860_v24  ;;  %v5442_v5 = vpop.f32.mrb[19].mxu1  ;;  %v2701_v45 = vcombine.high %v2693_v54, %v2693_v54  ;;  %v2709_v50 = vrot.slane %v2693_v54, %v5860_v24  ;;  %v2741_v4 = vrot.slane %v2680_v1, %v5860_v24 }
 0x17f   : > { %v2465_v10 = vcombine.high %v2463_v59, %v2463_v59  ;;  %v2479_v56 = vrot.slane %v2463_v59, %v5860_v24  ;;  %v2486_v49 = vrot.slane %v2464_v61, %v5860_v24  ;;  %v2494_v16 = vcombine.high %v2472_v62, %v2472_v62 }
 0x180   : > { %v2521_v35 = vadd.f32 %v2472_v62, %v2203_v32  ;;  %v2702_v11 = vcombine.high %v2700_v13, %v2700_v13  ;;  %v2716_v47 = vrot.slane %v2700_v13, %v5860_v24  ;;  %v2723_v0 = vrot.slane %v2701_v45, %v5860_v24 }
 0x181   : > { %v2493_v27 = vrot.slane %v2465_v10, %v5860_v24  ;;  %v2495_v14 = vcombine.high %v2479_v56, %v2479_v56  ;;  %v2496_v25 = vcombine.high %v2486_v49, %v2486_v49  ;;  %v2522_v37 = vadd.f32 %v2486_v49, %v2204_v7 }
 0x182   : > { %v2523_v29 = vadd.f32 %v2494_v16, %v2205_v63  ;;  %v2525_v17 = vadd.f32 %v2479_v56, %v2207_v31  ;;  %v2730_v28 = vrot.slane %v2702_v11, %v5860_v24  ;;  %v2731_v21 = vcombine.high %v2709_v50, %v2709_v50 }
 0x183   : > { %v2497_v22 = vcombine.high %v2493_v27, %v2493_v27  ;;  %v2524_v2 = vadd.f32 %v2496_v25, %v2206_v41  ;;  %v2526_v6 = vadd.f32 %v2493_v27, %v2208_v26  ;;  %v2527_v58 = vadd.f32 %v2495_v14, %v2209_v42 }
 0x184   : > { %v2732_v44 = vcombine.high %v2716_v47, %v2716_v47  ;;  %v2733_v60 = vcombine.high %v2723_v0, %v2723_v0  ;;  %v2734_v9 = vcombine.high %v2730_v28, %v2730_v28  ;;  %v2758_v18 = vadd.f32 %v2709_v50, %v2521_v35 }
 0x185   : > { %v2528_v53 = vadd.f32 %v2497_v22, %v2210_v43  ;;  %v2759_v33 = vadd.f32 %v2723_v0, %v2522_v37  ;;  %v2760_v36 = vadd.f32 %v2731_v21, %v2523_v29  ;;  %v2762_v39 = vadd.f32 %v2716_v47, %v2525_v17 }
 0x186   : > { %v2761_v38 = vadd.f32 %v2733_v60, %v2524_v2  ;;  %v2763_v32 = vadd.f32 %v2730_v28, %v2526_v6  ;;  %v2764_v40 = vadd.f32 %v2732_v44, %v2527_v58  ;;  %v2511_v7 = vrot.slane %v2504_v8, %v5860_v24 }
 0x187   : > { %v2765_v63 = vadd.f32 %v2734_v9, %v2528_v53  ;;  %v2748_v31 = vrot.slane %v2741_v4, %v5860_v24 }
 0x188   : > { %v2529_v57 = vadd.f32 %v2511_v7, %v2211_v48 }
 0x18a   : > { %v2766_v41 = vadd.f32 %v2748_v31, %v2529_v57 }
 0x19a   : > { %v2917_v26 = vpop.f32.mrb[16].mxu0 }
 0x19b   : > { %v3154_v42 = vpop.f32.mrb[20].mxu1  ;;  %v2926_v46 = vcombine.high %v2917_v26, %v2917_v26  ;;  %v2933_v15 = vrot.slane %v2917_v26, %v5860_v24  ;;  %v5461_v52 = vpop.f32.mrb[17].mxu0 }
 0x19c   : > { %v3163_v51 = vcombine.high %v3154_v42, %v3154_v42  ;;  %v3170_v43 = vrot.slane %v3154_v42, %v5860_v24  ;;  %v5481_v34 = vpop.f32.mrb[21].mxu1  ;;  %v2920_v20 = vpop.f32.mrb[18].mxu0 }
 0x19d   : > { %v3157_v19 = vpop.f32.mrb[22].mxu1  ;;  %v2940_v54 = vrot.slane %v2926_v46, %v5860_v24  ;;  %v2941_v55 = vcombine.high %v2933_v15, %v2933_v15  ;;  %v2949_v23 = vrot.slane %v2933_v15, %v5860_v24  ;;  %v5462_v30 = vpop.f32.mrb[19].mxu0  ;;  %v2981_v62 = vrot.slane %v2920_v20, %v5860_v24 }
 0x19e   : > { %v3177_v48 = vrot.slane %v3163_v51, %v5860_v24  ;;  %v5482_v1 = vpop.f32.mrb[23].mxu1  ;;  %v3178_v59 = vcombine.high %v3170_v43, %v3170_v43  ;;  %v3186_v61 = vrot.slane %v3170_v43, %v5860_v24  ;;  %v3218_v13 = vrot.slane %v3157_v19, %v5860_v24 }
 0x19f   : > { %v2942_v3 = vcombine.high %v2940_v54, %v2940_v54  ;;  %v2956_v5 = vrot.slane %v2940_v54, %v5860_v24  ;;  %v2963_v45 = vrot.slane %v2941_v55, %v5860_v24  ;;  %v2971_v50 = vcombine.high %v2949_v23, %v2949_v23 }
 0x1a0   : > { %v2998_v8 = vadd.f32 %v2949_v23, %v2758_v18  ;;  %v3179_v4 = vcombine.high %v3177_v48, %v3177_v48  ;;  %v3193_v10 = vrot.slane %v3177_v48, %v5860_v24  ;;  %v3200_v56 = vrot.slane %v3178_v59, %v5860_v24 }
 0x1a1   : > { %v2970_v49 = vrot.slane %v2942_v3, %v5860_v24  ;;  %v2972_v16 = vcombine.high %v2956_v5, %v2956_v5  ;;  %v2973_v35 = vcombine.high %v2963_v45, %v2963_v45  ;;  %v2999_v11 = vadd.f32 %v2963_v45, %v2759_v33 }
 0x1a2   : > { %v3000_v47 = vadd.f32 %v2971_v50, %v2760_v36  ;;  %v3002_v0 = vadd.f32 %v2956_v5, %v2762_v39  ;;  %v3207_v27 = vrot.slane %v3179_v4, %v5860_v24  ;;  %v3208_v14 = vcombine.high %v3186_v61, %v3186_v61 }
 0x1a3   : > { %v2974_v25 = vcombine.high %v2970_v49, %v2970_v49  ;;  %v3001_v37 = vadd.f32 %v2973_v35, %v2761_v38  ;;  %v3003_v29 = vadd.f32 %v2970_v49, %v2763_v32  ;;  %v3004_v17 = vadd.f32 %v2972_v16, %v2764_v40 }
 0x1a4   : > { %v3209_v28 = vcombine.high %v3193_v10, %v3193_v10  ;;  %v3210_v21 = vcombine.high %v3200_v56, %v3200_v56  ;;  %v3211_v22 = vcombine.high %v3207_v27, %v3207_v27  ;;  %v3235_v2 = vadd.f32 %v3186_v61, %v2998_v8 }
 0x1a5   : > { %v3005_v6 = vadd.f32 %v2974_v25, %v2765_v63  ;;  %v3236_v58 = vadd.f32 %v3200_v56, %v2999_v11  ;;  %v3237_v44 = vadd.f32 %v3208_v14, %v3000_v47  ;;  %v3239_v60 = vadd.f32 %v3193_v10, %v3002_v0 }
 0x1a6   : > { %v3238_v9 = vadd.f32 %v3210_v21, %v3001_v37  ;;  %v3240_v18 = vadd.f32 %v3207_v27, %v3003_v29  ;;  %v3241_v53 = vadd.f32 %v3209_v28, %v3004_v17  ;;  %v2988_v33 = vrot.slane %v2981_v62, %v5860_v24 }
 0x1a7   : > { %v3242_v36 = vadd.f32 %v3211_v22, %v3005_v6  ;;  %v3225_v39 = vrot.slane %v3218_v13, %v5860_v24 }
 0x1a8   : > { %v3006_v7 = vadd.f32 %v2988_v33, %v2766_v41 }
 0x1aa   : > { %v3243_v38 = vadd.f32 %v3225_v39, %v3006_v7 }
 0x1ba   : > { %v3472_v32 = vpop.f32.mrb[20].mxu0 }
 0x1bb   : > { %v3709_v40 = vpop.f32.mrb[24].mxu1  ;;  %v3481_v31 = vcombine.high %v3472_v32, %v3472_v32  ;;  %v3488_v57 = vrot.slane %v3472_v32, %v5860_v24  ;;  %v5501_v42 = vpop.f32.mrb[21].mxu0 }
 0x1bc   : > { %v3718_v26 = vcombine.high %v3709_v40, %v3709_v40  ;;  %v3725_v63 = vrot.slane %v3709_v40, %v5860_v24  ;;  %v5521_v46 = vpop.f32.mrb[25].mxu1  ;;  %v3475_v15 = vpop.f32.mrb[22].mxu0 }
 0x1bd   : > { %v3712_v51 = vpop.f32.mrb[26].mxu1  ;;  %v3495_v43 = vrot.slane %v3481_v31, %v5860_v24  ;;  %v3496_v52 = vcombine.high %v3488_v57, %v3488_v57  ;;  %v3504_v34 = vrot.slane %v3488_v57, %v5860_v24  ;;  %v5502_v20 = vpop.f32.mrb[23].mxu0  ;;  %v3536_v23 = vrot.slane %v3475_v15, %v5860_v24 }
 0x1be   : > { %v3732_v41 = vrot.slane %v3718_v26, %v5860_v24  ;;  %v5522_v19 = vpop.f32.mrb[27].mxu1  ;;  %v3733_v54 = vcombine.high %v3725_v63, %v3725_v63  ;;  %v3741_v55 = vrot.slane %v3725_v63, %v5860_v24  ;;  %v3773_v48 = vrot.slane %v3712_v51, %v5860_v24 }
 0x1bf   : > { %v3497_v30 = vcombine.high %v3495_v43, %v3495_v43  ;;  %v3511_v1 = vrot.slane %v3495_v43, %v5860_v24  ;;  %v3518_v59 = vrot.slane %v3496_v52, %v5860_v24  ;;  %v3526_v61 = vcombine.high %v3504_v34, %v3504_v34 }
 0x1c0   : > { %v3553_v62 = vadd.f32 %v3504_v34, %v3235_v2  ;;  %v3734_v13 = vcombine.high %v3732_v41, %v3732_v41  ;;  %v3748_v3 = vrot.slane %v3732_v41, %v5860_v24  ;;  %v3755_v5 = vrot.slane %v3733_v54, %v5860_v24 }
 0x1c1   : > { %v3525_v45 = vrot.slane %v3497_v30, %v5860_v24  ;;  %v3527_v50 = vcombine.high %v3511_v1, %v3511_v1  ;;  %v3528_v8 = vcombine.high %v3518_v59, %v3518_v59  ;;  %v3554_v4 = vadd.f32 %v3518_v59, %v3236_v58 }
 0x1c2   : > { %v3555_v10 = vadd.f32 %v3526_v61, %v3237_v44  ;;  %v3557_v56 = vadd.f32 %v3511_v1, %v3239_v60  ;;  %v3762_v49 = vrot.slane %v3734_v13, %v5860_v24  ;;  %v3763_v16 = vcombine.high %v3741_v55, %v3741_v55 }
 0x1c3   : > { %v3529_v35 = vcombine.high %v3525_v45, %v3525_v45  ;;  %v3556_v11 = vadd.f32 %v3528_v8, %v3238_v9  ;;  %v3558_v47 = vadd.f32 %v3525_v45, %v3240_v18  ;;  %v3559_v0 = vadd.f32 %v3527_v50, %v3241_v53  ;;  %v5096_v18 = vld [vmem:[%s6953_s2] ss:$0 sm:$0xff] }
 0x1c4   : > { %v3764_v27 = vcombine.high %v3748_v3, %v3748_v3  ;;  %v3765_v14 = vcombine.high %v3755_v5, %v3755_v5  ;;  %v3766_v25 = vcombine.high %v3762_v49, %v3762_v49  ;;  %v3790_v37 = vadd.f32 %v3741_v55, %v3553_v62 }
 0x1c5   : > { %v3560_v29 = vadd.f32 %v3529_v35, %v3242_v36  ;;  %v3791_v17 = vadd.f32 %v3755_v5, %v3554_v4  ;;  %v3792_v28 = vadd.f32 %v3763_v16, %v3555_v10  ;;  %v3794_v21 = vadd.f32 %v3748_v3, %v3557_v56 }
 0x1c6   : > { %v3793_v22 = vadd.f32 %v3765_v14, %v3556_v11  ;;  %v3795_v2 = vadd.f32 %v3762_v49, %v3558_v47  ;;  %v3796_v6 = vadd.f32 %v3764_v27, %v3559_v0  ;;  %v3543_v58 = vrot.slane %v3536_v23, %v5860_v24 }
 0x1c7   : > { %v3797_v44 = vadd.f32 %v3766_v25, %v3560_v29  ;;  %v3780_v60 = vrot.slane %v3773_v48, %v5860_v24  ;;  %v4288_v53 = vrot.slane %v5096_v18, %v5860_v24 }
 0x1c8   : > { %v3561_v33 = vadd.f32 %v3543_v58, %v3243_v38 }
 0x1c9   : > { %v4289_v36 = vcombine.high %v4288_v53, %v4288_v53  ;;  %v6848_v39 = vrot.slane %v4288_v53, %v5860_v24 }
 0x1ca   : > { %v6841_v9 = vadd.f32 %v3780_v60, %v3561_v33 }
 0x1cb   : > { %v4303_v42 = vrot.slane %v4289_v36, %v5860_v24  ;;  %v6855_v46 = vcombine.high %v6848_v39, %v6848_v39 }
 0x1da   : > { %v3949_v7 = vpop.f32.mrb[24].mxu0 }
 0x1db   : > { %v4186_v32 = vpop.f32.mrb[28].mxu1  ;;  %v3958_v40 = vcombine.high %v3949_v7, %v3949_v7  ;;  %v3965_v31 = vrot.slane %v3949_v7, %v5860_v24  ;;  %v5541_v26 = vpop.f32.mrb[25].mxu0 }
 0x1dc   : > { %v4195_v57 = vcombine.high %v4186_v32, %v4186_v32  ;;  %v4202_v38 = vrot.slane %v4186_v32, %v5860_v24  ;;  %v5561_v63 = vpop.f32.mrb[29].mxu1  ;;  %v6857_v15 = vpop.f32.mrb[26].mxu0 }
 0x1dd   : > { %v6859_v51 = vpop.f32.mrb[30].mxu1  ;;  %v3972_v43 = vrot.slane %v3958_v40, %v5860_v24  ;;  %v3973_v52 = vcombine.high %v3965_v31, %v3965_v31  ;;  %v3981_v34 = vrot.slane %v3965_v31, %v5860_v24  ;;  %v5542_v20 = vpop.f32.mrb[27].mxu0  ;;  %v4013_v23 = vrot.slane %v6857_v15, %v5860_v24 }
 0x1de   : > { %v4209_v41 = vrot.slane %v4195_v57, %v5860_v24  ;;  %v5562_v19 = vpop.f32.mrb[31].mxu1  ;;  %v4210_v54 = vcombine.high %v4202_v38, %v4202_v38  ;;  %v4218_v55 = vrot.slane %v4202_v38, %v5860_v24  ;;  %v4250_v48 = vrot.slane %v6859_v51, %v5860_v24 }
 0x1df   : > { %v3974_v30 = vcombine.high %v3972_v43, %v3972_v43  ;;  %v3988_v1 = vrot.slane %v3972_v43, %v5860_v24  ;;  %v3995_v59 = vrot.slane %v3973_v52, %v5860_v24  ;;  %v4003_v61 = vcombine.high %v3981_v34, %v3981_v34 }
 0x1e0   : > { %v4030_v62 = vadd.f32 %v3981_v34, %v3790_v37  ;;  %v4211_v13 = vcombine.high %v4209_v41, %v4209_v41  ;;  %v4225_v3 = vrot.slane %v4209_v41, %v5860_v24  ;;  %v4232_v5 = vrot.slane %v4210_v54, %v5860_v24 }
 0x1e1   : > { %v4002_v45 = vrot.slane %v3974_v30, %v5860_v24  ;;  %v4004_v50 = vcombine.high %v3988_v1, %v3988_v1  ;;  %v4005_v8 = vcombine.high %v3995_v59, %v3995_v59  ;;  %v4031_v4 = vadd.f32 %v3995_v59, %v3791_v17 }
 0x1e2   : > { %v4032_v10 = vadd.f32 %v4003_v61, %v3792_v28  ;;  %v4034_v56 = vadd.f32 %v3988_v1, %v3794_v21  ;;  %v4239_v49 = vrot.slane %v4211_v13, %v5860_v24  ;;  %v4240_v16 = vcombine.high %v4218_v55, %v4218_v55 }
 0x1e3   : > { %v4006_v35 = vcombine.high %v4002_v45, %v4002_v45  ;;  %v4033_v11 = vadd.f32 %v4005_v8, %v3793_v22  ;;  %v4035_v47 = vadd.f32 %v4002_v45, %v3795_v2  ;;  %v4036_v0 = vadd.f32 %v4004_v50, %v3796_v6 }
 0x1e4   : > { %v4241_v27 = vcombine.high %v4225_v3, %v4225_v3  ;;  %v4242_v14 = vcombine.high %v4232_v5, %v4232_v5  ;;  %v4243_v25 = vcombine.high %v4239_v49, %v4239_v49  ;;  %v4267_v37 = vadd.f32 %v4218_v55, %v4030_v62 }
 0x1e5   : > { %v4037_v29 = vadd.f32 %v4006_v35, %v3797_v44  ;;  %v4268_v58 = vadd.f32 %v4232_v5, %v4031_v4  ;;  %v4269_v60 = vadd.f32 %v4240_v16, %v4032_v10  ;;  %v4271_v33 = vadd.f32 %v4225_v3, %v4034_v56 }
 0x1e6   : > { %v4270_v18 = vadd.f32 %v4242_v14, %v4033_v11  ;;  %v4272_v17 = vadd.f32 %v4239_v49, %v4035_v47  ;;  %v4273_v28 = vadd.f32 %v4241_v27, %v4036_v0  ;;  %v4308_v21 = vadd.f32 %v6848_v39, %v4267_v37  ;;  %v4525_v11 = vld [vmem:[%s6889_s24 + $0x2] sm:$0x3] }
 0x1e7   : > { %v4274_v53 = vadd.f32 %v4243_v25, %v4037_v29  ;;  %v4309_v22 = vadd.f32 %v4303_v42, %v4268_v58  ;;  %v4310_v2 = vadd.f32 %v6855_v46, %v4269_v60  ;;  %v4312_v6 = vadd.f32 %v4303_v42, %v4271_v33 }
 0x1e8   : > { %v4311_v36 = vadd.f32 %v6848_v39, %v4270_v18  ;;  %v4313_v44 = vadd.f32 %v6855_v46, %v4272_v17  ;;  %v4314_v7 = vadd.f32 %v6848_v39, %v4273_v28  ;;  %v4410_v32 = vmul.f32 %v4308_v21, %v4308_v21 }
 0x1e9   : > { %v4315_v40 = vadd.f32 %v4303_v42, %v4274_v53  ;;  %v4326_v31 = vcombine.low %v4308_v21, %v4309_v22  ;;  %v4340_v57 = vrot.slane %v4310_v2, %v5860_v24  ;;  %v4411_v38 = vmul.f32 %v4309_v22, %v4309_v22 }
 0x1ea   : > { %v4349_v26 = vcombine.low %v4311_v36, %v4312_v6  ;;  %v4363_v63 = vrot.slane %v4313_v44, %v5860_v24  ;;  %v4412_v43 = vmul.f32 %v4310_v2, %v4310_v2  ;;  %v4413_v52 = vmul.f32 %v4311_v36, %v4311_v36  ;;  %v4528_v2 = vld [vmem:[%s6889_s24 + $0x4] sm:$0x3] }
 0x1eb   : > { %v4333_v34 = vrot.slane %v4326_v31, %v5860_v24  ;;  %v4372_v41 = vcombine.low %v4314_v7, %v4315_v40  ;;  %v4414_v20 = vmul.f32 %v4312_v6, %v4312_v6  ;;  %v4415_v19 = vmul.f32 %v4313_v44, %v4313_v44 }
 0x1ec   : > { %v4356_v54 = vrot.slane %v4349_v26, %v5860_v24  ;;  %v4416_v39 = vmul.f32 %v4314_v7, %v4314_v7  ;;  %v4417_v55 = vmul.f32 %v4315_v40, %v4315_v40  ;;  %v4428_v42 = vcombine.low %v4410_v32, %v4411_v38 }
 0x1ed   : > { %v4341_v30 = vcombine.low %v4333_v34, %v4340_v57  ;;  %v4442_v1 = vrot.slane %v4412_v43, %v5860_v24  ;;  %v4451_v59 = vcombine.low %v4413_v52, %v4414_v20  ;;  %v4020_v3 = vrot.slane %v4013_v23, %v5860_v24  ;;  %v4522_v23 = vld [vmem:[%s6889_s24] sm:$0x3] }
 0x1ee   : > { %v4364_v61 = vcombine.low %v4356_v54, %v4363_v63  ;;  %v4435_v62 = vrot.slane %v4428_v42, %v5860_v24  ;;  %v4474_v13 = vcombine.low %v4416_v39, %v4417_v55  ;;  %v4465_v50 = vrot.slane %v4415_v19, %v5860_v24 }
 0x1ef   : > { %v4348_v5 = vrot.slane %v4341_v30, %v5860_v24  ;;  %v4458_v45 = vrot.slane %v4451_v59, %v5860_v24  ;;  %v4038_v10 = vadd.f32 %v4020_v3, %v6841_v9  ;;  %v4257_v56 = vrot.slane %v4250_v48, %v5860_v24 }
 0x1f0   : > { %v4371_v8 = vrot.slane %v4364_v61, %v5860_v24  ;;  %v4443_v4 = vcombine.low %v4435_v62, %v4442_v1  ;;  %v4379_v37 = vrot.slane %v4372_v41, %v5860_v24  ;;  %v4481_v17 = vrot.slane %v4474_v13, %v5860_v24 }
 0x1f1   : > { %v4399_v49 = vsel %vm4398_vm2, %v4348_v5, 0.0  ;;  %v4466_v16 = vcombine.low %v4458_v45, %v4465_v50  ;;  %v4516_v35 = vpack.c.bf16 %v4348_v5, %v4348_v5  ;;  %v4275_v0 = vadd.f32 %v4257_v56, %v4038_v10 }
 0x1f2   : > { %v4450_v9 = vrot.slane %v4443_v4, %v5860_v24  ;;  %v4517_v47 = vpack.c.bf16 %v4371_v8, %v4371_v8  ;;  %v4400_v51 = vsel %vm4398_vm2, %v4371_v8, 0.0 }
 0x1f3   : > { %v4473_v48 = vrot.slane %v4466_v16, %v5860_v24  ;;  %v4401_v27 = vadd.f32 %v4400_v51, %v4399_v49  ;;  %v4523_v14 = vsel %vm6906_vm4, %v4516_v35, %v4522_v23  ;;  %v4316_v25 = vadd.f32 %v6855_v46, %v4275_v0 }
 0x1f4   : > { %4524 = vst [vmem:[%s6889_s24] sm:$0x3] %v4523_v14  ;;  %v4526_v29 = vsel %vm6906_vm4, %v4517_v47, %v4525_v11  ;;  %v4500_v58 = vsel %vm4398_vm2, %v4450_v9, 0.0 }
 0x1f5   : > { %v4501_v60 = vsel %vm4398_vm2, %v4473_v48, 0.0  ;;  %4527 = vst [vmem:[%s6889_s24 + $0x2] sm:$0x3] %v4526_v29  ;;  %v4386_v33 = vrot.slane %v4316_v25, %v5860_v24  ;;  %v4418_v18 = vmul.f32 %v4316_v25, %v4316_v25 }
 0x1f6   : > { %v4502_v28 = vadd.f32 %v4501_v60, %v4500_v58 }
 0x1f7   : > { %v4387_v21 = vcombine.low %v4379_v37, %v4386_v33  ;;  %v4488_v46 = vrot.slane %v4418_v18, %v5860_v24 }
 0x1f9   : > { %v4394_v53 = vrot.slane %v4387_v21, %v5860_v24  ;;  %v4489_v22 = vcombine.low %v4481_v17, %v4488_v46 }
 0x1fb   : > { %v4402_v6 = vsel %vm4398_vm2, %v4394_v53, 0.0  ;;  %v4496_v36 = vrot.slane %v4489_v22, %v5860_v24  ;;  %v4518_v44 = vpack.c.bf16 %v4394_v53, %v4394_v53 }
 0x1fc   : > { %v4403_v7 = vadd.f32 %v4402_v6, %v4401_v27 }
 0x1fd   : > { %v4503_v32 = vsel %vm4398_vm2, %v4496_v36, 0.0  ;;  %v4529_v40 = vsel %vm6906_vm4, %v4518_v44, %v4528_v2 }
 0x1fe   : > { %v4404_v31 = vrot.slane %v4403_v7, 4  ;;  %v4504_v57 = vadd.f32 %v4503_v32, %v4502_v28  ;;  %4530 = vst [vmem:[%s6889_s24 + $0x4] sm:$0x3] %v4529_v40 }
 0x200   : > { %v4405_v38 = vadd.f32 %v4404_v31, %v4403_v7  ;;  %v4505_v26 = vrot.slane %v4504_v57, 4 }
 0x202   : > { %v4406_v63 = vrot.slane %v4405_v38, 2  ;;  %v4506_v43 = vadd.f32 %v4505_v26, %v4504_v57 }
 0x204   : > { %v4407_v52 = vadd.f32 %v4406_v63, %v4405_v38  ;;  %v4507_v34 = vrot.slane %v4506_v43, 2 }
 0x206   : > { %v4408_v41 = vrot.slane %v4407_v52, 1  ;;  %v4508_v20 = vadd.f32 %v4507_v34, %v4506_v43 }
 0x208   : > { %v4509_v24 = vrot.slane %v4508_v20, 1  ;;  %v4409_v19 = vadd.f32 %v4408_v41, %v4407_v52 }
 0x20a   : > { %v4510_v54 = vadd.f32 %v4509_v24, %v4508_v20 }
 0x20c   : > { %v4514_v39 = vsel %vm4513_vm5, %v4409_v19, %v4510_v54 }
 0x20d   : > { %4515 = vst [vmem:[%s239_s28] sm:$0x3] %v4514_v39 }
 0x20e PF: > { %s15_s17 = sadd.s32 1, %s5746_s17   ;;  %s6958_s15 = smov %s5742_s16 }
 0x20f   : > { %p12_p5 = scmp.ge.s32.totalorder %s15_s17, 4   ;;  %s6959_s16 = smov %s6961_s18 }
 0x211   :  { %14 = sbr.rel (!%p12_p5) target bundleno = 2 (0x2), region = 93 }

</bundles_post_ra>
